<compile_context>
chip_gen: v7x
topology: tpu7x:2x2x1
jax: 0.10.0
libtpu: 0.0.40
codegen_flags: <defaults>
</compile_context>

<pallas_src>
import functools

import numpy as np

import jax
import jax.numpy as jnp
from jax.experimental import pallas as pl
from jax.experimental.pallas import tpu as pltpu


def _eagle3d_kernel(x_ref, mws_ref, mwd_ref, mhs_ref, mhd_ref, ah_ref, aw_ref,
                    fb0re_ref, fb0im_ref, f12re_ref, f12im_ref, w3_ref,
                    loss_ref, *, D, H, W, p):
    """Whole Eagle-3D loss on one (2D, H, W) block (output|target stacked on D)."""
    s0, s1, s2 = D // p, H // p, W // p
    L = s1 * s2
    n = float(p * p * p)
    DD = 2 * D

    def mm(a, b):
        return jnp.dot(a, b, preferred_element_type=jnp.float32)

    x = x_ref[...]                                   # (2D, H, W)
    mws = mws_ref[...]
    mwd = mwd_ref[...]
    mhs = mhs_ref[...]
    mhd = mhd_ref[...]
    ah = ah_ref[...]
    aw = aw_ref[...]

    # --- depth-axis (leading) 1-D convs: zero-padded shifts, seam-aware ------
    def shift_up(v):                                 # v[d+1], zero at volume tops
        z = jnp.zeros_like(v[:1])
        return jnp.concatenate([v[1:D], z, v[D + 1:], z], axis=0)

    def shift_dn(v):                                 # v[d-1], zero at volume starts
        z = jnp.zeros_like(v[:1])
        return jnp.concatenate([z, v[:D - 1], z, v[D:DD - 1]], axis=0)

    def smooth_d(v):
        return 3.0 * shift_dn(v) + 10.0 * v + 3.0 * shift_up(v)

    def diff_d(v):
        return shift_up(v) - shift_dn(v)

    # --- lane-axis (W) and transposed-lane (H) 1-D convs: flat 2-D matmuls ---
    def conv_w(v, m):                                # (2D, H, W) -> (2D, H, W)
        return mm(v.reshape(DD * H, W), m).reshape(DD, H, W)

    def conv_h_t(vt, m):                             # (2D, W, H) -> (2D, W, H)
        return mm(vt.reshape(DD * W, H), m).reshape(DD, W, H)

    # separable 3-D gradients with shared smooth intermediates
    u = smooth_d(x)                                  # S_d x
    xw = conv_w(x, mws)                              # S_w x
    udw = conv_w(u, mwd)                             # D_w S_d x
    uw = conv_w(u, mws)                              # S_w S_d x
    xwd = diff_d(xw)                                 # D_d S_w x

    # one minor transpose per gradient path, then the H-axis conv (lanes = H)
    gx = conv_h_t(jnp.swapaxes(udw, 1, 2), mhs)      # S_h D_w S_d x  (2D, W, H)
    gy = conv_h_t(jnp.swapaxes(uw, 1, 2), mhd)       # D_h S_w S_d x
    gz = conv_h_t(jnp.swapaxes(xwd, 1, 2), mhs)      # S_h D_d S_w x

    # --- per-patch sums of g and g^2 -----------------------------------------
    def patch_hd(g):                                 # (2D, W, H) -> (2*s0, W, s1)
        t = mm(g.reshape(DD * W, H), ah)             # lane (H) patch sum, big M
        t = t.reshape(2 * s0, p, W, s1)
        return jnp.sum(t, axis=1)                    # depth patch sum: p-1 VPU adds

    parts = [patch_hd(gx), patch_hd(gy), patch_hd(gz),
             patch_hd(gx * gx), patch_hd(gy * gy), patch_hd(gz * gz)]
    r = jnp.concatenate(parts, axis=0)               # (12*s0, W, s1), p^2-reduced

    # W patch sum on the small slab: minor swap + one matmul
    rt = jnp.swapaxes(r, 1, 2)                       # (12*s0, s1, W)
    rw = mm(rt.reshape(12 * s0 * s1, W), aw)         # (12*s0*s1, s2)

    half = 6 * s0 * s1
    psum = rw[:half]
    psq = rw[half:]
    # Unbiased per-patch variance (torch.var default).  One-pass formula is
    # fine: the high-pass Scharr-style gradients are approximately zero-mean.
    var = (psq - psum * psum * (1.0 / n)) * (1.0 / (n - 1.0))   # (6*s0*s1, s2)

    # --- 3-D DFT magnitude via dense DFT matmuls -----------------------------
    # rows: (direction, volume, s0-index); lanes: (s1, s2) merged.
    v3 = var.reshape(6 * s0, s1, s2)
    v2 = jnp.concatenate([v3[:, j, :] for j in range(s1)], axis=-1)  # (6*s0, L)

    are = mm(fb0re_ref[...], v2)                     # depth-axis DFT (block-diag)
    aim = mm(fb0im_ref[...], v2)
    f12re = f12re_ref[...]
    f12im = f12im_ref[...]
    cre = mm(are, f12re) - mm(aim, f12im)            # combined (s1 x s2) 2-D DFT
    cim = mm(are, f12im) + mm(aim, f12re)
    mag = jnp.sqrt(cre * cre + cim * cim)            # (6*s0, L)

    # --- Gaussian high-pass weighted L1 between the two volumes' spectra -----
    m4 = mag.reshape(3, 2, s0, L)
    d = jnp.abs(m4[:, 0] - m4[:, 1]).reshape(3 * s0, L)
    loss_ref[0, 0] = jnp.sum(w3_ref[...] * d) * (1.0 / float(s0 * s1 * s2))


def _constants(D, H, W, p, cutoff):
    """Small trace-time constants (numpy) fed to the kernel as VMEM inputs."""
    s0, s1, s2 = D // p, H // p, W // p

    def smooth_band(m):
        a = np.zeros((m, m), np.float32)
        for i in range(m):
            a[i, i] = 10.0
            if i + 1 < m:
                a[i, i + 1] = 3.0
                a[i + 1, i] = 3.0
        return a

    def diff_right(m):
        # out = v @ A with out[j] = v[j+1] - v[j-1] (zero-padded edges)
        a = np.zeros((m, m), np.float32)
        for j in range(m):
            if j + 1 < m:
                a[j + 1, j] = 1.0
            if j - 1 >= 0:
                a[j - 1, j] = -1.0
        return a

    def dft(m):
        k = np.arange(m)
        ang = -2.0 * np.pi * np.outer(k, k) / m
        return np.cos(ang).astype(np.float32), np.sin(ang).astype(np.float32)

    f0re, f0im = dft(s0)
    f1re, f1im = dft(s1)
    f2re, f2im = dft(s2)

    eye6 = np.eye(6, dtype=np.float32)
    fb0re = np.kron(eye6, f0re)                       # (6*s0, 6*s0) block DFT
    fb0im = np.kron(eye6, f0im)
    f12re = np.kron(f1re, f2re) - np.kron(f1im, f2im)  # (s1*s2, s1*s2) 2-D DFT
    f12im = np.kron(f1re, f2im) + np.kron(f1im, f2re)

    ah = (np.arange(H)[:, None] // p ==
          np.arange(s1)[None, :]).astype(np.float32)   # (H, s1) patch indicator
    aw = (np.arange(W)[:, None] // p ==
          np.arange(s2)[None, :]).astype(np.float32)   # (W, s2)

    fx = np.fft.fftfreq(s0).astype(np.float32).reshape(-1, 1, 1)
    fy = np.fft.fftfreq(s1).astype(np.float32).reshape(1, -1, 1)
    fz = np.fft.fftfreq(s2).astype(np.float32).reshape(1, 1, -1)
    fmag = np.sqrt(fx * fx + fy * fy + fz * fz)
    w3d = (1.0 - np.exp(-0.5 * (fmag - cutoff) ** 2)).astype(np.float32)
    # pre-tiled to the kernel's final (3*s0, s1*s2) layout
    w3 = np.tile(w3d.reshape(1, s0, s1 * s2), (3, 1, 1)).reshape(3 * s0, s1 * s2)

    return dict(mws=smooth_band(W), mwd=diff_right(W),
                mhs=smooth_band(H), mhd=diff_right(H),
                ah=ah, aw=aw,
                fb0re=fb0re, fb0im=fb0im,
                f12re=f12re, f12im=f12im,
                w3=w3)


def _vmem_cap_bytes():
    try:
        info = pltpu.get_tpu_info()
        cap = int(getattr(info, "vmem_capacity_bytes", 0) or 0)
        if cap > 0:
            return cap
    except Exception:
        pass
    return 64 * 2 ** 20


def eagle_loss_3d(output, target, patch_size=4, cutoff=0.5):
    """Pallas implementation of Eagle_Loss_3D.forward(output, target)."""
    assert output.shape == target.shape
    B, C, D, H, W = output.shape
    if C != 1:
        raise ValueError("inputs must be single-channel 3-D volumes")
    assert B == 1, "the torch module's reshape implicitly requires batch == 1"
    p = patch_size
    # TODO(synk): torch's unfold silently drops remainder voxels when the
    # spatial dims are not multiples of patch_size; we require divisibility.
    assert D % p == 0 and H % p == 0 and W % p == 0

    # stack output | target along the leading depth axis (no band-matrix waste)
    x = jnp.concatenate([output[0, 0].astype(jnp.float32),
                         target[0, 0].astype(jnp.float32)], axis=0)   # (2D, H, W)

    c = _constants(D, H, W, p, cutoff)
    names = ['mws', 'mwd', 'mhs', 'mhd', 'ah', 'aw',
             'fb0re', 'fb0im', 'f12re', 'f12im', 'w3']
    consts = [jnp.asarray(c[k]) for k in names]

    kernel = functools.partial(_eagle3d_kernel, D=D, H=H, W=W, p=p)

    # VMEM budget from actual live buffers (~<=20 full (2D,H,W) f32 slabs plus
    # constants), generation-aware cap with headroom for compiler scratch.
    vol_bytes = int(x.size) * 4
    const_bytes = sum(int(a.size) for a in consts) * 4
    need = 20 * vol_bytes + 2 * const_bytes + (2 << 20)
    cap = _vmem_cap_bytes()
    vmem_limit = int(min(max(need, 32 << 20), max(cap - (16 << 20), 32 << 20)))

    vmem = pl.BlockSpec(memory_space=pltpu.MemorySpace.VMEM)
    out = pl.pallas_call(
        kernel,
        out_shape=jax.ShapeDtypeStruct((1, 1), jnp.float32),
        in_specs=[vmem] * (1 + len(consts)),
        out_specs=pl.BlockSpec(memory_space=pltpu.MemorySpace.SMEM),
        compiler_params=pltpu.CompilerParams(vmem_limit_bytes=vmem_limit),
    )(x, *consts)
    return out[0, 0]


def eagle_loss_3d_ref(output, target, patch_size=4, cutoff=0.5):
    """Pure-JAX reference mirroring the PyTorch module, for validation."""
    B, C, D, H, W = output.shape
    p = patch_size
    s0, s1, s2 = D // p, H // p, W // p

    sm = np.array([3.0, 10.0, 3.0], np.float32)
    df = np.array([-1.0, 0.0, 1.0], np.float32)
    kx = np.einsum('a,b,c->abc', sm, sm, df)
    ky = np.einsum('a,b,c->abc', sm, df, sm)
    kz = np.einsum('a,b,c->abc', df, sm, sm)

    fx = np.fft.fftfreq(s0).astype(np.float32).reshape(-1, 1, 1)
    fy = np.fft.fftfreq(s1).astype(np.float32).reshape(1, -1, 1)
    fz = np.fft.fftfreq(s2).astype(np.float32).reshape(1, 1, -1)
    w3d = jnp.asarray(
        1.0 - np.exp(-0.5 * (np.sqrt(fx * fx + fy * fy + fz * fz) - cutoff) ** 2),
        jnp.float32)

    def conv3(v, k3):
        pad = jnp.pad(v, 1)
        out = jnp.zeros((D, H, W), jnp.float32)
        for a in range(3):
            for b in range(3):
                for c in range(3):
                    if k3[a, b, c] != 0.0:
                        out = out + float(k3[a, b, c]) * pad[a:a + D, b:b + H, c:c + W]
        return out

    def patch_var(g):
        g6 = g.reshape(s0, p, s1, p, s2, p)
        return jnp.var(g6, axis=(1, 3, 5), ddof=1)

    def fft_l1(vt, vo):
        mt = jnp.abs(jnp.fft.fftn(vt))
        mo = jnp.abs(jnp.fft.fftn(vo))
        return jnp.mean(jnp.abs(w3d * mt - w3d * mo))

    io = output[0, 0].astype(jnp.float32)
    it = target[0, 0].astype(jnp.float32)
    loss = jnp.float32(0.0)
    for ker in (kx, ky, kz):
        go = conv3(io, ker)
        gt = conv3(it, ker)
        loss = loss + fft_l1(patch_var(gt), patch_var(go))
    return loss


if __name__ == "__main__":
    key = jax.random.PRNGKey(0)
    k1, k2 = jax.random.split(key)
    # Small shapes consistent with the module: B=1, C=1 volume, 16^3, patch 4.
    shape = (1, 1, 16, 16, 16)
    output = jax.random.normal(k1, shape, jnp.float32)
    target = jax.random.normal(k2, shape, jnp.float32)

    loss = eagle_loss_3d(output, target, patch_size=4, cutoff=0.5)
    loss = jax.block_until_ready(loss)

    ref = float(jax.block_until_ready(
        eagle_loss_3d_ref(output, target, patch_size=4, cutoff=0.5)))
    assert abs(float(loss) - ref) <= 5e-3 * (abs(ref) + 1.0), (float(loss), ref)
    print("KERNEL_OK")
</pallas_src>

<mosaic_0001>
module attributes {stable_mosaic.version = 11 : i64} {
  func.func @_eagle3d_kernel(%arg0: memref<32x16x16xf32, #tpu.memory_space<vmem>>, %arg1: memref<16x16xf32, #tpu.memory_space<vmem>>, %arg2: memref<16x16xf32, #tpu.memory_space<vmem>>, %arg3: memref<16x16xf32, #tpu.memory_space<vmem>>, %arg4: memref<16x16xf32, #tpu.memory_space<vmem>>, %arg5: memref<16x4xf32, #tpu.memory_space<vmem>>, %arg6: memref<16x4xf32, #tpu.memory_space<vmem>>, %arg7: memref<24x24xf32, #tpu.memory_space<vmem>>, %arg8: memref<24x24xf32, #tpu.memory_space<vmem>>, %arg9: memref<16x16xf32, #tpu.memory_space<vmem>>, %arg10: memref<16x16xf32, #tpu.memory_space<vmem>>, %arg11: memref<12x16xf32, #tpu.memory_space<vmem>>, %arg12: memref<1x1xf32, #tpu.memory_space<smem>>) attributes {dimension_semantics = [], scalar_prefetch = 0 : i64, scratch_operands = 0 : i64, tpu.core_type = #tpu.core_type<tc>} {
    %c0 = arith.constant 0 : index
    %c0_0 = arith.constant 0 : index
    %c0_1 = arith.constant 0 : index
    %0 = vector.load %arg0[%c0, %c0_0, %c0_1] : memref<32x16x16xf32, #tpu.memory_space<vmem>>, vector<32x16x16xf32>
    %c0_2 = arith.constant 0 : index
    %c0_3 = arith.constant 0 : index
    %1 = vector.load %arg1[%c0_2, %c0_3] : memref<16x16xf32, #tpu.memory_space<vmem>>, vector<16x16xf32>
    %c0_4 = arith.constant 0 : index
    %c0_5 = arith.constant 0 : index
    %2 = vector.load %arg2[%c0_4, %c0_5] : memref<16x16xf32, #tpu.memory_space<vmem>>, vector<16x16xf32>
    %c0_6 = arith.constant 0 : index
    %c0_7 = arith.constant 0 : index
    %3 = vector.load %arg3[%c0_6, %c0_7] : memref<16x16xf32, #tpu.memory_space<vmem>>, vector<16x16xf32>
    %c0_8 = arith.constant 0 : index
    %c0_9 = arith.constant 0 : index
    %4 = vector.load %arg4[%c0_8, %c0_9] : memref<16x16xf32, #tpu.memory_space<vmem>>, vector<16x16xf32>
    %c0_10 = arith.constant 0 : index
    %c0_11 = arith.constant 0 : index
    %5 = vector.load %arg5[%c0_10, %c0_11] : memref<16x4xf32, #tpu.memory_space<vmem>>, vector<16x4xf32>
    %c0_12 = arith.constant 0 : index
    %c0_13 = arith.constant 0 : index
    %6 = vector.load %arg6[%c0_12, %c0_13] : memref<16x4xf32, #tpu.memory_space<vmem>>, vector<16x4xf32>
    %cst = arith.constant 0.000000e+00 : f32
    %7 = vector.broadcast %cst : f32 to vector<1x16x16xf32>
    %8 = vector.extract_strided_slice %0 {offsets = [0, 0, 0], sizes = [15, 16, 16], strides = [1, 1, 1]} : vector<32x16x16xf32> to vector<15x16x16xf32>
    %9 = vector.extract_strided_slice %0 {offsets = [16, 0, 0], sizes = [15, 16, 16], strides = [1, 1, 1]} : vector<32x16x16xf32> to vector<15x16x16xf32>
    %10 = tpu.concatenate %7, %8, %7, %9 in 0 : vector<1x16x16xf32>, vector<15x16x16xf32>, vector<1x16x16xf32>, vector<15x16x16xf32> -> vector<32x16x16xf32>
    %cst_14 = arith.constant 3.000000e+00 : f32
    %11 = vector.broadcast %cst_14 : f32 to vector<32x16x16xf32>
    %12 = arith.mulf %11, %10 : vector<32x16x16xf32>
    %cst_15 = arith.constant 1.000000e+01 : f32
    %13 = vector.broadcast %cst_15 : f32 to vector<32x16x16xf32>
    %14 = arith.mulf %13, %0 : vector<32x16x16xf32>
    %15 = arith.addf %12, %14 : vector<32x16x16xf32>
    %cst_16 = arith.constant 0.000000e+00 : f32
    %16 = vector.broadcast %cst_16 : f32 to vector<1x16x16xf32>
    %17 = vector.extract_strided_slice %0 {offsets = [1, 0, 0], sizes = [15, 16, 16], strides = [1, 1, 1]} : vector<32x16x16xf32> to vector<15x16x16xf32>
    %18 = vector.extract_strided_slice %0 {offsets = [17, 0, 0], sizes = [15, 16, 16], strides = [1, 1, 1]} : vector<32x16x16xf32> to vector<15x16x16xf32>
    %19 = tpu.concatenate %17, %16, %18, %16 in 0 : vector<15x16x16xf32>, vector<1x16x16xf32>, vector<15x16x16xf32>, vector<1x16x16xf32> -> vector<32x16x16xf32>
    %cst_17 = arith.constant 3.000000e+00 : f32
    %20 = vector.broadcast %cst_17 : f32 to vector<32x16x16xf32>
    %21 = arith.mulf %20, %19 : vector<32x16x16xf32>
    %22 = arith.addf %15, %21 : vector<32x16x16xf32>
    %23 = vector.shape_cast %0 : vector<32x16x16xf32> to vector<512x16xf32>
    %cst_18 = arith.constant dense<0.000000e+00> : vector<512x16xf32>
    %24 = tpu.matmul %23, %1, %cst_18 {dimension_numbers = #tpu.dot_dimension_numbers<[1], [0], [0], [1], [0, 0, 1, 1], [], []>} : vector<512x16xf32>, vector<16x16xf32>, vector<512x16xf32> -> vector<512x16xf32>
    %25 = vector.shape_cast %24 : vector<512x16xf32> to vector<32x16x16xf32>
    %26 = vector.shape_cast %22 : vector<32x16x16xf32> to vector<512x16xf32>
    %cst_19 = arith.constant dense<0.000000e+00> : vector<512x16xf32>
    %27 = tpu.matmul %26, %2, %cst_19 {dimension_numbers = #tpu.dot_dimension_numbers<[1], [0], [0], [1], [0, 0, 1, 1], [], []>} : vector<512x16xf32>, vector<16x16xf32>, vector<512x16xf32> -> vector<512x16xf32>
    %28 = vector.shape_cast %27 : vector<512x16xf32> to vector<32x16x16xf32>
    %29 = vector.shape_cast %22 : vector<32x16x16xf32> to vector<512x16xf32>
    %cst_20 = arith.constant dense<0.000000e+00> : vector<512x16xf32>
    %30 = tpu.matmul %29, %1, %cst_20 {dimension_numbers = #tpu.dot_dimension_numbers<[1], [0], [0], [1], [0, 0, 1, 1], [], []>} : vector<512x16xf32>, vector<16x16xf32>, vector<512x16xf32> -> vector<512x16xf32>
    %31 = vector.shape_cast %30 : vector<512x16xf32> to vector<32x16x16xf32>
    %cst_21 = arith.constant 0.000000e+00 : f32
    %32 = vector.broadcast %cst_21 : f32 to vector<1x16x16xf32>
    %33 = vector.extract_strided_slice %25 {offsets = [1, 0, 0], sizes = [15, 16, 16], strides = [1, 1, 1]} : vector<32x16x16xf32> to vector<15x16x16xf32>
    %34 = vector.extract_strided_slice %25 {offsets = [17, 0, 0], sizes = [15, 16, 16], strides = [1, 1, 1]} : vector<32x16x16xf32> to vector<15x16x16xf32>
    %35 = tpu.concatenate %33, %32, %34, %32 in 0 : vector<15x16x16xf32>, vector<1x16x16xf32>, vector<15x16x16xf32>, vector<1x16x16xf32> -> vector<32x16x16xf32>
    %cst_22 = arith.constant 0.000000e+00 : f32
    %36 = vector.broadcast %cst_22 : f32 to vector<1x16x16xf32>
    %37 = vector.extract_strided_slice %25 {offsets = [0, 0, 0], sizes = [15, 16, 16], strides = [1, 1, 1]} : vector<32x16x16xf32> to vector<15x16x16xf32>
    %38 = vector.extract_strided_slice %25 {offsets = [16, 0, 0], sizes = [15, 16, 16], strides = [1, 1, 1]} : vector<32x16x16xf32> to vector<15x16x16xf32>
    %39 = tpu.concatenate %36, %37, %36, %38 in 0 : vector<1x16x16xf32>, vector<15x16x16xf32>, vector<1x16x16xf32>, vector<15x16x16xf32> -> vector<32x16x16xf32>
    %40 = arith.subf %35, %39 : vector<32x16x16xf32>
    %41 = tpu.transpose %28, [0, 2, 1] : vector<32x16x16xf32> -> vector<32x16x16xf32>
    %42 = vector.shape_cast %41 : vector<32x16x16xf32> to vector<512x16xf32>
    %cst_23 = arith.constant dense<0.000000e+00> : vector<512x16xf32>
    %43 = tpu.matmul %42, %3, %cst_23 {dimension_numbers = #tpu.dot_dimension_numbers<[1], [0], [0], [1], [0, 0, 1, 1], [], []>} : vector<512x16xf32>, vector<16x16xf32>, vector<512x16xf32> -> vector<512x16xf32>
    %44 = vector.shape_cast %43 : vector<512x16xf32> to vector<32x16x16xf32>
    %45 = tpu.transpose %31, [0, 2, 1] : vector<32x16x16xf32> -> vector<32x16x16xf32>
    %46 = vector.shape_cast %45 : vector<32x16x16xf32> to vector<512x16xf32>
    %cst_24 = arith.constant dense<0.000000e+00> : vector<512x16xf32>
    %47 = tpu.matmul %46, %4, %cst_24 {dimension_numbers = #tpu.dot_dimension_numbers<[1], [0], [0], [1], [0, 0, 1, 1], [], []>} : vector<512x16xf32>, vector<16x16xf32>, vector<512x16xf32> -> vector<512x16xf32>
    %48 = vector.shape_cast %47 : vector<512x16xf32> to vector<32x16x16xf32>
    %49 = tpu.transpose %40, [0, 2, 1] : vector<32x16x16xf32> -> vector<32x16x16xf32>
    %50 = vector.shape_cast %49 : vector<32x16x16xf32> to vector<512x16xf32>
    %cst_25 = arith.constant dense<0.000000e+00> : vector<512x16xf32>
    %51 = tpu.matmul %50, %3, %cst_25 {dimension_numbers = #tpu.dot_dimension_numbers<[1], [0], [0], [1], [0, 0, 1, 1], [], []>} : vector<512x16xf32>, vector<16x16xf32>, vector<512x16xf32> -> vector<512x16xf32>
    %52 = vector.shape_cast %51 : vector<512x16xf32> to vector<32x16x16xf32>
    %53 = vector.shape_cast %44 : vector<32x16x16xf32> to vector<512x16xf32>
    %cst_26 = arith.constant dense<0.000000e+00> : vector<512x4xf32>
    %54 = tpu.matmul %53, %5, %cst_26 {dimension_numbers = #tpu.dot_dimension_numbers<[1], [0], [0], [1], [0, 0, 1, 1], [], []>} : vector<512x16xf32>, vector<16x4xf32>, vector<512x4xf32> -> vector<512x4xf32>
    %55 = vector.shape_cast %54 : vector<512x4xf32> to vector<8x4x16x4xf32>
    %cst_27 = arith.constant dense<0.000000e+00> : vector<8x16x4xf32>
    %56 = vector.multi_reduction <add>, %55, %cst_27 [1] : vector<8x4x16x4xf32> to vector<8x16x4xf32>
    %57 = vector.shape_cast %48 : vector<32x16x16xf32> to vector<512x16xf32>
    %cst_28 = arith.constant dense<0.000000e+00> : vector<512x4xf32>
    %58 = tpu.matmul %57, %5, %cst_28 {dimension_numbers = #tpu.dot_dimension_numbers<[1], [0], [0], [1], [0, 0, 1, 1], [], []>} : vector<512x16xf32>, vector<16x4xf32>, vector<512x4xf32> -> vector<512x4xf32>
    %59 = vector.shape_cast %58 : vector<512x4xf32> to vector<8x4x16x4xf32>
    %cst_29 = arith.constant dense<0.000000e+00> : vector<8x16x4xf32>
    %60 = vector.multi_reduction <add>, %59, %cst_29 [1] : vector<8x4x16x4xf32> to vector<8x16x4xf32>
    %61 = vector.shape_cast %52 : vector<32x16x16xf32> to vector<512x16xf32>
    %cst_30 = arith.constant dense<0.000000e+00> : vector<512x4xf32>
    %62 = tpu.matmul %61, %5, %cst_30 {dimension_numbers = #tpu.dot_dimension_numbers<[1], [0], [0], [1], [0, 0, 1, 1], [], []>} : vector<512x16xf32>, vector<16x4xf32>, vector<512x4xf32> -> vector<512x4xf32>
    %63 = vector.shape_cast %62 : vector<512x4xf32> to vector<8x4x16x4xf32>
    %cst_31 = arith.constant dense<0.000000e+00> : vector<8x16x4xf32>
    %64 = vector.multi_reduction <add>, %63, %cst_31 [1] : vector<8x4x16x4xf32> to vector<8x16x4xf32>
    %65 = arith.mulf %44, %44 : vector<32x16x16xf32>
    %66 = vector.shape_cast %65 : vector<32x16x16xf32> to vector<512x16xf32>
    %cst_32 = arith.constant dense<0.000000e+00> : vector<512x4xf32>
    %67 = tpu.matmul %66, %5, %cst_32 {dimension_numbers = #tpu.dot_dimension_numbers<[1], [0], [0], [1], [0, 0, 1, 1], [], []>} : vector<512x16xf32>, vector<16x4xf32>, vector<512x4xf32> -> vector<512x4xf32>
    %68 = vector.shape_cast %67 : vector<512x4xf32> to vector<8x4x16x4xf32>
    %cst_33 = arith.constant dense<0.000000e+00> : vector<8x16x4xf32>
    %69 = vector.multi_reduction <add>, %68, %cst_33 [1] : vector<8x4x16x4xf32> to vector<8x16x4xf32>
    %70 = arith.mulf %48, %48 : vector<32x16x16xf32>
    %71 = vector.shape_cast %70 : vector<32x16x16xf32> to vector<512x16xf32>
    %cst_34 = arith.constant dense<0.000000e+00> : vector<512x4xf32>
    %72 = tpu.matmul %71, %5, %cst_34 {dimension_numbers = #tpu.dot_dimension_numbers<[1], [0], [0], [1], [0, 0, 1, 1], [], []>} : vector<512x16xf32>, vector<16x4xf32>, vector<512x4xf32> -> vector<512x4xf32>
    %73 = vector.shape_cast %72 : vector<512x4xf32> to vector<8x4x16x4xf32>
    %cst_35 = arith.constant dense<0.000000e+00> : vector<8x16x4xf32>
    %74 = vector.multi_reduction <add>, %73, %cst_35 [1] : vector<8x4x16x4xf32> to vector<8x16x4xf32>
    %75 = arith.mulf %52, %52 : vector<32x16x16xf32>
    %76 = vector.shape_cast %75 : vector<32x16x16xf32> to vector<512x16xf32>
    %cst_36 = arith.constant dense<0.000000e+00> : vector<512x4xf32>
    %77 = tpu.matmul %76, %5, %cst_36 {dimension_numbers = #tpu.dot_dimension_numbers<[1], [0], [0], [1], [0, 0, 1, 1], [], []>} : vector<512x16xf32>, vector<16x4xf32>, vector<512x4xf32> -> vector<512x4xf32>
    %78 = vector.shape_cast %77 : vector<512x4xf32> to vector<8x4x16x4xf32>
    %cst_37 = arith.constant dense<0.000000e+00> : vector<8x16x4xf32>
    %79 = vector.multi_reduction <add>, %78, %cst_37 [1] : vector<8x4x16x4xf32> to vector<8x16x4xf32>
    %80 = tpu.concatenate %56, %60, %64, %69, %74, %79 in 0 : vector<8x16x4xf32>, vector<8x16x4xf32>, vector<8x16x4xf32>, vector<8x16x4xf32>, vector<8x16x4xf32>, vector<8x16x4xf32> -> vector<48x16x4xf32>
    %81 = tpu.transpose %80, [0, 2, 1] : vector<48x16x4xf32> -> vector<48x4x16xf32>
    %82 = vector.shape_cast %81 : vector<48x4x16xf32> to vector<192x16xf32>
    %cst_38 = arith.constant dense<0.000000e+00> : vector<192x4xf32>
    %83 = tpu.matmul %82, %6, %cst_38 {dimension_numbers = #tpu.dot_dimension_numbers<[1], [0], [0], [1], [0, 0, 1, 1], [], []>} : vector<192x16xf32>, vector<16x4xf32>, vector<192x4xf32> -> vector<192x4xf32>
    %84 = vector.extract_strided_slice %83 {offsets = [0, 0], sizes = [96, 4], strides = [1, 1]} : vector<192x4xf32> to vector<96x4xf32>
    %85 = vector.extract_strided_slice %83 {offsets = [96, 0], sizes = [96, 4], strides = [1, 1]} : vector<192x4xf32> to vector<96x4xf32>
    %86 = arith.mulf %84, %84 : vector<96x4xf32>
    %cst_39 = arith.constant 1.562500e-02 : f32
    %87 = vector.broadcast %cst_39 : f32 to vector<96x4xf32>
    %88 = arith.mulf %86, %87 : vector<96x4xf32>
    %89 = arith.subf %85, %88 : vector<96x4xf32>
    %cst_40 = arith.constant 0.0158730168 : f32
    %90 = vector.broadcast %cst_40 : f32 to vector<96x4xf32>
    %91 = arith.mulf %89, %90 : vector<96x4xf32>
    %92 = vector.shape_cast %91 : vector<96x4xf32> to vector<24x4x4xf32>
    %93 = vector.extract_strided_slice %92 {offsets = [0, 0, 0], sizes = [24, 1, 4], strides = [1, 1, 1]} : vector<24x4x4xf32> to vector<24x1x4xf32>
    %94 = vector.shape_cast %93 : vector<24x1x4xf32> to vector<24x4xf32>
    %95 = vector.extract_strided_slice %92 {offsets = [0, 1, 0], sizes = [24, 1, 4], strides = [1, 1, 1]} : vector<24x4x4xf32> to vector<24x1x4xf32>
    %96 = vector.shape_cast %95 : vector<24x1x4xf32> to vector<24x4xf32>
    %97 = vector.extract_strided_slice %92 {offsets = [0, 2, 0], sizes = [24, 1, 4], strides = [1, 1, 1]} : vector<24x4x4xf32> to vector<24x1x4xf32>
    %98 = vector.shape_cast %97 : vector<24x1x4xf32> to vector<24x4xf32>
    %99 = vector.extract_strided_slice %92 {offsets = [0, 3, 0], sizes = [24, 1, 4], strides = [1, 1, 1]} : vector<24x4x4xf32> to vector<24x1x4xf32>
    %100 = vector.shape_cast %99 : vector<24x1x4xf32> to vector<24x4xf32>
    %101 = tpu.concatenate %94, %96, %98, %100 in 1 : vector<24x4xf32>, vector<24x4xf32>, vector<24x4xf32>, vector<24x4xf32> -> vector<24x16xf32>
    %c0_41 = arith.constant 0 : index
    %c0_42 = arith.constant 0 : index
    %102 = vector.load %arg7[%c0_41, %c0_42] : memref<24x24xf32, #tpu.memory_space<vmem>>, vector<24x24xf32>
    %cst_43 = arith.constant dense<0.000000e+00> : vector<24x16xf32>
    %103 = tpu.matmul %102, %101, %cst_43 {dimension_numbers = #tpu.dot_dimension_numbers<[1], [0], [0], [1], [0, 0, 1, 1], [], []>} : vector<24x24xf32>, vector<24x16xf32>, vector<24x16xf32> -> vector<24x16xf32>
    %c0_44 = arith.constant 0 : index
    %c0_45 = arith.constant 0 : index
    %104 = vector.load %arg8[%c0_44, %c0_45] : memref<24x24xf32, #tpu.memory_space<vmem>>, vector<24x24xf32>
    %cst_46 = arith.constant dense<0.000000e+00> : vector<24x16xf32>
    %105 = tpu.matmul %104, %101, %cst_46 {dimension_numbers = #tpu.dot_dimension_numbers<[1], [0], [0], [1], [0, 0, 1, 1], [], []>} : vector<24x24xf32>, vector<24x16xf32>, vector<24x16xf32> -> vector<24x16xf32>
    %c0_47 = arith.constant 0 : index
    %c0_48 = arith.constant 0 : index
    %106 = vector.load %arg9[%c0_47, %c0_48] : memref<16x16xf32, #tpu.memory_space<vmem>>, vector<16x16xf32>
    %c0_49 = arith.constant 0 : index
    %c0_50 = arith.constant 0 : index
    %107 = vector.load %arg10[%c0_49, %c0_50] : memref<16x16xf32, #tpu.memory_space<vmem>>, vector<16x16xf32>
    %cst_51 = arith.constant dense<0.000000e+00> : vector<24x16xf32>
    %108 = tpu.matmul %103, %106, %cst_51 {dimension_numbers = #tpu.dot_dimension_numbers<[1], [0], [0], [1], [0, 0, 1, 1], [], []>} : vector<24x16xf32>, vector<16x16xf32>, vector<24x16xf32> -> vector<24x16xf32>
    %cst_52 = arith.constant dense<0.000000e+00> : vector<24x16xf32>
    %109 = tpu.matmul %105, %107, %cst_52 {dimension_numbers = #tpu.dot_dimension_numbers<[1], [0], [0], [1], [0, 0, 1, 1], [], []>} : vector<24x16xf32>, vector<16x16xf32>, vector<24x16xf32> -> vector<24x16xf32>
    %110 = arith.subf %108, %109 : vector<24x16xf32>
    %cst_53 = arith.constant dense<0.000000e+00> : vector<24x16xf32>
    %111 = tpu.matmul %103, %107, %cst_53 {dimension_numbers = #tpu.dot_dimension_numbers<[1], [0], [0], [1], [0, 0, 1, 1], [], []>} : vector<24x16xf32>, vector<16x16xf32>, vector<24x16xf32> -> vector<24x16xf32>
    %cst_54 = arith.constant dense<0.000000e+00> : vector<24x16xf32>
    %112 = tpu.matmul %105, %106, %cst_54 {dimension_numbers = #tpu.dot_dimension_numbers<[1], [0], [0], [1], [0, 0, 1, 1], [], []>} : vector<24x16xf32>, vector<16x16xf32>, vector<24x16xf32> -> vector<24x16xf32>
    %113 = arith.addf %111, %112 : vector<24x16xf32>
    %114 = arith.mulf %110, %110 : vector<24x16xf32>
    %115 = arith.mulf %113, %113 : vector<24x16xf32>
    %116 = arith.addf %114, %115 : vector<24x16xf32>
    %117 = math.sqrt %116 : vector<24x16xf32>
    %118 = vector.shape_cast %117 : vector<24x16xf32> to vector<3x2x4x16xf32>
    %119 = vector.extract_strided_slice %118 {offsets = [0, 0, 0, 0], sizes = [3, 1, 4, 16], strides = [1, 1, 1, 1]} : vector<3x2x4x16xf32> to vector<3x1x4x16xf32>
    %120 = vector.shape_cast %119 : vector<3x1x4x16xf32> to vector<3x4x16xf32>
    %121 = vector.extract_strided_slice %118 {offsets = [0, 1, 0, 0], sizes = [3, 1, 4, 16], strides = [1, 1, 1, 1]} : vector<3x2x4x16xf32> to vector<3x1x4x16xf32>
    %122 = vector.shape_cast %121 : vector<3x1x4x16xf32> to vector<3x4x16xf32>
    %123 = arith.subf %120, %122 : vector<3x4x16xf32>
    %124 = math.absf %123 : vector<3x4x16xf32>
    %125 = vector.shape_cast %124 : vector<3x4x16xf32> to vector<12x16xf32>
    %c0_55 = arith.constant 0 : index
    %c0_56 = arith.constant 0 : index
    %126 = vector.load %arg11[%c0_55, %c0_56] : memref<12x16xf32, #tpu.memory_space<vmem>>, vector<12x16xf32>
    %127 = arith.mulf %126, %125 : vector<12x16xf32>
    %128 = vector.shape_cast %127 : vector<12x16xf32> to vector<1x12x16xf32>
    %cst_57 = arith.constant dense<0.000000e+00> : vector<1xf32>
    %129 = vector.multi_reduction <add>, %128, %cst_57 [1, 2] : vector<1x12x16xf32> to vector<1xf32>
    %130 = vector.shape_cast %129 : vector<1xf32> to vector<1x1x1xf32>
    %131 = vector.extract %130[0, 0, 0] : f32 from vector<1x1x1xf32>
    %cst_58 = arith.constant 1.562500e-02 : f32
    %132 = arith.mulf %131, %cst_58 : f32
    %c0_59 = arith.constant 0 : index
    %c0_60 = arith.constant 0 : index
    %133 = memref.load %arg12[%c0_59, %c0_60] : memref<1x1xf32, #tpu.memory_space<smem>>
    memref.store %132, %arg12[%c0_59, %c0_60] : memref<1x1xf32, #tpu.memory_space<smem>>
    return
  }
}

</mosaic_0001>

<bundles_post_ra>
// kernel: tpu_custom_call.1
= control target key start
LH: loop header
LB: loop body
LE: loop exit
PB: predicated region body
PF: predicated region fallthrough
CT: control target
= control target key end

     0   :  { %vm374_vm0 = vcmask 130048   ;;  %s21300_s0 = inlined_call_operand.vmem [shape: f32[32,16,16], index: 0, kind: input, shape index: {}]   ;;  %s21301_s1 = inlined_call_operand.vmem [shape: f32[16,16], index: 1, kind: input, shape index: {}]   ;;  %s21302_s2 = inlined_call_operand.vmem [shape: f32[16,16], index: 2, kind: input, shape index: {}]   ;;  %s21303_s3 = inlined_call_operand.vmem [shape: f32[16,16], index: 3, kind: input, shape index: {}]   ;;  %s21304_s4 = inlined_call_operand.vmem [shape: f32[16,16], index: 4, kind: input, shape index: {}]   ;;  %s21305_s5 = inlined_call_operand.vmem [shape: f32[16,4], index: 5, kind: input, shape index: {}]   ;;  %s21306_s6 = inlined_call_operand.vmem [shape: f32[16,4], index: 6, kind: input, shape index: {}]   ;;  %s21307_s7 = inlined_call_operand.vmem [shape: f32[24,24], index: 7, kind: input, shape index: {}]   ;;  %s21308_s8 = inlined_call_operand.vmem [shape: f32[24,24], index: 8, kind: input, shape index: {}]   ;;  %s21309_s9 = inlined_call_operand.vmem [shape: f32[16,16], index: 9, kind: input, shape index: {}]   ;;  %s21310_s10 = inlined_call_operand.vmem [shape: f32[16,16], index: 10, kind: input, shape index: {}]   ;;  %s21311_s11 = inlined_call_operand.vmem [shape: f32[12,16], index: 11, kind: input, shape index: {}]   ;;  %s21312_s12 = inlined_call_operand.hbm [shape: f32[1,1], index: 12, kind: output, shape index: {}]  }
   0x1   :  { %v106_v0 = vld [vmem:[%s21301_s1] sm:$0xff]  ;;  %v107_v1 = vld [vmem:[%s21301_s1 + $0x8] sm:$0xff]  ;;  %v17332_v4 = vld [vmem:[%s21300_s0 + $0x1d0] sm:$0xff] }
   0x2   :  { %v42_v2 = vld [vmem:[%s21300_s0] sm:$0xff]  ;;  %v17127_v3 = vpack.c.bf16 %v107_v1, %v106_v0  ;;  %v43_v5 = vld [vmem:[%s21300_s0 + $0x8] sm:$0xff]  ;;  %v17340_v6 = vld [vmem:[%s21300_s0 + $0x1d8] sm:$0xff]  ;;  %15896 = vmatprep.mubr.msk.f32.mxu1 %vm374_vm0, %v17332_v4  ;;  %v17354_v9 = vmul.f32 3.0, %v17332_v4 }
   0x3   :  { %15809 = vmatprep.mubr.msk.f32.mxu0 %vm374_vm0, %v42_v2  ;;  %v44_v7 = vld [vmem:[%s21300_s0 + $0x10] sm:$0xff]  ;;  %v17350_v8 = vld [vmem:[%s21300_s0 + $0x1e0] sm:$0xff]  ;;  %v17362_v11 = vld [vmem:[%s21300_s0 + $0x1e8] sm:$0xff]  ;;  %v17372_v14 = vmul.f32 3.0, %v17340_v6  ;;  %v178_v16 = vmul.f32 10.0, %v42_v2  ;;  %v179_v23 = vmul.f32 10.0, %v43_v5 }
   0x4   :  { %17128 = vmatprep.subr.bf16.mxu0 %v17127_v3  ;;  %17197 = vmatprep.subr.bf16.mxu1 %v17127_v3  ;;  %v238_v10 = vmul.f32 10.0, %v17350_v8  ;;  %v45_v12 = vld [vmem:[%s21300_s0 + $0x18] sm:$0xff]  ;;  %v46_v13 = vld [vmem:[%s21300_s0 + $0x20] sm:$0xff]  ;;  %v239_v15 = vmul.f32 10.0, %v17362_v11  ;;  %v120_v17 = vmul.f32 3.0, %v44_v7  ;;  %v17383_v19 = vld [vmem:[%s21300_s0 + $0x1f0] sm:$0xff] }
   0x5   :  { %17130 = vmatpush3.bf16.msra.mxu0 %v17127_v3  ;;  %17198 = vmatpush3.bf16.msra.mxu1 %v17127_v3  ;;  %v108_v20 = vld [vmem:[%s21302_s2] sm:$0xff]  ;;  %v109_v21 = vld [vmem:[%s21302_s2 + $0x8] sm:$0xff]  ;;  %v121_v24 = vmul.f32 3.0, %v45_v12  ;;  %v118_v25 = vmul.f32 3.0, %v42_v2  ;;  %v180_v26 = vmul.f32 10.0, %v44_v7  ;;  %v17406_v28 = vld [vmem:[%s21300_s0 + $0x1f8] sm:$0xff] }
   0x6   :  { %17136 = vmatprep.subr.bf16.mxu0 %v17127_v3  ;;  %v17378_v18 = vadd.f32 %v238_v10, %v17354_v9  ;;  %v17392_v22 = vadd.f32 %v239_v15, %v17372_v14  ;;  %v47_v27 = vld [vmem:[%s21300_s0 + $0x28] sm:$0xff]  ;;  %v17131_v29 = vpack.c.bf16 %v109_v21, %v108_v20  ;;  %v119_v30 = vmul.f32 3.0, %v43_v5  ;;  %v48_v32 = vld [vmem:[%s21300_s0 + $0x30] sm:$0xff]  ;;  %v49_v39 = vld [vmem:[%s21300_s0 + $0x38] sm:$0xff] }
   0x7   :  { %v181_v31 = vmul.f32 10.0, %v45_v12  ;;  %v17411_v33 = vadd.f32 %v178_v16, %v120_v17  ;;  %v182_v34 = vmul.f32 10.0, %v46_v13  ;;  %v17413_v35 = vadd.f32 %v179_v23, %v121_v24  ;;  %v50_v42 = vld [vmem:[%s21300_s0 + $0x40] sm:$0xff]  ;;  %v51_v49 = vld [vmem:[%s21300_s0 + $0x48] sm:$0xff]  ;;  %v52_v52 = vld [vmem:[%s21300_s0 + $0x50] sm:$0xff] }
   0x8   :  { %15810 = vmatmul.mubr.msk.f32.vlgmr.msra.gmra.mrb[0].mxu0 %vm374_vm0, %v43_v5  ;;  %15897 = vmatmul.mubr.msk.f32.vlgmr.msra.gmra.mrb[0].mxu1 %vm374_vm0, %v17340_v6  ;;  %v183_v36 = vmul.f32 10.0, %v47_v27  ;;  %v244_v37 = vadd.f32 %v180_v26, %v118_v25  ;;  %v122_v38 = vmul.f32 3.0, %v46_v13  ;;  %v123_v41 = vmul.f32 3.0, %v47_v27 }
   0x9   :  { %15812 = vmatprep.mubr.msk.f32.mxu0 %vm374_vm0, %v44_v7  ;;  %15899 = vmatprep.mubr.msk.f32.mxu1 %vm374_vm0, %v17350_v8  ;;  %v245_v40 = vadd.f32 %v181_v31, %v119_v30  ;;  %v246_v43 = vadd.f32 %v182_v34, %v120_v17  ;;  %v124_v44 = vmul.f32 3.0, %v48_v32  ;;  %v184_v46 = vmul.f32 10.0, %v48_v32 }
   0xa   :  { %17138 = vmatpush3.bf16.msra.mxu0 %v17127_v3  ;;  %17132 = vmatprep.subr.bf16.mxu1 %v17131_v29  ;;  %v247_v45 = vadd.f32 %v183_v36, %v121_v24  ;;  %v125_v47 = vmul.f32 3.0, %v49_v39  ;;  %v185_v48 = vmul.f32 10.0, %v49_v39  ;;  %v17434_v50 = vadd.f32 %v244_v37, %v122_v38 }
   0xb   :  { %17134 = vmatpush3.bf16.msra.mxu1 %v17131_v29  ;;  %v186_v51 = vmul.f32 10.0, %v50_v42  ;;  %v17439_v53 = vadd.f32 %v245_v40, %v123_v41  ;;  %v17443_v54 = vadd.f32 %v246_v43, %v124_v44  ;;  %v248_v55 = vadd.f32 %v184_v46, %v122_v38 }
   0xc   :  { %15813 = vmatmul.mubr.msk.f32.gmra.mrb[2].mxu0 %vm374_vm0, %v45_v12  ;;  %15900 = vmatmul.mubr.msk.f32.gmra.mrb[2].mxu1 %vm374_vm0, %v17362_v11  ;;  %v126_v56 = vmul.f32 3.0, %v50_v42  ;;  %v187_v57 = vmul.f32 10.0, %v51_v49  ;;  %v17448_v58 = vadd.f32 %v247_v45, %v125_v47 }
   0xd   :  { %15815 = vmatprep.mubr.msk.f32.mxu0 %vm374_vm0, %v46_v13  ;;  %15902 = vmatprep.mubr.msk.f32.mxu1 %vm374_vm0, %v17383_v19 }
  0x10   :  { %15816 = vmatmul.mubr.msk.f32.gmra.mrb[4].mxu0 %vm374_vm0, %v47_v27  ;;  %15903 = vmatmul.mubr.msk.f32.gmra.mrb[4].mxu1 %vm374_vm0, %v17406_v28 }
  0x11   :  { %15818 = vmatprep.mubr.msk.f32.mxu0 %vm374_vm0, %v48_v32  ;;  %15909 = vmatprep.mubr.msk.f32.mxu1 %vm374_vm0, %v17411_v33 }
  0x14   :  { %15819 = vmatmul.mubr.msk.f32.gmra.mrb[6].mxu0 %vm374_vm0, %v49_v39  ;;  %15910 = vmatmul.mubr.msk.f32.vlgmr.msra.gmra.mrb[6].mxu1 %vm374_vm0, %v17413_v35 }
  0x15   :  { %15821 = vmatprep.mubr.msk.f32.mxu0 %vm374_vm0, %v50_v42  ;;  %15912 = vmatprep.mubr.msk.f32.mxu1 %vm374_vm0, %v17434_v50 }
  0x18   :  { %15822 = vmatmul.mubr.msk.f32.gmra.mrb[8].mxu0 %vm374_vm0, %v51_v49  ;;  %15913 = vmatmul.mubr.msk.f32.gmra.mrb[8].mxu1 %vm374_vm0, %v17439_v53 }
  0x19   :  { %17 = vsyncpa [#allocation3], 0  ;;  %v249_v59 = vadd.f32 %v185_v48, %v123_v41  ;;  %v127_v60 = vmul.f32 3.0, %v51_v49  ;;  %v188_v61 = vmul.f32 10.0, %v52_v52  ;;  %15824 = vmatprep.mubr.msk.f32.mxu0 %vm374_vm0, %v52_v52  ;;  %v53_v62 = vld [vmem:[%s21300_s0 + $0x58] sm:$0xff]  ;;  %15915 = vmatprep.mubr.msk.f32.mxu1 %vm374_vm0, %v17443_v54  ;;  %v250_v63 = vadd.f32 %v186_v51, %v124_v44  ;;  %v54_v1 = vld [vmem:[%s21300_s0 + $0x60] sm:$0xff] }
  0x1a   :  { %v128_v0 = vmul.f32 3.0, %v52_v52  ;;  %v251_v2 = vadd.f32 %v187_v57, %v125_v47  ;;  %v129_v3 = vmul.f32 3.0, %v53_v62  ;;  %v189_v5 = vmul.f32 10.0, %v53_v62  ;;  %v55_v15 = vld [vmem:[%s21300_s0 + $0x68] sm:$0xff]  ;;  %v56_v17 = vld [vmem:[%s21300_s0 + $0x70] sm:$0xff]  ;;  %v57_v30 = vld [vmem:[%s21300_s0 + $0x78] sm:$0xff] }
  0x1b   :  { %v17462_v7 = vadd.f32 %v248_v55, %v126_v56  ;;  %v252_v10 = vadd.f32 %v188_v61, %v126_v56  ;;  %v130_v12 = vmul.f32 3.0, %v54_v1  ;;  %v190_v13 = vmul.f32 10.0, %v54_v1  ;;  %v58_v32 = vld [vmem:[%s21300_s0 + $0x80] sm:$0xff]  ;;  %v59_v42 = vld [vmem:[%s21300_s0 + $0x88] sm:$0xff]  ;;  %v60_v44 = vld [vmem:[%s21300_s0 + $0x90] sm:$0xff]  ;;  %s17248_s30 = smov 4  }
  0x1c   :  { %15825 = vmatmul.mubr.msk.f32.gmra.mrb[10].mxu0 %vm374_vm0, %v53_v62  ;;  %15916 = vmatmul.mubr.msk.f32.gmra.mrb[10].mxu1 %vm374_vm0, %v17448_v58  ;;  %v17468_v16 = vadd.f32 %v249_v59, %v127_v60  ;;  %v17475_v20 = vadd.f32 %v250_v63, %v128_v0  ;;  %v253_v21 = vadd.f32 %v189_v5, %v127_v60  ;;  %v131_v23 = vmul.f32 3.0, %v55_v15  ;;  %v61_v55 = vld [vmem:[%s21300_s0 + $0x98] sm:$0xff]  ;;  %v62_v57 = vld [vmem:[%s21300_s0 + $0xa0] sm:$0xff]  ;;  %v64_v5 = vld [vmem:[%s21300_s0 + $0xb0] sm:$0xff]  ;;  %s17249_s1 = smov 12  }
  0x1d   :  { %15827 = vmatprep.mubr.msk.f32.mxu0 %vm374_vm0, %v54_v1  ;;  %15918 = vmatprep.mubr.msk.f32.mxu1 %vm374_vm0, %v17462_v7  ;;  %v191_v24 = vmul.f32 10.0, %v55_v15  ;;  %v17480_v25 = vadd.f32 %v251_v2, %v129_v3  ;;  %v254_v26 = vadd.f32 %v190_v13, %v128_v0  ;;  %v132_v27 = vmul.f32 3.0, %v56_v17  ;;  %v63_v2 = vld [vmem:[%s21300_s0 + $0xa8] sm:$0xff] }
  0x1e   :  { %v192_v29 = vmul.f32 10.0, %v56_v17  ;;  %v17488_v31 = vadd.f32 %v252_v10, %v130_v12  ;;  %v133_v36 = vmul.f32 3.0, %v57_v30  ;;  %v193_v37 = vmul.f32 10.0, %v57_v30 }
  0x1f   :  { %v255_v34 = vadd.f32 %v191_v24, %v129_v3  ;;  %v17496_v38 = vadd.f32 %v253_v21, %v131_v23  ;;  %v134_v40 = vmul.f32 3.0, %v58_v32  ;;  %v194_v41 = vmul.f32 10.0, %v58_v32  ;;  %v65_v24 = vld [vmem:[%s21300_s0 + $0xb8] sm:$0xff] }
  0x20   :  { %15828 = vmatmul.mubr.msk.f32.gmra.mrb[12].mxu0 %vm374_vm0, %v55_v15  ;;  %15919 = vmatmul.mubr.msk.f32.gmra.mrb[12].mxu1 %vm374_vm0, %v17468_v16  ;;  %v256_v39 = vadd.f32 %v192_v29, %v130_v12  ;;  %v17504_v43 = vadd.f32 %v254_v26, %v132_v27  ;;  %v257_v45 = vadd.f32 %v193_v37, %v131_v23  ;;  %v135_v46 = vmul.f32 3.0, %v59_v42 }
  0x21   :  { %15830 = vmatprep.mubr.msk.f32.mxu0 %vm374_vm0, %v56_v17  ;;  %15921 = vmatprep.mubr.msk.f32.mxu1 %vm374_vm0, %v17475_v20  ;;  %v195_v47 = vmul.f32 10.0, %v59_v42  ;;  %v17512_v48 = vadd.f32 %v255_v34, %v133_v36  ;;  %v258_v49 = vadd.f32 %v194_v41, %v132_v27  ;;  %v136_v51 = vmul.f32 3.0, %v60_v44  ;;  %v66_v27 = vld [vmem:[%s21300_s0 + $0xc0] sm:$0xff] }
  0x22   :  { %v196_v52 = vmul.f32 10.0, %v60_v44  ;;  %v17520_v56 = vadd.f32 %v256_v39, %v134_v40  ;;  %v137_v60 = vmul.f32 3.0, %v61_v55  ;;  %v197_v61 = vmul.f32 10.0, %v61_v55 }
  0x23   :  { %v259_v59 = vadd.f32 %v195_v47, %v133_v36  ;;  %v17528_v62 = vadd.f32 %v257_v45, %v135_v46  ;;  %v138_v0 = vmul.f32 3.0, %v62_v57  ;;  %v198_v1 = vmul.f32 10.0, %v62_v57 }
  0x24   :  { %15831 = vmatmul.mubr.msk.f32.gmra.mrb[14].mxu0 %vm374_vm0, %v57_v30  ;;  %15922 = vmatmul.mubr.msk.f32.gmra.mrb[14].mxu1 %vm374_vm0, %v17480_v25  ;;  %v260_v63 = vadd.f32 %v196_v52, %v134_v40  ;;  %v17536_v3 = vadd.f32 %v258_v49, %v136_v51  ;;  %v261_v10 = vadd.f32 %v197_v61, %v135_v46  ;;  %v139_v12 = vmul.f32 3.0, %v63_v2  ;;  %v67_v40 = vld [vmem:[%s21300_s0 + $0xc8] sm:$0xff] }
  0x25   :  { %15833 = vmatprep.mubr.msk.f32.mxu0 %vm374_vm0, %v58_v32  ;;  %15924 = vmatprep.mubr.msk.f32.mxu1 %vm374_vm0, %v17488_v31  ;;  %v199_v13 = vmul.f32 10.0, %v63_v2  ;;  %v17544_v15 = vadd.f32 %v259_v59, %v137_v60  ;;  %v262_v17 = vadd.f32 %v198_v1, %v136_v51  ;;  %v140_v21 = vmul.f32 3.0, %v64_v5  ;;  %v70_v59 = vld [vmem:[%s21300_s0 + $0xe0] sm:$0xff] }
  0x26   :  { %v200_v23 = vmul.f32 10.0, %v64_v5  ;;  %v17552_v26 = vadd.f32 %v260_v63, %v138_v0  ;;  %v141_v30 = vmul.f32 3.0, %v65_v24  ;;  %v201_v32 = vmul.f32 10.0, %v65_v24 }
  0x27   :  { %v263_v29 = vadd.f32 %v199_v13, %v137_v60  ;;  %v17560_v34 = vadd.f32 %v261_v10, %v139_v12  ;;  %v142_v37 = vmul.f32 3.0, %v66_v27  ;;  %v202_v39 = vmul.f32 10.0, %v66_v27  ;;  %v71_v10 = vld [vmem:[%s21300_s0 + $0xe8] sm:$0xff]  ;;  %v72_v13 = vld [vmem:[%s21300_s0 + $0xf0] sm:$0xff] }
  0x28   :  { %15834 = vmatmul.mubr.msk.f32.gmra.mrb[16].mxu0 %vm374_vm0, %v59_v42  ;;  %15925 = vmatmul.mubr.msk.f32.gmra.mrb[16].mxu1 %vm374_vm0, %v17496_v38  ;;  %v264_v36 = vadd.f32 %v200_v23, %v138_v0  ;;  %v17568_v41 = vadd.f32 %v262_v17, %v140_v21  ;;  %v68_v42 = vld [vmem:[%s21300_s0 + $0xd0] sm:$0xff]  ;;  %v143_v45 = vmul.f32 3.0, %v67_v40  ;;  %v203_v46 = vmul.f32 10.0, %v67_v40 }
  0x29   :  { %15836 = vmatprep.mubr.msk.f32.mxu0 %vm374_vm0, %v60_v44  ;;  %15927 = vmatprep.mubr.msk.f32.mxu1 %vm374_vm0, %v17504_v43  ;;  %v265_v44 = vadd.f32 %v201_v32, %v139_v12  ;;  %v17576_v47 = vadd.f32 %v263_v29, %v141_v30  ;;  %v266_v49 = vadd.f32 %v202_v39, %v140_v21  ;;  %v144_v51 = vmul.f32 3.0, %v68_v42 }
  0x2a   :  { %v204_v52 = vmul.f32 10.0, %v68_v42  ;;  %v267_v60 = vadd.f32 %v203_v46, %v141_v30  ;;  %v147_v21 = vmul.f32 3.0, %v71_v10  ;;  %v207_v23 = vmul.f32 10.0, %v71_v10  ;;  %v73_v30 = vld [vmem:[%s21300_s0 + $0xf8] sm:$0xff]  ;;  %v76_v46 = vld [vmem:[%s21300_s0 + $0x110] sm:$0xff] }
  0x2b   :  { %v17592_v0 = vadd.f32 %v265_v44, %v143_v45  ;;  %v17600_v12 = vadd.f32 %v266_v49, %v144_v51  ;;  %v306_v29 = vmul.f32 3.0, %v72_v13  ;;  %v307_v39 = vmul.f32 3.0, %v73_v30  ;;  %v75_v44 = vld [vmem:[%s21300_s0 + $0x108] sm:$0xff] }
  0x2c   :  { %15837 = vmatmul.mubr.msk.f32.gmra.mrb[18].mxu0 %vm374_vm0, %v61_v55  ;;  %15928 = vmatmul.mubr.msk.f32.gmra.mrb[18].mxu1 %vm374_vm0, %v17512_v48  ;;  %v69_v55 = vld [vmem:[%s21300_s0 + $0xd8] sm:$0xff]  ;;  %v268_v1 = vadd.f32 %v204_v52, %v142_v37  ;;  %v209_v49 = vmul.f32 10.0, %v73_v30  ;;  %vm7354_vm1 = vcmask 31744   ;;  %vm13113_vm2 = vcmask 1041409  }
  0x2d   :  { %15839 = vmatprep.mubr.msk.f32.mxu0 %vm374_vm0, %v62_v57  ;;  %15930 = vmatprep.mubr.msk.f32.mxu1 %vm374_vm0, %v17520_v56  ;;  %v17584_v57 = vadd.f32 %v264_v36, %v142_v37  ;;  %v145_v61 = vmul.f32 3.0, %v69_v55  ;;  %v205_v63 = vmul.f32 10.0, %v69_v55  ;;  %v74_v36 = vld [vmem:[%s21300_s0 + $0x100] sm:$0xff]  ;;  %vm13115_vm3 = vcmask 1042434  }
  0x2e   :  { %vm13117_vm4 = vcmask 1043459   ;;  %vm13119_vm5 = vcmask 1044484   ;;  %vm13121_vm6 = vcmask 1045509   ;;  %vm13123_vm7 = vcmask 1046534  }
  0x2f   :  { %v269_v17 = vadd.f32 %v205_v63, %v143_v45  ;;  %v271_v37 = vadd.f32 %v207_v23, %v145_v61  ;;  %v17656_v23 = vadd.f32 %v209_v49, %v147_v21  ;;  %vm13125_vm8 = vcmask 1047559  }
  0x30   :  { %15840 = vmatmul.mubr.msk.f32.gmra.mrb[20].mxu0 %vm374_vm0, %v63_v2  ;;  %15931 = vmatmul.mubr.msk.f32.gmra.mrb[20].mxu1 %vm374_vm0, %v17528_v62  ;;  %v146_v2 = vmul.f32 3.0, %v70_v59  ;;  %vm17251_vm9 = vmmov 0   ;;  %vm13525_vm10 = vcmask 64512   ;;  %vm13529_vm11 = vcmask 97280  }
  0x31   :  { %15842 = vmatprep.mubr.msk.f32.mxu0 %vm374_vm0, %v64_v5  ;;  %15933 = vmatprep.mubr.msk.f32.mxu1 %vm374_vm0, %v17536_v3  ;;  %v206_v5 = vmul.f32 10.0, %v70_v59  ;;  %v17640_v52 = vadd.f32 %v307_v39, %v271_v37  ;;  %21544 = vst [vmem:[#allocation7_spill] sm:$0xff] %v17656_v23  ;;  %v80_v37 = vld [vmem:[%s21300_s0 + $0x130] sm:$0xff]  ;;  %vm13536_vm12 = vcmask 195584  }
  0x32   :  { %v17616_v32 = vadd.f32 %v268_v1, %v146_v2  ;;  %v78_v1 = vld [vmem:[%s21300_s0 + $0x120] sm:$0xff]  ;;  %v154_v49 = vmul.f32 3.0, %v80_v37 }
  0x33   :  { %21542 = vst [vmem:[#allocation5_spill] sm:$0xff] %v17640_v52 }
  0x34   :  { %15843 = vmatmul.mubr.msk.f32.gmra.mrb[22].mxu0 %vm374_vm0, %v65_v24  ;;  %15934 = vmatmul.mubr.msk.f32.gmra.mrb[22].mxu1 %vm374_vm0, %v17544_v15  ;;  %v17608_v24 = vadd.f32 %v267_v60, %v145_v61  ;;  %v212_v60 = vmul.f32 10.0, %v76_v46  ;;  %v77_v61 = vld [vmem:[%s21300_s0 + $0x118] sm:$0xff] }
  0x35   :  { %15845 = vmatprep.mubr.msk.f32.mxu0 %vm374_vm0, %v66_v27  ;;  %15936 = vmatprep.mubr.msk.f32.mxu1 %vm374_vm0, %v17552_v26  ;;  %v270_v27 = vadd.f32 %v206_v5, %v144_v51  ;;  %v148_v51 = vmul.f32 3.0, %v74_v36  ;;  %v149_v5 = vmul.f32 3.0, %v75_v44 }
  0x37   :  { %v17632_v45 = vadd.f32 %v306_v29, %v270_v27  ;;  %v276_v27 = vadd.f32 %v212_v60, %v148_v51  ;;  %v152_v29 = vmul.f32 3.0, %v78_v1  ;;  %v216_v51 = vmul.f32 10.0, %v80_v37 }
  0x38   :  { %15846 = vmatmul.mubr.msk.f32.gmra.mrb[24].mxu0 %vm374_vm0, %v67_v40  ;;  %15937 = vmatmul.mubr.msk.f32.gmra.mrb[24].mxu1 %vm374_vm0, %v17560_v34  ;;  %v17624_v40 = vadd.f32 %v269_v17, %v147_v21  ;;  %v213_v17 = vmul.f32 10.0, %v77_v61 }
  0x39   :  { %15848 = vmatprep.mubr.msk.f32.mxu0 %vm374_vm0, %v68_v42  ;;  %15939 = vmatprep.mubr.msk.f32.mxu1 %vm374_vm0, %v17568_v41  ;;  %v208_v42 = vmul.f32 10.0, %v72_v13  ;;  %v17680_v60 = vadd.f32 %v276_v27, %v152_v29  ;;  %v83_v27 = vld [vmem:[%s21300_s0 + $0x148] sm:$0xff] }
  0x3a   :  { %v277_v21 = vadd.f32 %v213_v17, %v149_v5  ;;  %v280_v17 = vadd.f32 %v216_v51, %v152_v29  ;;  %v219_v29 = vmul.f32 10.0, %v83_v27 }
  0x3b   :  { %v17648_v63 = vadd.f32 %v208_v42, %v146_v2  ;;  %v79_v2 = vld [vmem:[%s21300_s0 + $0x128] sm:$0xff]  ;;  %21547 = vst [vmem:[#allocation10_spill] sm:$0xff] %v17680_v60 }
  0x3c   :  { %15849 = vmatmul.mubr.msk.f32.gmra.mrb[26].mxu0 %vm374_vm0, %v69_v55  ;;  %15940 = vmatmul.mubr.msk.f32.gmra.mrb[26].mxu1 %vm374_vm0, %v17576_v47  ;;  %v210_v55 = vmul.f32 10.0, %v74_v36  ;;  %v153_v39 = vmul.f32 3.0, %v79_v2  ;;  %v215_v42 = vmul.f32 10.0, %v79_v2 }
  0x3d   :  { %15851 = vmatprep.mubr.msk.f32.mxu0 %vm374_vm0, %v70_v59  ;;  %15942 = vmatprep.mubr.msk.f32.mxu1 %vm374_vm0, %v17584_v57  ;;  %v150_v59 = vmul.f32 3.0, %v76_v46  ;;  %21543 = vst [vmem:[#allocation6_spill] sm:$0xff] %v17648_v63 }
  0x40   :  { %15852 = vmatmul.mubr.msk.f32.gmra.mrb[28].mxu0 %vm374_vm0, %v71_v10  ;;  %15943 = vmatmul.mubr.msk.f32.gmra.mrb[28].mxu1 %vm374_vm0, %v17592_v0  ;;  %v211_v10 = vmul.f32 10.0, %v75_v44 }
  0x41   :  { %15854 = vmatprep.mubr.msk.f32.mxu0 %vm374_vm0, %v72_v13  ;;  %15945 = vmatprep.mubr.msk.f32.mxu1 %vm374_vm0, %v17600_v12  ;;  %v151_v13 = vmul.f32 3.0, %v77_v61 }
  0x44   :  { %15855 = vmatmul.mubr.msk.f32.gmra.mrb[30].mxu0 %vm374_vm0, %v73_v30  ;;  %15946 = vmatmul.mubr.msk.f32.gmra.mrb[30].mxu1 %vm374_vm0, %v17608_v24  ;;  %v214_v30 = vmul.f32 10.0, %v78_v1 }
  0x45   :  { %15857 = vmatprep.mubr.msk.f32.mxu0 %vm374_vm0, %v74_v36  ;;  %15948 = vmatprep.mubr.msk.f32.mxu1 %vm374_vm0, %v17616_v32  ;;  %v17664_v36 = vadd.f32 %v210_v55, %v150_v59  ;;  %v81_v55 = vld [vmem:[%s21300_s0 + $0x138] sm:$0xff] }
  0x46   :  { %v155_v5 = vmul.f32 3.0, %v81_v55 }
  0x47   :  { %21545 = vst [vmem:[#allocation8_spill] sm:$0xff] %v17664_v36 }
  0x48   :  { %15858 = vmatmul.mubr.msk.f32.gmra.mrb[32].mxu0 %vm374_vm0, %v75_v44  ;;  %15949 = vmatmul.mubr.msk.f32.gmra.mrb[32].mxu1 %vm374_vm0, %v17624_v40  ;;  %v17672_v44 = vadd.f32 %v211_v10, %v151_v13  ;;  %v17688_v10 = vadd.f32 %v277_v21, %v153_v39 }
  0x49   :  { %15860 = vmatprep.mubr.msk.f32.mxu0 %vm374_vm0, %v76_v46  ;;  %15951 = vmatprep.mubr.msk.f32.mxu1 %vm374_vm0, %v17632_v45  ;;  %v278_v46 = vadd.f32 %v214_v30, %v150_v59  ;;  %v217_v59 = vmul.f32 10.0, %v81_v55 }
  0x4a   :  { %21546 = vst [vmem:[#allocation9_spill] sm:$0xff] %v17672_v44  ;;  %21548 = vst [vmem:[#allocation11_spill] sm:$0xff] %v17688_v10 }
  0x4b   :  { %v281_v21 = vadd.f32 %v217_v59, %v153_v39  ;;  %v86_v59 = vld [vmem:[%s21300_s0 + $0x160] sm:$0xff] }
  0x4c   :  { %15861 = vmatmul.mubr.msk.f32.gmra.mrb[34].mxu0 %vm374_vm0, %v77_v61  ;;  %15952 = vmatmul.mubr.msk.f32.gmra.mrb[34].mxu1 %vm374_vm0, %v17640_v52  ;;  %v82_v61 = vld [vmem:[%s21300_s0 + $0x140] sm:$0xff] }
  0x4d   :  { %15863 = vmatprep.mubr.msk.f32.mxu0 %vm374_vm0, %v78_v1  ;;  %15954 = vmatprep.mubr.msk.f32.mxu1 %vm374_vm0, %v17648_v63  ;;  %v279_v1 = vadd.f32 %v215_v42, %v151_v13  ;;  %v156_v30 = vmul.f32 3.0, %v82_v61  ;;  %v17696_v13 = vadd.f32 %v278_v46, %v154_v49  ;;  %v157_v42 = vmul.f32 3.0, %v83_v27  ;;  %v85_v46 = vld [vmem:[%s21300_s0 + $0x158] sm:$0xff] }
  0x4e   :  { %v177_v63 = vmul.f32 3.0, %v17362_v11  ;;  %v97_v11 = vld [vmem:[%s21300_s0 + $0x1b8] sm:$0xff] }
  0x4f   :  { %21549 = vst [vmem:[#allocation12_spill] sm:$0xff] %v17696_v13  ;;  %v17704_v51 = vadd.f32 %v279_v1, %v155_v5  ;;  %v17712_v39 = vadd.f32 %v280_v17, %v156_v30  ;;  %v283_v1 = vadd.f32 %v219_v29, %v155_v5  ;;  %v87_v17 = vld [vmem:[%s21300_s0 + $0x168] sm:$0xff]  ;;  %v88_v29 = vld [vmem:[%s21300_s0 + $0x170] sm:$0xff] }
  0x50   :  { %15864 = vmatmul.mubr.msk.f32.gmra.mrb[36].mxu0 %vm374_vm0, %v79_v2  ;;  %15955 = vmatmul.mubr.msk.f32.gmra.mrb[36].mxu1 %vm374_vm0, %v17656_v23  ;;  %v218_v2 = vmul.f32 10.0, %v82_v61 }
  0x51   :  { %15866 = vmatprep.mubr.msk.f32.mxu0 %vm374_vm0, %v80_v37  ;;  %15957 = vmatprep.mubr.msk.f32.mxu1 %vm374_vm0, %v17664_v36  ;;  %v84_v37 = vld [vmem:[%s21300_s0 + $0x150] sm:$0xff]  ;;  %21550 = vst [vmem:[#allocation13_spill] sm:$0xff] %v17704_v51  ;;  %21551 = vst [vmem:[#allocation14_spill] sm:$0xff] %v17712_v39 }
  0x54   :  { %15867 = vmatmul.mubr.msk.f32.gmra.mrb[38].mxu0 %vm374_vm0, %v81_v55  ;;  %15958 = vmatmul.mubr.msk.f32.gmra.mrb[38].mxu1 %vm374_vm0, %v17672_v44  ;;  %v282_v55 = vadd.f32 %v218_v2, %v154_v49  ;;  %v220_v44 = vmul.f32 10.0, %v84_v37  ;;  %v221_v49 = vmul.f32 10.0, %v85_v46  ;;  %v17720_v2 = vadd.f32 %v281_v21, %v157_v42 }
  0x55   :  { %15869 = vmatprep.mubr.msk.f32.mxu0 %vm374_vm0, %v82_v61  ;;  %15960 = vmatprep.mubr.msk.f32.mxu1 %vm374_vm0, %v17680_v60  ;;  %v158_v61 = vmul.f32 3.0, %v84_v37  ;;  %v222_v60 = vmul.f32 10.0, %v86_v59 }
  0x56   :  { %21552 = vst [vmem:[#allocation15_spill] sm:$0xff] %v17720_v2  ;;  %v285_v21 = vadd.f32 %v221_v49, %v157_v42  ;;  %v90_v49 = vld [vmem:[%s21300_s0 + $0x180] sm:$0xff] }
  0x57   :  { %v17728_v5 = vadd.f32 %v282_v55, %v158_v61  ;;  %v89_v55 = vld [vmem:[%s21300_s0 + $0x178] sm:$0xff] }
  0x58   :  { %15870 = vmatmul.mubr.msk.f32.gmra.mrb[40].mxu0 %vm374_vm0, %v83_v27  ;;  %15961 = vmatmul.mubr.msk.f32.gmra.mrb[40].mxu1 %vm374_vm0, %v17688_v10  ;;  %v159_v27 = vmul.f32 3.0, %v85_v46  ;;  %v160_v10 = vmul.f32 3.0, %v86_v59 }
  0x59   :  { %15872 = vmatprep.mubr.msk.f32.mxu0 %vm374_vm0, %v84_v37  ;;  %15963 = vmatprep.mubr.msk.f32.mxu1 %vm374_vm0, %v17696_v13  ;;  %v284_v37 = vadd.f32 %v220_v44, %v156_v30  ;;  %21553 = vst [vmem:[#allocation16_spill] sm:$0xff] %v17728_v5  ;;  %v223_v44 = vmul.f32 10.0, %v87_v17  ;;  %v224_v13 = vmul.f32 10.0, %v88_v29 }
  0x5a   :  { %v17736_v30 = vadd.f32 %v283_v1, %v159_v27 }
  0x5b   :  { %v17744_v42 = vadd.f32 %v284_v37, %v160_v10  ;;  %v287_v1 = vadd.f32 %v223_v44, %v159_v27  ;;  %v91_v37 = vld [vmem:[%s21300_s0 + $0x188] sm:$0xff]  ;;  %v92_v44 = vld [vmem:[%s21300_s0 + $0x190] sm:$0xff] }
  0x5c   :  { %15873 = vmatmul.mubr.msk.f32.gmra.mrb[42].mxu0 %vm374_vm0, %v85_v46  ;;  %15964 = vmatmul.mubr.msk.f32.gmra.mrb[42].mxu1 %vm374_vm0, %v17704_v51  ;;  %v161_v46 = vmul.f32 3.0, %v87_v17  ;;  %21554 = vst [vmem:[#allocation17_spill] sm:$0xff] %v17736_v30  ;;  %v162_v51 = vmul.f32 3.0, %v88_v29 }
  0x5d   :  { %15875 = vmatprep.mubr.msk.f32.mxu0 %vm374_vm0, %v86_v59  ;;  %15966 = vmatprep.mubr.msk.f32.mxu1 %vm374_vm0, %v17712_v39  ;;  %v286_v59 = vadd.f32 %v222_v60, %v158_v61  ;;  %21555 = vst [vmem:[#allocation18_spill] sm:$0xff] %v17744_v42  ;;  %v225_v60 = vmul.f32 10.0, %v89_v55  ;;  %v226_v39 = vmul.f32 10.0, %v90_v49 }
  0x5e   :  { %v17752_v61 = vadd.f32 %v285_v21, %v161_v46  ;;  %v227_v21 = vmul.f32 10.0, %v91_v37 }
  0x5f   :  { %v17760_v27 = vadd.f32 %v286_v59, %v162_v51  ;;  %v228_v59 = vmul.f32 10.0, %v92_v44 }
  0x60   :  { %15876 = vmatmul.mubr.msk.f32.gmra.mrb[44].mxu0 %vm374_vm0, %v87_v17  ;;  %15967 = vmatmul.mubr.msk.f32.gmra.mrb[44].mxu1 %vm374_vm0, %v17720_v2  ;;  %v163_v17 = vmul.f32 3.0, %v89_v55  ;;  %21556 = vst [vmem:[#allocation19_spill] sm:$0xff] %v17752_v61  ;;  %v164_v2 = vmul.f32 3.0, %v90_v49 }
  0x61   :  { %15878 = vmatprep.mubr.msk.f32.mxu0 %vm374_vm0, %v88_v29  ;;  %15969 = vmatprep.mubr.msk.f32.mxu1 %vm374_vm0, %v17728_v5  ;;  %v288_v29 = vadd.f32 %v224_v13, %v160_v10  ;;  %21557 = vst [vmem:[#allocation20_spill] sm:$0xff] %v17760_v27  ;;  %v236_v10 = vmul.f32 10.0, %v17332_v4  ;;  %v289_v13 = vadd.f32 %v225_v60, %v161_v46  ;;  %v93_v5 = vld [vmem:[%s21300_s0 + $0x198] sm:$0xff]  ;;  %v237_v46 = vmul.f32 10.0, %v17340_v6 }
  0x62   :  { %v291_v60 = vadd.f32 %v227_v21, %v163_v17  ;;  %v292_v23 = vadd.f32 %v228_v59, %v164_v2 }
  0x63   :  { %v17777_v4 = vadd.f32 %v288_v29, %v164_v2  ;;  %v99_v29 = vld [vmem:[%s21300_s0 + $0x1c8] sm:$0xff] }
  0x64   :  { %15879 = vmatmul.mubr.msk.f32.gmra.mrb[46].mxu0 %vm374_vm0, %v89_v55  ;;  %15970 = vmatmul.mubr.msk.f32.gmra.mrb[46].mxu1 %vm374_vm0, %v17736_v30  ;;  %v165_v55 = vmul.f32 3.0, %v91_v37  ;;  %v290_v30 = vadd.f32 %v226_v39, %v162_v51  ;;  %v98_v51 = vld [vmem:[%s21300_s0 + $0x1c0] sm:$0xff]  ;;  %v17787_v39 = vmul.f32 3.0, %v17350_v8 }
  0x65   :  { %15881 = vmatprep.mubr.msk.f32.mxu0 %vm374_vm0, %v90_v49  ;;  %15972 = vmatprep.mubr.msk.f32.mxu1 %vm374_vm0, %v17744_v42  ;;  %v17769_v49 = vadd.f32 %v287_v1, %v163_v17  ;;  %v166_v42 = vmul.f32 3.0, %v92_v44  ;;  %21559 = vst [vmem:[#allocation22_spill] sm:$0xff] %v17777_v4  ;;  %v94_v1 = vld [vmem:[%s21300_s0 + $0x1a0] sm:$0xff]  ;;  %v95_v17 = vld [vmem:[%s21300_s0 + $0x1a8] sm:$0xff] }
  0x66   :  { %v168_v6 = vmul.f32 3.0, %v94_v1  ;;  %v17795_v36 = vadd.f32 %v289_v13, %v165_v55  ;;  %v230_v8 = vmul.f32 10.0, %v94_v1  ;;  %v96_v13 = vld [vmem:[%s21300_s0 + $0x1b0] sm:$0xff]  ;;  %v169_v59 = vmul.f32 3.0, %v95_v17 }
  0x67   :  { %21558 = vst [vmem:[#allocation21_spill] sm:$0xff] %v17769_v49  ;;  %v170_v52 = vmul.f32 3.0, %v96_v13 }
  0x68   :  { %15882 = vmatmul.mubr.msk.f32.gmra.mrb[48].mxu0 %vm374_vm0, %v91_v37  ;;  %15973 = vmatmul.mubr.msk.f32.gmra.mrb[48].mxu1 %vm374_vm0, %v17752_v61  ;;  %v167_v37 = vmul.f32 3.0, %v93_v5  ;;  %v173_v61 = vmul.f32 3.0, %v99_v29 }
  0x69   :  { %15884 = vmatprep.mubr.msk.f32.mxu0 %vm374_vm0, %v92_v44  ;;  %15975 = vmatprep.mubr.msk.f32.mxu1 %vm374_vm0, %v17760_v27  ;;  %v172_v44 = vmul.f32 3.0, %v98_v51  ;;  %v229_v27 = vmul.f32 10.0, %v93_v5 }
  0x6a   :  { %v301_v2 = vadd.f32 %v237_v46, %v173_v61 }
  0x6b   :  { %v300_v21 = vadd.f32 %v236_v10, %v172_v44  ;;  %v17812_v10 = vadd.f32 %v291_v60, %v167_v37 }
  0x6c   :  { %15885 = vmatmul.mubr.msk.f32.gmra.mrb[50].mxu0 %vm374_vm0, %v93_v5  ;;  %15976 = vmatmul.mubr.msk.f32.gmra.mrb[50].mxu1 %vm374_vm0, %v17769_v49  ;;  %v17803_v5 = vadd.f32 %v290_v30, %v166_v42  ;;  %v293_v49 = vadd.f32 %v229_v27, %v165_v55  ;;  %v294_v30 = vadd.f32 %v230_v8, %v166_v42  ;;  %v233_v42 = vmul.f32 10.0, %v97_v11 }
  0x6d   :  { %15887 = vmatprep.mubr.msk.f32.mxu0 %vm374_vm0, %v94_v1  ;;  %15978 = vmatprep.mubr.msk.f32.mxu1 %vm374_vm0, %v17777_v4  ;;  %v231_v1 = vmul.f32 10.0, %v95_v17  ;;  %v232_v4 = vmul.f32 10.0, %v96_v13  ;;  %v17820_v27 = vadd.f32 %v292_v23, %v168_v6  ;;  %v17823_v55 = vadd.f32 %v300_v21, %v17787_v39 }
  0x6e   :  { %21560 = vst [vmem:[#allocation23_spill] sm:$0xff] %v17803_v5  ;;  %v17825_v46 = vadd.f32 %v301_v2, %v177_v63  ;;  %v17830_v8 = vadd.f32 %v293_v49, %v169_v59  ;;  %v234_v23 = vmul.f32 10.0, %v98_v51  ;;  %v17836_v21 = vadd.f32 %v294_v30, %v170_v52 }
  0x6f   :  { %v295_v60 = vadd.f32 %v231_v1, %v167_v37  ;;  %v309_v37 = vmul.f32 3.0, %v17406_v28  ;;  %v297_v2 = vadd.f32 %v233_v42, %v169_v59  ;;  %v235_v1 = vmul.f32 10.0, %v99_v29 }
  0x70   :  { %15888 = vmatmul.mubr.msk.f32.gmra.mrb[52].mxu0 %vm374_vm0, %v95_v17  ;;  %15979 = vmatmul.mubr.msk.f32.gmra.mrb[52].mxu1 %vm374_vm0, %v17795_v36  ;;  %v171_v17 = vmul.f32 3.0, %v97_v11 }
  0x71   :  { %15890 = vmatprep.mubr.msk.f32.mxu0 %vm374_vm0, %v96_v13  ;;  %15981 = vmatprep.mubr.msk.f32.mxu1 %vm374_vm0, %v17803_v5  ;;  %v308_v13 = vmul.f32 3.0, %v17383_v19  ;;  %v296_v5 = vadd.f32 %v232_v4, %v168_v6  ;;  %v298_v4 = vadd.f32 %v234_v23, %v170_v52  ;;  %v17854_v59 = vadd.f32 %v309_v37, %v17392_v22 }
  0x72   :  { %v17842_v49 = vadd.f32 %v295_v60, %v171_v17  ;;  %v17860_v52 = vadd.f32 %v297_v2, %v173_v61  ;;  %v241_v22 = vmul.f32 10.0, %v17406_v28  ;;  %v21562_v28 = vld [vmem:[#allocation6_spill] sm:$0xff] }
  0x73   :  { %v17851_v6 = vadd.f32 %v308_v13, %v17378_v18  ;;  %v17868_v18 = vadd.f32 %v298_v4, %v17354_v9 }
  0x74   :  { %15891 = vmatmul.mubr.msk.f32.gmra.mrb[54].mxu0 %vm374_vm0, %v97_v11  ;;  %15982 = vmatmul.mubr.msk.f32.gmra.mrb[54].mxu1 %vm374_vm0, %v17812_v10 }
  0x75   :  { %15893 = vmatprep.mubr.msk.f32.mxu0 %vm374_vm0, %v98_v51  ;;  %15984 = vmatprep.mubr.msk.f32.mxu1 %vm374_vm0, %v17820_v27  ;;  %v17848_v51 = vadd.f32 %v296_v5, %v172_v44 }
  0x78   :  { %15894 = vmatmul.mubr.msk.f32.gmra.mrb[56].mxu0 %vm374_vm0, %v99_v29  ;;  %15985 = vmatmul.mubr.msk.f32.gmra.mrb[56].mxu1 %vm374_vm0, %v17830_v8  ;;  %v299_v29 = vadd.f32 %v235_v1, %v171_v17 }
  0x79   :  { %16009 = vmatprep.mubr.msk.f32.mxu0 %vm374_vm0, %v17411_v33  ;;  %15987 = vmatprep.mubr.msk.f32.mxu1 %vm374_vm0, %v17836_v21  ;;  %v240_v33 = vmul.f32 10.0, %v17383_v19  ;;  %v17885_v19 = vadd.f32 %v241_v22, %v177_v63 }
  0x7b   :  { %v17883_v9 = vadd.f32 %v240_v33, %v17787_v39 }
  0x7c   :  { %16010 = vmatmul.mubr.msk.f32.vlgmr.msra.gmra.mrb[58].mxu0 %vm374_vm0, %v17413_v35  ;;  %15988 = vmatmul.mubr.msk.f32.gmra.mrb[58].mxu1 %vm374_vm0, %v17842_v49  ;;  %v17876_v35 = vadd.f32 %v299_v29, %v17372_v14  ;;  %v21561_v14 = vld [vmem:[#allocation5_spill] sm:$0xff] }
  0x7d   :  { %16012 = vmatprep.mubr.msk.f32.mxu0 %vm374_vm0, %v17434_v50  ;;  %15990 = vmatprep.mubr.msk.f32.mxu1 %vm374_vm0, %v17848_v51  ;;  %v21563_v50 = vld [vmem:[#allocation7_spill] sm:$0xff] }
  0x80   :  { %16013 = vmatmul.mubr.msk.f32.gmra.mrb[60].mxu0 %vm374_vm0, %v17439_v53  ;;  %15991 = vmatmul.mubr.msk.f32.gmra.mrb[60].mxu1 %vm374_vm0, %v17860_v52  ;;  %v21564_v53 = vld [vmem:[#allocation8_spill] sm:$0xff] }
  0x81   :  { %16015 = vmatprep.mubr.msk.f32.mxu0 %vm374_vm0, %v17443_v54  ;;  %15993 = vmatprep.mubr.msk.f32.mxu1 %vm374_vm0, %v17868_v18  ;;  %v21565_v54 = vld [vmem:[#allocation9_spill] sm:$0xff] }
  0x84   :  { %16016 = vmatmul.mubr.msk.f32.gmra.mrb[62].mxu0 %vm374_vm0, %v17448_v58  ;;  %15994 = vmatmul.mubr.msk.f32.gmra.mrb[62].mxu1 %vm374_vm0, %v17876_v35  ;;  %v21566_v58 = vld [vmem:[#allocation10_spill] sm:$0xff] }
  0x85   :  { %16018 = vmatprep.mubr.msk.f32.mxu0 %vm374_vm0, %v17462_v7  ;;  %15996 = vmatprep.mubr.msk.f32.mxu1 %vm374_vm0, %v17823_v55  ;;  %v21567_v7 = vld [vmem:[#allocation11_spill] sm:$0xff] }
  0x88   :  { %16019 = vmatmul.mubr.msk.f32.gmra.mrb[64].mxu0 %vm374_vm0, %v17468_v16  ;;  %15997 = vmatmul.mubr.msk.f32.gmra.mrb[64].mxu1 %vm374_vm0, %v17825_v46  ;;  %v21568_v16 = vld [vmem:[#allocation12_spill] sm:$0xff] }
  0x89   :  { %16021 = vmatprep.mubr.msk.f32.mxu0 %vm374_vm0, %v17475_v20  ;;  %15999 = vmatprep.mubr.msk.f32.mxu1 %vm374_vm0, %v17851_v6  ;;  %v21569_v20 = vld [vmem:[#allocation13_spill] sm:$0xff] }
  0x8c   :  { %16022 = vmatmul.mubr.msk.f32.gmra.mrb[66].mxu0 %vm374_vm0, %v17480_v25  ;;  %16000 = vmatmul.mubr.msk.f32.gmra.mrb[66].mxu1 %vm374_vm0, %v17854_v59  ;;  %v21570_v25 = vld [vmem:[#allocation14_spill] sm:$0xff] }
  0x8d   :  { %16024 = vmatprep.mubr.msk.f32.mxu0 %vm374_vm0, %v17488_v31  ;;  %16002 = vmatprep.mubr.msk.f32.mxu1 %vm374_vm0, %v17883_v9  ;;  %v21571_v31 = vld [vmem:[#allocation15_spill] sm:$0xff] }
  0x90   :  { %16025 = vmatmul.mubr.msk.f32.gmra.mrb[68].mxu0 %vm374_vm0, %v17496_v38  ;;  %16003 = vmatmul.mubr.msk.f32.gmra.mrb[68].mxu1 %vm374_vm0, %v17885_v19  ;;  %v21572_v38 = vld [vmem:[#allocation16_spill] sm:$0xff] }
  0x91   :  { %16027 = vmatprep.mubr.msk.f32.mxu0 %vm374_vm0, %v17504_v43  ;;  %v21573_v43 = vld [vmem:[#allocation17_spill] sm:$0xff] }
  0x94   :  { %16028 = vmatmul.mubr.msk.f32.gmra.mrb[70].mxu0 %vm374_vm0, %v17512_v48  ;;  %v21574_v48 = vld [vmem:[#allocation18_spill] sm:$0xff] }
  0x95   :  { %16030 = vmatprep.mubr.msk.f32.mxu0 %vm374_vm0, %v17520_v56  ;;  %v21575_v56 = vld [vmem:[#allocation19_spill] sm:$0xff] }
  0x98   :  { %16031 = vmatmul.mubr.msk.f32.gmra.mrb[72].mxu0 %vm374_vm0, %v17528_v62  ;;  %v21576_v62 = vld [vmem:[#allocation20_spill] sm:$0xff] }
  0x99   :  { %16033 = vmatprep.mubr.msk.f32.mxu0 %vm374_vm0, %v17536_v3  ;;  %v21577_v3 = vld [vmem:[#allocation21_spill] sm:$0xff] }
  0x9c   :  { %16034 = vmatmul.mubr.msk.f32.gmra.mrb[74].mxu0 %vm374_vm0, %v17544_v15  ;;  %v21578_v15 = vld [vmem:[#allocation22_spill] sm:$0xff] }
  0x9d   :  { %16036 = vmatprep.mubr.msk.f32.mxu0 %vm374_vm0, %v17552_v26  ;;  %v21579_v26 = vld [vmem:[#allocation23_spill] sm:$0xff] }
  0xa0   :  { %16037 = vmatmul.mubr.msk.f32.gmra.mrb[76].mxu0 %vm374_vm0, %v17560_v34 }
  0xa1   :  { %16039 = vmatprep.mubr.msk.f32.mxu0 %vm374_vm0, %v17568_v41 }
  0xa4   :  { %16040 = vmatmul.mubr.msk.f32.gmra.mrb[78].mxu0 %vm374_vm0, %v17576_v47 }
  0xa5   :  { %16042 = vmatprep.mubr.msk.f32.mxu0 %vm374_vm0, %v17584_v57 }
  0xa8   :  { %16043 = vmatmul.mubr.msk.f32.gmra.mrb[80].mxu0 %vm374_vm0, %v17592_v0 }
  0xa9   :  { %16045 = vmatprep.mubr.msk.f32.mxu0 %vm374_vm0, %v17600_v12 }
  0xac   :  { %16046 = vmatmul.mubr.msk.f32.gmra.mrb[82].mxu0 %vm374_vm0, %v17608_v24 }
  0xad   :  { %16048 = vmatprep.mubr.msk.f32.mxu0 %vm374_vm0, %v17616_v32 }
  0xb0   :  { %16049 = vmatmul.mubr.msk.f32.gmra.mrb[84].mxu0 %vm374_vm0, %v17624_v40 }
  0xb1   :  { %16051 = vmatprep.mubr.msk.f32.mxu0 %vm374_vm0, %v17632_v45 }
  0xb4   :  { %16052 = vmatmul.mubr.msk.f32.gmra.mrb[86].mxu0 %vm374_vm0, %v21561_v14 }
  0xb5   :  { %16054 = vmatprep.mubr.msk.f32.mxu0 %vm374_vm0, %v21562_v28 }
  0xb8   :  { %16055 = vmatmul.mubr.msk.f32.gmra.mrb[88].mxu0 %vm374_vm0, %v21563_v50 }
  0xb9   :  { %16057 = vmatprep.mubr.msk.f32.mxu0 %vm374_vm0, %v21564_v53 }
  0xbc   :  { %16058 = vmatmul.mubr.msk.f32.gmra.mrb[90].mxu0 %vm374_vm0, %v21565_v54 }
  0xbd   :  { %16060 = vmatprep.mubr.msk.f32.mxu0 %vm374_vm0, %v21566_v58 }
  0xc0   :  { %16061 = vmatmul.mubr.msk.f32.gmra.mrb[92].mxu0 %vm374_vm0, %v21567_v7 }
  0xc1   :  { %16063 = vmatprep.mubr.msk.f32.mxu0 %vm374_vm0, %v21568_v16 }
  0xc4   :  { %16064 = vmatmul.mubr.msk.f32.gmra.mrb[94].mxu0 %vm374_vm0, %v21569_v20 }
  0xc5   :  { %16066 = vmatprep.mubr.msk.f32.mxu0 %vm374_vm0, %v21570_v25 }
  0xc8   :  { %16067 = vmatmul.mubr.msk.f32.gmra.mrb[96].mxu0 %vm374_vm0, %v21571_v31 }
  0xc9   :  { %16069 = vmatprep.mubr.msk.f32.mxu0 %vm374_vm0, %v21572_v38 }
  0xcc   :  { %16070 = vmatmul.mubr.msk.f32.gmra.mrb[98].mxu0 %vm374_vm0, %v21573_v43 }
  0xcd   :  { %16072 = vmatprep.mubr.msk.f32.mxu0 %vm374_vm0, %v21574_v48 }
  0xd0   :  { %16073 = vmatmul.mubr.msk.f32.gmra.mrb[100].mxu0 %vm374_vm0, %v21575_v56 }
  0xd1   :  { %16075 = vmatprep.mubr.msk.f32.mxu0 %vm374_vm0, %v21576_v62 }
  0xd4   :  { %16076 = vmatmul.mubr.msk.f32.gmra.mrb[102].mxu0 %vm374_vm0, %v21577_v3 }
  0xd5   :  { %16078 = vmatprep.mubr.msk.f32.mxu0 %vm374_vm0, %v21578_v15 }
  0xd8   :  { %16079 = vmatmul.mubr.msk.f32.gmra.mrb[104].mxu0 %vm374_vm0, %v17795_v36 }
  0xd9   :  { %16081 = vmatprep.mubr.msk.f32.mxu0 %vm374_vm0, %v21579_v26 }
  0xdb   :  { %v15811_v34 = vpop.f32.mrb[0].mxu0  ;;  %v17989_v41 = vpop.f32.mrb[0].mxu1 }
  0xdc   :  { %21580 = vst [vmem:[#allocation5_spill] sm:$0xff] %v17989_v41  ;;  %v633_v47 = vpop.f32.mrb[1].mxu0  ;;  %v17991_v57 = vpop.f32.mrb[1].mxu1  ;;  %16082 = vmatmul.mubr.msk.f32.gmra.mrb[106].mxu0 %vm374_vm0, %v17812_v10 }
  0xdd   :  { %21581 = vst [vmem:[#allocation6_spill] sm:$0xff] %v17991_v57  ;;  %16084 = vmatprep.mubr.msk.f32.mxu0 %vm374_vm0, %v17820_v27  ;;  %v112_v57 = vld [vmem:[%s21304_s4] sm:$0xff] }
  0xdf   :  { %v17997_v0 = vpop.f32.mrb[2].mxu0  ;;  %v17999_v12 = vpop.f32.mrb[2].mxu1 }
  0xe0   :  { %21582 = vst [vmem:[#allocation7_spill] sm:$0xff] %v17999_v12  ;;  %v643_v24 = vpop.f32.mrb[3].mxu0  ;;  %v18001_v32 = vpop.f32.mrb[3].mxu1  ;;  %16085 = vmatmul.mubr.msk.f32.gmra.mrb[108].mxu0 %vm374_vm0, %v17830_v8 }
  0xe1   :  { %21583 = vst [vmem:[#allocation8_spill] sm:$0xff] %v18001_v32  ;;  %5176 = vxpose.xlu0.b32.start [1/2] (short) (narrow) %v643_v24, 16  ;;  %16087 = vmatprep.mubr.msk.f32.mxu0 %vm374_vm0, %v17836_v21 }
  0xe3   :  { %v18007_v40 = vpop.f32.mrb[4].mxu0  ;;  %v18009_v45 = vpop.f32.mrb[4].mxu1 }
  0xe4   :  { %21584 = vst [vmem:[#allocation9_spill] sm:$0xff] %v18009_v45  ;;  %v18011_v63 = vpop.f32.mrb[5].mxu0  ;;  %v1915_v61 = vsub.f32 %v18007_v40, %v15811_v34  ;;  %v18016_v39 = vpop.f32.mrb[5].mxu1  ;;  %16088 = vmatmul.mubr.msk.f32.gmra.mrb[110].mxu0 %vm374_vm0, %v17842_v49 }
  0xe5   :  { %21585 = vst [vmem:[#allocation10_spill] sm:$0xff] %v18016_v39  ;;  %5177 = vxpose.xlu0.b32.end [2/2] (short) (narrow) %v17997_v0, 16  ;;  %v1914_v44 = vsub.f32 %v18011_v63, %v633_v47  ;;  %16090 = vmatprep.mubr.msk.f32.mxu0 %vm374_vm0, %v17848_v51 }
  0xe7   :  { %v18026_v10 = vpop.f32.mrb[6].mxu0  ;;  %v15911_v30 = vpop.f32.mrb[6].mxu1 }
  0xe8   :  { %v18028_v11 = vpop.f32.mrb[7].mxu0  ;;  %v1210_v27 = vpop.f32.mrb[7].mxu1  ;;  %v1917_v60 = vsub.f32 %v18026_v10, %v17997_v0  ;;  %16091 = vmatmul.mubr.msk.f32.gmra.mrb[112].mxu0 %vm374_vm0, %v17860_v52 }
  0xe9   :  { %5208 = vxpose.xlu0.b32.start [1/2] (short) (narrow) %v1914_v44, 16  ;;  %v1916_v17 = vsub.f32 %v18028_v11, %v643_v24  ;;  %16093 = vmatprep.mubr.msk.f32.mxu0 %vm374_vm0, %v17868_v18 }
  0xeb   :  { %v18037_v42 = vpop.f32.mrb[8].mxu0  ;;  %v15914_v8 = vpop.f32.mrb[8].mxu1 }
  0xec   :  { %v18039_v13 = vpop.f32.mrb[9].mxu0  ;;  %v1919_v23 = vsub.f32 %v18037_v42, %v18007_v40  ;;  %v1220_v21 = vpop.f32.mrb[9].mxu1  ;;  %16094 = vmatmul.mubr.msk.f32.gmra.mrb[114].mxu0 %vm374_vm0, %v17876_v35 }
  0xed   :  { %5209 = vxpose.xlu0.b32.end [2/2] (short) (narrow) %v1915_v61, 16  ;;  %v1918_v37 = vsub.f32 %v18039_v13, %v18011_v63  ;;  %2006 = vxpose.xlu1.b32.start [1/2] (short) (narrow) %v1220_v21, 16 }
  0xee   :  { %16096 = vmatprep.mubr.msk.f32.mxu0 %vm374_vm0, %v17823_v55 }
  0xef   :  { %v18049_v2 = vpop.f32.mrb[10].mxu0  ;;  %v18051_v1 = vpop.f32.mrb[10].mxu1 }
  0xf0   :  { %v18053_v49 = vpop.f32.mrb[11].mxu0  ;;  %v1230_v4 = vpop.f32.mrb[11].mxu1  ;;  %v1921_v51 = vsub.f32 %v18049_v2, %v18026_v10  ;;  %16097 = vmatmul.mubr.msk.f32.gmra.mrb[116].mxu0 %vm374_vm0, %v17825_v46 }
  0xf1   :  { %1974 = vxpose.xlu0.b32.start [1/2] (short) (narrow) %v1210_v27, 16  ;;  %v1920_v29 = vsub.f32 %v18053_v49, %v18028_v11  ;;  %2007 = vxpose.xlu1.b32.end [2/2] (short) (narrow) %v15914_v8, 16 }
  0xf2   :  { %16099 = vmatprep.mubr.msk.f32.mxu0 %vm374_vm0, %v17851_v6 }
  0xf3   :  { %v18063_v55 = vpop.f32.mrb[12].mxu0  ;;  %v15920_v52 = vpop.f32.mrb[12].mxu1 }
  0xf4   :  { %v18065_v33 = vpop.f32.mrb[13].mxu0  ;;  %v1240_v18 = vpop.f32.mrb[13].mxu1  ;;  %16100 = vmatmul.mubr.msk.f32.gmra.mrb[118].mxu0 %vm374_vm0, %v17854_v59 }
  0xf5   :  { %1975 = vxpose.xlu0.b32.end [2/2] (short) (narrow) %v15911_v30, 16  ;;  %2070 = vxpose.xlu1.b32.start [1/2] (short) (narrow) %v1240_v18, 16 }
  0xf6   :  { %16102 = vmatprep.mubr.msk.f32.mxu0 %vm374_vm0, %v17883_v9 }
  0xf7   :  { %v18075_v6 = vpop.f32.mrb[14].mxu0  ;;  %v18077_v35 = vpop.f32.mrb[14].mxu1 }
  0xf8   :  { %v18079_v14 = vpop.f32.mrb[15].mxu0  ;;  %v18081_v28 = vpop.f32.mrb[15].mxu1  ;;  %16103 = vmatmul.mubr.msk.f32.gmra.mrb[120].mxu0 %vm374_vm0, %v17885_v19 }
  0xf9   :  { %5240 = vxpose.xlu0.b32.start [1/2] (short) (narrow) %v1916_v17, 16  ;;  %2071 = vxpose.xlu1.b32.end [2/2] (short) (narrow) %v15920_v52, 16 }
  0xfb   :  { %v18089_v9 = vpop.f32.mrb[16].mxu0  ;;  %v15926_v53 = vpop.f32.mrb[16].mxu1 }
  0xfc   :  { %v18091_v54 = vpop.f32.mrb[17].mxu0  ;;  %v1260_v58 = vpop.f32.mrb[17].mxu1 }
  0xfd   :  { %5241 = vxpose.xlu0.b32.end [2/2] (short) (narrow) %v1917_v60, 16  ;;  %2134 = vxpose.xlu1.b32.start [1/2] (short) (narrow) %v1260_v58, 16 }
  0xff   :  { %v18097_v16 = vpop.f32.mrb[18].mxu0  ;;  %v18099_v20 = vpop.f32.mrb[18].mxu1 }
 0x100   :  { %v18101_v25 = vpop.f32.mrb[19].mxu0  ;;  %v1270_v31 = vpop.f32.mrb[19].mxu1 }
 0x101   :  { %5272 = vxpose.xlu0.b32.start [1/2] (short) (narrow) %v1918_v37, 16  ;;  %2135 = vxpose.xlu1.b32.end [2/2] (short) (narrow) %v15926_v53, 16 }
 0x103   :  { %v18107_v48 = vpop.f32.mrb[20].mxu0  ;;  %v15932_v56 = vpop.f32.mrb[20].mxu1 }
 0x104   :  { %v18109_v62 = vpop.f32.mrb[21].mxu0  ;;  %v1280_v3 = vpop.f32.mrb[21].mxu1 }
 0x105   :  { %5273 = vxpose.xlu0.b32.end [2/2] (short) (narrow) %v1919_v23, 16  ;;  %2198 = vxpose.xlu1.b32.start [1/2] (short) (narrow) %v1280_v3, 16 }
 0x107   :  { %v18115_v34 = vpop.f32.mrb[22].mxu0  ;;  %v18117_v47 = vpop.f32.mrb[22].mxu1 }
 0x108   :  { %v18119_v0 = vpop.f32.mrb[23].mxu0  ;;  %v18121_v24 = vpop.f32.mrb[23].mxu1 }
 0x109   :  { %2038 = vxpose.xlu0.b32.start [1/2] (short) (narrow) %v1230_v4, 16  ;;  %2199 = vxpose.xlu1.b32.end [2/2] (short) (narrow) %v15932_v56, 16  ;;  %v111_v56 = vld [vmem:[%s21303_s3 + $0x8] sm:$0xff] }
 0x10b   :  { %v18127_v61 = vpop.f32.mrb[24].mxu0  ;;  %v15938_v44 = vpop.f32.mrb[24].mxu1 }
 0x10c   :  { %21586 = vst [vmem:[#allocation11_spill] sm:$0xff] %v18127_v61  ;;  %v18129_v30 = vpop.f32.mrb[25].mxu0  ;;  %v1300_v27 = vpop.f32.mrb[25].mxu1 }
 0x10d   :  { %21587 = vst [vmem:[#allocation12_spill] sm:$0xff] %v18129_v30  ;;  %2039 = vxpose.xlu0.b32.end [2/2] (short) (narrow) %v18051_v1, 16  ;;  %2262 = vxpose.xlu1.b32.start [1/2] (short) (narrow) %v1300_v27, 16 }
 0x10f   :  { %v18136_v8 = vpop.f32.mrb[26].mxu0  ;;  %v18138_v23 = vpop.f32.mrb[26].mxu1 }
 0x110   :  { %21588 = vst [vmem:[#allocation13_spill] sm:$0xff] %v18136_v8  ;;  %v18140_v21 = vpop.f32.mrb[27].mxu0  ;;  %v1310_v37 = vpop.f32.mrb[27].mxu1 }
 0x111   :  { %21589 = vst [vmem:[#allocation14_spill] sm:$0xff] %v18140_v21  ;;  %5304 = vxpose.xlu0.b32.start [1/2] (short) (narrow) %v1920_v29, 16  ;;  %2263 = vxpose.xlu1.b32.end [2/2] (short) (narrow) %v15938_v44, 16 }
 0x113   :  { %v18149_v52 = vpop.f32.mrb[28].mxu0  ;;  %v18151_v18 = vpop.f32.mrb[28].mxu1 }
 0x114   :  { %21590 = vst [vmem:[#allocation15_spill] sm:$0xff] %v18149_v52  ;;  %v18153_v53 = vpop.f32.mrb[29].mxu0  ;;  %v18155_v58 = vpop.f32.mrb[29].mxu1 }
 0x115   :  { %21591 = vst [vmem:[#allocation16_spill] sm:$0xff] %v18153_v53  ;;  %5305 = vxpose.xlu0.b32.end [2/2] (short) (narrow) %v1921_v51, 16 }
 0x117   :  { %v18164_v29 = vpop.f32.mrb[30].mxu0  ;;  %v18166_v3 = vpop.f32.mrb[30].mxu1 }
 0x118   :  { %21592 = vst [vmem:[#allocation17_spill] sm:$0xff] %v18164_v29  ;;  %v18170_v27 = vpop.f32.mrb[31].mxu0  ;;  %v18172_v36 = vpop.f32.mrb[31].mxu1 }
 0x119   :  { %21593 = vst [vmem:[#allocation18_spill] sm:$0xff] %v18170_v27  ;;  %2102 = vxpose.xlu0.b32.start [1/2] (short) (narrow) %v18081_v28, 16  ;;  %v110_v28 = vld [vmem:[%s21303_s3] sm:$0xff] }
 0x11a   :  { %v18200_v1 = vpack.c.bf16 %v111_v56, %v110_v28 }
 0x11b   :  { %v18177_v10 = vpop.f32.mrb[32].mxu0  ;;  %v18179_v51 = vpop.f32.mrb[32].mxu1 }
 0x11c   :  { %21594 = vst [vmem:[#allocation19_spill] sm:$0xff] %v18177_v10  ;;  %v18181_v5 = vpop.f32.mrb[33].mxu0  ;;  %v18183_v11 = vpop.f32.mrb[33].mxu1  ;;  %17140 = vmatprep.subr.bf16.mxu1 %v18200_v1 }
 0x11d   :  { %21595 = vst [vmem:[#allocation20_spill] sm:$0xff] %v18181_v5  ;;  %2103 = vxpose.xlu0.b32.end [2/2] (short) (narrow) %v18077_v35, 16  ;;  %17142 = vmatpush3.bf16.msra.mxu1 %v18200_v1 }
 0x11e   :  { %17148 = vmatprep.subr.bf16.mxu1 %v18200_v1 }
 0x11f   :  { %v18186_v60 = vpop.f32.mrb[34].mxu0  ;;  %v18188_v17 = vpop.f32.mrb[34].mxu1 }
 0x120   :  { %21596 = vst [vmem:[#allocation21_spill] sm:$0xff] %v18186_v60  ;;  %v18190_v44 = vpop.f32.mrb[35].mxu0  ;;  %v18192_v4 = vpop.f32.mrb[35].mxu1 }
 0x121   :  { %21597 = vst [vmem:[#allocation22_spill] sm:$0xff] %v18190_v44  ;;  %2166 = vxpose.xlu0.b32.start [1/2] (short) (narrow) %v1270_v31, 16 }
 0x123   :  { %v18202_v35 = vpop.f32.mrb[36].mxu0  ;;  %v18204_v40 = vpop.f32.mrb[36].mxu1 }
 0x124   :  { %21598 = vst [vmem:[#allocation23_spill] sm:$0xff] %v18202_v35  ;;  %v18206_v63 = vpop.f32.mrb[37].mxu0  ;;  %v18208_v15 = vpop.f32.mrb[37].mxu1 }
 0x125   :  { %21599 = vst [vmem:[#allocation24_spill] sm:$0xff] %v18206_v63  ;;  %2167 = vxpose.xlu0.b32.end [2/2] (short) (narrow) %v18099_v20, 16 }
 0x127   :  { %v18218_v28 = vpop.f32.mrb[38].mxu0  ;;  %v18220_v26 = vpop.f32.mrb[38].mxu1 }
 0x128   :  { %21600 = vst [vmem:[#allocation25_spill] sm:$0xff] %v18218_v28  ;;  %v18222_v38 = vpop.f32.mrb[39].mxu0  ;;  %v18224_v43 = vpop.f32.mrb[39].mxu1  ;;  %v113_v28 = vld [vmem:[%s21304_s4 + $0x8] sm:$0xff] }
 0x129   :  { %21601 = vst [vmem:[#allocation26_spill] sm:$0xff] %v18222_v38  ;;  %2230 = vxpose.xlu0.b32.start [1/2] (short) (narrow) %v18121_v24, 16 }
 0x12b   :  { %v18231_v7 = vpop.f32.mrb[40].mxu0  ;;  %v18233_v56 = vpop.f32.mrb[40].mxu1 }
 0x12c   :  { %21602 = vst [vmem:[#allocation27_spill] sm:$0xff] %v18231_v7  ;;  %v18235_v19 = vpop.f32.mrb[41].mxu0  ;;  %v18237_v59 = vpop.f32.mrb[41].mxu1 }
 0x12d   :  { %21603 = vst [vmem:[#allocation28_spill] sm:$0xff] %v18235_v19  ;;  %2231 = vxpose.xlu0.b32.end [2/2] (short) (narrow) %v18117_v47, 16 }
 0x12f   :  { %v18244_v24 = vpop.f32.mrb[42].mxu0  ;;  %v18246_v46 = vpop.f32.mrb[42].mxu1 }
 0x130   :  { %21604 = vst [vmem:[#allocation29_spill] sm:$0xff] %v18244_v24  ;;  %v18248_v20 = vpop.f32.mrb[43].mxu0  ;;  %v18250_v22 = vpop.f32.mrb[43].mxu1 }
 0x131   :  { %21605 = vst [vmem:[#allocation30_spill] sm:$0xff] %v18248_v20  ;;  %2294 = vxpose.xlu0.b32.start [1/2] (short) (narrow) %v1310_v37, 16 }
 0x133   :  { %v18256_v35 = vpop.f32.mrb[44].mxu0  ;;  %v18258_v47 = vpop.f32.mrb[44].mxu1 }
 0x134   :  { %21606 = vst [vmem:[#allocation31_spill] sm:$0xff] %v18256_v35  ;;  %v18260_v31 = vpop.f32.mrb[45].mxu0  ;;  %v18262_v5 = vpop.f32.mrb[45].mxu1 }
 0x135   :  { %21607 = vst [vmem:[#allocation32_spill] sm:$0xff] %v18260_v31  ;;  %2295 = vxpose.xlu0.b32.end [2/2] (short) (narrow) %v18138_v23, 16 }
 0x137   :  { %v18269_v37 = vpop.f32.mrb[46].mxu0  ;;  %v18271_v45 = vpop.f32.mrb[46].mxu1 }
 0x138   :  { %21608 = vst [vmem:[#allocation33_spill] sm:$0xff] %v18269_v37  ;;  %v18273_v50 = vpop.f32.mrb[47].mxu0  ;;  %v18275_v52 = vpop.f32.mrb[47].mxu1 }
 0x139   :  { %21609 = vst [vmem:[#allocation34_spill] sm:$0xff] %v18273_v50  ;;  %2326 = vxpose.xlu0.b32.start [1/2] (short) (narrow) %v18155_v58, 16 }
 0x13b   :  { %v18282_v23 = vpop.f32.mrb[48].mxu0  ;;  %v18284_v7 = vpop.f32.mrb[48].mxu1 }
 0x13c   :  { %21610 = vst [vmem:[#allocation35_spill] sm:$0xff] %v18282_v23  ;;  %v18286_v10 = vpop.f32.mrb[49].mxu0  ;;  %v18288_v19 = vpop.f32.mrb[49].mxu1 }
 0x13d   :  { %21611 = vst [vmem:[#allocation36_spill] sm:$0xff] %v18286_v10  ;;  %2327 = vxpose.xlu0.b32.end [2/2] (short) (narrow) %v18151_v18, 16 }
 0x13f   :  { %v18295_v58 = vpop.f32.mrb[50].mxu0  ;;  %v18297_v61 = vpop.f32.mrb[50].mxu1 }
 0x140   :  { %21612 = vst [vmem:[#allocation37_spill] sm:$0xff] %v18295_v58  ;;  %v18299_v63 = vpop.f32.mrb[51].mxu0  ;;  %v18301_v30 = vpop.f32.mrb[51].mxu1 }
 0x141   :  { %21613 = vst [vmem:[#allocation38_spill] sm:$0xff] %v18299_v63  ;;  %2358 = vxpose.xlu0.b32.start [1/2] (short) (narrow) %v18172_v36, 16 }
 0x143   :  { %v18308_v18 = vpop.f32.mrb[52].mxu0  ;;  %v18310_v35 = vpop.f32.mrb[52].mxu1 }
 0x144   :  { %21614 = vst [vmem:[#allocation39_spill] sm:$0xff] %v18308_v18  ;;  %v18312_v39 = vpop.f32.mrb[53].mxu0  ;;  %v18314_v31 = vpop.f32.mrb[53].mxu1 }
 0x145   :  { %21615 = vst [vmem:[#allocation40_spill] sm:$0xff] %v18312_v39  ;;  %2359 = vxpose.xlu0.b32.end [2/2] (short) (narrow) %v18166_v3, 16 }
 0x147   :  { %v18321_v36 = vpop.f32.mrb[54].mxu0  ;;  %v18323_v37 = vpop.f32.mrb[54].mxu1 }
 0x148   :  { %21616 = vst [vmem:[#allocation41_spill] sm:$0xff] %v18321_v36  ;;  %v18325_v53 = vpop.f32.mrb[55].mxu0  ;;  %v18327_v50 = vpop.f32.mrb[55].mxu1 }
 0x149   :  { %21617 = vst [vmem:[#allocation42_spill] sm:$0xff] %v18325_v53  ;;  %2390 = vxpose.xlu0.b32.start [1/2] (short) (narrow) %v18183_v11, 16 }
 0x14b   :  { %v18338_v24 = vpop.f32.mrb[56].mxu0  ;;  %v18340_v23 = vpop.f32.mrb[56].mxu1 }
 0x14c   :  { %21618 = vst [vmem:[#allocation43_spill] sm:$0xff] %v18338_v24  ;;  %v18342_v10 = vpop.f32.mrb[57].mxu0  ;;  %v18344_v60 = vpop.f32.mrb[57].mxu1 }
 0x14d   :  { %21619 = vst [vmem:[#allocation44_spill] sm:$0xff] %v18342_v10  ;;  %2391 = vxpose.xlu0.b32.end [2/2] (short) (narrow) %v18179_v51, 16  ;;  %v17143_v51 = vpack.c.bf16 %v113_v28, %v112_v57 }
 0x14f   :  { %v16011_v3 = vpop.f32.mrb[58].mxu0  ;;  %v18355_v41 = vpop.f32.mrb[58].mxu1  ;;  %17144 = vmatprep.subr.bf16.mxu0 %v17143_v51 }
 0x150   :  { %v1595_v11 = vpop.f32.mrb[59].mxu0  ;;  %v18363_v12 = vpop.f32.mrb[59].mxu1  ;;  %17146 = vmatpush3.bf16.msra.mxu0 %v17143_v51 }
 0x151   :  { %3575 = vxpose.xlu1.b32.start [1/2] (short) (narrow) %v1595_v11, 16  ;;  %2422 = vxpose.xlu0.b32.start [1/2] (short) (narrow) %v18192_v4, 16 }
 0x153   :  { %v16014_v20 = vpop.f32.mrb[60].mxu0  ;;  %v18366_v38 = vpop.f32.mrb[60].mxu1 }
 0x154   :  { %v1605_v32 = vpop.f32.mrb[61].mxu0  ;;  %v18368_v24 = vpop.f32.mrb[61].mxu1 }
 0x155   :  { %3576 = vxpose.xlu1.b32.end [2/2] (short) (narrow) %v16011_v3, 16  ;;  %2423 = vxpose.xlu0.b32.end [2/2] (short) (narrow) %v18188_v17, 16 }
 0x157   :  { %v16017_v10 = vpop.f32.mrb[62].mxu0  ;;  %v18371_v18 = vpop.f32.mrb[62].mxu1 }
 0x158   :  { %v1615_v39 = vpop.f32.mrb[63].mxu0  ;;  %v18373_v36 = vpop.f32.mrb[63].mxu1 }
 0x159   :  { %3607 = vxpose.xlu1.b32.start [1/2] (short) (narrow) %v1605_v32, 16  ;;  %2454 = vxpose.xlu0.b32.start [1/2] (short) (narrow) %v18208_v15, 16 }
 0x15b   :  { %v16020_v57 = vpop.f32.mrb[64].mxu0  ;;  %v18376_v4 = vpop.f32.mrb[64].mxu1 }
 0x15c   :  { %v1625_v28 = vpop.f32.mrb[65].mxu0  ;;  %v18378_v11 = vpop.f32.mrb[65].mxu1 }
 0x15d   :  { %3608 = vxpose.xlu1.b32.end [2/2] (short) (narrow) %v16014_v20, 16  ;;  %2455 = vxpose.xlu0.b32.end [2/2] (short) (narrow) %v18204_v40, 16 }
 0x15f   :  { %v16023_v3 = vpop.f32.mrb[66].mxu0  ;;  %v18381_v17 = vpop.f32.mrb[66].mxu1 }
 0x160   :  { %v1635_v51 = vpop.f32.mrb[67].mxu0  ;;  %v18383_v53 = vpop.f32.mrb[67].mxu1 }
 0x161   :  { %v18385_v58 = vpop.trf.xlu0  ;;  %3639 = vxpose.xlu1.b32.start [1/2] (short) (narrow) %v1615_v39, 16  ;;  %2486 = vxpose.xlu0.b32.start [1/2] (short) (narrow) %v18224_v43, 16 }
 0x162   :  { %21620 = vst [vmem:[#allocation45_spill] sm:$0xff] %v18385_v58 }
 0x163   :  { %v16026_v32 = vpop.f32.mrb[68].mxu0  ;;  %v18388_v15 = vpop.f32.mrb[68].mxu1 }
 0x164   :  { %v1645_v63 = vpop.f32.mrb[69].mxu0  ;;  %v18390_v44 = vpop.f32.mrb[69].mxu1 }
 0x165   :  { %v18392_v20 = vpop.trf.xlu0  ;;  %3640 = vxpose.xlu1.b32.end [2/2] (short) (narrow) %v16017_v10, 16  ;;  %2487 = vxpose.xlu0.b32.end [2/2] (short) (narrow) %v18220_v26, 16 }
 0x166   :  { %21621 = vst [vmem:[#allocation46_spill] sm:$0xff] %v18392_v20 }
 0x167   :  { %v16029_v40 = vpop.f32.mrb[70].mxu0 }
 0x168   :  { %v1655_v29 = vpop.f32.mrb[71].mxu0 }
 0x169   :  { %v18395_v27 = vpop.trf.xlu0  ;;  %3671 = vxpose.xlu1.b32.start [1/2] (short) (narrow) %v1625_v28, 16  ;;  %2518 = vxpose.xlu0.b32.start [1/2] (short) (narrow) %v18237_v59, 16 }
 0x16b   :  { %v16032_v39 = vpop.f32.mrb[72].mxu0 }
 0x16c   :  { %v1665_v43 = vpop.f32.mrb[73].mxu0 }
 0x16d   :  { %v18398_v58 = vpop.trf.xlu0  ;;  %3672 = vxpose.xlu1.b32.end [2/2] (short) (narrow) %v16020_v57, 16  ;;  %2519 = vxpose.xlu0.b32.end [2/2] (short) (narrow) %v18233_v56, 16  ;;  %v2022_v26 = vpop.trf.xlu1 }
 0x16e   :  { %21622 = vst [vmem:[#allocation47_spill] sm:$0xff] %v18398_v58 }
 0x16f   :  { %v16035_v8 = vpop.f32.mrb[74].mxu0 }
 0x170   :  { %v1675_v21 = vpop.f32.mrb[75].mxu0 }
 0x171   :  { %v1990_v20 = vpop.trf.xlu0  ;;  %3703 = vxpose.xlu1.b32.start [1/2] (short) (narrow) %v1635_v51, 16  ;;  %2550 = vxpose.xlu0.b32.start [1/2] (short) (narrow) %v18250_v22, 16  ;;  %v2023_v56 = vpop.trf.xlu1 }
 0x172   :  { %16109 = vmatprep.mubr.msk.f32.mxu1 %vm374_vm0, %v1990_v20 }
 0x173   :  { %v18403_v10 = vpop.f32.mrb[76].mxu0 }
 0x174   :  { %v1685_v28 = vpop.f32.mrb[77].mxu0 }
 0x175   :  { %v1991_v59 = vpop.trf.xlu0  ;;  %3704 = vxpose.xlu1.b32.end [2/2] (short) (narrow) %v16023_v3, 16  ;;  %2551 = vxpose.xlu0.b32.end [2/2] (short) (narrow) %v18246_v46, 16 }
 0x176   :  { %16110 = vmatmul.mubr.msk.f32.vlgmr.msra.gmra.mrb[70].mxu1 %vm374_vm0, %v1991_v59 }
 0x177   :  { %v18407_v57 = vpop.f32.mrb[78].mxu0  ;;  %16112 = vmatprep.mubr.msk.f32.mxu1 %vm374_vm0, %v2022_v26  ;;  %17150 = vmatpush3.bf16.msra.mxu1 %v18200_v1 }
 0x178   :  { %v18411_v22 = vpop.f32.mrb[79].mxu0 }
 0x179   :  { %v18413_v51 = vpop.trf.xlu0  ;;  %3735 = vxpose.xlu1.b32.start [1/2] (short) (narrow) %v1645_v63, 16  ;;  %2582 = vxpose.xlu0.b32.start [1/2] (short) (narrow) %v18262_v5, 16 }
 0x17a   :  { %21623 = vst [vmem:[#allocation48_spill] sm:$0xff] %v18413_v51  ;;  %16113 = vmatmul.mubr.msk.f32.gmra.mrb[72].mxu1 %vm374_vm0, %v2023_v56 }
 0x17b   :  { %v18417_v3 = vpop.f32.mrb[80].mxu0 }
 0x17c   :  { %v18419_v46 = vpop.f32.mrb[81].mxu0 }
 0x17d   :  { %v18421_v20 = vpop.trf.xlu0  ;;  %3736 = vxpose.xlu1.b32.end [2/2] (short) (narrow) %v16026_v32, 16  ;;  %2583 = vxpose.xlu0.b32.end [2/2] (short) (narrow) %v18258_v47, 16  ;;  %v2086_v32 = vpop.trf.xlu1 }
 0x17e   :  { %21624 = vst [vmem:[#allocation49_spill] sm:$0xff] %v18421_v20 }
 0x17f   :  { %v18424_v26 = vpop.f32.mrb[82].mxu0 }
 0x180   :  { %v18426_v1 = vpop.f32.mrb[83].mxu0 }
 0x181   :  { %v18428_v59 = vpop.trf.xlu0  ;;  %3767 = vxpose.xlu1.b32.start [1/2] (short) (narrow) %v1655_v29, 16  ;;  %2614 = vxpose.xlu0.b32.start [1/2] (short) (narrow) %v18275_v52, 16  ;;  %v2087_v52 = vpop.trf.xlu1 }
 0x182   :  { %21625 = vst [vmem:[#allocation50_spill] sm:$0xff] %v18428_v59 }
 0x183   :  { %v18431_v5 = vpop.f32.mrb[84].mxu0 }
 0x184   :  { %v18433_v63 = vpop.f32.mrb[85].mxu0 }
 0x185   :  { %v18435_v56 = vpop.trf.xlu0  ;;  %3768 = vxpose.xlu1.b32.end [2/2] (short) (narrow) %v16029_v40, 16  ;;  %2615 = vxpose.xlu0.b32.end [2/2] (short) (narrow) %v18271_v45, 16 }
 0x186   :  { %21626 = vst [vmem:[#allocation51_spill] sm:$0xff] %v18435_v56 }
 0x187   :  { %v18438_v47 = vpop.f32.mrb[86].mxu0 }
 0x188   :  { %v18440_v20 = vpop.f32.mrb[87].mxu0 }
 0x189   :  { %v2054_v51 = vpop.trf.xlu0  ;;  %3799 = vxpose.xlu1.b32.start [1/2] (short) (narrow) %v1665_v43, 16  ;;  %2646 = vxpose.xlu0.b32.start [1/2] (short) (narrow) %v18288_v19, 16  ;;  %v2150_v43 = vpop.trf.xlu1 }
 0x18a   :  { %16115 = vmatprep.mubr.msk.f32.mxu1 %vm374_vm0, %v2054_v51 }
 0x18b   :  { %v18444_v29 = vpop.f32.mrb[88].mxu0 }
 0x18c   :  { %v18446_v59 = vpop.f32.mrb[89].mxu0 }
 0x18d   :  { %v2055_v56 = vpop.trf.xlu0  ;;  %3800 = vxpose.xlu1.b32.end [2/2] (short) (narrow) %v16032_v39, 16  ;;  %2647 = vxpose.xlu0.b32.end [2/2] (short) (narrow) %v18284_v7, 16 }
 0x18e   :  { %16116 = vmatmul.mubr.msk.f32.gmra.mrb[74].mxu1 %vm374_vm0, %v2055_v56  ;;  %v2151_v56 = vpop.trf.xlu1 }
 0x18f   :  { %16118 = vmatprep.mubr.msk.f32.mxu1 %vm374_vm0, %v2086_v32  ;;  %v18451_v45 = vpop.f32.mrb[90].mxu0 }
 0x190   :  { %v18453_v40 = vpop.f32.mrb[91].mxu0 }
 0x191   :  { %v18455_v19 = vpop.trf.xlu0  ;;  %3831 = vxpose.xlu1.b32.start [1/2] (short) (narrow) %v1675_v21, 16  ;;  %2678 = vxpose.xlu0.b32.start [1/2] (short) (narrow) %v18301_v30, 16 }
 0x192   :  { %21627 = vst [vmem:[#allocation52_spill] sm:$0xff] %v18455_v19  ;;  %16119 = vmatmul.mubr.msk.f32.gmra.mrb[76].mxu1 %vm374_vm0, %v2087_v52 }
 0x193   :  { %v18459_v51 = vpop.f32.mrb[92].mxu0 }
 0x194   :  { %v18461_v39 = vpop.f32.mrb[93].mxu0 }
 0x195   :  { %v18463_v7 = vpop.trf.xlu0  ;;  %3832 = vxpose.xlu1.b32.end [2/2] (short) (narrow) %v16035_v8, 16  ;;  %2679 = vxpose.xlu0.b32.end [2/2] (short) (narrow) %v18297_v61, 16  ;;  %v2214_v61 = vpop.trf.xlu1 }
 0x197   :  { %v18466_v32 = vpop.f32.mrb[94].mxu0 }
 0x198   :  { %v18468_v58 = vpop.f32.mrb[95].mxu0 }
 0x199   :  { %v2118_v21 = vpop.trf.xlu0  ;;  %3863 = vxpose.xlu1.b32.start [1/2] (short) (narrow) %v1685_v28, 16  ;;  %2710 = vxpose.xlu0.b32.start [1/2] (short) (narrow) %v18314_v31, 16 }
 0x19a   :  { %16121 = vmatprep.mubr.msk.f32.mxu1 %vm374_vm0, %v2118_v21 }
 0x19b   :  { %v18472_v30 = vpop.f32.mrb[96].mxu0 }
 0x19c   :  { %v18474_v52 = vpop.f32.mrb[97].mxu0 }
 0x19d   :  { %v2119_v19 = vpop.trf.xlu0  ;;  %3864 = vxpose.xlu1.b32.end [2/2] (short) (narrow) %v18403_v10, 16  ;;  %2711 = vxpose.xlu0.b32.end [2/2] (short) (narrow) %v18310_v35, 16  ;;  %v2215_v10 = vpop.trf.xlu1 }
 0x19e   :  { %16122 = vmatmul.mubr.msk.f32.gmra.mrb[78].mxu1 %vm374_vm0, %v2119_v19 }
 0x19f   :  { %16124 = vmatprep.mubr.msk.f32.mxu1 %vm374_vm0, %v2150_v43  ;;  %v18480_v8 = vpop.f32.mrb[98].mxu0 }
 0x1a0   :  { %v18482_v28 = vpop.f32.mrb[99].mxu0 }
 0x1a1   :  { %v2182_v31 = vpop.trf.xlu0  ;;  %3895 = vxpose.xlu1.b32.start [1/2] (short) (narrow) %v18411_v22, 16  ;;  %2742 = vxpose.xlu0.b32.start [1/2] (short) (narrow) %v18327_v50, 16 }
 0x1a2   :  { %16125 = vmatmul.mubr.msk.f32.gmra.mrb[80].mxu1 %vm374_vm0, %v2151_v56  ;;  %v2278_v56 = vpop.trf.xlu1 }
 0x1a3   :  { %16127 = vmatprep.mubr.msk.f32.mxu1 %vm374_vm0, %v2182_v31  ;;  %v18488_v35 = vpop.f32.mrb[100].mxu0 }
 0x1a4   :  { %v18490_v21 = vpop.f32.mrb[101].mxu0 }
 0x1a5   :  { %v2183_v19 = vpop.trf.xlu0  ;;  %3896 = vxpose.xlu1.b32.end [2/2] (short) (narrow) %v18407_v57, 16  ;;  %2743 = vxpose.xlu0.b32.end [2/2] (short) (narrow) %v18323_v37, 16 }
 0x1a6   :  { %16128 = vmatmul.mubr.msk.f32.gmra.mrb[82].mxu1 %vm374_vm0, %v2183_v19 }
 0x1a7   :  { %16130 = vmatprep.mubr.msk.f32.mxu1 %vm374_vm0, %v2214_v61  ;;  %v18496_v22 = vpop.f32.mrb[102].mxu0 }
 0x1a8   :  { %v18498_v50 = vpop.f32.mrb[103].mxu0 }
 0x1a9   :  { %v2246_v43 = vpop.trf.xlu0  ;;  %3927 = vxpose.xlu1.b32.start [1/2] (short) (narrow) %v18419_v46, 16  ;;  %2774 = vxpose.xlu0.b32.start [1/2] (short) (narrow) %v18344_v60, 16  ;;  %v2279_v46 = vpop.trf.xlu1 }
 0x1aa   :  { %16131 = vmatmul.mubr.msk.f32.gmra.mrb[84].mxu1 %vm374_vm0, %v2215_v10 }
 0x1ab   :  { %16133 = vmatprep.mubr.msk.f32.mxu1 %vm374_vm0, %v2246_v43  ;;  %v18504_v57 = vpop.f32.mrb[104].mxu0 }
 0x1ac   :  { %v18506_v37 = vpop.f32.mrb[105].mxu0 }
 0x1ad   :  { %v2247_v31 = vpop.trf.xlu0  ;;  %3928 = vxpose.xlu1.b32.end [2/2] (short) (narrow) %v18417_v3, 16  ;;  %2775 = vxpose.xlu0.b32.end [2/2] (short) (narrow) %v18340_v23, 16 }
 0x1ae   :  { %16134 = vmatmul.mubr.msk.f32.gmra.mrb[86].mxu1 %vm374_vm0, %v2247_v31 }
 0x1af   :  { %16136 = vmatprep.mubr.msk.f32.mxu1 %vm374_vm0, %v2278_v56  ;;  %v18512_v60 = vpop.f32.mrb[106].mxu0 }
 0x1b0   :  { %v18514_v61 = vpop.f32.mrb[107].mxu0 }
 0x1b1   :  { %3959 = vxpose.xlu1.b32.start [1/2] (short) (narrow) %v18426_v1, 16  ;;  %v2310_v10 = vpop.trf.xlu0  ;;  %2806 = vxpose.xlu0.b32.start [1/2] (short) (narrow) %v18363_v12, 16 }
 0x1b2   :  { %16137 = vmatmul.mubr.msk.f32.gmra.mrb[88].mxu1 %vm374_vm0, %v2279_v46 }
 0x1b3   :  { %16139 = vmatprep.mubr.msk.f32.mxu1 %vm374_vm0, %v2310_v10  ;;  %v18520_v3 = vpop.f32.mrb[108].mxu0 }
 0x1b4   :  { %v18522_v23 = vpop.f32.mrb[109].mxu0 }
 0x1b5   :  { %3960 = vxpose.xlu1.b32.end [2/2] (short) (narrow) %v18424_v26, 16  ;;  %v2311_v19 = vpop.trf.xlu0  ;;  %2807 = vxpose.xlu0.b32.end [2/2] (short) (narrow) %v18355_v41, 16 }
 0x1b6   :  { %16140 = vmatmul.mubr.msk.f32.gmra.mrb[90].mxu1 %vm374_vm0, %v2311_v19 }
 0x1b7   :  { %v18527_v43 = vpop.f32.mrb[110].mxu0 }
 0x1b8   :  { %v18529_v1 = vpop.f32.mrb[111].mxu0 }
 0x1b9   :  { %3991 = vxpose.xlu1.b32.start [1/2] (short) (narrow) %v18433_v63, 16  ;;  %v2342_v12 = vpop.trf.xlu0  ;;  %2838 = vxpose.xlu0.b32.start [1/2] (short) (narrow) %v18368_v24, 16 }
 0x1ba   :  { %16142 = vmatprep.mubr.msk.f32.mxu1 %vm374_vm0, %v2342_v12 }
 0x1bb   :  { %v18534_v56 = vpop.f32.mrb[112].mxu0 }
 0x1bc   :  { %v18536_v31 = vpop.f32.mrb[113].mxu0 }
 0x1bd   :  { %3992 = vxpose.xlu1.b32.end [2/2] (short) (narrow) %v18431_v5, 16  ;;  %v2343_v41 = vpop.trf.xlu0  ;;  %2839 = vxpose.xlu0.b32.end [2/2] (short) (narrow) %v18366_v38, 16 }
 0x1be   :  { %16143 = vmatmul.mubr.msk.f32.gmra.mrb[92].mxu1 %vm374_vm0, %v2343_v41 }
 0x1bf   :  { %v18541_v26 = vpop.f32.mrb[114].mxu0 }
 0x1c0   :  { %v18543_v46 = vpop.f32.mrb[115].mxu0 }
 0x1c1   :  { %4023 = vxpose.xlu1.b32.start [1/2] (short) (narrow) %v18440_v20, 16  ;;  %v2374_v24 = vpop.trf.xlu0  ;;  %2870 = vxpose.xlu0.b32.start [1/2] (short) (narrow) %v18373_v36, 16 }
 0x1c2   :  { %16145 = vmatprep.mubr.msk.f32.mxu1 %vm374_vm0, %v2374_v24  ;;  %v21630_v24 = vsub.f32 %v18079_v14, %v18053_v49 }
 0x1c3   :  { %v18548_v63 = vpop.f32.mrb[116].mxu0 }
 0x1c4   :  { %v18550_v10 = vpop.f32.mrb[117].mxu0 }
 0x1c5   :  { %4024 = vxpose.xlu1.b32.end [2/2] (short) (narrow) %v18438_v47, 16  ;;  %v2375_v38 = vpop.trf.xlu0  ;;  %2871 = vxpose.xlu0.b32.end [2/2] (short) (narrow) %v18371_v18, 16 }
 0x1c6   :  { %16146 = vmatmul.mubr.msk.f32.gmra.mrb[94].mxu1 %vm374_vm0, %v2375_v38  ;;  %v21631_v38 = vsub.f32 %v18075_v6, %v18049_v2 }
 0x1c7   :  { %v18555_v5 = vpop.f32.mrb[118].mxu0 }
 0x1c8   :  { %v18557_v19 = vpop.f32.mrb[119].mxu0 }
 0x1c9   :  { %4055 = vxpose.xlu1.b32.start [1/2] (short) (narrow) %v18446_v59, 16  ;;  %v2406_v36 = vpop.trf.xlu0  ;;  %2902 = vxpose.xlu0.b32.start [1/2] (short) (narrow) %v18378_v11, 16 }
 0x1ca   :  { %16148 = vmatprep.mubr.msk.f32.mxu1 %vm374_vm0, %v2406_v36  ;;  %v21632_v36 = vsub.f32 %v18091_v54, %v18065_v33 }
 0x1cb   :  { %v18562_v20 = vpop.f32.mrb[120].mxu0 }
 0x1cc   :  { %v18564_v12 = vpop.f32.mrb[121].mxu0 }
 0x1cd   :  { %4056 = vxpose.xlu1.b32.end [2/2] (short) (narrow) %v18444_v29, 16  ;;  %v2407_v18 = vpop.trf.xlu0  ;;  %2903 = vxpose.xlu0.b32.end [2/2] (short) (narrow) %v18376_v4, 16 }
 0x1ce   :  { %16149 = vmatmul.mubr.msk.f32.gmra.mrb[96].mxu1 %vm374_vm0, %v2407_v18  ;;  %v21633_v18 = vsub.f32 %v18089_v9, %v18063_v55 }
 0x1d1   :  { %4087 = vxpose.xlu1.b32.start [1/2] (short) (narrow) %v18453_v40, 16  ;;  %v3591_v47 = vpop.trf.xlu1  ;;  %v2438_v59 = vpop.trf.xlu0  ;;  %2934 = vxpose.xlu0.b32.start [1/2] (short) (narrow) %v18383_v53, 16 }
 0x1d2   :  { %16209 = vmatprep.mubr.msk.f32.mxu0 %vm374_vm0, %v3591_v47  ;;  %16151 = vmatprep.mubr.msk.f32.mxu1 %vm374_vm0, %v2438_v59  ;;  %v21634_v47 = vsub.f32 %v18101_v25, %v18079_v14  ;;  %v21635_v59 = vsub.f32 %v18097_v16, %v18075_v6 }
 0x1d5   :  { %4088 = vxpose.xlu1.b32.end [2/2] (short) (narrow) %v18451_v45, 16  ;;  %v3592_v11 = vpop.trf.xlu1  ;;  %v2439_v41 = vpop.trf.xlu0  ;;  %2935 = vxpose.xlu0.b32.end [2/2] (short) (narrow) %v18381_v17, 16 }
 0x1d6   :  { %16210 = vmatmul.mubr.msk.f32.vlgmr.msra.gmra.mrb[122].mxu0 %vm374_vm0, %v3592_v11  ;;  %16152 = vmatmul.mubr.msk.f32.gmra.mrb[98].mxu1 %vm374_vm0, %v2439_v41  ;;  %v21636_v11 = vsub.f32 %v18109_v62, %v18091_v54  ;;  %v21637_v41 = vsub.f32 %v18107_v48, %v18089_v9 }
 0x1d9   :  { %4119 = vxpose.xlu1.b32.start [1/2] (short) (narrow) %v18461_v39, 16  ;;  %v3623_v4 = vpop.trf.xlu1  ;;  %v2470_v29 = vpop.trf.xlu0  ;;  %2966 = vxpose.xlu0.b32.start [1/2] (short) (narrow) %v18390_v44, 16  ;;  %v21628_v44 = vsub.f32 %v18065_v33, %v18039_v13  ;;  %v21629_v39 = vsub.f32 %v18063_v55, %v18037_v42 }
 0x1da   :  { %16212 = vmatprep.mubr.msk.f32.mxu0 %vm374_vm0, %v3623_v4  ;;  %16154 = vmatprep.mubr.msk.f32.mxu1 %vm374_vm0, %v2470_v29  ;;  %v21638_v4 = vsub.f32 %v18119_v0, %v18101_v25  ;;  %v21639_v29 = vsub.f32 %v18115_v34, %v18097_v16 }
 0x1dd   :  { %4120 = vxpose.xlu1.b32.end [2/2] (short) (narrow) %v18459_v51, 16  ;;  %v3624_v53 = vpop.trf.xlu1  ;;  %v2471_v45 = vpop.trf.xlu0  ;;  %2967 = vxpose.xlu0.b32.end [2/2] (short) (narrow) %v18388_v15, 16 }
 0x1de   :  { %16213 = vmatmul.mubr.msk.f32.gmra.mrb[124].mxu0 %vm374_vm0, %v3624_v53  ;;  %16155 = vmatmul.mubr.msk.f32.gmra.mrb[100].mxu1 %vm374_vm0, %v2471_v45  ;;  %v21640_v53 = vld [vmem:[#allocation14_spill] sm:$0xff] }
 0x1df   :  { %v21641_v45 = vsub.f32 %v21640_v53, %v18119_v0 }
 0x1e1   :  { %4151 = vxpose.xlu1.b32.start [1/2] (short) (narrow) %v18468_v58, 16  ;;  %v3655_v17 = vpop.trf.xlu1  ;;  %v2502_v40 = vpop.trf.xlu0  ;;  %5336 = vxpose.xlu0.b32.start [1/2] (short) (narrow) %v21628_v44, 16  ;;  %v21644_v44 = vld [vmem:[#allocation18_spill] sm:$0xff] }
 0x1e2   :  { %16215 = vmatprep.mubr.msk.f32.mxu0 %vm374_vm0, %v3655_v17  ;;  %16157 = vmatprep.mubr.msk.f32.mxu1 %vm374_vm0, %v2502_v40  ;;  %v21642_v17 = vld [vmem:[#allocation13_spill] sm:$0xff] }
 0x1e3   :  { %v21643_v40 = vsub.f32 %v21642_v17, %v18115_v34 }
 0x1e5   :  { %4152 = vxpose.xlu1.b32.end [2/2] (short) (narrow) %v18466_v32, 16  ;;  %v3656_v51 = vpop.trf.xlu1  ;;  %v2503_v15 = vpop.trf.xlu0  ;;  %5337 = vxpose.xlu0.b32.end [2/2] (short) (narrow) %v21629_v39, 16 }
 0x1e6   :  { %16216 = vmatmul.mubr.msk.f32.gmra.mrb[126].mxu0 %vm374_vm0, %v3656_v51  ;;  %16158 = vmatmul.mubr.msk.f32.gmra.mrb[102].mxu1 %vm374_vm0, %v2503_v15  ;;  %v21645_v51 = vsub.f32 %v21644_v44, %v21640_v53  ;;  %v21646_v15 = vld [vmem:[#allocation17_spill] sm:$0xff] }
 0x1e7   :  { %v21647_v39 = vsub.f32 %v21646_v15, %v21642_v17  ;;  %v114_v53 = vld [vmem:[%s21305_s5] sm:$0xff] }
 0x1e8   :  { %v21670_v17 = vld [vmem:[#allocation41_spill] sm:$0xff] }
 0x1e9   :  { %4183 = vxpose.xlu1.b32.start [1/2] (short) (narrow) %v18474_v52, 16  ;;  %v3687_v13 = vpop.trf.xlu1  ;;  %v2534_v58 = vpop.trf.xlu0  ;;  %5368 = vxpose.xlu0.b32.start [1/2] (short) (narrow) %v21630_v24, 16 }
 0x1ea   :  { %16218 = vmatprep.mubr.msk.f32.mxu0 %vm374_vm0, %v3687_v13  ;;  %16160 = vmatprep.mubr.msk.f32.mxu1 %vm374_vm0, %v2534_v58  ;;  %v21648_v58 = vld [vmem:[#allocation22_spill] sm:$0xff] }
 0x1ed   :  { %4184 = vxpose.xlu1.b32.end [2/2] (short) (narrow) %v18472_v30, 16  ;;  %v3688_v42 = vpop.trf.xlu1  ;;  %v2535_v32 = vpop.trf.xlu0  ;;  %5369 = vxpose.xlu0.b32.end [2/2] (short) (narrow) %v21631_v38, 16  ;;  %v21650_v38 = vld [vmem:[#allocation26_spill] sm:$0xff] }
 0x1ee   :  { %16219 = vmatmul.mubr.msk.f32.gmra.mrb[128].mxu0 %vm374_vm0, %v3688_v42  ;;  %16161 = vmatmul.mubr.msk.f32.gmra.mrb[104].mxu1 %vm374_vm0, %v2535_v32  ;;  %v21649_v42 = vld [vmem:[#allocation21_spill] sm:$0xff] }
 0x1f1   :  { %4215 = vxpose.xlu1.b32.start [1/2] (short) (narrow) %v18482_v28, 16  ;;  %v3719_v49 = vpop.trf.xlu1  ;;  %v2566_v52 = vpop.trf.xlu0  ;;  %5400 = vxpose.xlu0.b32.start [1/2] (short) (narrow) %v21632_v36, 16  ;;  %v21652_v36 = vld [vmem:[#allocation25_spill] sm:$0xff] }
 0x1f2   :  { %16221 = vmatprep.mubr.msk.f32.mxu0 %vm374_vm0, %v3719_v49  ;;  %16163 = vmatprep.mubr.msk.f32.mxu1 %vm374_vm0, %v2566_v52  ;;  %v21651_v49 = vsub.f32 %v21650_v38, %v21648_v58 }
 0x1f5   :  { %4216 = vxpose.xlu1.b32.end [2/2] (short) (narrow) %v18480_v8, 16  ;;  %v3720_v2 = vpop.trf.xlu1  ;;  %v2567_v30 = vpop.trf.xlu0  ;;  %5401 = vxpose.xlu0.b32.end [2/2] (short) (narrow) %v21633_v18, 16  ;;  %v21654_v18 = vld [vmem:[#allocation30_spill] sm:$0xff] }
 0x1f6   :  { %16222 = vmatmul.mubr.msk.f32.gmra.mrb[130].mxu0 %vm374_vm0, %v3720_v2  ;;  %16164 = vmatmul.mubr.msk.f32.gmra.mrb[106].mxu1 %vm374_vm0, %v2567_v30  ;;  %v21653_v2 = vsub.f32 %v21652_v36, %v21649_v42 }
 0x1f9   :  { %4247 = vxpose.xlu1.b32.start [1/2] (short) (narrow) %v18490_v21, 16  ;;  %v3751_v33 = vpop.trf.xlu1  ;;  %v2598_v28 = vpop.trf.xlu0  ;;  %5432 = vxpose.xlu0.b32.start [1/2] (short) (narrow) %v21634_v47, 16  ;;  %v21656_v47 = vld [vmem:[#allocation29_spill] sm:$0xff] }
 0x1fa   :  { %16224 = vmatprep.mubr.msk.f32.mxu0 %vm374_vm0, %v3751_v33  ;;  %16166 = vmatprep.mubr.msk.f32.mxu1 %vm374_vm0, %v2598_v28  ;;  %v21655_v33 = vsub.f32 %v21654_v18, %v21650_v38 }
 0x1fd   :  { %4248 = vxpose.xlu1.b32.end [2/2] (short) (narrow) %v18488_v35, 16  ;;  %v3752_v55 = vpop.trf.xlu1  ;;  %v2599_v8 = vpop.trf.xlu0  ;;  %5433 = vxpose.xlu0.b32.end [2/2] (short) (narrow) %v21635_v59, 16  ;;  %v21658_v59 = vld [vmem:[#allocation34_spill] sm:$0xff] }
 0x1fe   :  { %16225 = vmatmul.mubr.msk.f32.gmra.mrb[132].mxu0 %vm374_vm0, %v3752_v55  ;;  %16167 = vmatmul.mubr.msk.f32.gmra.mrb[108].mxu1 %vm374_vm0, %v2599_v8  ;;  %v21657_v55 = vsub.f32 %v21656_v47, %v21652_v36  ;;  %v21687_v36 = vld [vmem:[#allocation9_spill] sm:$0xff] }
 0x201   :  { %4279 = vxpose.xlu1.b32.start [1/2] (short) (narrow) %v18498_v50, 16  ;;  %v3783_v14 = vpop.trf.xlu1  ;;  %v2630_v21 = vpop.trf.xlu0  ;;  %5464 = vxpose.xlu0.b32.start [1/2] (short) (narrow) %v21636_v11, 16  ;;  %v21660_v11 = vld [vmem:[#allocation33_spill] sm:$0xff] }
 0x202   :  { %16227 = vmatprep.mubr.msk.f32.mxu0 %vm374_vm0, %v3783_v14  ;;  %16169 = vmatprep.mubr.msk.f32.mxu1 %vm374_vm0, %v2630_v21  ;;  %v21659_v14 = vsub.f32 %v21658_v59, %v21654_v18 }
 0x205   :  { %4280 = vxpose.xlu1.b32.end [2/2] (short) (narrow) %v18496_v22, 16  ;;  %v3784_v6 = vpop.trf.xlu1  ;;  %v2631_v35 = vpop.trf.xlu0  ;;  %5465 = vxpose.xlu0.b32.end [2/2] (short) (narrow) %v21637_v41, 16  ;;  %v21662_v41 = vld [vmem:[#allocation38_spill] sm:$0xff] }
 0x206   :  { %16228 = vmatmul.mubr.msk.f32.gmra.mrb[134].mxu0 %vm374_vm0, %v3784_v6  ;;  %16170 = vmatmul.mubr.msk.f32.gmra.mrb[110].mxu1 %vm374_vm0, %v2631_v35  ;;  %v21661_v6 = vsub.f32 %v21660_v11, %v21656_v47 }
 0x209   :  { %4311 = vxpose.xlu1.b32.start [1/2] (short) (narrow) %v18506_v37, 16  ;;  %v3815_v54 = vpop.trf.xlu1  ;;  %v2662_v50 = vpop.trf.xlu0  ;;  %5496 = vxpose.xlu0.b32.start [1/2] (short) (narrow) %v21638_v4, 16  ;;  %v21664_v4 = vld [vmem:[#allocation37_spill] sm:$0xff] }
 0x20a   :  { %16230 = vmatprep.mubr.msk.f32.mxu0 %vm374_vm0, %v3815_v54  ;;  %16172 = vmatprep.mubr.msk.f32.mxu1 %vm374_vm0, %v2662_v50  ;;  %v21663_v54 = vsub.f32 %v21662_v41, %v21658_v59 }
 0x20d   :  { %4312 = vxpose.xlu1.b32.end [2/2] (short) (narrow) %v18504_v57, 16  ;;  %v3816_v9 = vpop.trf.xlu1  ;;  %v2663_v22 = vpop.trf.xlu0  ;;  %5497 = vxpose.xlu0.b32.end [2/2] (short) (narrow) %v21639_v29, 16  ;;  %v21666_v29 = vld [vmem:[#allocation42_spill] sm:$0xff] }
 0x20e   :  { %16231 = vmatmul.mubr.msk.f32.gmra.mrb[136].mxu0 %vm374_vm0, %v3816_v9  ;;  %16173 = vmatmul.mubr.msk.f32.gmra.mrb[112].mxu1 %vm374_vm0, %v2663_v22  ;;  %v21665_v9 = vsub.f32 %v21664_v4, %v21660_v11  ;;  %v21697_v11 = vld [vmem:[#allocation24_spill] sm:$0xff] }
 0x211   :  { %4343 = vxpose.xlu1.b32.start [1/2] (short) (narrow) %v18514_v61, 16  ;;  %v3847_v25 = vpop.trf.xlu1  ;;  %v2694_v37 = vpop.trf.xlu0  ;;  %5560 = vxpose.xlu0.b32.start [1/2] (short) (narrow) %v21641_v45, 16 }
 0x212   :  { %16233 = vmatprep.mubr.msk.f32.mxu0 %vm374_vm0, %v3847_v25  ;;  %16175 = vmatprep.mubr.msk.f32.mxu1 %vm374_vm0, %v2694_v37  ;;  %v21667_v25 = vsub.f32 %v21666_v29, %v21662_v41 }
 0x215   :  { %4344 = vxpose.xlu1.b32.end [2/2] (short) (narrow) %v18512_v60, 16  ;;  %v3848_v16 = vpop.trf.xlu1  ;;  %v2695_v57 = vpop.trf.xlu0  ;;  %5561 = vxpose.xlu0.b32.end [2/2] (short) (narrow) %v21643_v40, 16  ;;  %v21671_v40 = vsub.f32 %v21670_v17, %v21664_v4  ;;  %v21703_v4 = vld [vmem:[#allocation19_spill] sm:$0xff] }
 0x216   :  { %16234 = vmatmul.mubr.msk.f32.gmra.mrb[138].mxu0 %vm374_vm0, %v3848_v16  ;;  %16176 = vmatmul.mubr.msk.f32.gmra.mrb[114].mxu1 %vm374_vm0, %v2695_v57 }
 0x219   :  { %4375 = vxpose.xlu1.b32.start [1/2] (short) (narrow) %v18522_v23, 16  ;;  %v3879_v0 = vpop.trf.xlu1  ;;  %v2726_v61 = vpop.trf.xlu0  ;;  %5624 = vxpose.xlu0.b32.start [1/2] (short) (narrow) %v21645_v51, 16 }
 0x21a   :  { %16236 = vmatprep.mubr.msk.f32.mxu0 %vm374_vm0, %v3879_v0  ;;  %16178 = vmatprep.mubr.msk.f32.mxu1 %vm374_vm0, %v2726_v61 }
 0x21d   :  { %4376 = vxpose.xlu1.b32.end [2/2] (short) (narrow) %v18520_v3, 16  ;;  %v3880_v34 = vpop.trf.xlu1  ;;  %v2727_v60 = vpop.trf.xlu0  ;;  %5625 = vxpose.xlu0.b32.end [2/2] (short) (narrow) %v21647_v39, 16  ;;  %v21677_v39 = vld [vmem:[#allocation11_spill] sm:$0xff] }
 0x21e   :  { %16237 = vmatmul.mubr.msk.f32.gmra.mrb[140].mxu0 %vm374_vm0, %v3880_v34  ;;  %16179 = vmatmul.mubr.msk.f32.gmra.mrb[116].mxu1 %vm374_vm0, %v2727_v60  ;;  %v21675_v60 = vld [vmem:[#allocation6_spill] sm:$0xff] }
 0x21f   :  { %v21676_v15 = vsub.f32 %v21675_v60, %v21666_v29  ;;  %v21705_v29 = vld [vmem:[#allocation51_spill] sm:$0xff] }
 0x221   :  { %4407 = vxpose.xlu1.b32.start [1/2] (short) (narrow) %v18529_v1, 16  ;;  %v3911_v23 = vpop.trf.xlu1  ;;  %v2758_v13 = vpop.trf.xlu0  ;;  %5688 = vxpose.xlu0.b32.start [1/2] (short) (narrow) %v21648_v58, 16 }
 0x222   :  { %16239 = vmatprep.mubr.msk.f32.mxu0 %vm374_vm0, %v3911_v23  ;;  %16181 = vmatprep.mubr.msk.f32.mxu1 %vm374_vm0, %v2758_v13  ;;  %v21678_v23 = vsub.f32 %v21677_v39, %v18107_v48 }
 0x225   :  { %4408 = vxpose.xlu1.b32.end [2/2] (short) (narrow) %v18527_v43, 16  ;;  %v3912_v3 = vpop.trf.xlu1  ;;  %v2759_v24 = vpop.trf.xlu0  ;;  %5689 = vxpose.xlu0.b32.end [2/2] (short) (narrow) %v21649_v42, 16 }
 0x226   :  { %16240 = vmatmul.mubr.msk.f32.gmra.mrb[142].mxu0 %vm374_vm0, %v3912_v3  ;;  %16182 = vmatmul.mubr.msk.f32.gmra.mrb[118].mxu1 %vm374_vm0, %v2759_v24  ;;  %v21681_v24 = vld [vmem:[#allocation16_spill] sm:$0xff] }
 0x227   :  { %v1942_v18 = vsub.f32 0.0, %v21681_v24 }
 0x229   :  { %4439 = vxpose.xlu1.b32.start [1/2] (short) (narrow) %v18536_v31, 16  ;;  %v3943_v1 = vpop.trf.xlu1  ;;  %v2790_v32 = vpop.trf.xlu0  ;;  %5752 = vxpose.xlu0.b32.start [1/2] (short) (narrow) %v21651_v49, 16  ;;  %v21685_v49 = vld [vmem:[#allocation15_spill] sm:$0xff] }
 0x22a   :  { %16242 = vmatprep.mubr.msk.f32.mxu0 %vm374_vm0, %v3943_v1  ;;  %16184 = vmatprep.mubr.msk.f32.mxu1 %vm374_vm0, %v2790_v32  ;;  %v21683_v32 = vld [vmem:[#allocation10_spill] sm:$0xff] }
 0x22b   :  { %v21684_v38 = vsub.f32 %v21683_v32, %v21675_v60 }
 0x22d   :  { %4440 = vxpose.xlu1.b32.end [2/2] (short) (narrow) %v18534_v56, 16  ;;  %v3944_v43 = vpop.trf.xlu1  ;;  %v2791_v52 = vpop.trf.xlu0  ;;  %5753 = vxpose.xlu0.b32.end [2/2] (short) (narrow) %v21653_v2, 16 }
 0x22e   :  { %16243 = vmatmul.mubr.msk.f32.gmra.mrb[144].mxu0 %vm374_vm0, %v3944_v43  ;;  %16185 = vmatmul.mubr.msk.f32.gmra.mrb[120].mxu1 %vm374_vm0, %v2791_v52  ;;  %v21686_v43 = vsub.f32 %v21685_v49, %v21677_v39 }
 0x231   :  { %4471 = vxpose.xlu1.b32.start [1/2] (short) (narrow) %v18543_v46, 16  ;;  %v3975_v31 = vpop.trf.xlu1  ;;  %v2822_v30 = vpop.trf.xlu0  ;;  %5816 = vxpose.xlu0.b32.start [1/2] (short) (narrow) %v21655_v33, 16 }
 0x232   :  { %16245 = vmatprep.mubr.msk.f32.mxu0 %vm374_vm0, %v3975_v31  ;;  %16187 = vmatprep.mubr.msk.f32.mxu1 %vm374_vm0, %v2822_v30  ;;  %v21689_v30 = vld [vmem:[#allocation45_spill] sm:$0xff] }
 0x235   :  { %4472 = vxpose.xlu1.b32.end [2/2] (short) (narrow) %v18541_v26, 16  ;;  %v3976_v56 = vpop.trf.xlu1  ;;  %v2823_v28 = vpop.trf.xlu0  ;;  %5817 = vxpose.xlu0.b32.end [2/2] (short) (narrow) %v21657_v55, 16  ;;  %v1943_v55 = vsub.f32 0.0, %v21685_v49 }
 0x236   :  { %16246 = vmatmul.mubr.msk.f32.gmra.mrb[146].mxu0 %vm374_vm0, %v3976_v56  ;;  %16188 = vmatmul.mubr.msk.f32.gmra.mrb[122].mxu1 %vm374_vm0, %v2823_v28  ;;  %v21690_v28 = vld [vmem:[#allocation46_spill] sm:$0xff] }
 0x239   :  { %4503 = vxpose.xlu1.b32.start [1/2] (short) (narrow) %v18550_v10, 16  ;;  %v4007_v46 = vpop.trf.xlu1  ;;  %v2854_v8 = vpop.trf.xlu0  ;;  %5880 = vxpose.xlu0.b32.start [1/2] (short) (narrow) %v21659_v14, 16  ;;  %v21693_v14 = vld [vmem:[#allocation47_spill] sm:$0xff] }
 0x23a   :  { %16248 = vmatprep.mubr.msk.f32.mxu0 %vm374_vm0, %v4007_v46  ;;  %16190 = vmatprep.mubr.msk.f32.mxu1 %vm374_vm0, %v2854_v8 }
 0x23d   :  { %4504 = vxpose.xlu1.b32.end [2/2] (short) (narrow) %v18548_v63, 16  ;;  %v4008_v26 = vpop.trf.xlu1  ;;  %v2855_v21 = vpop.trf.xlu0  ;;  %5881 = vxpose.xlu0.b32.end [2/2] (short) (narrow) %v21661_v6, 16  ;;  %v21698_v6 = vld [vmem:[#allocation20_spill] sm:$0xff] }
 0x23e   :  { %16249 = vmatmul.mubr.msk.f32.gmra.mrb[148].mxu0 %vm374_vm0, %v4008_v26  ;;  %16191 = vmatmul.mubr.msk.f32.gmra.mrb[124].mxu1 %vm374_vm0, %v2855_v21  ;;  %v21695_v21 = vld [vmem:[#allocation48_spill] sm:$0xff] }
 0x241   :  { %4535 = vxpose.xlu1.b32.start [1/2] (short) (narrow) %v18557_v19, 16  ;;  %v4039_v10 = vpop.trf.xlu1  ;;  %v2886_v35 = vpop.trf.xlu0  ;;  %5944 = vxpose.xlu0.b32.start [1/2] (short) (narrow) %v21663_v54, 16  ;;  %v21700_v54 = vld [vmem:[#allocation49_spill] sm:$0xff] }
 0x242   :  { %16251 = vmatprep.mubr.msk.f32.mxu0 %vm374_vm0, %v4039_v10  ;;  %16193 = vmatprep.mubr.msk.f32.mxu1 %vm374_vm0, %v2886_v35  ;;  %v21699_v10 = vsub.f32 %v21697_v11, %v21698_v6  ;;  %v21732_v6 = vld [vmem:[#allocation39_spill] sm:$0xff] }
 0x245   :  { %4536 = vxpose.xlu1.b32.end [2/2] (short) (narrow) %v18555_v5, 16  ;;  %v4040_v63 = vpop.trf.xlu1  ;;  %v2887_v50 = vpop.trf.xlu0  ;;  %5945 = vxpose.xlu0.b32.end [2/2] (short) (narrow) %v21665_v9, 16 }
 0x246   :  { %16252 = vmatmul.mubr.msk.f32.gmra.mrb[150].mxu0 %vm374_vm0, %v4040_v63  ;;  %16194 = vmatmul.mubr.msk.f32.gmra.mrb[126].mxu1 %vm374_vm0, %v2887_v50  ;;  %v21701_v63 = vld [vmem:[#allocation50_spill] sm:$0xff]  ;;  %v21702_v50 = vld [vmem:[#allocation23_spill] sm:$0xff] }
 0x247   :  { %v21704_v9 = vsub.f32 %v21702_v50, %v21703_v4 }
 0x249   :  { %4567 = vxpose.xlu1.b32.start [1/2] (short) (narrow) %v18564_v12, 16  ;;  %v4071_v19 = vpop.trf.xlu1  ;;  %v2918_v22 = vpop.trf.xlu0  ;;  %6008 = vxpose.xlu0.b32.start [1/2] (short) (narrow) %v21667_v25, 16  ;;  %v115_v12 = vld [vmem:[%s21305_s5 + $0x8] sm:$0xff]  ;;  %v21706_v25 = vld [vmem:[#allocation52_spill] sm:$0xff] }
 0x24a   :  { %16254 = vmatprep.mubr.msk.f32.mxu0 %vm374_vm0, %v4071_v19  ;;  %16196 = vmatprep.mubr.msk.f32.mxu1 %vm374_vm0, %v2918_v22  ;;  %v18743_v5 = vpop.f32.mrb[70].mxu1  ;;  %v18753_v45 = vpack.c.bf16 %v115_v12, %v114_v53  ;;  %v21707_v53 = vld [vmem:[#allocation28_spill] sm:$0xff] }
 0x24b   :  { %21668 = vst [vmem:[#allocation14_spill] sm:$0xff] %v18743_v5  ;;  %v18745_v37 = vpop.f32.mrb[71].mxu1  ;;  %v21708_v12 = vsub.f32 %v21707_v53, %v21697_v11 }
 0x24c   :  { %21669 = vst [vmem:[#allocation13_spill] sm:$0xff] %v18745_v37  ;;  %17152 = vmatprep.subr.bf16.mxu0 %v18753_v45  ;;  %17156 = vmatprep.subr.bf16.mxu1 %v18753_v45 }
 0x24d   :  { %4568 = vxpose.xlu1.b32.end [2/2] (short) (narrow) %v18562_v20, 16  ;;  %v4072_v16 = vpop.trf.xlu1  ;;  %v2919_v57 = vpop.trf.xlu0  ;;  %6009 = vxpose.xlu0.b32.end [2/2] (short) (narrow) %v21671_v40, 16  ;;  %v21673_v20 = vld [vmem:[#allocation12_spill] sm:$0xff] }
 0x24e   :  { %16255 = vmatmul.mubr.msk.f32.gmra.mrb[152].mxu0 %vm374_vm0, %v4072_v16  ;;  %16197 = vmatmul.mubr.msk.f32.gmra.mrb[128].mxu1 %vm374_vm0, %v2919_v57  ;;  %v18761_v0 = vpop.f32.mrb[72].mxu1  ;;  %v21674_v44 = vsub.f32 %v21673_v20, %v18109_v62  ;;  %v21679_v62 = vld [vmem:[#allocation5_spill] sm:$0xff]  ;;  %v21682_v42 = vsub.f32 %v21681_v24, %v21673_v20  ;;  %v21711_v20 = vld [vmem:[#allocation27_spill] sm:$0xff] }
 0x24f   :  { %v18763_v61 = vpop.f32.mrb[73].mxu1  ;;  %17154 = vmatpush3.bf16.msra.mxu0 %v18753_v45  ;;  %v21680_v3 = vsub.f32 %v21679_v62, %v21670_v17  ;;  %v21688_v2 = vsub.f32 %v21687_v36, %v21679_v62 }
 0x250   :  { %21672 = vst [vmem:[#allocation18_spill] sm:$0xff] %v18763_v61  ;;  %17160 = vmatprep.subr.bf16.mxu0 %v18753_v45 }
 0x251   :  { %5528 = vxpose.xlu1.b32.start [1/2] (short) (narrow) %v21674_v44, 16  ;;  %v4103_v51 = vpop.trf.xlu1  ;;  %v2950_v34 = vpop.trf.xlu0  ;;  %6072 = vxpose.xlu0.b32.start [1/2] (short) (narrow) %v21676_v15, 16  ;;  %v21712_v44 = vsub.f32 %v21711_v20, %v21702_v50 }
 0x252   :  { %16257 = vmatprep.mubr.msk.f32.mxu0 %vm374_vm0, %v4103_v51  ;;  %16199 = vmatprep.mubr.msk.f32.mxu1 %vm374_vm0, %v2950_v34 }
 0x255   :  { %5529 = vxpose.xlu1.b32.end [2/2] (short) (narrow) %v21678_v23, 16  ;;  %v4104_v13 = vpop.trf.xlu1  ;;  %v2951_v58 = vpop.trf.xlu0  ;;  %6073 = vxpose.xlu0.b32.end [2/2] (short) (narrow) %v21680_v3, 16  ;;  %v21718_v3 = vld [vmem:[#allocation31_spill] sm:$0xff] }
 0x256   :  { %16258 = vmatmul.mubr.msk.f32.gmra.mrb[154].mxu0 %vm374_vm0, %v4104_v13  ;;  %16200 = vmatmul.mubr.msk.f32.gmra.mrb[130].mxu1 %vm374_vm0, %v2951_v58  ;;  %v21719_v24 = vsub.f32 %v21718_v3, %v21711_v20 }
 0x259   :  { %5592 = vxpose.xlu1.b32.start [1/2] (short) (narrow) %v21682_v42, 16  ;;  %v4135_v1 = vpop.trf.xlu1  ;;  %6136 = vxpose.xlu0.b32.start [1/2] (short) (narrow) %v21684_v38, 16  ;;  %v2982_v48 = vpop.trf.xlu0 }
 0x25a   :  { %16260 = vmatprep.mubr.msk.f32.mxu0 %vm374_vm0, %v4135_v1  ;;  %16202 = vmatprep.mubr.msk.f32.mxu1 %vm374_vm0, %v2982_v48  ;;  %v21721_v48 = vld [vmem:[#allocation36_spill] sm:$0xff] }
 0x25d   :  { %5593 = vxpose.xlu1.b32.end [2/2] (short) (narrow) %v21686_v43, 16  ;;  %v4136_v52 = vpop.trf.xlu1  ;;  %6137 = vxpose.xlu0.b32.end [2/2] (short) (narrow) %v21688_v2, 16  ;;  %v2983_v31 = vpop.trf.xlu0 }
 0x25e   :  { %16203 = vmatmul.mubr.msk.f32.gmra.mrb[132].mxu1 %vm374_vm0, %v2983_v31  ;;  %16261 = vmatmul.mubr.msk.f32.gmra.mrb[156].mxu0 %vm374_vm0, %v4136_v52  ;;  %v21725_v31 = vld [vmem:[#allocation35_spill] sm:$0xff] }
 0x25f   :  { %16309 = vmatprep.mubr.msk.f32.mxu1 %vm374_vm0, %v21689_v30  ;;  %v21726_v30 = vsub.f32 %v21725_v31, %v21718_v3 }
 0x261   :  { %5656 = vxpose.xlu1.b32.start [1/2] (short) (narrow) %v1942_v18, 16  ;;  %v4167_v33 = vpop.trf.xlu1  ;;  %v5352_v56 = vpop.trf.xlu0 }
 0x262   :  { %16263 = vmatprep.mubr.msk.f32.mxu0 %vm374_vm0, %v4167_v33  ;;  %16310 = vmatmul.mubr.msk.f32.vlgmr.msra.gmra.mrb[134].mxu1 %vm374_vm0, %v21690_v28  ;;  %v18807_v47 = vpop.f32.mrb[74].mxu1 }
 0x263   :  { %21691 = vst [vmem:[#allocation17_spill] sm:$0xff] %v18807_v47  ;;  %16312 = vmatprep.mubr.msk.f32.mxu1 %vm374_vm0, %v18395_v27  ;;  %v18812_v46 = vpop.f32.mrb[75].mxu1  ;;  %17158 = vmatpush3.bf16.msra.mxu1 %v18753_v45 }
 0x264   :  { %21692 = vst [vmem:[#allocation22_spill] sm:$0xff] %v18812_v46  ;;  %17164 = vmatprep.subr.bf16.mxu1 %v18753_v45 }
 0x265   :  { %5657 = vxpose.xlu1.b32.end [2/2] (short) (narrow) %v1943_v55, 16  ;;  %v4168_v8 = vpop.trf.xlu1  ;;  %v5353_v59 = vpop.trf.xlu0  ;;  %v21728_v55 = vld [vmem:[#allocation40_spill] sm:$0xff] }
 0x266   :  { %16264 = vmatmul.mubr.msk.f32.gmra.mrb[158].mxu0 %vm374_vm0, %v4168_v8  ;;  %16313 = vmatmul.mubr.msk.f32.gmra.mrb[136].mxu1 %vm374_vm0, %v21693_v14  ;;  %v18819_v26 = vpop.f32.mrb[76].mxu1  ;;  %v21729_v8 = vsub.f32 %v21728_v55, %v21721_v48 }
 0x267   :  { %21694 = vst [vmem:[#allocation21_spill] sm:$0xff] %v18819_v26  ;;  %16315 = vmatprep.mubr.msk.f32.mxu1 %vm374_vm0, %v21695_v21  ;;  %v18823_v27 = vpop.f32.mrb[77].mxu1 }
 0x268   :  { %21696 = vst [vmem:[#allocation26_spill] sm:$0xff] %v18823_v27 }
 0x269   :  { %5720 = vxpose.xlu1.b32.start [1/2] (short) (narrow) %v21699_v10, 16  ;;  %v4199_v35 = vpop.trf.xlu1  ;;  %v5384_v41 = vpop.trf.xlu0  ;;  %v21733_v10 = vsub.f32 %v21732_v6, %v21725_v31 }
 0x26a   :  { %16266 = vmatprep.mubr.msk.f32.mxu0 %vm374_vm0, %v4199_v35  ;;  %16316 = vmatmul.mubr.msk.f32.gmra.mrb[138].mxu1 %vm374_vm0, %v21700_v54  ;;  %v21734_v54 = vld [vmem:[#allocation44_spill] sm:$0xff] }
 0x26b   :  { %16318 = vmatprep.mubr.msk.f32.mxu1 %vm374_vm0, %v21701_v63  ;;  %v21735_v63 = vsub.f32 %v21734_v54, %v21728_v55 }
 0x26d   :  { %5721 = vxpose.xlu1.b32.end [2/2] (short) (narrow) %v21704_v9, 16  ;;  %v4200_v19 = vpop.trf.xlu1  ;;  %v5385_v22 = vpop.trf.xlu0 }
 0x26e   :  { %16267 = vmatmul.mubr.msk.f32.gmra.mrb[160].mxu0 %vm374_vm0, %v4200_v19  ;;  %16319 = vmatmul.mubr.msk.f32.gmra.mrb[140].mxu1 %vm374_vm0, %v21705_v29 }
 0x26f   :  { %16321 = vmatprep.mubr.msk.f32.mxu1 %vm374_vm0, %v21706_v25 }
 0x271   :  { %5784 = vxpose.xlu1.b32.start [1/2] (short) (narrow) %v21708_v12, 16  ;;  %v4231_v16 = vpop.trf.xlu1  ;;  %v18844_v57 = vpop.f32.mrb[78].mxu1  ;;  %v21739_v12 = vld [vmem:[#allocation8_spill] sm:$0xff] }
 0x272   :  { %21709 = vst [vmem:[#allocation25_spill] sm:$0xff] %v18844_v57  ;;  %16269 = vmatprep.mubr.msk.f32.mxu0 %vm374_vm0, %v4231_v16  ;;  %16322 = vmatmul.mubr.msk.f32.gmra.mrb[142].mxu1 %vm374_vm0, %v18463_v7  ;;  %v18849_v17 = vpop.f32.mrb[79].mxu1  ;;  %v5416_v40 = vpop.trf.xlu0  ;;  %v21714_v7 = vld [vmem:[#allocation32_spill] sm:$0xff]  ;;  %v21740_v16 = vsub.f32 %v21739_v12, %v21734_v54 }
 0x273   :  { %21710 = vst [vmem:[#allocation30_spill] sm:$0xff] %v18849_v17  ;;  %16324 = vmatprep.mubr.msk.f32.mxu1 %vm374_vm0, %v5352_v56  ;;  %v21715_v39 = vsub.f32 %v21714_v7, %v21707_v53  ;;  %v21722_v49 = vsub.f32 %v21721_v48, %v21714_v7 }
 0x275   :  { %5785 = vxpose.xlu1.b32.end [2/2] (short) (narrow) %v21712_v44, 16  ;;  %v4232_v51 = vpop.trf.xlu1  ;;  %v18855_v34 = vpop.f32.mrb[80].mxu1 }
 0x276   :  { %21713 = vst [vmem:[#allocation29_spill] sm:$0xff] %v18855_v34  ;;  %16270 = vmatmul.mubr.msk.f32.gmra.mrb[162].mxu0 %vm374_vm0, %v4232_v51  ;;  %16325 = vmatmul.mubr.msk.f32.gmra.mrb[144].mxu1 %vm374_vm0, %v5353_v59  ;;  %v18859_v60 = vpop.f32.mrb[81].mxu1  ;;  %v5417_v15 = vpop.trf.xlu0 }
 0x277   :  { %16327 = vmatprep.mubr.msk.f32.mxu1 %vm374_vm0, %v5384_v41 }
 0x279   :  { %5848 = vxpose.xlu1.b32.start [1/2] (short) (narrow) %v21715_v39, 16  ;;  %v4263_v23 = vpop.trf.xlu1  ;;  %v18865_v13 = vpop.f32.mrb[82].mxu1 }
 0x27a   :  { %21716 = vst [vmem:[#allocation34_spill] sm:$0xff] %v18865_v13  ;;  %16272 = vmatprep.mubr.msk.f32.mxu0 %vm374_vm0, %v4263_v23  ;;  %16328 = vmatmul.mubr.msk.f32.gmra.mrb[146].mxu1 %vm374_vm0, %v5385_v22  ;;  %v18869_v58 = vpop.f32.mrb[83].mxu1  ;;  %v5448_v62 = vpop.trf.xlu0  ;;  %v21737_v22 = vld [vmem:[#allocation43_spill] sm:$0xff]  ;;  %v1972_v23 = vsub.f32 0.0, %v21739_v12 }
 0x27b   :  { %21717 = vst [vmem:[#allocation33_spill] sm:$0xff] %v18869_v58  ;;  %16330 = vmatprep.mubr.msk.f32.mxu1 %vm374_vm0, %v5416_v40  ;;  %v21738_v29 = vsub.f32 %v21737_v22, %v21732_v6 }
 0x27d   :  { %5849 = vxpose.xlu1.b32.end [2/2] (short) (narrow) %v21719_v24, 16  ;;  %v4264_v42 = vpop.trf.xlu1  ;;  %v18875_v1 = vpop.f32.mrb[84].mxu1 }
 0x27e   :  { %21720 = vst [vmem:[#allocation38_spill] sm:$0xff] %v18875_v1  ;;  %16273 = vmatmul.mubr.msk.f32.gmra.mrb[164].mxu0 %vm374_vm0, %v4264_v42  ;;  %16331 = vmatmul.mubr.msk.f32.gmra.mrb[148].mxu1 %vm374_vm0, %v5417_v15  ;;  %v18879_v32 = vpop.f32.mrb[85].mxu1  ;;  %v5449_v38 = vpop.trf.xlu0  ;;  %v21743_v15 = vld [vmem:[#allocation7_spill] sm:$0xff] }
 0x27f   :  { %16333 = vmatprep.mubr.msk.f32.mxu1 %vm374_vm0, %v5448_v62  ;;  %v21744_v7 = vsub.f32 %v21743_v15, %v21737_v22 }
 0x281   :  { %5912 = vxpose.xlu1.b32.start [1/2] (short) (narrow) %v21722_v49, 16  ;;  %v4295_v43 = vpop.trf.xlu1  ;;  %v18885_v52 = vpop.f32.mrb[86].mxu1 }
 0x282   :  { %21723 = vst [vmem:[#allocation37_spill] sm:$0xff] %v18885_v52  ;;  %16275 = vmatprep.mubr.msk.f32.mxu0 %vm374_vm0, %v4295_v43  ;;  %v18888_v36 = vpop.f32.mrb[87].mxu1  ;;  %v5480_v2 = vpop.trf.xlu0  ;;  %16334 = vmatmul.mubr.msk.f32.gmra.mrb[150].mxu1 %vm374_vm0, %v5449_v38  ;;  %v1973_v38 = vsub.f32 0.0, %v21743_v15 }
 0x283   :  { %21724 = vst [vmem:[#allocation42_spill] sm:$0xff] %v18888_v36  ;;  %16336 = vmatprep.mubr.msk.f32.mxu1 %vm374_vm0, %v5480_v2 }
 0x285   :  { %5913 = vxpose.xlu1.b32.end [2/2] (short) (narrow) %v21726_v30, 16  ;;  %v4296_v18 = vpop.trf.xlu1  ;;  %v18895_v33 = vpop.f32.mrb[88].mxu1 }
 0x286   :  { %21727 = vst [vmem:[#allocation41_spill] sm:$0xff] %v18895_v33  ;;  %16276 = vmatmul.mubr.msk.f32.gmra.mrb[166].mxu0 %vm374_vm0, %v4296_v18  ;;  %v18898_v56 = vpop.f32.mrb[89].mxu1  ;;  %v5481_v28 = vpop.trf.xlu0 }
 0x287   :  { %16337 = vmatmul.mubr.msk.f32.gmra.mrb[152].mxu1 %vm374_vm0, %v5481_v28 }
 0x289   :  { %5976 = vxpose.xlu1.b32.start [1/2] (short) (narrow) %v21729_v8, 16  ;;  %v4327_v59 = vpop.trf.xlu1  ;;  %v18904_v14 = vpop.f32.mrb[90].mxu1 }
 0x28a   :  { %21730 = vst [vmem:[#allocation12_spill] sm:$0xff] %v18904_v14  ;;  %16278 = vmatprep.mubr.msk.f32.mxu0 %vm374_vm0, %v4327_v59  ;;  %v5512_v21 = vpop.trf.xlu0  ;;  %v18907_v11 = vpop.f32.mrb[91].mxu1 }
 0x28b   :  { %21731 = vst [vmem:[#allocation6_spill] sm:$0xff] %v18907_v11  ;;  %16339 = vmatprep.mubr.msk.f32.mxu1 %vm374_vm0, %v5512_v21 }
 0x28d   :  { %5977 = vxpose.xlu1.b32.end [2/2] (short) (narrow) %v21733_v10, 16  ;;  %v4328_v35 = vpop.trf.xlu1 }
 0x28e   :  { %16279 = vmatmul.mubr.msk.f32.gmra.mrb[168].mxu0 %vm374_vm0, %v4328_v35  ;;  %v5513_v41 = vpop.trf.xlu0 }
 0x28f   :  { %16340 = vmatmul.mubr.msk.f32.gmra.mrb[154].mxu1 %vm374_vm0, %v5513_v41 }
 0x291   :  { %6040 = vxpose.xlu1.b32.start [1/2] (short) (narrow) %v21735_v63, 16  ;;  %v4359_v50 = vpop.trf.xlu1  ;;  %v18918_v4 = vpop.f32.mrb[92].mxu1 }
 0x292   :  { %21736 = vst [vmem:[#allocation11_spill] sm:$0xff] %v18918_v4  ;;  %16281 = vmatprep.mubr.msk.f32.mxu0 %vm374_vm0, %v4359_v50  ;;  %v18921_v9 = vpop.trf.xlu0  ;;  %v18923_v19 = vpop.f32.mrb[93].mxu1 }
 0x295   :  { %6041 = vxpose.xlu1.b32.end [2/2] (short) (narrow) %v21738_v29, 16  ;;  %v4360_v25 = vpop.trf.xlu1 }
 0x296   :  { %16282 = vmatmul.mubr.msk.f32.gmra.mrb[170].mxu0 %vm374_vm0, %v4360_v25  ;;  %v18929_v53 = vpop.trf.xlu0 }
 0x299   :  { %6104 = vxpose.xlu1.b32.start [1/2] (short) (narrow) %v21740_v16, 16  ;;  %v4391_v40 = vpop.trf.xlu1  ;;  %v18934_v20 = vpop.f32.mrb[94].mxu1 }
 0x29a   :  { %21741 = vst [vmem:[#allocation5_spill] sm:$0xff] %v18934_v20  ;;  %16284 = vmatprep.mubr.msk.f32.mxu0 %vm374_vm0, %v4391_v40  ;;  %v18937_v44 = vpop.f32.mrb[95].mxu1  ;;  %v18939_v51 = vpop.trf.xlu0 }
 0x29b   :  { %21742 = vst [vmem:[#allocation16_spill] sm:$0xff] %v18937_v44 }
 0x29d   :  { %6105 = vxpose.xlu1.b32.end [2/2] (short) (narrow) %v21744_v7, 16  ;;  %v4392_v39 = vpop.trf.xlu1 }
 0x29e   :  { %16285 = vmatmul.mubr.msk.f32.gmra.mrb[172].mxu0 %vm374_vm0, %v4392_v39  ;;  %v18949_v24 = vpop.trf.xlu0 }
 0x2a1   :  { %6168 = vxpose.xlu1.b32.start [1/2] (short) (narrow) %v1972_v23, 16  ;;  %v4423_v62 = vpop.trf.xlu1  ;;  %v18946_v3 = vpop.f32.mrb[96].mxu1 }
 0x2a2   :  { %21745 = vst [vmem:[#allocation10_spill] sm:$0xff] %v18946_v3  ;;  %16287 = vmatprep.mubr.msk.f32.mxu0 %vm374_vm0, %v4423_v62  ;;  %v18951_v42 = vpop.f32.mrb[97].mxu1  ;;  %v18955_v49 = vpop.trf.xlu0 }
 0x2a5   :  { %6169 = vxpose.xlu1.b32.end [2/2] (short) (narrow) %v1973_v38, 16  ;;  %v4424_v48 = vpop.trf.xlu1 }
 0x2a6   :  { %16288 = vmatmul.mubr.msk.f32.gmra.mrb[174].mxu0 %vm374_vm0, %v4424_v48  ;;  %v18967_v55 = vpop.trf.xlu0 }
 0x2a9   :  { %v18957_v43 = vpop.f32.mrb[122].mxu0  ;;  %v4455_v2 = vpop.trf.xlu1 }
 0x2aa   :  { %v18959_v31 = vpop.f32.mrb[123].mxu0  ;;  %16290 = vmatprep.mubr.msk.f32.mxu0 %vm374_vm0, %v4455_v2  ;;  %v18962_v30 = vpop.f32.mrb[98].mxu1 }
 0x2ab   :  { %21746 = vst [vmem:[#allocation15_spill] sm:$0xff] %v18962_v30  ;;  %v18964_v18 = vpop.f32.mrb[99].mxu1  ;;  %v18979_v41 = vpop.trf.xlu0 }
 0x2ac   :  { %21747 = vst [vmem:[#allocation9_spill] sm:$0xff] %v18964_v18 }
 0x2ad   :  { %v4456_v28 = vpop.trf.xlu1 }
 0x2ae   :  { %16291 = vmatmul.mubr.msk.f32.gmra.mrb[176].mxu0 %vm374_vm0, %v4456_v28 }
 0x2af   :  { %v18991_v12 = vpop.trf.xlu0 }
 0x2b1   :  { %v18969_v8 = vpop.f32.mrb[124].mxu0  ;;  %v4487_v59 = vpop.trf.xlu1 }
 0x2b2   :  { %v18971_v21 = vpop.f32.mrb[125].mxu0  ;;  %16293 = vmatprep.mubr.msk.f32.mxu0 %vm374_vm0, %v4487_v59  ;;  %v18974_v6 = vpop.f32.mrb[100].mxu1 }
 0x2b3   :  { %21748 = vst [vmem:[#allocation45_spill] sm:$0xff] %v18971_v21  ;;  %21749 = vst [vmem:[#allocation46_spill] sm:$0xff] %v18974_v6  ;;  %v18976_v10 = vpop.f32.mrb[101].mxu1  ;;  %v19003_v62 = vpop.trf.xlu0 }
 0x2b5   :  { %v4488_v35 = vpop.trf.xlu1 }
 0x2b6   :  { %16294 = vmatmul.mubr.msk.f32.gmra.mrb[178].mxu0 %vm374_vm0, %v4488_v35 }
 0x2b9   :  { %v18981_v54 = vpop.f32.mrb[126].mxu0  ;;  %v4519_v63 = vpop.trf.xlu1 }
 0x2ba   :  { %21750 = vst [vmem:[#allocation47_spill] sm:$0xff] %v18981_v54  ;;  %v18983_v50 = vpop.f32.mrb[127].mxu0  ;;  %16296 = vmatprep.mubr.msk.f32.mxu0 %vm374_vm0, %v4519_v63  ;;  %v18986_v22 = vpop.f32.mrb[102].mxu1 }
 0x2bb   :  { %21751 = vst [vmem:[#allocation48_spill] sm:$0xff] %v18983_v50  ;;  %21752 = vst [vmem:[#allocation24_spill] sm:$0xff] %v18986_v22  ;;  %v18988_v29 = vpop.f32.mrb[103].mxu1  ;;  %v19017_v63 = vpop.trf.xlu0 }
 0x2bc   :  { %21753 = vst [vmem:[#allocation20_spill] sm:$0xff] %v18988_v29 }
 0x2bd   :  { %v4520_v25 = vpop.trf.xlu1 }
 0x2be   :  { %16297 = vmatmul.mubr.msk.f32.gmra.mrb[180].mxu0 %vm374_vm0, %v4520_v25 }
 0x2c1   :  { %v18993_v16 = vpop.f32.mrb[128].mxu0  ;;  %v4551_v40 = vpop.trf.xlu1 }
 0x2c2   :  { %v18995_v15 = vpop.f32.mrb[129].mxu0  ;;  %16299 = vmatprep.mubr.msk.f32.mxu0 %vm374_vm0, %v4551_v40  ;;  %v18998_v7 = vpop.f32.mrb[104].mxu1 }
 0x2c3   :  { %21754 = vst [vmem:[#allocation49_spill] sm:$0xff] %v18995_v15  ;;  %21755 = vst [vmem:[#allocation50_spill] sm:$0xff] %v18998_v7  ;;  %v19000_v39 = vpop.f32.mrb[105].mxu1 }
 0x2c5   :  { %v4552_v23 = vpop.trf.xlu1 }
 0x2c6   :  { %16300 = vmatmul.mubr.msk.f32.gmra.mrb[182].mxu0 %vm374_vm0, %v4552_v23 }
 0x2c9   :  { %v19005_v38 = vpop.f32.mrb[130].mxu0  ;;  %v4583_v48 = vpop.trf.xlu1 }
 0x2ca   :  { %21756 = vst [vmem:[#allocation23_spill] sm:$0xff] %v19005_v38  ;;  %v19007_v2 = vpop.f32.mrb[131].mxu0  ;;  %16302 = vmatprep.mubr.msk.f32.mxu0 %vm374_vm0, %v4583_v48  ;;  %v19010_v28 = vpop.f32.mrb[106].mxu1 }
 0x2cb   :  { %21757 = vst [vmem:[#allocation19_spill] sm:$0xff] %v19007_v2  ;;  %21758 = vst [vmem:[#allocation51_spill] sm:$0xff] %v19010_v28  ;;  %v19012_v59 = vpop.f32.mrb[107].mxu1 }
 0x2cc   :  { %21759 = vst [vmem:[#allocation52_spill] sm:$0xff] %v19012_v59 }
 0x2cd   :  { %v4584_v35 = vpop.trf.xlu1 }
 0x2ce   :  { %16303 = vmatmul.mubr.msk.f32.gmra.mrb[184].mxu0 %vm374_vm0, %v4584_v35 }
 0x2cf   :  { %16409 = vmatprep.mubr.msk.f32.mxu0 %vm374_vm0, %v18745_v37 }
 0x2d1   :  { %v19019_v25 = vpop.f32.mrb[132].mxu0  ;;  %v5544_v40 = vpop.trf.xlu1 }
 0x2d2   :  { %21760 = vst [vmem:[#allocation28_spill] sm:$0xff] %v19019_v25  ;;  %v19021_v23 = vpop.f32.mrb[133].mxu0  ;;  %16342 = vmatprep.mubr.msk.f32.mxu1 %vm374_vm0, %v5544_v40  ;;  %16410 = vmatmul.mubr.msk.f32.vlgmr.msra.gmra.mrb[186].mxu0 %vm374_vm0, %v18743_v5  ;;  %v19026_v48 = vpop.f32.mrb[108].mxu1 }
 0x2d3   :  { %21761 = vst [vmem:[#allocation27_spill] sm:$0xff] %v19021_v23  ;;  %16412 = vmatprep.mubr.msk.f32.mxu0 %vm374_vm0, %v18763_v61  ;;  %v19030_v35 = vpop.f32.mrb[109].mxu1  ;;  %17162 = vmatpush3.bf16.msra.mxu0 %v18753_v45  ;;  %v19041_v40 = vpop.trf.xlu0 }
 0x2d4   :  { %17168 = vmatprep.subr.bf16.mxu0 %v18753_v45 }
 0x2d5   :  { %v5545_v37 = vpop.trf.xlu1 }
 0x2d6   :  { %16343 = vmatmul.mubr.msk.f32.gmra.mrb[156].mxu1 %vm374_vm0, %v5545_v37  ;;  %16413 = vmatmul.mubr.msk.f32.gmra.mrb[188].mxu0 %vm374_vm0, %v18761_v0 }
 0x2d7   :  { %16345 = vmatprep.mubr.msk.f32.mxu1 %vm374_vm0, %v18921_v9  ;;  %16415 = vmatprep.mubr.msk.f32.mxu0 %vm374_vm0, %v18812_v46 }
 0x2d9   :  { %v19043_v61 = vpop.f32.mrb[134].mxu0  ;;  %v5608_v5 = vpop.trf.xlu1 }
 0x2da   :  { %v19045_v25 = vpop.f32.mrb[135].mxu0  ;;  %16346 = vmatmul.mubr.msk.f32.gmra.mrb[158].mxu1 %vm374_vm0, %v18929_v53  ;;  %16416 = vmatmul.mubr.msk.f32.gmra.mrb[190].mxu0 %vm374_vm0, %v18807_v47  ;;  %v19051_v37 = vpop.f32.mrb[110].mxu1 }
 0x2db   :  { %21762 = vst [vmem:[#allocation32_spill] sm:$0xff] %v19051_v37  ;;  %16348 = vmatprep.mubr.msk.f32.mxu1 %vm374_vm0, %v5608_v5  ;;  %16418 = vmatprep.mubr.msk.f32.mxu0 %vm374_vm0, %v18823_v27  ;;  %v19056_v9 = vpop.f32.mrb[111].mxu1  ;;  %v19065_v53 = vpop.trf.xlu0 }
 0x2dc   :  { %21763 = vst [vmem:[#allocation31_spill] sm:$0xff] %v19056_v9 }
 0x2dd   :  { %v5609_v46 = vpop.trf.xlu1 }
 0x2de   :  { %16349 = vmatmul.mubr.msk.f32.gmra.mrb[160].mxu1 %vm374_vm0, %v5609_v46  ;;  %16419 = vmatmul.mubr.msk.f32.gmra.mrb[192].mxu0 %vm374_vm0, %v18819_v26 }
 0x2df   :  { %16351 = vmatprep.mubr.msk.f32.mxu1 %vm374_vm0, %v18939_v51  ;;  %16421 = vmatprep.mubr.msk.f32.mxu0 %vm374_vm0, %v18849_v17 }
 0x2e1   :  { %v19067_v5 = vpop.f32.mrb[136].mxu0  ;;  %v5672_v47 = vpop.trf.xlu1 }
 0x2e2   :  { %v19069_v27 = vpop.f32.mrb[137].mxu0  ;;  %16352 = vmatmul.mubr.msk.f32.gmra.mrb[162].mxu1 %vm374_vm0, %v18949_v24  ;;  %16422 = vmatmul.mubr.msk.f32.gmra.mrb[194].mxu0 %vm374_vm0, %v18844_v57  ;;  %v19075_v46 = vpop.f32.mrb[112].mxu1 }
 0x2e3   :  { %21764 = vst [vmem:[#allocation36_spill] sm:$0xff] %v19069_v27  ;;  %16354 = vmatprep.mubr.msk.f32.mxu1 %vm374_vm0, %v5672_v47  ;;  %16424 = vmatprep.mubr.msk.f32.mxu0 %vm374_vm0, %v18859_v60  ;;  %v19080_v51 = vpop.f32.mrb[113].mxu1  ;;  %v5960_v24 = vpop.trf.xlu0 }
 0x2e5   :  { %v5673_v17 = vpop.trf.xlu1 }
 0x2e6   :  { %16355 = vmatmul.mubr.msk.f32.gmra.mrb[164].mxu1 %vm374_vm0, %v5673_v17  ;;  %16425 = vmatmul.mubr.msk.f32.gmra.mrb[196].mxu0 %vm374_vm0, %v18855_v34 }
 0x2e7   :  { %16357 = vmatprep.mubr.msk.f32.mxu1 %vm374_vm0, %v18955_v49  ;;  %16427 = vmatprep.mubr.msk.f32.mxu0 %vm374_vm0, %v18869_v58 }
 0x2e9   :  { %v19089_v57 = vpop.f32.mrb[138].mxu0  ;;  %v5736_v47 = vpop.trf.xlu1 }
 0x2ea   :  { %21765 = vst [vmem:[#allocation35_spill] sm:$0xff] %v19089_v57  ;;  %v19091_v26 = vpop.f32.mrb[139].mxu0  ;;  %16358 = vmatmul.mubr.msk.f32.gmra.mrb[166].mxu1 %vm374_vm0, %v18967_v55  ;;  %16428 = vmatmul.mubr.msk.f32.gmra.mrb[198].mxu0 %vm374_vm0, %v18865_v13  ;;  %v19097_v17 = vpop.f32.mrb[114].mxu1 }
 0x2eb   :  { %21766 = vst [vmem:[#allocation40_spill] sm:$0xff] %v19097_v17  ;;  %16360 = vmatprep.mubr.msk.f32.mxu1 %vm374_vm0, %v5736_v47  ;;  %16430 = vmatprep.mubr.msk.f32.mxu0 %vm374_vm0, %v18879_v32  ;;  %v19102_v49 = vpop.f32.mrb[115].mxu1  ;;  %v5961_v55 = vpop.trf.xlu0 }
 0x2ed   :  { %v5737_v58 = vpop.trf.xlu1 }
 0x2ee   :  { %16361 = vmatmul.mubr.msk.f32.gmra.mrb[168].mxu1 %vm374_vm0, %v5737_v58  ;;  %16431 = vmatmul.mubr.msk.f32.gmra.mrb[200].mxu0 %vm374_vm0, %v18875_v1 }
 0x2ef   :  { %16363 = vmatprep.mubr.msk.f32.mxu1 %vm374_vm0, %v18979_v41  ;;  %16433 = vmatprep.mubr.msk.f32.mxu0 %vm374_vm0, %v18888_v36 }
 0x2f1   :  { %v19111_v13 = vpop.f32.mrb[140].mxu0  ;;  %v5800_v47 = vpop.trf.xlu1 }
 0x2f2   :  { %v19113_v34 = vpop.f32.mrb[141].mxu0  ;;  %16364 = vmatmul.mubr.msk.f32.gmra.mrb[170].mxu1 %vm374_vm0, %v18991_v12  ;;  %16434 = vmatmul.mubr.msk.f32.gmra.mrb[202].mxu0 %vm374_vm0, %v18885_v52  ;;  %v19119_v58 = vpop.f32.mrb[116].mxu1 }
 0x2f3   :  { %21767 = vst [vmem:[#allocation39_spill] sm:$0xff] %v19113_v34  ;;  %21768 = vst [vmem:[#allocation44_spill] sm:$0xff] %v19119_v58  ;;  %16366 = vmatprep.mubr.msk.f32.mxu1 %vm374_vm0, %v5800_v47  ;;  %16436 = vmatprep.mubr.msk.f32.mxu0 %vm374_vm0, %v18898_v56  ;;  %v19124_v41 = vpop.f32.mrb[117].mxu1  ;;  %v6024_v12 = vpop.trf.xlu0 }
 0x2f4   :  { %21769 = vst [vmem:[#allocation43_spill] sm:$0xff] %v19124_v41 }
 0x2f5   :  { %v5801_v36 = vpop.trf.xlu1 }
 0x2f6   :  { %16367 = vmatmul.mubr.msk.f32.gmra.mrb[172].mxu1 %vm374_vm0, %v5801_v36  ;;  %16437 = vmatmul.mubr.msk.f32.gmra.mrb[204].mxu0 %vm374_vm0, %v18895_v33 }
 0x2f7   :  { %16369 = vmatprep.mubr.msk.f32.mxu1 %vm374_vm0, %v19003_v62  ;;  %16439 = vmatprep.mubr.msk.f32.mxu0 %vm374_vm0, %v18907_v11 }
 0x2f9   :  { %v19133_v52 = vpop.f32.mrb[142].mxu0  ;;  %v5864_v47 = vpop.trf.xlu1 }
 0x2fa   :  { %21770 = vst [vmem:[#allocation8_spill] sm:$0xff] %v19133_v52  ;;  %v19135_v1 = vpop.f32.mrb[143].mxu0  ;;  %16370 = vmatmul.mubr.msk.f32.gmra.mrb[174].mxu1 %vm374_vm0, %v19017_v63  ;;  %16440 = vmatmul.mubr.msk.f32.gmra.mrb[206].mxu0 %vm374_vm0, %v18904_v14  ;;  %v19141_v36 = vpop.f32.mrb[118].mxu1 }
 0x2fb   :  { %21771 = vst [vmem:[#allocation7_spill] sm:$0xff] %v19141_v36  ;;  %16372 = vmatprep.mubr.msk.f32.mxu1 %vm374_vm0, %v5864_v47  ;;  %16442 = vmatprep.mubr.msk.f32.mxu0 %vm374_vm0, %v18923_v19  ;;  %v19146_v62 = vpop.f32.mrb[119].mxu1  ;;  %v6025_v63 = vpop.trf.xlu0 }
 0x2fc   :  { %21772 = vst [vmem:[#allocation53_spill] sm:$0xff] %v19146_v62 }
 0x2fd   :  { %v5865_v11 = vpop.trf.xlu1 }
 0x2fe   :  { %16373 = vmatmul.mubr.msk.f32.gmra.mrb[176].mxu1 %vm374_vm0, %v5865_v11  ;;  %16443 = vmatmul.mubr.msk.f32.gmra.mrb[208].mxu0 %vm374_vm0, %v18918_v4 }
 0x2ff   :  { %16375 = vmatprep.mubr.msk.f32.mxu1 %vm374_vm0, %v19041_v40  ;;  %16445 = vmatprep.mubr.msk.f32.mxu0 %vm374_vm0, %v18937_v44 }
 0x301   :  { %v19155_v14 = vpop.f32.mrb[144].mxu0  ;;  %v5928_v47 = vpop.trf.xlu1 }
 0x302   :  { %21773 = vst [vmem:[#allocation54_spill] sm:$0xff] %v19155_v14  ;;  %v19157_v33 = vpop.f32.mrb[145].mxu0  ;;  %16376 = vmatmul.mubr.msk.f32.gmra.mrb[178].mxu1 %vm374_vm0, %v19065_v53  ;;  %16446 = vmatmul.mubr.msk.f32.gmra.mrb[210].mxu0 %vm374_vm0, %v18934_v20  ;;  %v19163_v11 = vpop.f32.mrb[120].mxu1 }
 0x303   :  { %21774 = vst [vmem:[#allocation55_spill] sm:$0xff] %v19163_v11  ;;  %16378 = vmatprep.mubr.msk.f32.mxu1 %vm374_vm0, %v5928_v47  ;;  %16448 = vmatprep.mubr.msk.f32.mxu0 %vm374_vm0, %v18951_v42  ;;  %v19168_v40 = vpop.f32.mrb[121].mxu1  ;;  %v6088_v53 = vpop.trf.xlu0 }
 0x304   :  { %21775 = vst [vmem:[#allocation56_spill] sm:$0xff] %v19168_v40 }
 0x305   :  { %v5929_v44 = vpop.trf.xlu1 }
 0x306   :  { %16379 = vmatmul.mubr.msk.f32.gmra.mrb[180].mxu1 %vm374_vm0, %v5929_v44  ;;  %16449 = vmatmul.mubr.msk.f32.gmra.mrb[212].mxu0 %vm374_vm0, %v18946_v3 }
 0x307   :  { %16381 = vmatprep.mubr.msk.f32.mxu1 %vm374_vm0, %v5960_v24  ;;  %16451 = vmatprep.mubr.msk.f32.mxu0 %vm374_vm0, %v18964_v18 }
 0x309   :  { %v19176_v20 = vpop.f32.mrb[146].mxu0  ;;  %v5992_v47 = vpop.trf.xlu1 }
 0x30a   :  { %v19178_v4 = vpop.f32.mrb[147].mxu0  ;;  %16382 = vmatmul.mubr.msk.f32.gmra.mrb[182].mxu1 %vm374_vm0, %v5961_v55  ;;  %16452 = vmatmul.mubr.msk.f32.gmra.mrb[214].mxu0 %vm374_vm0, %v18962_v30  ;;  %v19183_v44 = vpop.f32.mrb[122].mxu1 }
 0x30b   :  { %21776 = vst [vmem:[#allocation57_spill] sm:$0xff] %v19183_v44  ;;  %16384 = vmatprep.mubr.msk.f32.mxu1 %vm374_vm0, %v5992_v47  ;;  %16454 = vmatprep.mubr.msk.f32.mxu0 %vm374_vm0, %v18976_v10  ;;  %v19188_v24 = vpop.f32.mrb[123].mxu1  ;;  %v6089_v55 = vpop.trf.xlu0 }
 0x30c   :  { %21777 = vst [vmem:[#allocation58_spill] sm:$0xff] %v19188_v24 }
 0x30d   :  { %v5993_v18 = vpop.trf.xlu1 }
 0x30e   :  { %16385 = vmatmul.mubr.msk.f32.gmra.mrb[184].mxu1 %vm374_vm0, %v5993_v18  ;;  %16455 = vmatmul.mubr.msk.f32.gmra.mrb[216].mxu0 %vm374_vm0, %v18974_v6 }
 0x30f   :  { %16387 = vmatprep.mubr.msk.f32.mxu1 %vm374_vm0, %v6024_v12  ;;  %16457 = vmatprep.mubr.msk.f32.mxu0 %vm374_vm0, %v18988_v29 }
 0x311   :  { %v19196_v30 = vpop.f32.mrb[148].mxu0  ;;  %v6056_v47 = vpop.trf.xlu1 }
 0x312   :  { %v19198_v3 = vpop.f32.mrb[149].mxu0  ;;  %16388 = vmatmul.mubr.msk.f32.gmra.mrb[186].mxu1 %vm374_vm0, %v6025_v63  ;;  %16458 = vmatmul.mubr.msk.f32.gmra.mrb[218].mxu0 %vm374_vm0, %v18986_v22  ;;  %v19203_v18 = vpop.f32.mrb[124].mxu1 }
 0x313   :  { %21778 = vst [vmem:[#allocation59_spill] sm:$0xff] %v19198_v3  ;;  %21779 = vst [vmem:[#allocation60_spill] sm:$0xff] %v19203_v18  ;;  %16390 = vmatprep.mubr.msk.f32.mxu1 %vm374_vm0, %v6056_v47  ;;  %16460 = vmatprep.mubr.msk.f32.mxu0 %vm374_vm0, %v19000_v39  ;;  %v19208_v12 = vpop.f32.mrb[125].mxu1  ;;  %v6152_v63 = vpop.trf.xlu0 }
 0x314   :  { %21780 = vst [vmem:[#allocation61_spill] sm:$0xff] %v19208_v12 }
 0x315   :  { %v6057_v29 = vpop.trf.xlu1 }
 0x316   :  { %16391 = vmatmul.mubr.msk.f32.gmra.mrb[188].mxu1 %vm374_vm0, %v6057_v29  ;;  %16461 = vmatmul.mubr.msk.f32.gmra.mrb[220].mxu0 %vm374_vm0, %v18998_v7 }
 0x317   :  { %16393 = vmatprep.mubr.msk.f32.mxu1 %vm374_vm0, %v6088_v53  ;;  %16463 = vmatprep.mubr.msk.f32.mxu0 %vm374_vm0, %v19012_v59 }
 0x319   :  { %v19216_v22 = vpop.f32.mrb[150].mxu0  ;;  %v6120_v47 = vpop.trf.xlu1 }
 0x31a   :  { %v19218_v6 = vpop.f32.mrb[151].mxu0  ;;  %16394 = vmatmul.mubr.msk.f32.gmra.mrb[190].mxu1 %vm374_vm0, %v6089_v55  ;;  %16464 = vmatmul.mubr.msk.f32.gmra.mrb[222].mxu0 %vm374_vm0, %v19010_v28  ;;  %v19223_v29 = vpop.f32.mrb[126].mxu1 }
 0x31b   :  { %21781 = vst [vmem:[#allocation62_spill] sm:$0xff] %v19223_v29  ;;  %16396 = vmatprep.mubr.msk.f32.mxu1 %vm374_vm0, %v6120_v47  ;;  %16466 = vmatprep.mubr.msk.f32.mxu0 %vm374_vm0, %v19030_v35  ;;  %v19228_v53 = vpop.f32.mrb[127].mxu1  ;;  %v6153_v55 = vpop.trf.xlu0 }
 0x31c   :  { %21782 = vst [vmem:[#allocation63_spill] sm:$0xff] %v19228_v53 }
 0x31d   :  { %v6121_v59 = vpop.trf.xlu1 }
 0x31e   :  { %16397 = vmatmul.mubr.msk.f32.gmra.mrb[192].mxu1 %vm374_vm0, %v6121_v59  ;;  %16467 = vmatmul.mubr.msk.f32.gmra.mrb[224].mxu0 %vm374_vm0, %v19026_v48 }
 0x31f   :  { %16399 = vmatprep.mubr.msk.f32.mxu1 %vm374_vm0, %v6152_v63  ;;  %16469 = vmatprep.mubr.msk.f32.mxu0 %vm374_vm0, %v19056_v9 }
 0x321   :  { %v19236_v28 = vpop.f32.mrb[152].mxu0  ;;  %v6184_v47 = vpop.trf.xlu1 }
 0x322   :  { %v19238_v7 = vpop.f32.mrb[153].mxu0  ;;  %16400 = vmatmul.mubr.msk.f32.gmra.mrb[194].mxu1 %vm374_vm0, %v6153_v55  ;;  %16470 = vmatmul.mubr.msk.f32.gmra.mrb[226].mxu0 %vm374_vm0, %v19051_v37  ;;  %v19243_v59 = vpop.f32.mrb[128].mxu1 }
 0x323   :  { %21783 = vst [vmem:[#allocation64_spill] sm:$0xff] %v19238_v7  ;;  %21784 = vst [vmem:[#allocation65_spill] sm:$0xff] %v19243_v59  ;;  %16402 = vmatprep.mubr.msk.f32.mxu1 %vm374_vm0, %v6184_v47  ;;  %16472 = vmatprep.mubr.msk.f32.mxu0 %vm374_vm0, %v19080_v51  ;;  %v19248_v63 = vpop.f32.mrb[129].mxu1 }
 0x324   :  { %21785 = vst [vmem:[#allocation66_spill] sm:$0xff] %v19248_v63 }
 0x325   :  { %v6185_v9 = vpop.trf.xlu1 }
 0x326   :  { %16403 = vmatmul.mubr.msk.f32.gmra.mrb[196].mxu1 %vm374_vm0, %v6185_v9  ;;  %16473 = vmatmul.mubr.msk.f32.gmra.mrb[228].mxu0 %vm374_vm0, %v19075_v46 }
 0x327   :  { %16509 = vmatprep.mubr.msk.f32.mxu1 %vm374_vm0, %v18959_v31  ;;  %16475 = vmatprep.mubr.msk.f32.mxu0 %vm374_vm0, %v19102_v49 }
 0x329   :  { %v19257_v55 = vpop.f32.mrb[154].mxu0  ;;  %v19259_v47 = vpop.f32.mrb[130].mxu1 }
 0x32a   :  { %21786 = vst [vmem:[#allocation67_spill] sm:$0xff] %v19257_v55  ;;  %21787 = vst [vmem:[#allocation68_spill] sm:$0xff] %v19259_v47  ;;  %v19261_v37 = vpop.f32.mrb[155].mxu0  ;;  %16476 = vmatmul.mubr.msk.f32.gmra.mrb[230].mxu0 %vm374_vm0, %v19097_v17  ;;  %16510 = vmatmul.mubr.msk.f32.vlgmr.msra.gmra.mrb[198].mxu1 %vm374_vm0, %v18957_v43  ;;  %v19267_v9 = vpop.f32.mrb[131].mxu1 }
 0x32b   :  { %21788 = vst [vmem:[#allocation69_spill] sm:$0xff] %v19267_v9  ;;  %16512 = vmatprep.mubr.msk.f32.mxu1 %vm374_vm0, %v18971_v21  ;;  %16478 = vmatprep.mubr.msk.f32.mxu0 %vm374_vm0, %v19124_v41 }
 0x32c   :  { %17166 = vmatpush3.bf16.msra.mxu1 %v18753_v45 }
 0x32d   :  { %17172 = vmatprep.subr.bf16.mxu1 %v18753_v45 }
 0x32e   :  { %16479 = vmatmul.mubr.msk.f32.gmra.mrb[232].mxu0 %vm374_vm0, %v19119_v58  ;;  %16513 = vmatmul.mubr.msk.f32.gmra.mrb[200].mxu1 %vm374_vm0, %v18969_v8 }
 0x32f   :  { %16515 = vmatprep.mubr.msk.f32.mxu1 %vm374_vm0, %v18983_v50  ;;  %16481 = vmatprep.mubr.msk.f32.mxu0 %vm374_vm0, %v19146_v62 }
 0x331   :  { %v19283_v17 = vpop.f32.mrb[156].mxu0  ;;  %v19285_v21 = vpop.f32.mrb[132].mxu1 }
 0x332   :  { %21789 = vst [vmem:[#allocation70_spill] sm:$0xff] %v19285_v21  ;;  %v19287_v41 = vpop.f32.mrb[157].mxu0  ;;  %16482 = vmatmul.mubr.msk.f32.gmra.mrb[234].mxu0 %vm374_vm0, %v19141_v36  ;;  %16516 = vmatmul.mubr.msk.f32.gmra.mrb[202].mxu1 %vm374_vm0, %v18981_v54  ;;  %v19293_v58 = vpop.f32.mrb[133].mxu1 }
 0x333   :  { %21790 = vst [vmem:[#allocation71_spill] sm:$0xff] %v19293_v58  ;;  %16518 = vmatprep.mubr.msk.f32.mxu1 %vm374_vm0, %v18995_v15  ;;  %16484 = vmatprep.mubr.msk.f32.mxu0 %vm374_vm0, %v19168_v40 }
 0x335   :  { %v19299_v62 = vpop.f32.mrb[134].mxu1 }
 0x336   :  { %21791 = vst [vmem:[#allocation72_spill] sm:$0xff] %v19299_v62  ;;  %v19301_v50 = vpop.f32.mrb[135].mxu1  ;;  %16485 = vmatmul.mubr.msk.f32.gmra.mrb[236].mxu0 %vm374_vm0, %v19163_v11  ;;  %16519 = vmatmul.mubr.msk.f32.gmra.mrb[204].mxu1 %vm374_vm0, %v18993_v16 }
 0x337   :  { %21792 = vst [vmem:[#allocation73_spill] sm:$0xff] %v19301_v50  ;;  %16521 = vmatprep.mubr.msk.f32.mxu1 %vm374_vm0, %v19007_v2  ;;  %16487 = vmatprep.mubr.msk.f32.mxu0 %vm374_vm0, %v19188_v24  ;;  %v21797_v2 = vld [vmem:[#allocation28_spill] sm:$0xff] }
 0x339   :  { %v19311_v36 = vpop.f32.mrb[158].mxu0  ;;  %v19313_v15 = vpop.f32.mrb[136].mxu1 }
 0x33a   :  { %21793 = vst [vmem:[#allocation74_spill] sm:$0xff] %v19311_v36  ;;  %21794 = vst [vmem:[#allocation75_spill] sm:$0xff] %v19313_v15  ;;  %v19315_v40 = vpop.f32.mrb[159].mxu0  ;;  %v19317_v54 = vpop.f32.mrb[137].mxu1  ;;  %16488 = vmatmul.mubr.msk.f32.gmra.mrb[238].mxu0 %vm374_vm0, %v19183_v44  ;;  %16522 = vmatmul.mubr.msk.f32.gmra.mrb[206].mxu1 %vm374_vm0, %v19005_v38 }
 0x33b   :  { %21795 = vst [vmem:[#allocation76_spill] sm:$0xff] %v19317_v54  ;;  %16524 = vmatprep.mubr.msk.f32.mxu1 %vm374_vm0, %v19021_v23  ;;  %16490 = vmatprep.mubr.msk.f32.mxu0 %vm374_vm0, %v19208_v12 }
 0x33d   :  { %v19327_v24 = vpop.f32.mrb[138].mxu1 }
 0x33e   :  { %21796 = vst [vmem:[#allocation77_spill] sm:$0xff] %v19327_v24  ;;  %v19329_v11 = vpop.f32.mrb[139].mxu1  ;;  %16491 = vmatmul.mubr.msk.f32.gmra.mrb[240].mxu0 %vm374_vm0, %v19203_v18  ;;  %16525 = vmatmul.mubr.msk.f32.gmra.mrb[208].mxu1 %vm374_vm0, %v21797_v2 }
 0x33f   :  { %16527 = vmatprep.mubr.msk.f32.mxu1 %vm374_vm0, %v19045_v25  ;;  %16493 = vmatprep.mubr.msk.f32.mxu0 %vm374_vm0, %v19228_v53 }
 0x341   :  { %v19339_v44 = vpop.f32.mrb[160].mxu0  ;;  %v19341_v23 = vpop.f32.mrb[140].mxu1 }
 0x342   :  { %21798 = vst [vmem:[#allocation28_spill] sm:$0xff] %v19341_v23  ;;  %v19343_v12 = vpop.f32.mrb[161].mxu0  ;;  %v19345_v38 = vpop.f32.mrb[141].mxu1  ;;  %16494 = vmatmul.mubr.msk.f32.gmra.mrb[242].mxu0 %vm374_vm0, %v19223_v29  ;;  %16528 = vmatmul.mubr.msk.f32.gmra.mrb[210].mxu1 %vm374_vm0, %v19043_v61 }
 0x343   :  { %21799 = vst [vmem:[#allocation78_spill] sm:$0xff] %v19345_v38  ;;  %16530 = vmatprep.mubr.msk.f32.mxu1 %vm374_vm0, %v19069_v27  ;;  %16496 = vmatprep.mubr.msk.f32.mxu0 %vm374_vm0, %v19248_v63 }
 0x345   :  { %v19355_v53 = vpop.f32.mrb[142].mxu1 }
 0x346   :  { %21800 = vst [vmem:[#allocation79_spill] sm:$0xff] %v19355_v53  ;;  %v19357_v18 = vpop.f32.mrb[143].mxu1  ;;  %16497 = vmatmul.mubr.msk.f32.gmra.mrb[244].mxu0 %vm374_vm0, %v19243_v59  ;;  %16531 = vmatmul.mubr.msk.f32.gmra.mrb[212].mxu1 %vm374_vm0, %v19067_v5 }
 0x347   :  { %16533 = vmatprep.mubr.msk.f32.mxu1 %vm374_vm0, %v19091_v26  ;;  %16499 = vmatprep.mubr.msk.f32.mxu0 %vm374_vm0, %v19267_v9 }
 0x349   :  { %v19367_v29 = vpop.f32.mrb[162].mxu0  ;;  %v19369_v27 = vpop.f32.mrb[144].mxu1 }
 0x34a   :  { %v19371_v63 = vpop.f32.mrb[163].mxu0  ;;  %16500 = vmatmul.mubr.msk.f32.gmra.mrb[246].mxu0 %vm374_vm0, %v19259_v47  ;;  %16534 = vmatmul.mubr.msk.f32.gmra.mrb[214].mxu1 %vm374_vm0, %v19089_v57  ;;  %v19377_v59 = vpop.f32.mrb[145].mxu1 }
 0x34b   :  { %16536 = vmatprep.mubr.msk.f32.mxu1 %vm374_vm0, %v19113_v34  ;;  %16502 = vmatprep.mubr.msk.f32.mxu0 %vm374_vm0, %v19293_v58 }
 0x34d   :  { %v19383_v9 = vpop.f32.mrb[146].mxu1 }
 0x34e   :  { %21801 = vst [vmem:[#allocation80_spill] sm:$0xff] %v19383_v9  ;;  %16503 = vmatmul.mubr.msk.f32.gmra.mrb[248].mxu0 %vm374_vm0, %v19285_v21  ;;  %16537 = vmatmul.mubr.msk.f32.gmra.mrb[216].mxu1 %vm374_vm0, %v19111_v13  ;;  %v19389_v47 = vpop.f32.mrb[147].mxu1 }
 0x34f   :  { %16539 = vmatprep.mubr.msk.f32.mxu1 %vm374_vm0, %v19135_v1  ;;  %16609 = vmatprep.mubr.msk.f32.mxu0 %vm374_vm0, %v19301_v50 }
 0x351   :  { %v19395_v34 = vpop.f32.mrb[164].mxu0  ;;  %v19397_v57 = vpop.f32.mrb[148].mxu1 }
 0x352   :  { %21802 = vst [vmem:[#allocation81_spill] sm:$0xff] %v19395_v34  ;;  %v19399_v58 = vpop.f32.mrb[165].mxu0  ;;  %16540 = vmatmul.mubr.msk.f32.gmra.mrb[218].mxu1 %vm374_vm0, %v19133_v52  ;;  %16610 = vmatmul.mubr.msk.f32.vlgmr.msra.gmra.mrb[250].mxu0 %vm374_vm0, %v19299_v62  ;;  %v19405_v21 = vpop.f32.mrb[149].mxu1 }
 0x353   :  { %16542 = vmatprep.mubr.msk.f32.mxu1 %vm374_vm0, %v19157_v33  ;;  %16612 = vmatprep.mubr.msk.f32.mxu0 %vm374_vm0, %v19317_v54 }
 0x354   :  { %17170 = vmatpush3.bf16.msra.mxu0 %v18753_v45 }
 0x355   :  { %v19412_v50 = vpop.f32.mrb[150].mxu1 }
 0x356   :  { %21803 = vst [vmem:[#allocation82_spill] sm:$0xff] %v19412_v50  ;;  %16543 = vmatmul.mubr.msk.f32.gmra.mrb[220].mxu1 %vm374_vm0, %v19155_v14  ;;  %16613 = vmatmul.mubr.msk.f32.gmra.mrb[252].mxu0 %vm374_vm0, %v19313_v15  ;;  %v19418_v52 = vpop.f32.mrb[151].mxu1 }
 0x357   :  { %16545 = vmatprep.mubr.msk.f32.mxu1 %vm374_vm0, %v19178_v4  ;;  %16615 = vmatprep.mubr.msk.f32.mxu0 %vm374_vm0, %v19329_v11 }
 0x359   :  { %v19424_v62 = vpop.f32.mrb[166].mxu0 }
 0x35a   :  { %21804 = vst [vmem:[#allocation83_spill] sm:$0xff] %v19424_v62  ;;  %v19426_v54 = vpop.f32.mrb[167].mxu0  ;;  %16546 = vmatmul.mubr.msk.f32.gmra.mrb[222].mxu1 %vm374_vm0, %v19176_v20  ;;  %16616 = vmatmul.mubr.msk.f32.gmra.mrb[254].mxu0 %vm374_vm0, %v19327_v24  ;;  %v19432_v14 = vpop.f32.mrb[152].mxu1 }
 0x35b   :  { %21805 = vst [vmem:[#allocation84_spill] sm:$0xff] %v19426_v54  ;;  %21806 = vst [vmem:[#allocation85_spill] sm:$0xff] %v19432_v14  ;;  %16548 = vmatprep.mubr.msk.f32.mxu1 %vm374_vm0, %v19198_v3  ;;  %16618 = vmatprep.mubr.msk.f32.mxu0 %vm374_vm0, %v19345_v38  ;;  %v19438_v15 = vpop.f32.mrb[153].mxu1 }
 0x35e   :  { %16549 = vmatmul.mubr.msk.f32.gmra.mrb[224].mxu1 %vm374_vm0, %v19196_v30  ;;  %16619 = vmatmul.mubr.msk.f32.gmra.mrb[0].mxu0 %vm374_vm0, %v19341_v23 }
 0x35f   :  { %16551 = vmatprep.mubr.msk.f32.mxu1 %vm374_vm0, %v19218_v6  ;;  %16621 = vmatprep.mubr.msk.f32.mxu0 %vm374_vm0, %v19357_v18 }
 0x361   :  { %v19448_v24 = vpop.f32.mrb[168].mxu0 }
 0x362   :  { %21807 = vst [vmem:[#allocation86_spill] sm:$0xff] %v19448_v24  ;;  %v19450_v3 = vpop.f32.mrb[169].mxu0  ;;  %16552 = vmatmul.mubr.msk.f32.gmra.mrb[226].mxu1 %vm374_vm0, %v19216_v22  ;;  %16622 = vmatmul.mubr.msk.f32.gmra.mrb[2].mxu0 %vm374_vm0, %v19355_v53  ;;  %v19456_v38 = vpop.f32.mrb[154].mxu1 }
 0x363   :  { %21808 = vst [vmem:[#allocation87_spill] sm:$0xff] %v19450_v3  ;;  %21809 = vst [vmem:[#allocation88_spill] sm:$0xff] %v19456_v38  ;;  %16554 = vmatprep.mubr.msk.f32.mxu1 %vm374_vm0, %v19238_v7  ;;  %16624 = vmatprep.mubr.msk.f32.mxu0 %vm374_vm0, %v19377_v59  ;;  %v19462_v23 = vpop.f32.mrb[155].mxu1 }
 0x364   :  { %21810 = vst [vmem:[#allocation89_spill] sm:$0xff] %v19462_v23 }
 0x366   :  { %16555 = vmatmul.mubr.msk.f32.gmra.mrb[228].mxu1 %vm374_vm0, %v19236_v28  ;;  %16625 = vmatmul.mubr.msk.f32.gmra.mrb[4].mxu0 %vm374_vm0, %v19369_v27 }
 0x367   :  { %16557 = vmatprep.mubr.msk.f32.mxu1 %vm374_vm0, %v19261_v37  ;;  %16627 = vmatprep.mubr.msk.f32.mxu0 %vm374_vm0, %v19389_v47 }
 0x369   :  { %v19472_v53 = vpop.f32.mrb[170].mxu0 }
 0x36a   :  { %21811 = vst [vmem:[#allocation90_spill] sm:$0xff] %v19472_v53  ;;  %v19474_v7 = vpop.f32.mrb[171].mxu0  ;;  %16558 = vmatmul.mubr.msk.f32.gmra.mrb[230].mxu1 %vm374_vm0, %v19257_v55  ;;  %16628 = vmatmul.mubr.msk.f32.gmra.mrb[6].mxu0 %vm374_vm0, %v19383_v9 }
 0x36b   :  { %21812 = vst [vmem:[#allocation91_spill] sm:$0xff] %v19474_v7  ;;  %16560 = vmatprep.mubr.msk.f32.mxu1 %vm374_vm0, %v19287_v41  ;;  %16630 = vmatprep.mubr.msk.f32.mxu0 %vm374_vm0, %v19405_v21 }
 0x36e   :  { %16561 = vmatmul.mubr.msk.f32.gmra.mrb[232].mxu1 %vm374_vm0, %v19283_v17  ;;  %16631 = vmatmul.mubr.msk.f32.gmra.mrb[8].mxu0 %vm374_vm0, %v19397_v57 }
 0x36f   :  { %16563 = vmatprep.mubr.msk.f32.mxu1 %vm374_vm0, %v19315_v40  ;;  %16633 = vmatprep.mubr.msk.f32.mxu0 %vm374_vm0, %v19418_v52 }
 0x371   :  { %v19492_v55 = vpop.f32.mrb[172].mxu0 }
 0x372   :  { %21813 = vst [vmem:[#allocation92_spill] sm:$0xff] %v19492_v55  ;;  %v19494_v9 = vpop.f32.mrb[173].mxu0  ;;  %16564 = vmatmul.mubr.msk.f32.gmra.mrb[234].mxu1 %vm374_vm0, %v19311_v36  ;;  %16634 = vmatmul.mubr.msk.f32.gmra.mrb[10].mxu0 %vm374_vm0, %v19412_v50 }
 0x373   :  { %21814 = vst [vmem:[#allocation93_spill] sm:$0xff] %v19494_v9  ;;  %16566 = vmatprep.mubr.msk.f32.mxu1 %vm374_vm0, %v19343_v12  ;;  %16636 = vmatprep.mubr.msk.f32.mxu0 %vm374_vm0, %v19438_v15 }
 0x376   :  { %16567 = vmatmul.mubr.msk.f32.gmra.mrb[236].mxu1 %vm374_vm0, %v19339_v44  ;;  %16637 = vmatmul.mubr.msk.f32.gmra.mrb[12].mxu0 %vm374_vm0, %v19432_v14 }
 0x377   :  { %16569 = vmatprep.mubr.msk.f32.mxu1 %vm374_vm0, %v19371_v63  ;;  %16639 = vmatprep.mubr.msk.f32.mxu0 %vm374_vm0, %v19462_v23 }
 0x379   :  { %v19512_v36 = vpop.f32.mrb[174].mxu0 }
 0x37a   :  { %21815 = vst [vmem:[#allocation94_spill] sm:$0xff] %v19512_v36  ;;  %v19514_v50 = vpop.f32.mrb[175].mxu0  ;;  %16570 = vmatmul.mubr.msk.f32.gmra.mrb[238].mxu1 %vm374_vm0, %v19367_v29  ;;  %16640 = vmatmul.mubr.msk.f32.gmra.mrb[14].mxu0 %vm374_vm0, %v19456_v38 }
 0x37b   :  { %21816 = vst [vmem:[#allocation95_spill] sm:$0xff] %v19514_v50  ;;  %16572 = vmatprep.mubr.msk.f32.mxu1 %vm374_vm0, %v19399_v58 }
 0x37e   :  { %16573 = vmatmul.mubr.msk.f32.gmra.mrb[240].mxu1 %vm374_vm0, %v19395_v34 }
 0x37f   :  { %16575 = vmatprep.mubr.msk.f32.mxu1 %vm374_vm0, %v19426_v54 }
 0x381   :  { %v19526_v23 = vpop.f32.mrb[176].mxu0 }
 0x382   :  { %21817 = vst [vmem:[#allocation96_spill] sm:$0xff] %v19526_v23  ;;  %v19528_v14 = vpop.f32.mrb[177].mxu0  ;;  %16576 = vmatmul.mubr.msk.f32.gmra.mrb[242].mxu1 %vm374_vm0, %v19424_v62 }
 0x383   :  { %21818 = vst [vmem:[#allocation97_spill] sm:$0xff] %v19528_v14  ;;  %16578 = vmatprep.mubr.msk.f32.mxu1 %vm374_vm0, %v19450_v3 }
 0x386   :  { %16579 = vmatmul.mubr.msk.f32.gmra.mrb[244].mxu1 %vm374_vm0, %v19448_v24 }
 0x387   :  { %16581 = vmatprep.mubr.msk.f32.mxu1 %vm374_vm0, %v19474_v7 }
 0x389   :  { %v19538_v34 = vpop.f32.mrb[178].mxu0 }
 0x38a   :  { %21819 = vst [vmem:[#allocation98_spill] sm:$0xff] %v19538_v34  ;;  %v19540_v38 = vpop.f32.mrb[179].mxu0  ;;  %16582 = vmatmul.mubr.msk.f32.gmra.mrb[246].mxu1 %vm374_vm0, %v19472_v53 }
 0x38b   :  { %21820 = vst [vmem:[#allocation99_spill] sm:$0xff] %v19540_v38  ;;  %16584 = vmatprep.mubr.msk.f32.mxu1 %vm374_vm0, %v19494_v9 }
 0x38e   :  { %16585 = vmatmul.mubr.msk.f32.gmra.mrb[248].mxu1 %vm374_vm0, %v19492_v55 }
 0x38f   :  { %16587 = vmatprep.mubr.msk.f32.mxu1 %vm374_vm0, %v19514_v50  ;;  %v21829_v50 = vld [vmem:[#allocation18_spill] sm:$0xff] }
 0x391   :  { %v19550_v24 = vpop.f32.mrb[180].mxu0 }
 0x392   :  { %21821 = vst [vmem:[#allocation100_spill] sm:$0xff] %v19550_v24  ;;  %v19552_v3 = vpop.f32.mrb[181].mxu0  ;;  %16588 = vmatmul.mubr.msk.f32.gmra.mrb[250].mxu1 %vm374_vm0, %v19512_v36 }
 0x393   :  { %21822 = vst [vmem:[#allocation101_spill] sm:$0xff] %v19552_v3  ;;  %16590 = vmatprep.mubr.msk.f32.mxu1 %vm374_vm0, %v19528_v14 }
 0x396   :  { %16591 = vmatmul.mubr.msk.f32.gmra.mrb[252].mxu1 %vm374_vm0, %v19526_v23 }
 0x397   :  { %16593 = vmatprep.mubr.msk.f32.mxu1 %vm374_vm0, %v19540_v38 }
 0x399   :  { %v19562_v55 = vpop.f32.mrb[182].mxu0 }
 0x39a   :  { %21823 = vst [vmem:[#allocation102_spill] sm:$0xff] %v19562_v55  ;;  %v19564_v9 = vpop.f32.mrb[183].mxu0  ;;  %16594 = vmatmul.mubr.msk.f32.gmra.mrb[254].mxu1 %vm374_vm0, %v19538_v34  ;;  %v21827_v34 = vld [vmem:[#allocation13_spill] sm:$0xff] }
 0x39b   :  { %21824 = vst [vmem:[#allocation103_spill] sm:$0xff] %v19564_v9  ;;  %16596 = vmatprep.mubr.msk.f32.mxu1 %vm374_vm0, %v19552_v3  ;;  %v8845_v38 = vmul.f32 %v21827_v34, %v21827_v34 }
 0x39e   :  { %16597 = vmatmul.mubr.msk.f32.gmra.mrb[0].mxu1 %vm374_vm0, %v19550_v24 }
 0x39f   :  { %16599 = vmatprep.mubr.msk.f32.mxu1 %vm374_vm0, %v19564_v9  ;;  %v21828_v9 = vld [vmem:[#allocation14_spill] sm:$0xff] }
 0x3a0   :  { %v8846_v24 = vmul.f32 %v21828_v9, %v21828_v9 }
 0x3a1   :  { %v19574_v23 = vpop.f32.mrb[184].mxu0 }
 0x3a2   :  { %21825 = vst [vmem:[#allocation104_spill] sm:$0xff] %v19574_v23  ;;  %v19576_v14 = vpop.f32.mrb[185].mxu0  ;;  %16600 = vmatmul.mubr.msk.f32.gmra.mrb[2].mxu1 %vm374_vm0, %v19562_v55  ;;  %v8847_v55 = vmul.f32 %v21829_v50, %v21829_v50 }
 0x3a3   :  { %21826 = vst [vmem:[#allocation105_spill] sm:$0xff] %v19576_v14  ;;  %16602 = vmatprep.mubr.msk.f32.mxu1 %vm374_vm0, %v19576_v14 }
 0x3a5   :  { %v16411_v3 = vpop.f32.mrb[186].mxu0 }
 0x3a6   :  { %v7035_v36 = vpop.f32.mrb[187].mxu0  ;;  %16603 = vmatmul.mubr.msk.f32.gmra.mrb[4].mxu1 %vm374_vm0, %v19574_v23  ;;  %v7362_v7 = vsel %vm7354_vm1, %v16411_v3, 0.0  ;;  %v8848_v3 = vmul.f32 %v18761_v0, %v18761_v0 }
 0x3a7   :  { %16709 = vmatprep.mubr.msk.f32.mxu1 %vm374_vm0, %v8845_v38  ;;  %v7355_v38 = vsel %vm7354_vm1, %v7035_v36, 0.0 }
 0x3a9   :  { %v19591_v53 = vpop.f32.mrb[156].mxu1  ;;  %v16414_v14 = vpop.f32.mrb[188].mxu0 }
 0x3aa   :  { %21830 = vst [vmem:[#allocation13_spill] sm:$0xff] %v19591_v53  ;;  %v7363_v34 = vsel %vm7354_vm1, %v16414_v14, 0.0  ;;  %v19595_v62 = vpop.f32.mrb[157].mxu1  ;;  %v7045_v54 = vpop.f32.mrb[189].mxu0  ;;  %16710 = vmatmul.mubr.msk.f32.vlgmr.msra.gmra.mrb[6].mxu1 %vm374_vm0, %v8846_v24  ;;  %v21832_v14 = vld [vmem:[#allocation22_spill] sm:$0xff] }
 0x3ab   :  { %21831 = vst [vmem:[#allocation14_spill] sm:$0xff] %v19595_v62  ;;  %v7364_v23 = vadd.f32 %v7363_v34, %v7362_v7  ;;  %v7356_v9 = vsel %vm7354_vm1, %v7045_v54, 0.0  ;;  %16642 = vmatprep.mubr.msk.f32.mxu0 %vm374_vm0, %v19595_v62  ;;  %16712 = vmatprep.mubr.msk.f32.mxu1 %vm374_vm0, %v8847_v55  ;;  %v8849_v36 = vmul.f32 %v21832_v14, %v21832_v14 }
 0x3ac   :  { %v7357_v50 = vadd.f32 %v7356_v9, %v7355_v38  ;;  %16643 = vmatmul.mubr.msk.f32.gmra.mrb[16].mxu0 %vm374_vm0, %v19591_v53  ;;  %17174 = vmatpush3.bf16.msra.mxu1 %v18753_v45  ;;  %v21835_v45 = vld [vmem:[#allocation17_spill] sm:$0xff] }
 0x3ad   :  { %v19610_v7 = vpop.f32.mrb[158].mxu1  ;;  %v16417_v54 = vpop.f32.mrb[190].mxu0  ;;  %v8850_v9 = vmul.f32 %v21835_v45, %v21835_v45 }
 0x3ae   :  { %21833 = vst [vmem:[#allocation18_spill] sm:$0xff] %v19610_v7  ;;  %v7365_v24 = vsel %vm7354_vm1, %v16417_v54, 0.0  ;;  %v19613_v34 = vpop.f32.mrb[159].mxu1  ;;  %v7055_v55 = vpop.f32.mrb[191].mxu0  ;;  %16713 = vmatmul.mubr.msk.f32.gmra.mrb[8].mxu1 %vm374_vm0, %v8848_v3  ;;  %v21836_v54 = vld [vmem:[#allocation26_spill] sm:$0xff] }
 0x3af   :  { %21834 = vst [vmem:[#allocation22_spill] sm:$0xff] %v19613_v34  ;;  %v7366_v0 = vadd.f32 %v7365_v24, %v7364_v23  ;;  %v7358_v38 = vsel %vm7354_vm1, %v7055_v55, 0.0  ;;  %16645 = vmatprep.mubr.msk.f32.mxu0 %vm374_vm0, %v19613_v34  ;;  %16715 = vmatprep.mubr.msk.f32.mxu1 %vm374_vm0, %v8849_v36  ;;  %v8851_v53 = vmul.f32 %v21836_v54, %v21836_v54 }
 0x3b0   :  { %v7359_v14 = vadd.f32 %v7358_v38, %v7357_v50  ;;  %16646 = vmatmul.mubr.msk.f32.gmra.mrb[18].mxu0 %vm374_vm0, %v19610_v7  ;;  %v21838_v50 = vld [vmem:[#allocation21_spill] sm:$0xff] }
 0x3b1   :  { %v19626_v62 = vpop.f32.mrb[160].mxu1  ;;  %v16420_v23 = vpop.f32.mrb[192].mxu0  ;;  %v8852_v38 = vmul.f32 %v21838_v50, %v21838_v50 }
 0x3b2   :  { %21837 = vst [vmem:[#allocation17_spill] sm:$0xff] %v19626_v62  ;;  %v7367_v3 = vsel %vm7354_vm1, %v16420_v23, 0.0  ;;  %v19629_v24 = vpop.f32.mrb[161].mxu1  ;;  %v7065_v55 = vpop.f32.mrb[193].mxu0  ;;  %16716 = vmatmul.mubr.msk.f32.gmra.mrb[10].mxu1 %vm374_vm0, %v8850_v9  ;;  %v21839_v23 = vld [vmem:[#allocation30_spill] sm:$0xff] }
 0x3b3   :  { %v7368_v36 = vadd.f32 %v7367_v3, %v7366_v0  ;;  %v7360_v45 = vsel %vm7354_vm1, %v7065_v55, 0.0  ;;  %16648 = vmatprep.mubr.msk.f32.mxu0 %vm374_vm0, %v19629_v24  ;;  %16718 = vmatprep.mubr.msk.f32.mxu1 %vm374_vm0, %v8851_v53  ;;  %v8853_v7 = vmul.f32 %v21839_v23, %v21839_v23  ;;  %v21842_v53 = vld [vmem:[#allocation25_spill] sm:$0xff]  ;;  %v8855_v55 = vmul.f32 %v18859_v60, %v18859_v60 }
 0x3b4   :  { %v7361_v54 = vadd.f32 %v7360_v45, %v7359_v14  ;;  %16649 = vmatmul.mubr.msk.f32.gmra.mrb[20].mxu0 %vm374_vm0, %v19626_v62  ;;  %v8854_v14 = vmul.f32 %v21842_v53, %v21842_v53  ;;  %v21844_v60 = vld [vmem:[#allocation29_spill] sm:$0xff] }
 0x3b5   :  { %v19642_v34 = vpop.f32.mrb[162].mxu1  ;;  %v16423_v0 = vpop.f32.mrb[194].mxu0 }
 0x3b6   :  { %21840 = vst [vmem:[#allocation26_spill] sm:$0xff] %v19642_v34  ;;  %16719 = vmatmul.mubr.msk.f32.gmra.mrb[12].mxu1 %vm374_vm0, %v8852_v38  ;;  %11104 = vxpose.xlu0.b32.start [1/2] (short) (narrow) %v7361_v54, 8  ;;  %v19645_v9 = vpop.f32.mrb[163].mxu1  ;;  %v7075_v3 = vpop.f32.mrb[195].mxu0  ;;  %v7376_v38 = vsel %vm7354_vm1, %v16423_v0, 0.0  ;;  %v8856_v0 = vmul.f32 %v21844_v60, %v21844_v60 }
 0x3b7   :  { %21841 = vst [vmem:[#allocation21_spill] sm:$0xff] %v19645_v9  ;;  %16651 = vmatprep.mubr.msk.f32.mxu0 %vm374_vm0, %v19645_v9  ;;  %16721 = vmatprep.mubr.msk.f32.mxu1 %vm374_vm0, %v8853_v7  ;;  %v7369_v53 = vsel %vm7354_vm1, %v7075_v3, 0.0 }
 0x3b8   :  { %16652 = vmatmul.mubr.msk.f32.gmra.mrb[22].mxu0 %vm374_vm0, %v19642_v34 }
 0x3b9   :  { %v19656_v45 = vpop.f32.mrb[164].mxu1  ;;  %v16426_v50 = vpop.f32.mrb[196].mxu0 }
 0x3ba   :  { %21843 = vst [vmem:[#allocation30_spill] sm:$0xff] %v19656_v45  ;;  %v7377_v54 = vsel %vm7354_vm1, %v16426_v50, 0.0  ;;  %11105 = vxpose.xlu0.b32.end [2/2] (short) (narrow) %v7368_v36, 8  ;;  %v19660_v23 = vpop.f32.mrb[165].mxu1  ;;  %v7085_v7 = vpop.f32.mrb[197].mxu0  ;;  %16722 = vmatmul.mubr.msk.f32.gmra.mrb[14].mxu1 %vm374_vm0, %v8854_v14  ;;  %v21845_v36 = vld [vmem:[#allocation33_spill] sm:$0xff] }
 0x3bb   :  { %v7378_v9 = vadd.f32 %v7377_v54, %v7376_v38  ;;  %v7370_v34 = vsel %vm7354_vm1, %v7085_v7, 0.0  ;;  %16654 = vmatprep.mubr.msk.f32.mxu0 %vm374_vm0, %v19660_v23  ;;  %16724 = vmatprep.mubr.msk.f32.mxu1 %vm374_vm0, %v8855_v55  ;;  %v8857_v14 = vmul.f32 %v21845_v36, %v21845_v36 }
 0x3bc   :  { %v7371_v50 = vadd.f32 %v7370_v34, %v7369_v53  ;;  %16655 = vmatmul.mubr.msk.f32.gmra.mrb[24].mxu0 %vm374_vm0, %v19656_v45  ;;  %v21848_v34 = vld [vmem:[#allocation34_spill] sm:$0xff] }
 0x3bd   :  { %v19674_v62 = vpop.f32.mrb[166].mxu1  ;;  %v16429_v3 = vpop.f32.mrb[198].mxu0  ;;  %v8858_v53 = vmul.f32 %v21848_v34, %v21848_v34 }
 0x3be   :  { %21846 = vst [vmem:[#allocation25_spill] sm:$0xff] %v19674_v62  ;;  %v7379_v38 = vsel %vm7354_vm1, %v16429_v3, 0.0  ;;  %v19677_v54 = vpop.f32.mrb[167].mxu1  ;;  %v7095_v7 = vpop.f32.mrb[199].mxu0  ;;  %16725 = vmatmul.mubr.msk.f32.gmra.mrb[16].mxu1 %vm374_vm0, %v8856_v0  ;;  %v8859_v3 = vmul.f32 %v18879_v32, %v18879_v32 }
 0x3bf   :  { %21847 = vst [vmem:[#allocation29_spill] sm:$0xff] %v19677_v54  ;;  %v7380_v55 = vadd.f32 %v7379_v38, %v7378_v9  ;;  %v7372_v60 = vsel %vm7354_vm1, %v7095_v7, 0.0  ;;  %16657 = vmatprep.mubr.msk.f32.mxu0 %vm374_vm0, %v19677_v54  ;;  %16727 = vmatprep.mubr.msk.f32.mxu1 %vm374_vm0, %v8857_v14 }
 0x3c0   :  { %v7373_v36 = vadd.f32 %v7372_v60, %v7371_v50  ;;  %16658 = vmatmul.mubr.msk.f32.gmra.mrb[26].mxu0 %vm374_vm0, %v19674_v62  ;;  %v21850_v50 = vld [vmem:[#allocation38_spill] sm:$0xff] }
 0x3c1   :  { %v19690_v45 = vpop.f32.mrb[168].mxu1  ;;  %v16432_v9 = vpop.f32.mrb[200].mxu0  ;;  %v8860_v32 = vmul.f32 %v21850_v50, %v21850_v50 }
 0x3c2   :  { %21849 = vst [vmem:[#allocation33_spill] sm:$0xff] %v19690_v45  ;;  %v7381_v0 = vsel %vm7354_vm1, %v16432_v9, 0.0  ;;  %v19693_v38 = vpop.f32.mrb[169].mxu1  ;;  %v7105_v7 = vpop.f32.mrb[201].mxu0  ;;  %16728 = vmatmul.mubr.msk.f32.gmra.mrb[18].mxu1 %vm374_vm0, %v8858_v53  ;;  %v21851_v9 = vld [vmem:[#allocation42_spill] sm:$0xff] }
 0x3c3   :  { %v7382_v14 = vadd.f32 %v7381_v0, %v7380_v55  ;;  %v7374_v34 = vsel %vm7354_vm1, %v7105_v7, 0.0  ;;  %16660 = vmatprep.mubr.msk.f32.mxu0 %vm374_vm0, %v19693_v38  ;;  %16730 = vmatprep.mubr.msk.f32.mxu1 %vm374_vm0, %v8859_v3  ;;  %v8861_v62 = vmul.f32 %v21851_v9, %v21851_v9  ;;  %v8863_v7 = vmul.f32 %v18898_v56, %v18898_v56  ;;  %v21856_v56 = vld [vmem:[#allocation41_spill] sm:$0xff] }
 0x3c4   :  { %v7375_v60 = vadd.f32 %v7374_v34, %v7373_v36  ;;  %16661 = vmatmul.mubr.msk.f32.gmra.mrb[28].mxu0 %vm374_vm0, %v19690_v45  ;;  %v21854_v36 = vld [vmem:[#allocation37_spill] sm:$0xff] }
 0x3c5   :  { %v19706_v54 = vpop.f32.mrb[170].mxu1  ;;  %v16435_v55 = vpop.f32.mrb[202].mxu0  ;;  %v8862_v3 = vmul.f32 %v21854_v36, %v21854_v36 }
 0x3c6   :  { %21852 = vst [vmem:[#allocation34_spill] sm:$0xff] %v19706_v54  ;;  %16731 = vmatmul.mubr.msk.f32.gmra.mrb[20].mxu1 %vm374_vm0, %v8860_v32  ;;  %11136 = vxpose.xlu1.b32.start [1/2] (short) (narrow) %v7375_v60, 8  ;;  %v19709_v53 = vpop.f32.mrb[171].mxu1  ;;  %v7115_v0 = vpop.f32.mrb[203].mxu0  ;;  %v7390_v32 = vsel %vm7354_vm1, %v16435_v55, 0.0  ;;  %v8864_v55 = vmul.f32 %v21856_v56, %v21856_v56 }
 0x3c7   :  { %21853 = vst [vmem:[#allocation38_spill] sm:$0xff] %v19709_v53  ;;  %16663 = vmatprep.mubr.msk.f32.mxu0 %vm374_vm0, %v19709_v53  ;;  %16733 = vmatprep.mubr.msk.f32.mxu1 %vm374_vm0, %v8861_v62  ;;  %v7383_v36 = vsel %vm7354_vm1, %v7115_v0, 0.0 }
 0x3c8   :  { %16664 = vmatmul.mubr.msk.f32.gmra.mrb[30].mxu0 %vm374_vm0, %v19706_v54 }
 0x3c9   :  { %v19720_v34 = vpop.f32.mrb[172].mxu1  ;;  %v16438_v50 = vpop.f32.mrb[204].mxu0 }
 0x3ca   :  { %21855 = vst [vmem:[#allocation42_spill] sm:$0xff] %v19720_v34  ;;  %v7391_v60 = vsel %vm7354_vm1, %v16438_v50, 0.0  ;;  %11137 = vxpose.xlu1.b32.end [2/2] (short) (narrow) %v7382_v14, 8  ;;  %v19724_v9 = vpop.f32.mrb[173].mxu1  ;;  %v7125_v62 = vpop.f32.mrb[205].mxu0  ;;  %16734 = vmatmul.mubr.msk.f32.gmra.mrb[22].mxu1 %vm374_vm0, %v8862_v3  ;;  %v21857_v14 = vld [vmem:[#allocation6_spill] sm:$0xff] }
 0x3cb   :  { %v7392_v53 = vadd.f32 %v7391_v60, %v7390_v32  ;;  %v7384_v54 = vsel %vm7354_vm1, %v7125_v62, 0.0  ;;  %16666 = vmatprep.mubr.msk.f32.mxu0 %vm374_vm0, %v19724_v9  ;;  %16736 = vmatprep.mubr.msk.f32.mxu1 %vm374_vm0, %v8863_v7  ;;  %v8865_v3 = vmul.f32 %v21857_v14, %v21857_v14 }
 0x3cc   :  { %v7385_v50 = vadd.f32 %v7384_v54, %v7383_v36  ;;  %16667 = vmatmul.mubr.msk.f32.gmra.mrb[32].mxu0 %vm374_vm0, %v19720_v34  ;;  %v21860_v54 = vld [vmem:[#allocation12_spill] sm:$0xff] }
 0x3cd   :  { %v19738_v45 = vpop.f32.mrb[174].mxu1  ;;  %v16441_v0 = vpop.f32.mrb[206].mxu0  ;;  %v8866_v36 = vmul.f32 %v21860_v54, %v21860_v54 }
 0x3ce   :  { %21858 = vst [vmem:[#allocation37_spill] sm:$0xff] %v19738_v45  ;;  %v7393_v32 = vsel %vm7354_vm1, %v16441_v0, 0.0  ;;  %v19741_v60 = vpop.f32.mrb[175].mxu1  ;;  %v7135_v62 = vpop.f32.mrb[207].mxu0  ;;  %16737 = vmatmul.mubr.msk.f32.gmra.mrb[24].mxu1 %vm374_vm0, %v8864_v55  ;;  %v8867_v0 = vmul.f32 %v18923_v19, %v18923_v19 }
 0x3cf   :  { %21859 = vst [vmem:[#allocation41_spill] sm:$0xff] %v19741_v60  ;;  %v7394_v7 = vadd.f32 %v7393_v32, %v7392_v53  ;;  %v7386_v56 = vsel %vm7354_vm1, %v7135_v62, 0.0  ;;  %16669 = vmatprep.mubr.msk.f32.mxu0 %vm374_vm0, %v19741_v60  ;;  %16739 = vmatprep.mubr.msk.f32.mxu1 %vm374_vm0, %v8865_v3 }
 0x3d0   :  { %v7387_v14 = vadd.f32 %v7386_v56, %v7385_v50  ;;  %16670 = vmatmul.mubr.msk.f32.gmra.mrb[34].mxu0 %vm374_vm0, %v19738_v45  ;;  %v21862_v50 = vld [vmem:[#allocation11_spill] sm:$0xff] }
 0x3d1   :  { %v19754_v34 = vpop.f32.mrb[176].mxu1  ;;  %v16444_v53 = vpop.f32.mrb[208].mxu0  ;;  %v8868_v19 = vmul.f32 %v21862_v50, %v21862_v50 }
 0x3d2   :  { %21861 = vst [vmem:[#allocation6_spill] sm:$0xff] %v19754_v34  ;;  %v7395_v55 = vsel %vm7354_vm1, %v16444_v53, 0.0  ;;  %v19757_v32 = vpop.f32.mrb[177].mxu1  ;;  %v7145_v62 = vpop.f32.mrb[209].mxu0  ;;  %16740 = vmatmul.mubr.msk.f32.gmra.mrb[26].mxu1 %vm374_vm0, %v8866_v36  ;;  %v21863_v53 = vld [vmem:[#allocation16_spill] sm:$0xff] }
 0x3d3   :  { %v7396_v3 = vadd.f32 %v7395_v55, %v7394_v7  ;;  %v7388_v54 = vsel %vm7354_vm1, %v7145_v62, 0.0  ;;  %16672 = vmatprep.mubr.msk.f32.mxu0 %vm374_vm0, %v19757_v32  ;;  %16742 = vmatprep.mubr.msk.f32.mxu1 %vm374_vm0, %v8867_v0  ;;  %v8869_v45 = vmul.f32 %v21863_v53, %v21863_v53  ;;  %v8871_v62 = vmul.f32 %v18951_v42, %v18951_v42  ;;  %v21868_v42 = vld [vmem:[#allocation10_spill] sm:$0xff] }
 0x3d4   :  { %v7389_v56 = vadd.f32 %v7388_v54, %v7387_v14  ;;  %16673 = vmatmul.mubr.msk.f32.gmra.mrb[36].mxu0 %vm374_vm0, %v19754_v34  ;;  %v21866_v14 = vld [vmem:[#allocation5_spill] sm:$0xff] }
 0x3d5   :  { %v19770_v60 = vpop.f32.mrb[178].mxu1  ;;  %v16447_v7 = vpop.f32.mrb[210].mxu0  ;;  %v8870_v0 = vmul.f32 %v21866_v14, %v21866_v14 }
 0x3d6   :  { %21864 = vst [vmem:[#allocation12_spill] sm:$0xff] %v19770_v60  ;;  %16743 = vmatmul.mubr.msk.f32.gmra.mrb[28].mxu1 %vm374_vm0, %v8868_v19  ;;  %11168 = vxpose.xlu0.b32.start [1/2] (short) (narrow) %v7389_v56, 8  ;;  %v19773_v36 = vpop.f32.mrb[179].mxu1  ;;  %v7155_v55 = vpop.f32.mrb[211].mxu0  ;;  %v7404_v19 = vsel %vm7354_vm1, %v16447_v7, 0.0  ;;  %v8872_v7 = vmul.f32 %v21868_v42, %v21868_v42 }
 0x3d7   :  { %21865 = vst [vmem:[#allocation11_spill] sm:$0xff] %v19773_v36  ;;  %16675 = vmatprep.mubr.msk.f32.mxu0 %vm374_vm0, %v19773_v36  ;;  %16745 = vmatprep.mubr.msk.f32.mxu1 %vm374_vm0, %v8869_v45  ;;  %v7397_v14 = vsel %vm7354_vm1, %v7155_v55, 0.0 }
 0x3d8   :  { %16676 = vmatmul.mubr.msk.f32.gmra.mrb[38].mxu0 %vm374_vm0, %v19770_v60 }
 0x3d9   :  { %v19784_v54 = vpop.f32.mrb[180].mxu1  ;;  %v16450_v50 = vpop.f32.mrb[212].mxu0 }
 0x3da   :  { %21867 = vst [vmem:[#allocation16_spill] sm:$0xff] %v19784_v54  ;;  %v7405_v56 = vsel %vm7354_vm1, %v16450_v50, 0.0  ;;  %11169 = vxpose.xlu0.b32.end [2/2] (short) (narrow) %v7396_v3, 8  ;;  %v19788_v53 = vpop.f32.mrb[181].mxu1  ;;  %v7165_v45 = vpop.f32.mrb[213].mxu0  ;;  %16746 = vmatmul.mubr.msk.f32.gmra.mrb[30].mxu1 %vm374_vm0, %v8870_v0  ;;  %v21869_v3 = vld [vmem:[#allocation9_spill] sm:$0xff] }
 0x3db   :  { %v7406_v36 = vadd.f32 %v7405_v56, %v7404_v19  ;;  %v7398_v60 = vsel %vm7354_vm1, %v7165_v45, 0.0  ;;  %16678 = vmatprep.mubr.msk.f32.mxu0 %vm374_vm0, %v19788_v53  ;;  %16748 = vmatprep.mubr.msk.f32.mxu1 %vm374_vm0, %v8871_v62  ;;  %v8873_v0 = vmul.f32 %v21869_v3, %v21869_v3 }
 0x3dc   :  { %v7399_v50 = vadd.f32 %v7398_v60, %v7397_v14  ;;  %16679 = vmatmul.mubr.msk.f32.gmra.mrb[40].mxu0 %vm374_vm0, %v19784_v54  ;;  %v21872_v60 = vld [vmem:[#allocation15_spill] sm:$0xff] }
 0x3dd   :  { %v19802_v34 = vpop.f32.mrb[182].mxu1  ;;  %v16453_v55 = vpop.f32.mrb[214].mxu0  ;;  %v8874_v14 = vmul.f32 %v21872_v60, %v21872_v60 }
 0x3de   :  { %21870 = vst [vmem:[#allocation5_spill] sm:$0xff] %v19802_v34  ;;  %v7407_v19 = vsel %vm7354_vm1, %v16453_v55, 0.0  ;;  %v19805_v56 = vpop.f32.mrb[183].mxu1  ;;  %v7175_v45 = vpop.f32.mrb[215].mxu0  ;;  %16749 = vmatmul.mubr.msk.f32.gmra.mrb[32].mxu1 %vm374_vm0, %v8872_v7  ;;  %v8875_v55 = vmul.f32 %v18976_v10, %v18976_v10 }
 0x3df   :  { %21871 = vst [vmem:[#allocation10_spill] sm:$0xff] %v19805_v56  ;;  %v7408_v62 = vadd.f32 %v7407_v19, %v7406_v36  ;;  %v7400_v42 = vsel %vm7354_vm1, %v7175_v45, 0.0  ;;  %16681 = vmatprep.mubr.msk.f32.mxu0 %vm374_vm0, %v19805_v56  ;;  %16751 = vmatprep.mubr.msk.f32.mxu1 %vm374_vm0, %v8873_v0 }
 0x3e0   :  { %v7401_v3 = vadd.f32 %v7400_v42, %v7399_v50  ;;  %16682 = vmatmul.mubr.msk.f32.gmra.mrb[42].mxu0 %vm374_vm0, %v19802_v34  ;;  %v21874_v50 = vld [vmem:[#allocation46_spill] sm:$0xff] }
 0x3e1   :  { %v19818_v54 = vpop.f32.mrb[184].mxu1  ;;  %v16456_v36 = vpop.f32.mrb[216].mxu0  ;;  %v8876_v10 = vmul.f32 %v21874_v50, %v21874_v50 }
 0x3e2   :  { %21873 = vst [vmem:[#allocation9_spill] sm:$0xff] %v19818_v54  ;;  %v7409_v7 = vsel %vm7354_vm1, %v16456_v36, 0.0  ;;  %v19821_v19 = vpop.f32.mrb[185].mxu1  ;;  %v7185_v45 = vpop.f32.mrb[217].mxu0  ;;  %16752 = vmatmul.mubr.msk.f32.gmra.mrb[34].mxu1 %vm374_vm0, %v8874_v14  ;;  %v21875_v36 = vld [vmem:[#allocation20_spill] sm:$0xff] }
 0x3e3   :  { %v7410_v0 = vadd.f32 %v7409_v7, %v7408_v62  ;;  %v7402_v60 = vsel %vm7354_vm1, %v7185_v45, 0.0  ;;  %16684 = vmatprep.mubr.msk.f32.mxu0 %vm374_vm0, %v19821_v19  ;;  %16754 = vmatprep.mubr.msk.f32.mxu1 %vm374_vm0, %v8875_v55  ;;  %v8877_v34 = vmul.f32 %v21875_v36, %v21875_v36  ;;  %v8879_v45 = vmul.f32 %v19000_v39, %v19000_v39  ;;  %v21880_v39 = vld [vmem:[#allocation50_spill] sm:$0xff] }
 0x3e4   :  { %v7403_v42 = vadd.f32 %v7402_v60, %v7401_v3  ;;  %16685 = vmatmul.mubr.msk.f32.gmra.mrb[44].mxu0 %vm374_vm0, %v19818_v54  ;;  %v21878_v3 = vld [vmem:[#allocation24_spill] sm:$0xff] }
 0x3e5   :  { %v19834_v56 = vpop.f32.mrb[186].mxu1  ;;  %v16459_v62 = vpop.f32.mrb[218].mxu0  ;;  %v8878_v55 = vmul.f32 %v21878_v3, %v21878_v3 }
 0x3e6   :  { %21876 = vst [vmem:[#allocation15_spill] sm:$0xff] %v19834_v56  ;;  %16755 = vmatmul.mubr.msk.f32.gmra.mrb[36].mxu1 %vm374_vm0, %v8876_v10  ;;  %11200 = vxpose.xlu1.b32.start [1/2] (short) (narrow) %v7403_v42, 8  ;;  %v19837_v14 = vpop.f32.mrb[187].mxu1  ;;  %v7195_v7 = vpop.f32.mrb[219].mxu0  ;;  %v7418_v10 = vsel %vm7354_vm1, %v16459_v62, 0.0  ;;  %v8880_v62 = vmul.f32 %v21880_v39, %v21880_v39 }
 0x3e7   :  { %21877 = vst [vmem:[#allocation46_spill] sm:$0xff] %v19837_v14  ;;  %16687 = vmatprep.mubr.msk.f32.mxu0 %vm374_vm0, %v19837_v14  ;;  %16757 = vmatprep.mubr.msk.f32.mxu1 %vm374_vm0, %v8877_v34  ;;  %v7411_v3 = vsel %vm7354_vm1, %v7195_v7, 0.0 }
 0x3e8   :  { %16688 = vmatmul.mubr.msk.f32.gmra.mrb[46].mxu0 %vm374_vm0, %v19834_v56 }
 0x3e9   :  { %v19848_v60 = vpop.f32.mrb[188].mxu1  ;;  %v16462_v50 = vpop.f32.mrb[220].mxu0 }
 0x3ea   :  { %21879 = vst [vmem:[#allocation20_spill] sm:$0xff] %v19848_v60  ;;  %v7419_v42 = vsel %vm7354_vm1, %v16462_v50, 0.0  ;;  %11201 = vxpose.xlu1.b32.end [2/2] (short) (narrow) %v7410_v0, 8  ;;  %v19852_v36 = vpop.f32.mrb[189].mxu1  ;;  %v7205_v34 = vpop.f32.mrb[221].mxu0  ;;  %16758 = vmatmul.mubr.msk.f32.gmra.mrb[38].mxu1 %vm374_vm0, %v8878_v55  ;;  %v21881_v0 = vld [vmem:[#allocation52_spill] sm:$0xff] }
 0x3eb   :  { %v7420_v14 = vadd.f32 %v7419_v42, %v7418_v10  ;;  %v7412_v56 = vsel %vm7354_vm1, %v7205_v34, 0.0  ;;  %16690 = vmatprep.mubr.msk.f32.mxu0 %vm374_vm0, %v19852_v36  ;;  %16760 = vmatprep.mubr.msk.f32.mxu1 %vm374_vm0, %v8879_v45  ;;  %v8881_v55 = vmul.f32 %v21881_v0, %v21881_v0 }
 0x3ec   :  { %v7413_v50 = vadd.f32 %v7412_v56, %v7411_v3  ;;  %16691 = vmatmul.mubr.msk.f32.gmra.mrb[48].mxu0 %vm374_vm0, %v19848_v60  ;;  %v21884_v56 = vld [vmem:[#allocation51_spill] sm:$0xff] }
 0x3ed   :  { %v19866_v54 = vpop.f32.mrb[190].mxu1  ;;  %v16465_v7 = vpop.f32.mrb[222].mxu0  ;;  %v8882_v3 = vmul.f32 %v21884_v56, %v21884_v56 }
 0x3ee   :  { %21882 = vst [vmem:[#allocation24_spill] sm:$0xff] %v19866_v54  ;;  %v7421_v10 = vsel %vm7354_vm1, %v16465_v7, 0.0  ;;  %v19869_v42 = vpop.f32.mrb[191].mxu1  ;;  %v7215_v34 = vpop.f32.mrb[223].mxu0  ;;  %16761 = vmatmul.mubr.msk.f32.gmra.mrb[40].mxu1 %vm374_vm0, %v8880_v62  ;;  %v8883_v7 = vmul.f32 %v19030_v35, %v19030_v35  ;;  %v8884_v35 = vmul.f32 %v19026_v48, %v19026_v48  ;;  %v21890_v48 = vld [vmem:[#allocation32_spill] sm:$0xff] }
 0x3ef   :  { %21883 = vst [vmem:[#allocation50_spill] sm:$0xff] %v19869_v42  ;;  %v7422_v45 = vadd.f32 %v7421_v10, %v7420_v14  ;;  %v7414_v39 = vsel %vm7354_vm1, %v7215_v34, 0.0  ;;  %16693 = vmatprep.mubr.msk.f32.mxu0 %vm374_vm0, %v19869_v42  ;;  %16763 = vmatprep.mubr.msk.f32.mxu1 %vm374_vm0, %v8881_v55 }
 0x3f0   :  { %v7415_v0 = vadd.f32 %v7414_v39, %v7413_v50  ;;  %16694 = vmatmul.mubr.msk.f32.gmra.mrb[50].mxu0 %vm374_vm0, %v19866_v54  ;;  %v21887_v39 = vld [vmem:[#allocation31_spill] sm:$0xff] }
 0x3f1   :  { %v19882_v60 = vpop.f32.mrb[192].mxu1  ;;  %v16468_v14 = vpop.f32.mrb[224].mxu0 }
 0x3f2   :  { %21885 = vst [vmem:[#allocation52_spill] sm:$0xff] %v19882_v60  ;;  %v7423_v62 = vsel %vm7354_vm1, %v16468_v14, 0.0  ;;  %v19885_v10 = vpop.f32.mrb[193].mxu1  ;;  %v7225_v34 = vpop.f32.mrb[225].mxu0  ;;  %16764 = vmatmul.mubr.msk.f32.gmra.mrb[42].mxu1 %vm374_vm0, %v8882_v3  ;;  %v8885_v14 = vmul.f32 %v21887_v39, %v21887_v39 }
 0x3f3   :  { %21886 = vst [vmem:[#allocation51_spill] sm:$0xff] %v19885_v10  ;;  %v7424_v55 = vadd.f32 %v7423_v62, %v7422_v45  ;;  %v7416_v56 = vsel %vm7354_vm1, %v7225_v34, 0.0  ;;  %16696 = vmatprep.mubr.msk.f32.mxu0 %vm374_vm0, %v19885_v10  ;;  %16766 = vmatprep.mubr.msk.f32.mxu1 %vm374_vm0, %v8883_v7  ;;  %v8887_v7 = vmul.f32 %v19080_v51, %v19080_v51 }
 0x3f4   :  { %v7417_v50 = vadd.f32 %v7416_v56, %v7415_v0  ;;  %16697 = vmatmul.mubr.msk.f32.gmra.mrb[52].mxu0 %vm374_vm0, %v19882_v60  ;;  %v8886_v0 = vmul.f32 %v21890_v48, %v21890_v48  ;;  %v9598_v48 = vmul.f32 %v18959_v31, %v18959_v31  ;;  %v8889_v31 = vmul.f32 %v19102_v49, %v19102_v49  ;;  %v21894_v49 = vld [vmem:[#allocation40_spill] sm:$0xff] }
 0x3f5   :  { %v19898_v54 = vpop.f32.mrb[194].mxu1  ;;  %v16471_v45 = vpop.f32.mrb[226].mxu0 }
 0x3f6   :  { %21888 = vst [vmem:[#allocation31_spill] sm:$0xff] %v19898_v54  ;;  %16767 = vmatmul.mubr.msk.f32.gmra.mrb[44].mxu1 %vm374_vm0, %v8884_v35  ;;  %11232 = vxpose.xlu0.b32.start [1/2] (short) (narrow) %v7417_v50, 8  ;;  %v19901_v3 = vpop.f32.mrb[195].mxu1  ;;  %v7235_v62 = vpop.f32.mrb[227].mxu0  ;;  %v7432_v35 = vsel %vm7354_vm1, %v16471_v45, 0.0 }
 0x3f7   :  { %21889 = vst [vmem:[#allocation106_spill] sm:$0xff] %v19901_v3  ;;  %16699 = vmatprep.mubr.msk.f32.mxu0 %vm374_vm0, %v19901_v3  ;;  %16769 = vmatprep.mubr.msk.f32.mxu1 %vm374_vm0, %v8885_v14 }
 0x3f8   :  { %16700 = vmatmul.mubr.msk.f32.gmra.mrb[54].mxu0 %vm374_vm0, %v19898_v54  ;;  %v7425_v54 = vsel %vm7354_vm1, %v7235_v62, 0.0 }
 0x3f9   :  { %v19912_v34 = vpop.f32.mrb[196].mxu1  ;;  %v16474_v56 = vpop.f32.mrb[228].mxu0 }
 0x3fa   :  { %21891 = vst [vmem:[#allocation32_spill] sm:$0xff] %v19912_v34  ;;  %v7433_v50 = vsel %vm7354_vm1, %v16474_v56, 0.0  ;;  %11233 = vxpose.xlu0.b32.end [2/2] (short) (narrow) %v7424_v55, 8  ;;  %v19916_v39 = vpop.f32.mrb[197].mxu1  ;;  %v7245_v14 = vpop.f32.mrb[229].mxu0  ;;  %16770 = vmatmul.mubr.msk.f32.gmra.mrb[46].mxu1 %vm374_vm0, %v8886_v0  ;;  %v8888_v55 = vmul.f32 %v19075_v46, %v19075_v46  ;;  %v9599_v56 = vmul.f32 %v18957_v43, %v18957_v43  ;;  %v21893_v46 = vld [vmem:[#allocation45_spill] sm:$0xff] }
 0x3fb   :  { %21892 = vst [vmem:[#allocation107_spill] sm:$0xff] %v19916_v39  ;;  %v7434_v3 = vadd.f32 %v7433_v50, %v7432_v35  ;;  %v7426_v51 = vsel %vm7354_vm1, %v7245_v14, 0.0  ;;  %16702 = vmatprep.mubr.msk.f32.mxu0 %vm374_vm0, %v19916_v39  ;;  %16772 = vmatprep.mubr.msk.f32.mxu1 %vm374_vm0, %v8887_v7  ;;  %v9601_v43 = vmul.f32 %v18969_v8, %v18969_v8  ;;  %v21896_v39 = vld [vmem:[#allocation43_spill] sm:$0xff] }
 0x3fc   :  { %v7427_v45 = vadd.f32 %v7426_v51, %v7425_v54  ;;  %16703 = vmatmul.mubr.msk.f32.gmra.mrb[56].mxu0 %vm374_vm0, %v19912_v34  ;;  %v9600_v54 = vmul.f32 %v21893_v46, %v21893_v46  ;;  %v8891_v46 = vmul.f32 %v21896_v39, %v21896_v39 }
 0x3fd   :  { %v16477_v0 = vpop.f32.mrb[230].mxu0  ;;  %v16511_v62 = vpop.f32.mrb[198].mxu1  ;;  %16809 = vmatprep.mubr.msk.f32.mxu0 %vm374_vm0, %v9598_v48  ;;  %v8890_v48 = vmul.f32 %v21894_v49, %v21894_v49 }
 0x3fe   :  { %v7435_v35 = vsel %vm7354_vm1, %v16477_v0, 0.0  ;;  %v7255_v7 = vpop.f32.mrb[231].mxu0  ;;  %v7725_v50 = vpop.f32.mrb[199].mxu1  ;;  %16773 = vmatmul.mubr.msk.f32.gmra.mrb[48].mxu1 %vm374_vm0, %v8888_v55  ;;  %v21895_v0 = vld [vmem:[#allocation48_spill] sm:$0xff] }
 0x3ff   :  { %v7436_v14 = vadd.f32 %v7435_v35, %v7434_v3  ;;  %v7428_v51 = vsel %vm7354_vm1, %v7255_v7, 0.0  ;;  %16775 = vmatprep.mubr.msk.f32.mxu1 %vm374_vm0, %v8889_v31  ;;  %v9602_v55 = vmul.f32 %v21895_v0, %v21895_v0  ;;  %v8051_v31 = vsel %vm7354_vm1, %v16511_v62, 0.0 }
 0x400   :  { %v7429_v34 = vadd.f32 %v7428_v51, %v7427_v45  ;;  %16810 = vmatmul.mubr.msk.f32.vlgmr.msra.gmra.mrb[58].mxu0 %vm374_vm0, %v9599_v56  ;;  %v8044_v7 = vsel %vm7354_vm1, %v7725_v50, 0.0 }
 0x401   :  { %v16480_v3 = vpop.f32.mrb[232].mxu0  ;;  %v16514_v35 = vpop.f32.mrb[200].mxu1  ;;  %16812 = vmatprep.mubr.msk.f32.mxu0 %vm374_vm0, %v9600_v54  ;;  %v21897_v54 = vld [vmem:[#allocation44_spill] sm:$0xff] }
 0x402   :  { %v7437_v45 = vsel %vm7354_vm1, %v16480_v3, 0.0  ;;  %v8052_v56 = vsel %vm7354_vm1, %v16514_v35, 0.0  ;;  %v7265_v51 = vpop.f32.mrb[233].mxu0  ;;  %v7735_v8 = vpop.f32.mrb[201].mxu1  ;;  %16776 = vmatmul.mubr.msk.f32.gmra.mrb[50].mxu1 %vm374_vm0, %v8890_v48  ;;  %v8892_v62 = vmul.f32 %v21897_v54, %v21897_v54  ;;  %v21898_v3 = vld [vmem:[#allocation53_spill] sm:$0xff]  ;;  %v21899_v48 = vld [vmem:[#allocation47_spill] sm:$0xff] }
 0x403   :  { %v7438_v49 = vadd.f32 %v7437_v45, %v7436_v14  ;;  %v8053_v0 = vadd.f32 %v8052_v56, %v8051_v31  ;;  %v7430_v39 = vsel %vm7354_vm1, %v7265_v51, 0.0  ;;  %v8045_v60 = vsel %vm7354_vm1, %v7735_v8, 0.0  ;;  %16778 = vmatprep.mubr.msk.f32.mxu1 %vm374_vm0, %v8891_v46 }
 0x404   :  { %v7431_v50 = vadd.f32 %v7430_v39, %v7429_v34  ;;  %v8046_v10 = vadd.f32 %v8045_v60, %v8044_v7  ;;  %16813 = vmatmul.mubr.msk.f32.gmra.mrb[60].mxu0 %vm374_vm0, %v9601_v43  ;;  %v8893_v35 = vmul.f32 %v21898_v3, %v21898_v3  ;;  %v9603_v31 = vmul.f32 %v21899_v48, %v21899_v48  ;;  %v21900_v60 = vld [vmem:[#allocation49_spill] sm:$0xff]  ;;  %v21902_v39 = vld [vmem:[#allocation56_spill] sm:$0xff] }
 0x405   :  { %v16517_v42 = vpop.f32.mrb[202].mxu1  ;;  %16815 = vmatprep.mubr.msk.f32.mxu0 %vm374_vm0, %v9602_v55  ;;  %v16483_v14 = vpop.f32.mrb[234].mxu0  ;;  %v9604_v43 = vmul.f32 %v21900_v60, %v21900_v60  ;;  %v21901_v55 = vld [vmem:[#allocation7_spill] sm:$0xff]  ;;  %v8895_v54 = vmul.f32 %v21902_v39, %v21902_v39  ;;  %v9605_v3 = vmul.f32 %v18993_v16, %v18993_v16  ;;  %v21905_v39 = vld [vmem:[#allocation58_spill] sm:$0xff] }
 0x406   :  { %v8054_v45 = vsel %vm7354_vm1, %v16517_v42, 0.0  ;;  %16779 = vmatmul.mubr.msk.f32.gmra.mrb[52].mxu1 %vm374_vm0, %v8892_v62  ;;  %11264 = vxpose.xlu1.b32.start [1/2] (short) (narrow) %v7431_v50, 8  ;;  %v7745_v46 = vpop.f32.mrb[203].mxu1  ;;  %v7275_v34 = vpop.f32.mrb[235].mxu0  ;;  %v8894_v51 = vmul.f32 %v21901_v55, %v21901_v55  ;;  %v7446_v42 = vsel %vm7354_vm1, %v16483_v14, 0.0 }
 0x407   :  { %v8055_v7 = vadd.f32 %v8054_v45, %v8053_v0  ;;  %v8047_v56 = vsel %vm7354_vm1, %v7745_v46, 0.0  ;;  %16781 = vmatprep.mubr.msk.f32.mxu1 %vm374_vm0, %v8893_v35  ;;  %v7439_v0 = vsel %vm7354_vm1, %v7275_v34, 0.0  ;;  %v21903_v35 = vld [vmem:[#allocation19_spill] sm:$0xff] }
 0x408   :  { %v8048_v8 = vadd.f32 %v8047_v56, %v8046_v10  ;;  %16816 = vmatmul.mubr.msk.f32.gmra.mrb[62].mxu0 %vm374_vm0, %v9603_v31  ;;  %v9606_v48 = vmul.f32 %v21903_v35, %v21903_v35 }
 0x409   :  { %v16520_v62 = vpop.f32.mrb[204].mxu1  ;;  %16818 = vmatprep.mubr.msk.f32.mxu0 %vm374_vm0, %v9604_v43  ;;  %v16486_v50 = vpop.f32.mrb[236].mxu0  ;;  %v21904_v43 = vld [vmem:[#allocation55_spill] sm:$0xff] }
 0x40a   :  { %v8056_v10 = vsel %vm7354_vm1, %v16520_v62, 0.0  ;;  %11265 = vxpose.xlu1.b32.end [2/2] (short) (narrow) %v7438_v49, 8  ;;  %v7755_v31 = vpop.f32.mrb[205].mxu1  ;;  %16782 = vmatmul.mubr.msk.f32.gmra.mrb[54].mxu1 %vm374_vm0, %v8894_v51  ;;  %v7447_v14 = vsel %vm7354_vm1, %v16486_v50, 0.0  ;;  %v7285_v45 = vpop.f32.mrb[237].mxu0  ;;  %v8896_v56 = vmul.f32 %v21904_v43, %v21904_v43  ;;  %v8897_v51 = vmul.f32 %v21905_v39, %v21905_v39  ;;  %v21906_v50 = vld [vmem:[#allocation23_spill] sm:$0xff] }
 0x40b   :  { %v8057_v46 = vadd.f32 %v8056_v10, %v8055_v7  ;;  %v8049_v60 = vsel %vm7354_vm1, %v7755_v31, 0.0  ;;  %16784 = vmatprep.mubr.msk.f32.mxu1 %vm374_vm0, %v8895_v54  ;;  %v7448_v34 = vadd.f32 %v7447_v14, %v7446_v42  ;;  %v7440_v16 = vsel %vm7354_vm1, %v7285_v45, 0.0  ;;  %v21907_v10 = vld [vmem:[#allocation27_spill] sm:$0xff] }
 0x40c   :  { %v8050_v55 = vadd.f32 %v8049_v60, %v8048_v8  ;;  %16819 = vmatmul.mubr.msk.f32.gmra.mrb[64].mxu0 %vm374_vm0, %v9605_v3  ;;  %v7441_v49 = vadd.f32 %v7440_v16, %v7439_v0  ;;  %v9607_v54 = vmul.f32 %v21906_v50, %v21906_v50  ;;  %v9608_v0 = vmul.f32 %v21907_v10, %v21907_v10  ;;  %v21909_v16 = vld [vmem:[#allocation61_spill] sm:$0xff] }
 0x40d   :  { %v16523_v62 = vpop.f32.mrb[206].mxu1  ;;  %16821 = vmatprep.mubr.msk.f32.mxu0 %vm374_vm0, %v9606_v48  ;;  %v16489_v7 = vpop.f32.mrb[238].mxu0  ;;  %v21908_v48 = vld [vmem:[#allocation57_spill] sm:$0xff]  ;;  %v9609_v60 = vmul.f32 %v21797_v2, %v21797_v2  ;;  %v8899_v43 = vmul.f32 %v21909_v16, %v21909_v16  ;;  %v9610_v39 = vmul.f32 %v19045_v25, %v19045_v25  ;;  %v21910_v25 = vld [vmem:[#allocation60_spill] sm:$0xff] }
 0x40e   :  { %16785 = vmatmul.mubr.msk.f32.gmra.mrb[56].mxu1 %vm374_vm0, %v8896_v56  ;;  %11360 = vxpose.xlu0.b32.start [1/2] (short) (narrow) %v8050_v55, 8  ;;  %v7765_v42 = vpop.f32.mrb[207].mxu1  ;;  %v7449_v35 = vsel %vm7354_vm1, %v16489_v7, 0.0  ;;  %v7295_v8 = vpop.f32.mrb[239].mxu0  ;;  %v8898_v14 = vmul.f32 %v21908_v48, %v21908_v48  ;;  %v8065_v56 = vsel %vm7354_vm1, %v16523_v62, 0.0 }
 0x40f   :  { %v7450_v3 = vadd.f32 %v7449_v35, %v7448_v34  ;;  %16787 = vmatprep.mubr.msk.f32.mxu1 %vm374_vm0, %v8897_v51  ;;  %v7442_v31 = vsel %vm7354_vm1, %v7295_v8, 0.0  ;;  %v8058_v51 = vsel %vm7354_vm1, %v7765_v42, 0.0  ;;  %v8900_v42 = vmul.f32 %v21910_v25, %v21910_v25 }
 0x410   :  { %v7443_v45 = vadd.f32 %v7442_v31, %v7441_v49  ;;  %16822 = vmatmul.mubr.msk.f32.gmra.mrb[66].mxu0 %vm374_vm0, %v9607_v54  ;;  %v21911_v31 = vld [vmem:[#allocation63_spill] sm:$0xff]  ;;  %v9614_v25 = vmul.f32 %v19091_v26, %v19091_v26 }
 0x411   :  { %v16492_v55 = vpop.f32.mrb[240].mxu0  ;;  %v16526_v34 = vpop.f32.mrb[208].mxu1  ;;  %16824 = vmatprep.mubr.msk.f32.mxu0 %vm374_vm0, %v9608_v0  ;;  %v8901_v48 = vmul.f32 %v21911_v31, %v21911_v31 }
 0x412   :  { %v7451_v49 = vsel %vm7354_vm1, %v16492_v55, 0.0  ;;  %v8066_v7 = vsel %vm7354_vm1, %v16526_v34, 0.0  ;;  %v7305_v50 = vpop.f32.mrb[241].mxu0  ;;  %16788 = vmatmul.mubr.msk.f32.gmra.mrb[58].mxu1 %vm374_vm0, %v8898_v14  ;;  %11361 = vxpose.xlu0.b32.end [2/2] (short) (narrow) %v8057_v46, 8  ;;  %v7775_v2 = vpop.f32.mrb[209].mxu1  ;;  %v9611_v14 = vmul.f32 %v19043_v61, %v19043_v61 }
 0x413   :  { %v7452_v54 = vadd.f32 %v7451_v49, %v7450_v3  ;;  %v8067_v62 = vadd.f32 %v8066_v7, %v8065_v56  ;;  %v7444_v35 = vsel %vm7354_vm1, %v7305_v50, 0.0  ;;  %v8059_v8 = vsel %vm7354_vm1, %v7775_v2, 0.0  ;;  %16790 = vmatprep.mubr.msk.f32.mxu1 %vm374_vm0, %v8899_v43  ;;  %v21912_v56 = vld [vmem:[#allocation36_spill] sm:$0xff]  ;;  %v21914_v7 = vld [vmem:[#allocation66_spill] sm:$0xff] }
 0x414   :  { %v7445_v10 = vadd.f32 %v7444_v35, %v7443_v45  ;;  %v8060_v0 = vadd.f32 %v8059_v8, %v8058_v51  ;;  %16825 = vmatmul.mubr.msk.f32.gmra.mrb[68].mxu0 %vm374_vm0, %v9609_v60  ;;  %v9612_v60 = vmul.f32 %v21912_v56, %v21912_v56  ;;  %v8903_v50 = vmul.f32 %v21914_v7, %v21914_v7 }
 0x415   :  { %v16529_v46 = vpop.f32.mrb[210].mxu1  ;;  %16827 = vmatprep.mubr.msk.f32.mxu0 %vm374_vm0, %v9610_v39  ;;  %v16495_v3 = vpop.f32.mrb[242].mxu0  ;;  %v21913_v39 = vld [vmem:[#allocation62_spill] sm:$0xff]  ;;  %v9613_v8 = vmul.f32 %v19067_v5, %v19067_v5 }
 0x416   :  { %v8068_v16 = vsel %vm7354_vm1, %v16529_v46, 0.0  ;;  %16791 = vmatmul.mubr.msk.f32.gmra.mrb[60].mxu1 %vm374_vm0, %v8900_v42  ;;  %11296 = vxpose.xlu0.b32.start [1/2] (short) (narrow) %v7445_v10, 8  ;;  %v7785_v43 = vpop.f32.mrb[211].mxu1  ;;  %v7315_v45 = vpop.f32.mrb[243].mxu0  ;;  %v8902_v51 = vmul.f32 %v21913_v39, %v21913_v39  ;;  %v7460_v61 = vsel %vm7354_vm1, %v16495_v3, 0.0 }
 0x417   :  { %v8069_v55 = vadd.f32 %v8068_v16, %v8067_v62  ;;  %v8061_v34 = vsel %vm7354_vm1, %v7785_v43, 0.0  ;;  %16793 = vmatprep.mubr.msk.f32.mxu1 %vm374_vm0, %v8901_v48  ;;  %v7453_v62 = vsel %vm7354_vm1, %v7315_v45, 0.0 }
 0x418   :  { %v8062_v49 = vadd.f32 %v8061_v34, %v8060_v0  ;;  %16828 = vmatmul.mubr.msk.f32.gmra.mrb[70].mxu0 %vm374_vm0, %v9611_v14  ;;  %v21915_v14 = vld [vmem:[#allocation65_spill] sm:$0xff] }
 0x419   :  { %v16532_v2 = vpop.f32.mrb[212].mxu1  ;;  %16830 = vmatprep.mubr.msk.f32.mxu0 %vm374_vm0, %v9612_v60  ;;  %v16498_v35 = vpop.f32.mrb[244].mxu0  ;;  %v8904_v26 = vmul.f32 %v21915_v14, %v21915_v14 }
 0x41a   :  { %v8070_v42 = vsel %vm7354_vm1, %v16532_v2, 0.0  ;;  %16794 = vmatmul.mubr.msk.f32.gmra.mrb[62].mxu1 %vm374_vm0, %v8902_v51  ;;  %11297 = vxpose.xlu0.b32.end [2/2] (short) (narrow) %v7452_v54, 8  ;;  %v7795_v10 = vpop.f32.mrb[213].mxu1  ;;  %v7461_v0 = vsel %vm7354_vm1, %v16498_v35, 0.0  ;;  %v7325_v31 = vpop.f32.mrb[245].mxu0  ;;  %v21916_v54 = vld [vmem:[#allocation69_spill] sm:$0xff] }
 0x41b   :  { %v8071_v48 = vadd.f32 %v8070_v42, %v8069_v55  ;;  %v8063_v46 = vsel %vm7354_vm1, %v7795_v10, 0.0  ;;  %16796 = vmatprep.mubr.msk.f32.mxu1 %vm374_vm0, %v8903_v50  ;;  %v7462_v3 = vadd.f32 %v7461_v0, %v7460_v61  ;;  %v7454_v5 = vsel %vm7354_vm1, %v7325_v31, 0.0  ;;  %v21917_v55 = vld [vmem:[#allocation35_spill] sm:$0xff] }
 0x41c   :  { %v8064_v16 = vadd.f32 %v8063_v46, %v8062_v49  ;;  %16831 = vmatmul.mubr.msk.f32.gmra.mrb[72].mxu0 %vm374_vm0, %v9613_v8  ;;  %v7455_v43 = vadd.f32 %v7454_v5, %v7453_v62  ;;  %v8905_v45 = vmul.f32 %v21916_v54, %v21916_v54  ;;  %v9615_v34 = vmul.f32 %v21917_v55, %v21917_v55  ;;  %v21918_v61 = vld [vmem:[#allocation39_spill] sm:$0xff]  ;;  %v21919_v62 = vld [vmem:[#allocation68_spill] sm:$0xff] }
 0x41d   :  { %v16535_v56 = vpop.f32.mrb[214].mxu1  ;;  %16833 = vmatprep.mubr.msk.f32.mxu0 %vm374_vm0, %v9614_v25  ;;  %v16501_v60 = vpop.f32.mrb[246].mxu0  ;;  %v9616_v7 = vmul.f32 %v21918_v61, %v21918_v61  ;;  %v8906_v35 = vmul.f32 %v21919_v62, %v21919_v62  ;;  %v9617_v25 = vmul.f32 %v19111_v13, %v19111_v13  ;;  %v21920_v42 = vld [vmem:[#allocation71_spill] sm:$0xff]  ;;  %v21923_v61 = vld [vmem:[#allocation8_spill] sm:$0xff] }
 0x41e   :  { %16797 = vmatmul.mubr.msk.f32.gmra.mrb[64].mxu1 %vm374_vm0, %v8904_v26  ;;  %11392 = vxpose.xlu1.b32.start [1/2] (short) (narrow) %v8064_v16, 8  ;;  %v7805_v39 = vpop.f32.mrb[215].mxu1  ;;  %v7463_v51 = vsel %vm7354_vm1, %v16501_v60, 0.0  ;;  %v7335_v49 = vpop.f32.mrb[247].mxu0  ;;  %v8907_v10 = vmul.f32 %v21920_v42, %v21920_v42  ;;  %v8079_v0 = vsel %vm7354_vm1, %v16535_v56, 0.0  ;;  %v21924_v42 = vld [vmem:[#allocation72_spill] sm:$0xff] }
 0x41f   :  { %16799 = vmatprep.mubr.msk.f32.mxu1 %vm374_vm0, %v8905_v45  ;;  %v7464_v50 = vadd.f32 %v7463_v51, %v7462_v3  ;;  %v7456_v2 = vsel %vm7354_vm1, %v7335_v49, 0.0  ;;  %v9618_v3 = vmul.f32 %v19135_v1, %v19135_v1  ;;  %v8072_v5 = vsel %vm7354_vm1, %v7805_v39, 0.0  ;;  %v21921_v1 = vld [vmem:[#allocation70_spill] sm:$0xff] }
 0x420   :  { %16834 = vmatmul.mubr.msk.f32.gmra.mrb[74].mxu0 %vm374_vm0, %v9615_v34  ;;  %v7457_v8 = vadd.f32 %v7456_v2, %v7455_v43  ;;  %v8908_v60 = vmul.f32 %v21921_v1, %v21921_v1  ;;  %v9622_v1 = vmul.f32 %v19178_v4, %v19178_v4 }
 0x421   :  { %v16538_v31 = vpop.f32.mrb[216].mxu1  ;;  %16836 = vmatprep.mubr.msk.f32.mxu0 %vm374_vm0, %v9616_v7  ;;  %v16504_v46 = vpop.f32.mrb[248].mxu0  ;;  %v9619_v7 = vmul.f32 %v21923_v61, %v21923_v61 }
 0x422   :  { %v8080_v14 = vsel %vm7354_vm1, %v16538_v31, 0.0  ;;  %16800 = vmatmul.mubr.msk.f32.gmra.mrb[66].mxu1 %vm374_vm0, %v8906_v35  ;;  %11393 = vxpose.xlu1.b32.end [2/2] (short) (narrow) %v8071_v48, 8  ;;  %v7815_v13 = vpop.f32.mrb[217].mxu1  ;;  %v7465_v26 = vsel %vm7354_vm1, %v16504_v46, 0.0  ;;  %v7345_v16 = vpop.f32.mrb[249].mxu0  ;;  %v21922_v48 = vld [vmem:[#allocation73_spill] sm:$0xff]  ;;  %v9620_v35 = vmul.f32 %v19157_v33, %v19157_v33 }
 0x423   :  { %v8081_v43 = vadd.f32 %v8080_v14, %v8079_v0  ;;  %v8073_v54 = vsel %vm7354_vm1, %v7815_v13, 0.0  ;;  %v7466_v45 = vadd.f32 %v7465_v26, %v7464_v50  ;;  %16802 = vmatprep.mubr.msk.f32.mxu1 %vm374_vm0, %v8907_v10  ;;  %v7458_v56 = vsel %vm7354_vm1, %v7345_v16, 0.0  ;;  %v21925_v31 = vld [vmem:[#allocation54_spill] sm:$0xff] }
 0x424   :  { %v8074_v55 = vadd.f32 %v8073_v54, %v8072_v5  ;;  %v7459_v34 = vadd.f32 %v7458_v56, %v7457_v8  ;;  %16837 = vmatmul.mubr.msk.f32.gmra.mrb[76].mxu0 %vm374_vm0, %v9617_v25  ;;  %v10351_v39 = vmul.f32 %v21922_v48, %v21922_v48  ;;  %v10352_v10 = vmul.f32 %v21924_v42, %v21924_v42 }
 0x425   :  { %v16541_v51 = vpop.f32.mrb[218].mxu1  ;;  %v16611_v49 = vpop.f32.mrb[250].mxu0  ;;  %16839 = vmatprep.mubr.msk.f32.mxu0 %vm374_vm0, %v9618_v3  ;;  %v9621_v46 = vmul.f32 %v21925_v31, %v21925_v31  ;;  %v21926_v3 = vld [vmem:[#allocation76_spill] sm:$0xff] }
 0x426   :  { %v8082_v50 = vsel %vm7354_vm1, %v16541_v51, 0.0  ;;  %v7825_v2 = vpop.f32.mrb[219].mxu1  ;;  %v8414_v62 = vpop.f32.mrb[251].mxu0  ;;  %16803 = vmatmul.mubr.msk.f32.gmra.mrb[68].mxu1 %vm374_vm0, %v8908_v60  ;;  %11328 = vxpose.xlu1.b32.start [1/2] (short) (narrow) %v7459_v34, 8  ;;  %v10353_v5 = vmul.f32 %v21926_v3, %v21926_v3  ;;  %v8740_v14 = vsel %vm7354_vm1, %v16611_v49, 0.0 }
 0x427   :  { %v8083_v8 = vadd.f32 %v8082_v50, %v8081_v43  ;;  %v8075_v25 = vsel %vm7354_vm1, %v7825_v2, 0.0  ;;  %16909 = vmatprep.mubr.msk.f32.mxu1 %vm374_vm0, %v10351_v39  ;;  %v8733_v26 = vsel %vm7354_vm1, %v8414_v62, 0.0  ;;  %v21927_v39 = vld [vmem:[#allocation75_spill] sm:$0xff]  ;;  %v9623_v50 = vmul.f32 %v19176_v20, %v19176_v20 }
 0x428   :  { %v8076_v0 = vadd.f32 %v8075_v25, %v8074_v55  ;;  %16840 = vmatmul.mubr.msk.f32.gmra.mrb[78].mxu0 %vm374_vm0, %v9619_v7  ;;  %v10354_v51 = vmul.f32 %v21927_v39, %v21927_v39  ;;  %v10355_v7 = vmul.f32 %v19329_v11, %v19329_v11  ;;  %v21928_v11 = vld [vmem:[#allocation59_spill] sm:$0xff]  ;;  %v9625_v20 = vmul.f32 %v19196_v30, %v19196_v30 }
 0x429   :  { %v16544_v33 = vpop.f32.mrb[220].mxu1  ;;  %v16614_v13 = vpop.f32.mrb[252].mxu0  ;;  %16842 = vmatprep.mubr.msk.f32.mxu0 %vm374_vm0, %v9620_v35  ;;  %v9624_v42 = vmul.f32 %v21928_v11, %v21928_v11 }
 0x42a   :  { %v8084_v16 = vsel %vm7354_vm1, %v16544_v33, 0.0  ;;  %v8741_v43 = vsel %vm7354_vm1, %v16614_v13, 0.0  ;;  %v7835_v54 = vpop.f32.mrb[221].mxu1  ;;  %v8424_v56 = vpop.f32.mrb[253].mxu0  ;;  %16910 = vmatmul.mubr.msk.f32.vlgmr.msra.gmra.mrb[70].mxu1 %vm374_vm0, %v10352_v10  ;;  %11329 = vxpose.xlu1.b32.end [2/2] (short) (narrow) %v7466_v45, 8  ;;  %v21929_v10 = vld [vmem:[#allocation77_spill] sm:$0xff] }
 0x42b   :  { %v8085_v60 = vadd.f32 %v8084_v16, %v8083_v8  ;;  %v8742_v55 = vadd.f32 %v8741_v43, %v8740_v14  ;;  %v8077_v34 = vsel %vm7354_vm1, %v7835_v54, 0.0  ;;  %v8734_v48 = vsel %vm7354_vm1, %v8424_v56, 0.0  ;;  %16912 = vmatprep.mubr.msk.f32.mxu1 %vm374_vm0, %v10353_v5 }
 0x42c   :  { %v8078_v49 = vadd.f32 %v8077_v34, %v8076_v0  ;;  %v8735_v61 = vadd.f32 %v8734_v48, %v8733_v26  ;;  %16843 = vmatmul.mubr.msk.f32.gmra.mrb[80].mxu0 %vm374_vm0, %v9621_v46  ;;  %v10356_v0 = vmul.f32 %v21929_v10, %v21929_v10  ;;  %v21930_v46 = vld [vmem:[#allocation78_spill] sm:$0xff]  ;;  %v9626_v54 = vmul.f32 %v19218_v6, %v19218_v6  ;;  %v21931_v48 = vld [vmem:[#allocation28_spill] sm:$0xff] }
 0x42d   :  { %v16547_v4 = vpop.f32.mrb[222].mxu1  ;;  %v16617_v45 = vpop.f32.mrb[254].mxu0  ;;  %16845 = vmatprep.mubr.msk.f32.mxu0 %vm374_vm0, %v9622_v1  ;;  %v10357_v3 = vmul.f32 %v21930_v46, %v21930_v46  ;;  %v10358_v39 = vmul.f32 %v21931_v48, %v21931_v48 }
 0x42e   :  { %v8743_v2 = vsel %vm7354_vm1, %v16617_v45, 0.0  ;;  %v8434_v62 = vpop.f32.mrb[255].mxu0  ;;  %16913 = vmatmul.mubr.msk.f32.gmra.mrb[72].mxu1 %vm374_vm0, %v10354_v51  ;;  %11424 = vxpose.xlu0.b32.start [1/2] (short) (narrow) %v8078_v49, 8  ;;  %v7845_v35 = vpop.f32.mrb[223].mxu1  ;;  %v8093_v5 = vsel %vm7354_vm1, %v16547_v4, 0.0 }
 0x42f   :  { %v8744_v8 = vadd.f32 %v8743_v2, %v8742_v55  ;;  %v8736_v25 = vsel %vm7354_vm1, %v8434_v62, 0.0  ;;  %16915 = vmatprep.mubr.msk.f32.mxu1 %vm374_vm0, %v10355_v7  ;;  %v8086_v13 = vsel %vm7354_vm1, %v7845_v35, 0.0  ;;  %v9627_v7 = vmul.f32 %v19216_v22, %v19216_v22  ;;  %v21932_v2 = vld [vmem:[#allocation64_spill] sm:$0xff] }
 0x430   :  { %v8737_v31 = vadd.f32 %v8736_v25, %v8735_v61  ;;  %16846 = vmatmul.mubr.msk.f32.gmra.mrb[82].mxu0 %vm374_vm0, %v9623_v50  ;;  %v9628_v62 = vmul.f32 %v21932_v2, %v21932_v2  ;;  %v9629_v22 = vmul.f32 %v19236_v28, %v19236_v28 }
 0x431   :  { %v16550_v14 = vpop.f32.mrb[224].mxu1  ;;  %v16620_v33 = vpop.f32.mrb[0].mxu0  ;;  %16848 = vmatprep.mubr.msk.f32.mxu0 %vm374_vm0, %v9624_v42  ;;  %v10361_v42 = vmul.f32 %v19377_v59, %v19377_v59 }
 0x432   :  { %v8094_v26 = vsel %vm7354_vm1, %v16550_v14, 0.0  ;;  %v8745_v16 = vsel %vm7354_vm1, %v16620_v33, 0.0  ;;  %v8444_v43 = vpop.f32.mrb[1].mxu0  ;;  %16916 = vmatmul.mubr.msk.f32.gmra.mrb[74].mxu1 %vm374_vm0, %v10356_v0  ;;  %11425 = vxpose.xlu0.b32.end [2/2] (short) (narrow) %v8085_v60, 8  ;;  %v7855_v30 = vpop.f32.mrb[225].mxu1  ;;  %v10359_v60 = vmul.f32 %v19357_v18, %v19357_v18 }
 0x433   :  { %v8095_v56 = vadd.f32 %v8094_v26, %v8093_v5  ;;  %v8746_v1 = vadd.f32 %v8745_v16, %v8744_v8  ;;  %v8738_v55 = vsel %vm7354_vm1, %v8444_v43, 0.0  ;;  %v8087_v34 = vsel %vm7354_vm1, %v7855_v30, 0.0  ;;  %16918 = vmatprep.mubr.msk.f32.mxu1 %vm374_vm0, %v10357_v3  ;;  %v21933_v8 = vld [vmem:[#allocation79_spill] sm:$0xff] }
 0x434   :  { %v8739_v51 = vadd.f32 %v8738_v55, %v8737_v31  ;;  %v8088_v49 = vadd.f32 %v8087_v34, %v8086_v13  ;;  %16849 = vmatmul.mubr.msk.f32.gmra.mrb[84].mxu0 %vm374_vm0, %v9625_v20  ;;  %v10360_v25 = vmul.f32 %v21933_v8, %v21933_v8  ;;  %v9630_v20 = vmul.f32 %v19261_v37, %v19261_v37 }
 0x435   :  { %v16623_v61 = vpop.f32.mrb[2].mxu0  ;;  %16851 = vmatprep.mubr.msk.f32.mxu0 %vm374_vm0, %v9626_v54  ;;  %v16553_v6 = vpop.f32.mrb[226].mxu1  ;;  %v10362_v37 = vmul.f32 %v19369_v27, %v19369_v27  ;;  %v10363_v30 = vmul.f32 %v19389_v47, %v19389_v47 }
 0x436   :  { %v8096_v4 = vsel %vm7354_vm1, %v16553_v6, 0.0  ;;  %v8454_v45 = vpop.f32.mrb[3].mxu0  ;;  %16919 = vmatmul.mubr.msk.f32.gmra.mrb[76].mxu1 %vm374_vm0, %v10358_v39  ;;  %11616 = vxpose.xlu0.b32.start [1/2] (short) (narrow) %v8739_v51, 8  ;;  %v7865_v50 = vpop.f32.mrb[227].mxu1  ;;  %v8754_v10 = vsel %vm7354_vm1, %v16623_v61, 0.0  ;;  %v9632_v39 = vmul.f32 %v19287_v41, %v19287_v41  ;;  %v9633_v6 = vmul.f32 %v19283_v17, %v19283_v17 }
 0x437   :  { %v8097_v35 = vadd.f32 %v8096_v4, %v8095_v56  ;;  %v8089_v18 = vsel %vm7354_vm1, %v7865_v50, 0.0  ;;  %16921 = vmatprep.mubr.msk.f32.mxu1 %vm374_vm0, %v10359_v60  ;;  %v8747_v46 = vsel %vm7354_vm1, %v8454_v45, 0.0  ;;  %v9634_v50 = vmul.f32 %v19315_v40, %v19315_v40 }
 0x438   :  { %v8090_v11 = vadd.f32 %v8089_v18, %v8088_v49  ;;  %16852 = vmatmul.mubr.msk.f32.gmra.mrb[86].mxu0 %vm374_vm0, %v9627_v7  ;;  %v21935_v49 = vld [vmem:[#allocation80_spill] sm:$0xff]  ;;  %v10365_v7 = vmul.f32 %v19405_v21, %v19405_v21  ;;  %v10366_v40 = vmul.f32 %v19397_v57, %v19397_v57 }
 0x439   :  { %v16626_v0 = vpop.f32.mrb[4].mxu0  ;;  %16854 = vmatprep.mubr.msk.f32.mxu0 %vm374_vm0, %v9628_v62  ;;  %v16556_v31 = vpop.f32.mrb[228].mxu1  ;;  %v10364_v60 = vmul.f32 %v21935_v49, %v21935_v49  ;;  %v21939_v49 = vld [vmem:[#allocation89_spill] sm:$0xff] }
 0x43a   :  { %v8755_v3 = vsel %vm7354_vm1, %v16626_v0, 0.0  ;;  %v8098_v5 = vsel %vm7354_vm1, %v16556_v31, 0.0  ;;  %v8464_v14 = vpop.f32.mrb[5].mxu0  ;;  %16922 = vmatmul.mubr.msk.f32.gmra.mrb[78].mxu1 %vm374_vm0, %v10360_v25  ;;  %11617 = vxpose.xlu0.b32.end [2/2] (short) (narrow) %v8746_v1, 8  ;;  %v7875_v28 = vpop.f32.mrb[229].mxu1  ;;  %v21934_v1 = vld [vmem:[#allocation67_spill] sm:$0xff] }
 0x43b   :  { %v8756_v59 = vadd.f32 %v8755_v3, %v8754_v10  ;;  %v8099_v33 = vadd.f32 %v8098_v5, %v8097_v35  ;;  %v8748_v13 = vsel %vm7354_vm1, %v8464_v14, 0.0  ;;  %v8091_v26 = vsel %vm7354_vm1, %v7875_v28, 0.0  ;;  %16924 = vmatprep.mubr.msk.f32.mxu1 %vm374_vm0, %v10361_v42 }
 0x43c   :  { %v8749_v16 = vadd.f32 %v8748_v13, %v8747_v46  ;;  %v8092_v43 = vadd.f32 %v8091_v26, %v8090_v11  ;;  %16855 = vmatmul.mubr.msk.f32.gmra.mrb[88].mxu0 %vm374_vm0, %v9629_v22  ;;  %v9631_v55 = vmul.f32 %v21934_v1, %v21934_v1  ;;  %v10367_v10 = vmul.f32 %v19418_v52, %v19418_v52 }
 0x43d   :  { %v16559_v54 = vpop.f32.mrb[230].mxu1  ;;  %v16629_v56 = vpop.f32.mrb[6].mxu0  ;;  %16857 = vmatprep.mubr.msk.f32.mxu0 %vm374_vm0, %v9630_v20  ;;  %v21936_v20 = vld [vmem:[#allocation74_spill] sm:$0xff]  ;;  %v9636_v14 = vmul.f32 %v19343_v12, %v19343_v12 }
 0x43e   :  { %v8757_v34 = vsel %vm7354_vm1, %v16629_v56, 0.0  ;;  %v8474_v48 = vpop.f32.mrb[7].mxu0  ;;  %16925 = vmatmul.mubr.msk.f32.gmra.mrb[80].mxu1 %vm374_vm0, %v10362_v37  ;;  %11456 = vxpose.xlu1.b32.start [1/2] (short) (narrow) %v8092_v43, 8  ;;  %v7885_v27 = vpop.f32.mrb[231].mxu1  ;;  %v8107_v4 = vsel %vm7354_vm1, %v16559_v54, 0.0  ;;  %v9635_v46 = vmul.f32 %v21936_v20, %v21936_v20  ;;  %v10369_v37 = vmul.f32 %v19438_v15, %v19438_v15 }
 0x43f   :  { %v8758_v51 = vadd.f32 %v8757_v34, %v8756_v59  ;;  %v8750_v47 = vsel %vm7354_vm1, %v8474_v48, 0.0  ;;  %16927 = vmatprep.mubr.msk.f32.mxu1 %vm374_vm0, %v10363_v30  ;;  %v8100_v2 = vsel %vm7354_vm1, %v7885_v27, 0.0  ;;  %v21937_v59 = vld [vmem:[#allocation82_spill] sm:$0xff]  ;;  %v9637_v30 = vmul.f32 %v19339_v44, %v19339_v44 }
 0x440   :  { %v8751_v61 = vadd.f32 %v8750_v47, %v8749_v16  ;;  %16858 = vmatmul.mubr.msk.f32.gmra.mrb[90].mxu0 %vm374_vm0, %v9631_v55  ;;  %v9638_v54 = vmul.f32 %v19371_v63, %v19371_v63 }
 0x441   :  { %v16562_v41 = vpop.f32.mrb[232].mxu1  ;;  %v16632_v45 = vpop.f32.mrb[8].mxu0  ;;  %16860 = vmatprep.mubr.msk.f32.mxu0 %vm374_vm0, %v9632_v39  ;;  %v21938_v39 = vld [vmem:[#allocation85_spill] sm:$0xff] }
 0x442   :  { %v8108_v62 = vsel %vm7354_vm1, %v16562_v41, 0.0  ;;  %v8759_v35 = vsel %vm7354_vm1, %v16632_v45, 0.0  ;;  %v8484_v18 = vpop.f32.mrb[9].mxu0  ;;  %16928 = vmatmul.mubr.msk.f32.gmra.mrb[82].mxu1 %vm374_vm0, %v10364_v60  ;;  %11457 = vxpose.xlu1.b32.end [2/2] (short) (narrow) %v8099_v33, 8  ;;  %v7895_v21 = vpop.f32.mrb[233].mxu1  ;;  %v10368_v33 = vmul.f32 %v21937_v59, %v21937_v59  ;;  %v10370_v63 = vmul.f32 %v21938_v39, %v21938_v39 }
 0x443   :  { %v8109_v17 = vadd.f32 %v8108_v62, %v8107_v4  ;;  %v8760_v8 = vadd.f32 %v8759_v35, %v8758_v51  ;;  %v8752_v25 = vsel %vm7354_vm1, %v8484_v18, 0.0  ;;  %v8101_v11 = vsel %vm7354_vm1, %v7895_v21, 0.0  ;;  %16930 = vmatprep.mubr.msk.f32.mxu1 %vm374_vm0, %v10365_v7  ;;  %v21940_v35 = vld [vmem:[#allocation88_spill] sm:$0xff]  ;;  %v21941_v21 = vld [vmem:[#allocation14_spill] sm:$0xff] }
 0x444   :  { %v8753_v22 = vadd.f32 %v8752_v25, %v8751_v61  ;;  %v8102_v42 = vadd.f32 %v8101_v11, %v8100_v2  ;;  %16861 = vmatmul.mubr.msk.f32.gmra.mrb[92].mxu0 %vm374_vm0, %v9633_v6  ;;  %v10371_v60 = vmul.f32 %v21939_v49, %v21939_v49  ;;  %v9639_v7 = vmul.f32 %v19367_v29, %v19367_v29  ;;  %v21952_v49 = vld [vmem:[#allocation21_spill] sm:$0xff] }
 0x445   :  { %v16565_v0 = vpop.f32.mrb[234].mxu1  ;;  %16863 = vmatprep.mubr.msk.f32.mxu0 %vm374_vm0, %v9634_v50  ;;  %v16635_v31 = vpop.f32.mrb[10].mxu0  ;;  %v9640_v50 = vmul.f32 %v19399_v58, %v19399_v58  ;;  %v10372_v18 = vmul.f32 %v21940_v35, %v21940_v35  ;;  %v21942_v58 = vld [vmem:[#allocation81_spill] sm:$0xff]  ;;  %v10381_v35 = vmul.f32 %v19660_v23, %v19660_v23 }
 0x446   :  { %v8110_v3 = vsel %vm7354_vm1, %v16565_v0, 0.0  ;;  %16931 = vmatmul.mubr.msk.f32.gmra.mrb[84].mxu1 %vm374_vm0, %v10366_v40  ;;  %11648 = vxpose.xlu1.b32.start [1/2] (short) (narrow) %v8753_v22, 8  ;;  %v7905_v57 = vpop.f32.mrb[235].mxu1  ;;  %v8494_v5 = vpop.f32.mrb[11].mxu0  ;;  %v8768_v26 = vsel %vm7354_vm1, %v16635_v31, 0.0  ;;  %v9641_v25 = vmul.f32 %v21942_v58, %v21942_v58 }
 0x447   :  { %v8111_v28 = vadd.f32 %v8110_v3, %v8109_v17  ;;  %v8103_v52 = vsel %vm7354_vm1, %v7905_v57, 0.0  ;;  %16933 = vmatprep.mubr.msk.f32.mxu1 %vm374_vm0, %v10367_v10  ;;  %v8761_v12 = vsel %vm7354_vm1, %v8494_v5, 0.0  ;;  %v10373_v17 = vmul.f32 %v21941_v21, %v21941_v21  ;;  %v21945_v5 = vld [vmem:[#allocation22_spill] sm:$0xff]  ;;  %v21956_v21 = vld [vmem:[#allocation92_spill] sm:$0xff] }
 0x448   :  { %v8104_v13 = vadd.f32 %v8103_v52, %v8102_v42  ;;  %16864 = vmatmul.mubr.msk.f32.gmra.mrb[94].mxu0 %vm374_vm0, %v9635_v46  ;;  %v21943_v42 = vld [vmem:[#allocation84_spill] sm:$0xff]  ;;  %v21944_v46 = vld [vmem:[#allocation13_spill] sm:$0xff]  ;;  %v21946_v52 = vld [vmem:[#allocation83_spill] sm:$0xff] }
 0x449   :  { %v16568_v16 = vpop.f32.mrb[236].mxu1  ;;  %16866 = vmatprep.mubr.msk.f32.mxu0 %vm374_vm0, %v9636_v14  ;;  %v16638_v43 = vpop.f32.mrb[12].mxu0  ;;  %v9642_v10 = vmul.f32 %v21943_v42, %v21943_v42  ;;  %v10374_v3 = vmul.f32 %v21944_v46, %v21944_v46  ;;  %v10375_v14 = vmul.f32 %v21945_v5, %v21945_v5  ;;  %v9643_v59 = vmul.f32 %v21946_v52, %v21946_v52  ;;  %v21961_v52 = vld [vmem:[#allocation97_spill] sm:$0xff] }
 0x44a   :  { %v8112_v56 = vsel %vm7354_vm1, %v16568_v16, 0.0  ;;  %16934 = vmatmul.mubr.msk.f32.gmra.mrb[86].mxu1 %vm374_vm0, %v10368_v33  ;;  %11649 = vxpose.xlu1.b32.end [2/2] (short) (narrow) %v8760_v8, 8  ;;  %v7915_v1 = vpop.f32.mrb[237].mxu1  ;;  %v8769_v15 = vsel %vm7354_vm1, %v16638_v43, 0.0  ;;  %v8504_v55 = vpop.f32.mrb[13].mxu0  ;;  %v21948_v43 = vld [vmem:[#allocation18_spill] sm:$0xff] }
 0x44b   :  { %v8113_v34 = vadd.f32 %v8112_v56, %v8111_v28  ;;  %v8105_v48 = vsel %vm7354_vm1, %v7915_v1, 0.0  ;;  %16936 = vmatprep.mubr.msk.f32.mxu1 %vm374_vm0, %v10369_v37  ;;  %v8770_v27 = vadd.f32 %v8769_v15, %v8768_v26  ;;  %v8762_v44 = vsel %vm7354_vm1, %v8504_v55, 0.0  ;;  %v21947_v26 = vld [vmem:[#allocation87_spill] sm:$0xff]  ;;  %v21949_v15 = vld [vmem:[#allocation86_spill] sm:$0xff] }
 0x44c   :  { %v8106_v51 = vadd.f32 %v8105_v48, %v8104_v13  ;;  %16867 = vmatmul.mubr.msk.f32.gmra.mrb[96].mxu0 %vm374_vm0, %v9637_v30  ;;  %v8763_v47 = vadd.f32 %v8762_v44, %v8761_v12  ;;  %v9644_v37 = vmul.f32 %v21947_v26, %v21947_v26  ;;  %v10376_v30 = vmul.f32 %v21948_v43, %v21948_v43  ;;  %v21962_v26 = vld [vmem:[#allocation25_spill] sm:$0xff] }
 0x44d   :  { %v16571_v61 = vpop.f32.mrb[238].mxu1  ;;  %16869 = vmatprep.mubr.msk.f32.mxu0 %vm374_vm0, %v9638_v54  ;;  %v16641_v6 = vpop.f32.mrb[14].mxu0  ;;  %v10377_v56 = vmul.f32 %v19629_v24, %v19629_v24  ;;  %v9645_v55 = vmul.f32 %v21949_v15, %v21949_v15  ;;  %v21951_v24 = vld [vmem:[#allocation17_spill] sm:$0xff]  ;;  %v21964_v15 = vld [vmem:[#allocation99_spill] sm:$0xff] }
 0x44e   :  { %16937 = vmatmul.mubr.msk.f32.gmra.mrb[88].mxu1 %vm374_vm0, %v10370_v63  ;;  %11488 = vxpose.xlu0.b32.start [1/2] (short) (narrow) %v8106_v51, 8  ;;  %v7925_v4 = vpop.f32.mrb[239].mxu1  ;;  %v8771_v41 = vsel %vm7354_vm1, %v16641_v6, 0.0  ;;  %v8514_v45 = vpop.f32.mrb[15].mxu0  ;;  %v8121_v11 = vsel %vm7354_vm1, %v16571_v61, 0.0  ;;  %v10378_v51 = vmul.f32 %v21951_v24, %v21951_v24  ;;  %v21953_v6 = vld [vmem:[#allocation90_spill] sm:$0xff] }
 0x44f   :  { %16939 = vmatprep.mubr.msk.f32.mxu1 %vm374_vm0, %v10371_v60  ;;  %v20260_v2 = vadd.f32 %v8771_v41, %v8770_v27  ;;  %v8764_v62 = vsel %vm7354_vm1, %v8514_v45, 0.0  ;;  %v8114_v0 = vsel %vm7354_vm1, %v7925_v4, 0.0  ;;  %v21950_v27 = vld [vmem:[#allocation91_spill] sm:$0xff]  ;;  %v10379_v60 = vmul.f32 %v21952_v49, %v21952_v49  ;;  %v21954_v41 = vld [vmem:[#allocation93_spill] sm:$0xff] }
 0x450   :  { %16870 = vmatmul.mubr.msk.f32.gmra.mrb[98].mxu0 %vm374_vm0, %v9639_v7  ;;  %v20266_v29 = vadd.f32 %v8764_v62, %v8763_v47  ;;  %v9646_v44 = vmul.f32 %v21950_v27, %v21950_v27  ;;  %v9647_v7 = vmul.f32 %v21953_v6, %v21953_v6  ;;  %v9648_v45 = vmul.f32 %v21954_v41, %v21954_v41  ;;  %v21969_v6 = vld [vmem:[#allocation34_spill] sm:$0xff] }
 0x451   :  { %v16574_v8 = vpop.f32.mrb[240].mxu1  ;;  %16872 = vmatprep.mubr.msk.f32.mxu0 %vm374_vm0, %v9640_v50  ;;  %v21955_v50 = vld [vmem:[#allocation26_spill] sm:$0xff] }
 0x452   :  { %v8122_v40 = vsel %vm7354_vm1, %v16574_v8, 0.0  ;;  %16940 = vmatmul.mubr.msk.f32.gmra.mrb[90].mxu1 %vm374_vm0, %v10372_v18  ;;  %11489 = vxpose.xlu0.b32.end [2/2] (short) (narrow) %v8113_v34, 8  ;;  %v7935_v22 = vpop.f32.mrb[241].mxu1  ;;  %v10380_v62 = vmul.f32 %v21955_v50, %v21955_v50 }
 0x453   :  { %v8123_v31 = vadd.f32 %v8122_v40, %v8121_v11  ;;  %v8115_v20 = vsel %vm7354_vm1, %v7935_v22, 0.0  ;;  %16942 = vmatprep.mubr.msk.f32.mxu1 %vm374_vm0, %v10373_v17  ;;  %v9649_v17 = vmul.f32 %v21956_v21, %v21956_v21  ;;  %v21957_v11 = vld [vmem:[#allocation95_spill] sm:$0xff] }
 0x454   :  { %v8116_v57 = vadd.f32 %v8115_v20, %v8114_v0  ;;  %16873 = vmatmul.mubr.msk.f32.gmra.mrb[100].mxu0 %vm374_vm0, %v9641_v25  ;;  %v9650_v40 = vmul.f32 %v21957_v11, %v21957_v11  ;;  %v21959_v20 = vld [vmem:[#allocation29_spill] sm:$0xff]  ;;  %v21971_v21 = vld [vmem:[#allocation103_spill] sm:$0xff] }
 0x455   :  { %v16577_v28 = vpop.f32.mrb[242].mxu1  ;;  %16875 = vmatprep.mubr.msk.f32.mxu0 %vm374_vm0, %v9642_v10  ;;  %v21958_v10 = vld [vmem:[#allocation30_spill] sm:$0xff]  ;;  %v10383_v46 = vmul.f32 %v21959_v20, %v21959_v20 }
 0x456   :  { %v8124_v33 = vsel %vm7354_vm1, %v16577_v28, 0.0  ;;  %v7945_v13 = vpop.f32.mrb[243].mxu1  ;;  %16943 = vmatmul.mubr.msk.f32.gmra.mrb[92].mxu1 %vm374_vm0, %v10374_v3  ;;  %v10382_v0 = vmul.f32 %v21958_v10, %v21958_v10  ;;  %v21974_v10 = vld [vmem:[#allocation102_spill] sm:$0xff] }
 0x457   :  { %v8125_v16 = vadd.f32 %v8124_v33, %v8123_v31  ;;  %v8117_v12 = vsel %vm7354_vm1, %v7945_v13, 0.0  ;;  %16945 = vmatprep.mubr.msk.f32.mxu1 %vm374_vm0, %v10375_v14 }
 0x458   :  { %v8118_v54 = vadd.f32 %v8117_v12, %v8116_v57  ;;  %16876 = vmatmul.mubr.msk.f32.gmra.mrb[102].mxu0 %vm374_vm0, %v9643_v59  ;;  %v21960_v57 = vld [vmem:[#allocation94_spill] sm:$0xff]  ;;  %v9652_v59 = vmul.f32 %v21961_v52, %v21961_v52  ;;  %v10385_v12 = vmul.f32 %v19693_v38, %v19693_v38  ;;  %v21965_v38 = vld [vmem:[#allocation33_spill] sm:$0xff] }
 0x459   :  { %v16580_v1 = vpop.f32.mrb[244].mxu1  ;;  %16878 = vmatprep.mubr.msk.f32.mxu0 %vm374_vm0, %v9644_v37  ;;  %v9651_v5 = vmul.f32 %v21960_v57, %v21960_v57  ;;  %v10384_v37 = vmul.f32 %v21962_v26, %v21962_v26  ;;  %v10386_v27 = vmul.f32 %v21965_v38, %v21965_v38  ;;  %v21980_v38 = vld [vmem:[#allocation12_spill] sm:$0xff] }
 0x45a   :  { %v8126_v34 = vsel %vm7354_vm1, %v16580_v1, 0.0  ;;  %v7955_v48 = vpop.f32.mrb[245].mxu1  ;;  %16946 = vmatmul.mubr.msk.f32.gmra.mrb[94].mxu1 %vm374_vm0, %v10376_v30  ;;  %v21963_v30 = vld [vmem:[#allocation96_spill] sm:$0xff] }
 0x45b   :  { %v8127_v39 = vadd.f32 %v8126_v34, %v8125_v16  ;;  %v8119_v63 = vsel %vm7354_vm1, %v7955_v48, 0.0  ;;  %16948 = vmatprep.mubr.msk.f32.mxu1 %vm374_vm0, %v10377_v56 }
 0x45c   :  { %v8120_v47 = vadd.f32 %v8119_v63, %v8118_v54  ;;  %16879 = vmatmul.mubr.msk.f32.gmra.mrb[104].mxu0 %vm374_vm0, %v9645_v55  ;;  %v9653_v54 = vmul.f32 %v21963_v30, %v21963_v30  ;;  %v9654_v55 = vmul.f32 %v21964_v15, %v21964_v15  ;;  %v21978_v30 = vld [vmem:[#allocation6_spill] sm:$0xff] }
 0x45d   :  { %v16583_v61 = vpop.f32.mrb[246].mxu1  ;;  %16881 = vmatprep.mubr.msk.f32.mxu0 %vm374_vm0, %v9646_v44 }
 0x45e   :  { %16949 = vmatmul.mubr.msk.f32.gmra.mrb[96].mxu1 %vm374_vm0, %v10378_v51  ;;  %11520 = vxpose.xlu1.b32.start [1/2] (short) (narrow) %v8120_v47, 8  ;;  %v7965_v4 = vpop.f32.mrb[247].mxu1  ;;  %v8135_v8 = vsel %vm7354_vm1, %v16583_v61, 0.0  ;;  %v21967_v51 = vld [vmem:[#allocation98_spill] sm:$0xff] }
 0x45f   :  { %16951 = vmatprep.mubr.msk.f32.mxu1 %vm374_vm0, %v10379_v60  ;;  %v8128_v22 = vsel %vm7354_vm1, %v7965_v4, 0.0  ;;  %v9655_v47 = vmul.f32 %v21967_v51, %v21967_v51  ;;  %v21968_v60 = vld [vmem:[#allocation101_spill] sm:$0xff]  ;;  %v10389_v4 = vmul.f32 %v19724_v9, %v19724_v9 }
 0x460   :  { %16882 = vmatmul.mubr.msk.f32.gmra.mrb[106].mxu0 %vm374_vm0, %v9647_v7  ;;  %v9656_v61 = vmul.f32 %v21968_v60, %v21968_v60  ;;  %v10388_v7 = vmul.f32 %v21969_v6, %v21969_v6 }
 0x461   :  { %v16586_v18 = vpop.f32.mrb[248].mxu1  ;;  %16884 = vmatprep.mubr.msk.f32.mxu0 %vm374_vm0, %v9648_v45  ;;  %v21970_v45 = vld [vmem:[#allocation100_spill] sm:$0xff] }
 0x462   :  { %v8136_v58 = vsel %vm7354_vm1, %v16586_v18, 0.0  ;;  %16952 = vmatmul.mubr.msk.f32.gmra.mrb[98].mxu1 %vm374_vm0, %v10380_v62  ;;  %11521 = vxpose.xlu1.b32.end [2/2] (short) (narrow) %v8127_v39, 8  ;;  %v7975_v25 = vpop.f32.mrb[249].mxu1  ;;  %v21966_v39 = vld [vmem:[#allocation38_spill] sm:$0xff]  ;;  %v9657_v50 = vmul.f32 %v21970_v45, %v21970_v45 }
 0x463   :  { %v8137_v23 = vadd.f32 %v8136_v58, %v8135_v8  ;;  %v8129_v42 = vsel %vm7354_vm1, %v7975_v25, 0.0  ;;  %16954 = vmatprep.mubr.msk.f32.mxu1 %vm374_vm0, %v10381_v35  ;;  %v10387_v63 = vmul.f32 %v21966_v39, %v21966_v39  ;;  %v21972_v25 = vld [vmem:[#allocation42_spill] sm:$0xff] }
 0x464   :  { %v8130_v31 = vadd.f32 %v8129_v42, %v8128_v22  ;;  %16885 = vmatmul.mubr.msk.f32.gmra.mrb[108].mxu0 %vm374_vm0, %v9649_v17  ;;  %v9658_v17 = vmul.f32 %v21971_v21, %v21971_v21  ;;  %v10390_v11 = vmul.f32 %v21972_v25, %v21972_v25  ;;  %v21973_v22 = vld [vmem:[#allocation41_spill] sm:$0xff] }
 0x465   :  { %v16589_v3 = vpop.f32.mrb[250].mxu1  ;;  %16887 = vmatprep.mubr.msk.f32.mxu0 %vm374_vm0, %v9650_v40 }
 0x466   :  { %v8138_v14 = vsel %vm7354_vm1, %v16589_v3, 0.0  ;;  %v7985_v28 = vpop.f32.mrb[251].mxu1  ;;  %16955 = vmatmul.mubr.msk.f32.gmra.mrb[100].mxu1 %vm374_vm0, %v10382_v0  ;;  %v9659_v0 = vmul.f32 %v21974_v10, %v21974_v10 }
 0x467   :  { %v8139_v33 = vadd.f32 %v8138_v14, %v8137_v23  ;;  %v8131_v13 = vsel %vm7354_vm1, %v7985_v28, 0.0  ;;  %16957 = vmatprep.mubr.msk.f32.mxu1 %vm374_vm0, %v10383_v46  ;;  %v10391_v23 = vmul.f32 %v21973_v22, %v21973_v22  ;;  %v21975_v46 = vld [vmem:[#allocation105_spill] sm:$0xff] }
 0x468   :  { %v8132_v16 = vadd.f32 %v8131_v13, %v8130_v31  ;;  %16888 = vmatmul.mubr.msk.f32.gmra.mrb[110].mxu0 %vm374_vm0, %v9651_v5  ;;  %v9660_v3 = vmul.f32 %v21975_v46, %v21975_v46  ;;  %v21976_v14 = vld [vmem:[#allocation37_spill] sm:$0xff]  ;;  %v21977_v13 = vld [vmem:[#allocation104_spill] sm:$0xff] }
 0x469   :  { %v16592_v43 = vpop.f32.mrb[252].mxu1  ;;  %16890 = vmatprep.mubr.msk.f32.mxu0 %vm374_vm0, %v9652_v59  ;;  %v10392_v28 = vmul.f32 %v21976_v14, %v21976_v14  ;;  %v10393_v59 = vmul.f32 %v19757_v32, %v19757_v32  ;;  %v9661_v26 = vmul.f32 %v21977_v13, %v21977_v13  ;;  %v10394_v32 = vmul.f32 %v21978_v30, %v21978_v30 }
 0x46a   :  { %v8140_v56 = vsel %vm7354_vm1, %v16592_v43, 0.0  ;;  %v7995_v1 = vpop.f32.mrb[253].mxu1  ;;  %16958 = vmatmul.mubr.msk.f32.gmra.mrb[102].mxu1 %vm374_vm0, %v10384_v37 }
 0x46b   :  { %v20363_v34 = vadd.f32 %v8140_v56, %v8139_v33  ;;  %v8133_v48 = vsel %vm7354_vm1, %v7995_v1, 0.0  ;;  %16960 = vmatprep.mubr.msk.f32.mxu1 %vm374_vm0, %v10385_v12  ;;  %v21979_v56 = vld [vmem:[#allocation11_spill] sm:$0xff] }
 0x46c   :  { %v20369_v44 = vadd.f32 %v8133_v48, %v8132_v16  ;;  %16891 = vmatmul.mubr.msk.f32.gmra.mrb[112].mxu0 %vm374_vm0, %v9653_v54  ;;  %v10395_v1 = vmul.f32 %v21979_v56, %v21979_v56 }
 0x46d   :  { %v16595_v24 = vpop.f32.mrb[254].mxu1  ;;  %16893 = vmatprep.mubr.msk.f32.mxu0 %vm374_vm0, %v9654_v55 }
 0x46e   :  { %v8005_v49 = vpop.f32.mrb[255].mxu1  ;;  %16961 = vmatmul.mubr.msk.f32.gmra.mrb[104].mxu1 %vm374_vm0, %v10386_v27  ;;  %v8149_v62 = vsel %vm7354_vm1, %v16595_v24, 0.0  ;;  %v10396_v27 = vmul.f32 %v21980_v38, %v21980_v38  ;;  %v10397_v24 = vmul.f32 %v19788_v53, %v19788_v53 }
 0x46f   :  { %16963 = vmatprep.mubr.msk.f32.mxu1 %vm374_vm0, %v10387_v63  ;;  %v8142_v8 = vsel %vm7354_vm1, %v8005_v49, 0.0 }
 0x470   :  { %16894 = vmatmul.mubr.msk.f32.gmra.mrb[114].mxu0 %vm374_vm0, %v9655_v47 }
 0x471   :  { %v16598_v41 = vpop.f32.mrb[0].mxu1  ;;  %16896 = vmatprep.mubr.msk.f32.mxu0 %vm374_vm0, %v9656_v61 }
 0x472   :  { %v8150_v35 = vsel %vm7354_vm1, %v16598_v41, 0.0  ;;  %v8015_v18 = vpop.f32.mrb[1].mxu1  ;;  %16964 = vmatmul.mubr.msk.f32.gmra.mrb[106].mxu1 %vm374_vm0, %v10388_v7 }
 0x473   :  { %v8151_v58 = vadd.f32 %v8150_v35, %v8149_v62  ;;  %v8143_v9 = vsel %vm7354_vm1, %v8015_v18, 0.0  ;;  %16966 = vmatprep.mubr.msk.f32.mxu1 %vm374_vm0, %v10389_v4 }
 0x474   :  { %v8144_v40 = vadd.f32 %v8143_v9, %v8142_v8  ;;  %16897 = vmatmul.mubr.msk.f32.gmra.mrb[116].mxu0 %vm374_vm0, %v9657_v50 }
 0x475   :  { %v16601_v42 = vpop.f32.mrb[2].mxu1  ;;  %16899 = vmatprep.mubr.msk.f32.mxu0 %vm374_vm0, %v9658_v17 }
 0x476   :  { %v8152_v31 = vsel %vm7354_vm1, %v16601_v42, 0.0  ;;  %v8025_v20 = vpop.f32.mrb[3].mxu1  ;;  %16967 = vmatmul.mubr.msk.f32.gmra.mrb[108].mxu1 %vm374_vm0, %v10390_v11  ;;  %v21983_v11 = vld [vmem:[#allocation5_spill] sm:$0xff] }
 0x477   :  { %v8153_v57 = vadd.f32 %v8152_v31, %v8151_v58  ;;  %v8145_v5 = vsel %vm7354_vm1, %v8025_v20, 0.0  ;;  %16969 = vmatprep.mubr.msk.f32.mxu1 %vm374_vm0, %v10391_v23 }
 0x478   :  { %v8146_v52 = vadd.f32 %v8145_v5, %v8144_v40  ;;  %16900 = vmatmul.mubr.msk.f32.gmra.mrb[118].mxu0 %vm374_vm0, %v9659_v0  ;;  %v10400_v40 = vmul.f32 %v21983_v11, %v21983_v11  ;;  %v10401_v0 = vmul.f32 %v19821_v19, %v19821_v19  ;;  %v21984_v19 = vld [vmem:[#allocation9_spill] sm:$0xff] }
 0x479   :  { %v16604_v33 = vpop.f32.mrb[4].mxu1  ;;  %16902 = vmatprep.mubr.msk.f32.mxu0 %vm374_vm0, %v9660_v3 }
 0x47a   :  { %v8154_v37 = vsel %vm7354_vm1, %v16604_v33, 0.0  ;;  %v8035_v16 = vpop.f32.mrb[5].mxu1  ;;  %16970 = vmatmul.mubr.msk.f32.gmra.mrb[110].mxu1 %vm374_vm0, %v10392_v28  ;;  %v10402_v33 = vmul.f32 %v21984_v19, %v21984_v19 }
 0x47b   :  { %v20421_v12 = vadd.f32 %v8154_v37, %v8153_v57  ;;  %v8147_v43 = vsel %vm7354_vm1, %v8035_v16, 0.0  ;;  %16972 = vmatprep.mubr.msk.f32.mxu1 %vm374_vm0, %v10393_v59  ;;  %v21985_v16 = vld [vmem:[#allocation46_spill] sm:$0xff] }
 0x47c   :  { %v20427_v54 = vadd.f32 %v8147_v43, %v8146_v52  ;;  %16903 = vmatmul.mubr.msk.f32.gmra.mrb[120].mxu0 %vm374_vm0, %v9661_v26  ;;  %v10403_v43 = vmul.f32 %v21985_v16, %v21985_v16 }
 0x47d   :  { %v16711_v15 = vpop.f32.mrb[6].mxu1 }
 0x47e   :  { %v9167_v55 = vpop.f32.mrb[7].mxu1  ;;  %16973 = vmatmul.mubr.msk.f32.gmra.mrb[112].mxu1 %vm374_vm0, %v10394_v32  ;;  %v9493_v60 = vsel %vm7354_vm1, %v16711_v15, 0.0 }
 0x47f   :  { %v16644_v48 = vpop.f32.mrb[16].mxu0  ;;  %16975 = vmatprep.mubr.msk.f32.mxu1 %vm374_vm0, %v10395_v1  ;;  %v9486_v4 = vsel %vm7354_vm1, %v9167_v55, 0.0 }
 0x480   :  { %v8773_v39 = vsel %vm7354_vm1, %v16644_v48, 0.0  ;;  %v8524_v63 = vpop.f32.mrb[17].mxu0  ;;  %v21986_v48 = vld [vmem:[#allocation15_spill] sm:$0xff] }
 0x481   :  { %v8774_v51 = vadd.f32 %v8773_v39, %v20260_v2  ;;  %v8766_v47 = vsel %vm7354_vm1, %v8524_v63, 0.0  ;;  %v16714_v49 = vpop.f32.mrb[8].mxu1  ;;  %v21981_v2 = vld [vmem:[#allocation16_spill] sm:$0xff]  ;;  %v10404_v38 = vmul.f32 %v21986_v48, %v21986_v48  ;;  %v10405_v39 = vmul.f32 %v19852_v36, %v19852_v36 }
 0x482   :  { %v8767_v61 = vadd.f32 %v8766_v47, %v20266_v29  ;;  %v9494_v6 = vsel %vm7354_vm1, %v16714_v49, 0.0  ;;  %v9177_v7 = vpop.f32.mrb[9].mxu1  ;;  %16976 = vmatmul.mubr.msk.f32.gmra.mrb[114].mxu1 %vm374_vm0, %v10396_v27  ;;  %v10398_v50 = vmul.f32 %v21981_v2, %v21981_v2  ;;  %v21982_v29 = vld [vmem:[#allocation10_spill] sm:$0xff]  ;;  %v21987_v36 = vld [vmem:[#allocation20_spill] sm:$0xff] }
 0x483   :  { %v9495_v41 = vadd.f32 %v9494_v6, %v9493_v60  ;;  %v9487_v45 = vsel %vm7354_vm1, %v9177_v7, 0.0  ;;  %v16647_v53 = vpop.f32.mrb[18].mxu0  ;;  %16978 = vmatprep.mubr.msk.f32.mxu1 %vm374_vm0, %v10397_v24  ;;  %v10399_v18 = vmul.f32 %v21982_v29, %v21982_v29  ;;  %v21988_v2 = vld [vmem:[#allocation50_spill] sm:$0xff] }
 0x484   :  { %v9488_v62 = vadd.f32 %v9487_v45, %v9486_v4  ;;  %v8534_v35 = vpop.f32.mrb[19].mxu0  ;;  %11680 = vxpose.xlu0.b32.start [1/2] (short) (narrow) %v8767_v61, 8  ;;  %v8782_v22 = vsel %vm7354_vm1, %v16647_v53, 0.0 }
 0x485   :  { %v16717_v21 = vpop.f32.mrb[10].mxu1  ;;  %v8775_v31 = vsel %vm7354_vm1, %v8534_v35, 0.0 }
 0x486   :  { %v9496_v17 = vsel %vm7354_vm1, %v16717_v21, 0.0  ;;  %v9187_v8 = vpop.f32.mrb[11].mxu1  ;;  %16979 = vmatmul.mubr.msk.f32.gmra.mrb[116].mxu1 %vm374_vm0, %v10398_v50  ;;  %v10407_v50 = vmul.f32 %v21988_v2, %v21988_v2 }
 0x487   :  { %v9497_v58 = vadd.f32 %v9496_v17, %v9495_v41  ;;  %v9489_v9 = vsel %vm7354_vm1, %v9187_v8, 0.0  ;;  %v16650_v25 = vpop.f32.mrb[20].mxu0  ;;  %16981 = vmatprep.mubr.msk.f32.mxu1 %vm374_vm0, %v10399_v18  ;;  %v10406_v41 = vmul.f32 %v21987_v36, %v21987_v36  ;;  %v21989_v8 = vld [vmem:[#allocation24_spill] sm:$0xff] }
 0x488   :  { %v9490_v23 = vadd.f32 %v9489_v9, %v9488_v62  ;;  %v8783_v42 = vsel %vm7354_vm1, %v16650_v25, 0.0  ;;  %v8544_v10 = vpop.f32.mrb[21].mxu0  ;;  %11681 = vxpose.xlu0.b32.end [2/2] (short) (narrow) %v8774_v51, 8 }
 0x489   :  { %v8784_v20 = vadd.f32 %v8783_v42, %v8782_v22  ;;  %v8776_v46 = vsel %vm7354_vm1, %v8544_v10, 0.0  ;;  %v16720_v3 = vpop.f32.mrb[12].mxu1  ;;  %v21990_v22 = vld [vmem:[#allocation51_spill] sm:$0xff] }
 0x48a   :  { %v8777_v57 = vadd.f32 %v8776_v46, %v8775_v31  ;;  %v9498_v5 = vsel %vm7354_vm1, %v16720_v3, 0.0  ;;  %v9197_v14 = vpop.f32.mrb[13].mxu1  ;;  %16982 = vmatmul.mubr.msk.f32.gmra.mrb[118].mxu1 %vm374_vm0, %v10400_v40 }
 0x48b   :  { %v20466_v28 = vadd.f32 %v9498_v5, %v9497_v58  ;;  %v9491_v52 = vsel %vm7354_vm1, %v9197_v14, 0.0  ;;  %v16653_v59 = vpop.f32.mrb[22].mxu0  ;;  %16984 = vmatprep.mubr.msk.f32.mxu1 %vm374_vm0, %v10401_v0  ;;  %v10408_v58 = vmul.f32 %v21989_v8, %v21989_v8 }
 0x48c   :  { %v20472_v13 = vadd.f32 %v9491_v52, %v9490_v23  ;;  %v8785_v26 = vsel %vm7354_vm1, %v16653_v59, 0.0  ;;  %v8554_v37 = vpop.f32.mrb[23].mxu0  ;;  %11552 = vxpose.xlu0.b32.start [1/2] (short) (narrow) %v20369_v44, 8  ;;  %v10409_v23 = vmul.f32 %v21990_v22, %v21990_v22  ;;  %v21991_v52 = vld [vmem:[#allocation52_spill] sm:$0xff] }
 0x48d   :  { %v8786_v30 = vadd.f32 %v8785_v26, %v8784_v20  ;;  %v8778_v32 = vsel %vm7354_vm1, %v8554_v37, 0.0  ;;  %v16723_v56 = vpop.f32.mrb[14].mxu1  ;;  %v10410_v59 = vmul.f32 %v21991_v52, %v21991_v52  ;;  %v21992_v37 = vld [vmem:[#allocation106_spill] sm:$0xff] }
 0x48e   :  { %v8779_v1 = vadd.f32 %v8778_v32, %v8777_v57  ;;  %v9207_v15 = vpop.f32.mrb[15].mxu1  ;;  %16985 = vmatmul.mubr.msk.f32.gmra.mrb[120].mxu1 %vm374_vm0, %v10402_v33  ;;  %v9507_v47 = vsel %vm7354_vm1, %v16723_v56, 0.0  ;;  %v10411_v16 = vmul.f32 %v21992_v37, %v21992_v37 }
 0x48f   :  { %v16656_v55 = vpop.f32.mrb[24].mxu0  ;;  %16987 = vmatprep.mubr.msk.f32.mxu1 %vm374_vm0, %v10403_v43  ;;  %v9500_v6 = vsel %vm7354_vm1, %v9207_v15, 0.0 }
 0x490   :  { %v8787_v27 = vsel %vm7354_vm1, %v16656_v55, 0.0  ;;  %v8564_v44 = vpop.f32.mrb[25].mxu0  ;;  %11553 = vxpose.xlu0.b32.end [2/2] (short) (narrow) %v20363_v34, 8  ;;  %v21993_v55 = vld [vmem:[#allocation31_spill] sm:$0xff] }
 0x491   :  { %v8788_v63 = vadd.f32 %v8787_v27, %v8786_v30  ;;  %v8780_v24 = vsel %vm7354_vm1, %v8564_v44, 0.0  ;;  %v16726_v51 = vpop.f32.mrb[16].mxu1  ;;  %v10412_v48 = vmul.f32 %v21993_v55, %v21993_v55  ;;  %v21994_v27 = vld [vmem:[#allocation107_spill] sm:$0xff] }
 0x492   :  { %v8781_v49 = vadd.f32 %v8780_v24, %v8779_v1  ;;  %v9508_v60 = vsel %vm7354_vm1, %v16726_v51, 0.0  ;;  %v9217_v61 = vpop.f32.mrb[17].mxu1  ;;  %16988 = vmatmul.mubr.msk.f32.gmra.mrb[122].mxu1 %vm374_vm0, %v10404_v38  ;;  %v10413_v44 = vmul.f32 %v21994_v27, %v21994_v27 }
 0x493   :  { %v9509_v7 = vadd.f32 %v9508_v60, %v9507_v47  ;;  %v9501_v34 = vsel %vm7354_vm1, %v9217_v61, 0.0  ;;  %v16659_v4 = vpop.f32.mrb[26].mxu0  ;;  %16990 = vmatprep.mubr.msk.f32.mxu1 %vm374_vm0, %v10405_v39 }
 0x494   :  { %v9502_v45 = vadd.f32 %v9501_v34, %v9500_v6  ;;  %v8574_v53 = vpop.f32.mrb[27].mxu0  ;;  %11712 = vxpose.xlu1.b32.start [1/2] (short) (narrow) %v8781_v49, 8  ;;  %v8796_v9 = vsel %vm7354_vm1, %v16659_v4, 0.0  ;;  %v21995_v34 = vld [vmem:[#allocation32_spill] sm:$0xff] }
 0x495   :  { %v16729_v62 = vpop.f32.mrb[18].mxu1  ;;  %v8789_v42 = vsel %vm7354_vm1, %v8574_v53, 0.0  ;;  %v10414_v4 = vmul.f32 %v21995_v34, %v21995_v34 }
 0x496   :  { %v9510_v35 = vsel %vm7354_vm1, %v16729_v62, 0.0  ;;  %v9227_v29 = vpop.f32.mrb[19].mxu1  ;;  %16991 = vmatmul.mubr.msk.f32.gmra.mrb[124].mxu1 %vm374_vm0, %v10406_v41 }
 0x497   :  { %v9511_v18 = vadd.f32 %v9510_v35, %v9509_v7  ;;  %v9503_v21 = vsel %vm7354_vm1, %v9227_v29, 0.0  ;;  %v16662_v17 = vpop.f32.mrb[28].mxu0  ;;  %16993 = vmatprep.mubr.msk.f32.mxu1 %vm374_vm0, %v10407_v50 }
 0x498   :  { %v9504_v25 = vadd.f32 %v9503_v21, %v9502_v45  ;;  %v8797_v11 = vsel %vm7354_vm1, %v16662_v17, 0.0  ;;  %v8584_v40 = vpop.f32.mrb[29].mxu0  ;;  %11713 = vxpose.xlu1.b32.end [2/2] (short) (narrow) %v8788_v63, 8 }
 0x499   :  { %v8798_v10 = vadd.f32 %v8797_v11, %v8796_v9  ;;  %v8790_v0 = vsel %vm7354_vm1, %v8584_v40, 0.0  ;;  %v16732_v31 = vpop.f32.mrb[20].mxu1 }
 0x49a   :  { %v8791_v20 = vadd.f32 %v8790_v0, %v8789_v42  ;;  %v9512_v46 = vsel %vm7354_vm1, %v16732_v31, 0.0  ;;  %v9237_v3 = vpop.f32.mrb[21].mxu1  ;;  %16994 = vmatmul.mubr.msk.f32.gmra.mrb[126].mxu1 %vm374_vm0, %v10408_v58 }
 0x49b   :  { %v20512_v57 = vadd.f32 %v9512_v46, %v9511_v18  ;;  %v9505_v5 = vsel %vm7354_vm1, %v9237_v3, 0.0  ;;  %v16665_v14 = vpop.f32.mrb[30].mxu0  ;;  %16996 = vmatprep.mubr.msk.f32.mxu1 %vm374_vm0, %v10409_v23 }
 0x49c   :  { %v20518_v19 = vadd.f32 %v9505_v5, %v9504_v25  ;;  %v8799_v33 = vsel %vm7354_vm1, %v16665_v14, 0.0  ;;  %v8594_v26 = vpop.f32.mrb[31].mxu0  ;;  %11584 = vxpose.xlu1.b32.start [1/2] (short) (narrow) %v20427_v54, 8 }
 0x49d   :  { %v8800_v43 = vadd.f32 %v8799_v33, %v8798_v10  ;;  %v8792_v30 = vsel %vm7354_vm1, %v8594_v26, 0.0  ;;  %v16735_v32 = vpop.f32.mrb[22].mxu1 }
 0x49e   :  { %v8793_v56 = vadd.f32 %v8792_v30, %v8791_v20  ;;  %v9247_v1 = vpop.f32.mrb[23].mxu1  ;;  %16997 = vmatmul.mubr.msk.f32.gmra.mrb[128].mxu1 %vm374_vm0, %v10410_v59  ;;  %v9521_v51 = vsel %vm7354_vm1, %v16735_v32, 0.0 }
 0x49f   :  { %v16668_v15 = vpop.f32.mrb[32].mxu0  ;;  %16999 = vmatprep.mubr.msk.f32.mxu1 %vm374_vm0, %v10411_v16  ;;  %v9514_v61 = vsel %vm7354_vm1, %v9247_v1, 0.0 }
 0x4a0   :  { %v8801_v38 = vsel %vm7354_vm1, %v16668_v15, 0.0  ;;  %v8604_v54 = vpop.f32.mrb[33].mxu0  ;;  %11585 = vxpose.xlu1.b32.end [2/2] (short) (narrow) %v20421_v12, 8 }
 0x4a1   :  { %v8802_v39 = vadd.f32 %v8801_v38, %v8800_v43  ;;  %v8794_v63 = vsel %vm7354_vm1, %v8604_v54, 0.0  ;;  %v16738_v24 = vpop.f32.mrb[24].mxu1 }
 0x4a2   :  { %v8795_v47 = vadd.f32 %v8794_v63, %v8793_v56  ;;  %v9522_v49 = vsel %vm7354_vm1, %v16738_v24, 0.0  ;;  %v9257_v60 = vpop.f32.mrb[25].mxu1  ;;  %17000 = vmatmul.mubr.msk.f32.gmra.mrb[130].mxu1 %vm374_vm0, %v10412_v48 }
 0x4a3   :  { %v9523_v6 = vadd.f32 %v9522_v49, %v9521_v51  ;;  %v9515_v12 = vsel %vm7354_vm1, %v9257_v60, 0.0  ;;  %v16671_v7 = vpop.f32.mrb[34].mxu0  ;;  %17002 = vmatprep.mubr.msk.f32.mxu1 %vm374_vm0, %v10413_v44 }
 0x4a4   :  { %v9516_v36 = vadd.f32 %v9515_v12, %v9514_v61  ;;  %v8614_v41 = vpop.f32.mrb[35].mxu0  ;;  %11744 = vxpose.xlu0.b32.start [1/2] (short) (narrow) %v8795_v47, 8  ;;  %v8810_v29 = vsel %vm7354_vm1, %v16671_v7, 0.0 }
 0x4a5   :  { %v16741_v45 = vpop.f32.mrb[26].mxu1  ;;  %v8803_v8 = vsel %vm7354_vm1, %v8614_v41, 0.0 }
 0x4a6   :  { %v9524_v53 = vsel %vm7354_vm1, %v16741_v45, 0.0  ;;  %v9267_v2 = vpop.f32.mrb[27].mxu1  ;;  %17003 = vmatmul.mubr.msk.f32.gmra.mrb[132].mxu1 %vm374_vm0, %v10414_v4 }
 0x4a7   :  { %v9525_v50 = vadd.f32 %v9524_v53, %v9523_v6  ;;  %v9517_v62 = vsel %vm7354_vm1, %v9267_v2, 0.0  ;;  %v16674_v35 = vpop.f32.mrb[36].mxu0 }
 0x4a8   :  { %v9518_v18 = vadd.f32 %v9517_v62, %v9516_v36  ;;  %v8811_v21 = vsel %vm7354_vm1, %v16674_v35, 0.0  ;;  %v8624_v17 = vpop.f32.mrb[37].mxu0  ;;  %11745 = vxpose.xlu0.b32.end [2/2] (short) (narrow) %v8802_v39, 8 }
 0x4a9   :  { %v8812_v58 = vadd.f32 %v8811_v21, %v8810_v29  ;;  %v8804_v9 = vsel %vm7354_vm1, %v8624_v17, 0.0  ;;  %v16744_v25 = vpop.f32.mrb[28].mxu1 }
 0x4aa   :  { %v8805_v11 = vadd.f32 %v8804_v9, %v8803_v8  ;;  %v9526_v40 = vsel %vm7354_vm1, %v16744_v25, 0.0  ;;  %v9277_v22 = vpop.f32.mrb[29].mxu1 }
 0x4ab   :  { %v20550_v23 = vadd.f32 %v9526_v40, %v9525_v50  ;;  %v9519_v42 = vsel %vm7354_vm1, %v9277_v22, 0.0  ;;  %v16677_v10 = vpop.f32.mrb[38].mxu0 }
 0x4ac   :  { %v20553_v0 = vadd.f32 %v9519_v42, %v9518_v18  ;;  %v8813_v31 = vsel %vm7354_vm1, %v16677_v10, 0.0  ;;  %v8634_v20 = vpop.f32.mrb[39].mxu0  ;;  %11872 = vxpose.xlu0.b32.start [1/2] (short) (narrow) %v20472_v13, 8 }
 0x4ad   :  { %v8814_v46 = vadd.f32 %v8813_v31, %v8812_v58  ;;  %v8806_v3 = vsel %vm7354_vm1, %v8634_v20, 0.0  ;;  %v16747_v5 = vpop.f32.mrb[30].mxu1 }
 0x4ae   :  { %v8807_v14 = vadd.f32 %v8806_v3, %v8805_v11  ;;  %v9287_v52 = vpop.f32.mrb[31].mxu1  ;;  %v9535_v30 = vsel %vm7354_vm1, %v16747_v5, 0.0 }
 0x4af   :  { %v16680_v59 = vpop.f32.mrb[40].mxu0  ;;  %v9528_v1 = vsel %vm7354_vm1, %v9287_v52, 0.0 }
 0x4b0   :  { %v8815_v33 = vsel %vm7354_vm1, %v16680_v59, 0.0  ;;  %v8644_v26 = vpop.f32.mrb[41].mxu0  ;;  %11873 = vxpose.xlu0.b32.end [2/2] (short) (narrow) %v20466_v28, 8 }
 0x4b1   :  { %v8816_v37 = vadd.f32 %v8815_v33, %v8814_v46  ;;  %v8808_v16 = vsel %vm7354_vm1, %v8644_v26, 0.0  ;;  %v16750_v43 = vpop.f32.mrb[32].mxu1 }
 0x4b2   :  { %v8809_v32 = vadd.f32 %v8808_v16, %v8807_v14  ;;  %v9536_v13 = vsel %vm7354_vm1, %v16750_v43, 0.0  ;;  %v9297_v56 = vpop.f32.mrb[33].mxu1 }
 0x4b3   :  { %v9537_v15 = vadd.f32 %v9536_v13, %v9535_v30  ;;  %v9529_v55 = vsel %vm7354_vm1, %v9297_v56, 0.0  ;;  %v16683_v48 = vpop.f32.mrb[42].mxu0 }
 0x4b4   :  { %v9530_v38 = vadd.f32 %v9529_v55, %v9528_v1  ;;  %v8654_v54 = vpop.f32.mrb[43].mxu0  ;;  %11776 = vxpose.xlu1.b32.start [1/2] (short) (narrow) %v8809_v32, 8  ;;  %v8824_v51 = vsel %vm7354_vm1, %v16683_v48, 0.0 }
 0x4b5   :  { %v16753_v28 = vpop.f32.mrb[34].mxu1  ;;  %v8817_v61 = vsel %vm7354_vm1, %v8654_v54, 0.0 }
 0x4b6   :  { %v9538_v27 = vsel %vm7354_vm1, %v16753_v28, 0.0  ;;  %v9307_v44 = vpop.f32.mrb[35].mxu1 }
 0x4b7   :  { %v9539_v39 = vadd.f32 %v9538_v27, %v9537_v15  ;;  %v9531_v63 = vsel %vm7354_vm1, %v9307_v44, 0.0  ;;  %v16686_v24 = vpop.f32.mrb[44].mxu0 }
 0x4b8   :  { %v9532_v47 = vadd.f32 %v9531_v63, %v9530_v38  ;;  %v8825_v49 = vsel %vm7354_vm1, %v16686_v24, 0.0  ;;  %v8664_v60 = vpop.f32.mrb[45].mxu0  ;;  %11777 = vxpose.xlu1.b32.end [2/2] (short) (narrow) %v8816_v37, 8 }
 0x4b9   :  { %v8826_v6 = vadd.f32 %v8825_v49, %v8824_v51  ;;  %v8818_v12 = vsel %vm7354_vm1, %v8664_v60, 0.0  ;;  %v16756_v7 = vpop.f32.mrb[36].mxu1 }
 0x4ba   :  { %v8819_v34 = vadd.f32 %v8818_v12, %v8817_v61  ;;  %v9540_v4 = vsel %vm7354_vm1, %v16756_v7, 0.0  ;;  %v9317_v36 = vpop.f32.mrb[37].mxu1 }
 0x4bb   :  { %v20572_v41 = vadd.f32 %v9540_v4, %v9539_v39  ;;  %v9533_v45 = vsel %vm7354_vm1, %v9317_v36, 0.0  ;;  %v16689_v53 = vpop.f32.mrb[46].mxu0 }
 0x4bc   :  { %v20575_v2 = vadd.f32 %v9533_v45, %v9532_v47  ;;  %v8827_v50 = vsel %vm7354_vm1, %v16689_v53, 0.0  ;;  %v8674_v62 = vpop.f32.mrb[47].mxu0  ;;  %11904 = vxpose.xlu1.b32.start [1/2] (short) (narrow) %v20518_v19, 8 }
 0x4bd   :  { %v8828_v35 = vadd.f32 %v8827_v50, %v8826_v6  ;;  %v8820_v29 = vsel %vm7354_vm1, %v8674_v62, 0.0  ;;  %v16759_v18 = vpop.f32.mrb[38].mxu1 }
 0x4be   :  { %v8821_v21 = vadd.f32 %v8820_v29, %v8819_v34  ;;  %v9327_v17 = vpop.f32.mrb[39].mxu1  ;;  %v9549_v22 = vsel %vm7354_vm1, %v16759_v18, 0.0 }
 0x4bf   :  { %v16692_v8 = vpop.f32.mrb[48].mxu0  ;;  %v9542_v31 = vsel %vm7354_vm1, %v9327_v17, 0.0 }
 0x4c0   :  { %v8829_v58 = vsel %vm7354_vm1, %v16692_v8, 0.0  ;;  %v8684_v9 = vpop.f32.mrb[49].mxu0  ;;  %11905 = vxpose.xlu1.b32.end [2/2] (short) (narrow) %v20512_v57, 8  ;;  %v11152_v8 = vpop.trf.xlu1 }
 0x4c1   :  { %v8830_v25 = vadd.f32 %v8829_v58, %v8828_v35  ;;  %v8822_v11 = vsel %vm7354_vm1, %v8684_v9, 0.0  ;;  %v16762_v40 = vpop.f32.mrb[40].mxu1 }
 0x4c2   :  { %v8823_v42 = vadd.f32 %v8822_v11, %v8821_v21  ;;  %v9550_v19 = vsel %vm7354_vm1, %v16762_v40, 0.0  ;;  %v9337_v10 = vpop.f32.mrb[41].mxu1 }
 0x4c3   :  { %v9551_v20 = vadd.f32 %v9550_v19, %v9549_v22  ;;  %v9543_v46 = vsel %vm7354_vm1, %v9337_v10, 0.0  ;;  %v16695_v3 = vpop.f32.mrb[50].mxu0 }
 0x4c4   :  { %v9544_v5 = vadd.f32 %v9543_v46, %v9542_v31  ;;  %v8694_v14 = vpop.f32.mrb[51].mxu0  ;;  %11808 = vxpose.xlu0.b32.start [1/2] (short) (narrow) %v8823_v42, 8  ;;  %v8838_v16 = vsel %vm7354_vm1, %v16695_v3, 0.0 }
 0x4c5   :  { %v16765_v57 = vpop.f32.mrb[42].mxu1  ;;  %v8831_v13 = vsel %vm7354_vm1, %v8694_v14, 0.0 }
 0x4c6   :  { %v9552_v52 = vsel %vm7354_vm1, %v16765_v57, 0.0  ;;  %v9347_v59 = vpop.f32.mrb[43].mxu1  ;;  %v20618_v57 = vpop.trf.xlu1 }
 0x4c7   :  { %v9553_v33 = vadd.f32 %v9552_v52, %v9551_v20  ;;  %v9545_v26 = vsel %vm7354_vm1, %v9347_v59, 0.0  ;;  %v16698_v37 = vpop.f32.mrb[52].mxu0 }
 0x4c8   :  { %v9546_v43 = vadd.f32 %v9545_v26, %v9544_v5  ;;  %v8839_v30 = vsel %vm7354_vm1, %v16698_v37, 0.0  ;;  %v8704_v32 = vpop.f32.mrb[53].mxu0  ;;  %11809 = vxpose.xlu0.b32.end [2/2] (short) (narrow) %v8830_v25, 8 }
 0x4c9   :  { %v8840_v56 = vadd.f32 %v8839_v30, %v8838_v16  ;;  %v8832_v1 = vsel %vm7354_vm1, %v8704_v32, 0.0  ;;  %v16768_v15 = vpop.f32.mrb[44].mxu1 }
 0x4ca   :  { %v8833_v55 = vadd.f32 %v8832_v1, %v8831_v13  ;;  %v9554_v48 = vsel %vm7354_vm1, %v16768_v15, 0.0  ;;  %v9357_v38 = vpop.f32.mrb[45].mxu1 }
 0x4cb   :  { %v20594_v54 = vadd.f32 %v9554_v48, %v9553_v33  ;;  %v9547_v28 = vsel %vm7354_vm1, %v9357_v38, 0.0  ;;  %v16701_v27 = vpop.f32.mrb[54].mxu0 }
 0x4cc   :  { %v20597_v44 = vadd.f32 %v9547_v28, %v9546_v43  ;;  %v8841_v39 = vsel %vm7354_vm1, %v16701_v27, 0.0  ;;  %v8714_v63 = vpop.f32.mrb[55].mxu0  ;;  %11936 = vxpose.xlu0.b32.start [1/2] (short) (narrow) %v20553_v0, 8 }
 0x4cd   :  { %v8842_v24 = vadd.f32 %v8841_v39, %v8840_v56  ;;  %v8834_v51 = vsel %vm7354_vm1, %v8714_v63, 0.0  ;;  %v16771_v47 = vpop.f32.mrb[46].mxu1 }
 0x4ce   :  { %v8835_v49 = vadd.f32 %v8834_v51, %v8833_v55  ;;  %v9367_v60 = vpop.f32.mrb[47].mxu1  ;;  %v9563_v36 = vsel %vm7354_vm1, %v16771_v47, 0.0  ;;  %v20631_v55 = vpop.trf.xlu1 }
 0x4cf   :  { %v16704_v61 = vpop.f32.mrb[56].mxu0  ;;  %v9556_v50 = vsel %vm7354_vm1, %v9367_v60, 0.0 }
 0x4d0   :  { %v8843_v6 = vsel %vm7354_vm1, %v16704_v61, 0.0  ;;  %v8724_v12 = vpop.f32.mrb[57].mxu0  ;;  %11937 = vxpose.xlu0.b32.end [2/2] (short) (narrow) %v20550_v23, 8  ;;  %v11120_v23 = vpop.trf.xlu0 }
 0x4d1   :  { %v8844_v7 = vadd.f32 %v8843_v6, %v8842_v24  ;;  %v8836_v34 = vsel %vm7354_vm1, %v8724_v12, 0.0  ;;  %v16774_v4 = vpop.f32.mrb[48].mxu1  ;;  %v12688_v25 = vcombine.low %v11120_v23, %v11152_v8 }
 0x4d2   :  { %v8837_v45 = vadd.f32 %v8836_v34, %v8835_v49  ;;  %v9564_v0 = vsel %vm7354_vm1, %v16774_v4, 0.0  ;;  %v9377_v53 = vpop.f32.mrb[49].mxu1  ;;  %v20640_v6 = vpop.trf.xlu1 }
 0x4d3   :  { %v9565_v62 = vadd.f32 %v9564_v0, %v9563_v36  ;;  %v9557_v35 = vsel %vm7354_vm1, %v9377_v53, 0.0  ;;  %v16811_v29 = vpop.f32.mrb[58].mxu0  ;;  %17009 = vmatprep.mubr.msk.f32.mxu0 %vm374_vm0, %v12688_v25 }
 0x4d4   :  { %v9558_v18 = vadd.f32 %v9557_v35, %v9556_v50  ;;  %v9920_v21 = vpop.f32.mrb[59].mxu0  ;;  %11840 = vxpose.xlu1.b32.start [1/2] (short) (narrow) %v8837_v45, 8  ;;  %v10246_v42 = vsel %vm7354_vm1, %v16811_v29, 0.0  ;;  %v20613_v20 = vpop.trf.xlu0 }
 0x4d5   :  { %v16777_v17 = vpop.f32.mrb[50].mxu1  ;;  %v10239_v46 = vsel %vm7354_vm1, %v9920_v21, 0.0 }
 0x4d6   :  { %v9566_v58 = vsel %vm7354_vm1, %v16777_v17, 0.0  ;;  %v9387_v9 = vpop.f32.mrb[51].mxu1  ;;  %v20650_v8 = vpop.trf.xlu1 }
 0x4d7   :  { %v9567_v11 = vadd.f32 %v9566_v58, %v9565_v62  ;;  %v9559_v40 = vsel %vm7354_vm1, %v9387_v9, 0.0  ;;  %v16814_v22 = vpop.f32.mrb[60].mxu0 }
 0x4d8   :  { %v9560_v19 = vadd.f32 %v9559_v40, %v9558_v18  ;;  %v10247_v10 = vsel %vm7354_vm1, %v16814_v22, 0.0  ;;  %v9930_v31 = vpop.f32.mrb[61].mxu0  ;;  %11841 = vxpose.xlu1.b32.end [2/2] (short) (narrow) %v8844_v7, 8  ;;  %v20628_v13 = vpop.trf.xlu0 }
 0x4d9   :  { %v10248_v3 = vadd.f32 %v10247_v10, %v10246_v42  ;;  %v10240_v5 = vsel %vm7354_vm1, %v9930_v31, 0.0  ;;  %v16780_v14 = vpop.f32.mrb[52].mxu1 }
 0x4da   :  { %v10241_v52 = vadd.f32 %v10240_v5, %v10239_v46  ;;  %v9568_v59 = vsel %vm7354_vm1, %v16780_v14, 0.0  ;;  %v9397_v33 = vpop.f32.mrb[53].mxu1 }
 0x4db   :  { %v20621_v26 = vadd.f32 %v9568_v59, %v9567_v11  ;;  %v9561_v37 = vsel %vm7354_vm1, %v9397_v33, 0.0  ;;  %v16817_v16 = vpop.f32.mrb[62].mxu0 }
 0x4dc   :  { %v20624_v43 = vadd.f32 %v9561_v37, %v9560_v19  ;;  %v10249_v30 = vsel %vm7354_vm1, %v16817_v16, 0.0  ;;  %v9940_v32 = vpop.f32.mrb[63].mxu0  ;;  %11968 = vxpose.xlu1.b32.start [1/2] (short) (narrow) %v20575_v2, 8  ;;  %v20636_v51 = vpop.trf.xlu0 }
 0x4dd   :  { %v10250_v56 = vadd.f32 %v10249_v30, %v10248_v3  ;;  %v10242_v1 = vsel %vm7354_vm1, %v9940_v32, 0.0  ;;  %v16783_v15 = vpop.f32.mrb[54].mxu1  ;;  %v20665_v30 = vpop.trf.xlu1 }
 0x4de   :  { %v10243_v48 = vadd.f32 %v10242_v1, %v10241_v52  ;;  %v9407_v38 = vpop.f32.mrb[55].mxu1  ;;  %v9577_v47 = vsel %vm7354_vm1, %v16783_v15, 0.0  ;;  %v117_v1 = vld [vmem:[%s21306_s6 + $0x8] sm:$0xff] }
 0x4df   :  { %v16820_v28 = vpop.f32.mrb[64].mxu0  ;;  %v9570_v12 = vsel %vm7354_vm1, %v9407_v38, 0.0 }
 0x4e0   :  { %v10251_v27 = vsel %vm7354_vm1, %v16820_v28, 0.0  ;;  %v9950_v39 = vpop.f32.mrb[65].mxu0  ;;  %11969 = vxpose.xlu1.b32.end [2/2] (short) (narrow) %v20572_v41, 8  ;;  %v20646_v29 = vpop.trf.xlu0 }
 0x4e1   :  { %v10252_v63 = vadd.f32 %v10251_v27, %v10250_v56  ;;  %v10244_v24 = vsel %vm7354_vm1, %v9950_v39, 0.0  ;;  %v16786_v2 = vpop.f32.mrb[56].mxu1  ;;  %v116_v56 = vld [vmem:[%s21306_s6] sm:$0xff]  ;;  %s17247_s6 = smov 8  }
 0x4e2   :  { %v10245_v49 = vadd.f32 %v10244_v24, %v10243_v48  ;;  %v9578_v60 = vsel %vm7354_vm1, %v16786_v2, 0.0  ;;  %v9417_v61 = vpop.f32.mrb[57].mxu1  ;;  %v17175_v48 = vpack.c.bf16 %v117_v1, %v116_v56 }
 0x4e3   :  { %v9579_v7 = vadd.f32 %v9578_v60, %v9577_v47  ;;  %v9571_v34 = vsel %vm7354_vm1, %v9417_v61, 0.0  ;;  %v16823_v41 = vpop.f32.mrb[66].mxu0  ;;  %v12689_v47 = vcombine.low %v20613_v20, %v20618_v57 }
 0x4e4   :  { %v9572_v4 = vadd.f32 %v9571_v34, %v9570_v12  ;;  %v9960_v36 = vpop.f32.mrb[67].mxu0  ;;  %12128 = vxpose.xlu0.b32.start [1/2] (short) (narrow) %v10245_v49, 8  ;;  %v10260_v18 = vsel %vm7354_vm1, %v16823_v41, 0.0  ;;  %v20663_v33 = vpop.trf.xlu0  ;;  %17176 = vmatprep.subr.bf16.mxu0 %v17175_v48  ;;  %v12690_v12 = vcombine.low %v20628_v13, %v20631_v55 }
 0x4e5   :  { %v16789_v45 = vpop.f32.mrb[58].mxu1  ;;  %v10253_v58 = vsel %vm7354_vm1, %v9960_v36, 0.0  ;;  %17178 = vmatpush3.bf16.msra.mxu0 %v17175_v48 }
 0x4e6   :  { %v9580_v0 = vsel %vm7354_vm1, %v16789_v45, 0.0  ;;  %v9427_v53 = vpop.f32.mrb[59].mxu1  ;;  %v12691_v45 = vcombine.low %v20646_v29, %v20650_v8 }
 0x4e7   :  { %v9581_v50 = vadd.f32 %v9580_v0, %v9579_v7  ;;  %v9573_v62 = vsel %vm7354_vm1, %v9427_v53, 0.0  ;;  %v16826_v35 = vpop.f32.mrb[68].mxu0  ;;  %v12692_v53 = vcombine.low %v20636_v51, %v20640_v6  ;;  %v12693_v6 = vcombine.low %v20663_v33, %v20665_v30 }
 0x4e8   :  { %v9574_v21 = vadd.f32 %v9573_v62, %v9572_v4  ;;  %v10261_v23 = vsel %vm7354_vm1, %v16826_v35, 0.0  ;;  %v9970_v17 = vpop.f32.mrb[69].mxu0  ;;  %12129 = vxpose.xlu0.b32.end [2/2] (short) (narrow) %v10252_v63, 8  ;;  %v20684_v7 = vpop.trf.xlu0  ;;  %17010 = vmatmul.mubr.msk.f32.vlgmr.msra.gmra.mrb[122].mxu0 %vm374_vm0, %v12689_v47 }
 0x4e9   :  { %v10262_v9 = vadd.f32 %v10261_v23, %v10260_v18  ;;  %v10254_v25 = vsel %vm7354_vm1, %v9970_v17, 0.0  ;;  %v16792_v11 = vpop.f32.mrb[60].mxu1  ;;  %v20686_v4 = vpop.trf.xlu1  ;;  %17012 = vmatprep.mubr.msk.f32.mxu0 %vm374_vm0, %v12690_v12 }
 0x4ea   :  { %v10255_v40 = vadd.f32 %v10254_v25, %v10253_v58  ;;  %v9582_v22 = vsel %vm7354_vm1, %v16792_v11, 0.0  ;;  %v9437_v42 = vpop.f32.mrb[61].mxu1 }
 0x4eb   :  { %v20655_v19 = vadd.f32 %v9582_v22, %v9581_v50  ;;  %v9575_v10 = vsel %vm7354_vm1, %v9437_v42, 0.0  ;;  %v16829_v31 = vpop.f32.mrb[70].mxu0 }
 0x4ec   :  { %v20658_v46 = vadd.f32 %v9575_v10, %v9574_v21  ;;  %v10263_v3 = vsel %vm7354_vm1, %v16829_v31, 0.0  ;;  %v9980_v5 = vpop.f32.mrb[71].mxu0  ;;  %12000 = vxpose.xlu0.b32.start [1/2] (short) (narrow) %v20597_v44, 8  ;;  %v11504_v8 = vpop.trf.xlu0  ;;  %17013 = vmatmul.mubr.msk.f32.gmra.mrb[124].mxu0 %vm374_vm0, %v12691_v45 }
 0x4ed   :  { %v10264_v14 = vadd.f32 %v10263_v3, %v10262_v9  ;;  %v10256_v52 = vsel %vm7354_vm1, %v9980_v5, 0.0  ;;  %v16795_v59 = vpop.f32.mrb[62].mxu1  ;;  %v11536_v25 = vpop.trf.xlu1  ;;  %17015 = vmatprep.mubr.msk.f32.mxu0 %vm374_vm0, %v12692_v53 }
 0x4ee   :  { %v10257_v37 = vadd.f32 %v10256_v52, %v10255_v40  ;;  %v9447_v16 = vpop.f32.mrb[63].mxu1  ;;  %v9591_v39 = vsel %vm7354_vm1, %v16795_v59, 0.0  ;;  %v12694_v42 = vcombine.low %v11504_v8, %v11536_v25 }
 0x4ef   :  { %v16832_v32 = vpop.f32.mrb[72].mxu0  ;;  %v9584_v49 = vsel %vm7354_vm1, %v9447_v16, 0.0 }
 0x4f0   :  { %v10265_v44 = vsel %vm7354_vm1, %v16832_v32, 0.0  ;;  %v9990_v15 = vpop.f32.mrb[73].mxu0  ;;  %12001 = vxpose.xlu0.b32.end [2/2] (short) (narrow) %v20594_v54, 8  ;;  %17016 = vmatmul.mubr.msk.f32.gmra.mrb[126].mxu0 %vm374_vm0, %v12693_v6 }
 0x4f1   :  { %v10266_v38 = vadd.f32 %v10265_v44, %v10264_v14  ;;  %v10258_v28 = vsel %vm7354_vm1, %v9990_v15, 0.0  ;;  %v16798_v27 = vpop.f32.mrb[64].mxu1  ;;  %17018 = vmatprep.mubr.msk.f32.mxu0 %vm374_vm0, %v12694_v42 }
 0x4f2   :  { %v10259_v63 = vadd.f32 %v10258_v28, %v10257_v37  ;;  %v9592_v24 = vsel %vm7354_vm1, %v16798_v27, 0.0  ;;  %v9457_v2 = vpop.f32.mrb[65].mxu1 }
 0x4f3   :  { %v9593_v60 = vadd.f32 %v9592_v24, %v9591_v39  ;;  %v9585_v54 = vsel %vm7354_vm1, %v9457_v2, 0.0  ;;  %v16835_v61 = vpop.f32.mrb[74].mxu0 }
 0x4f4   :  { %v9586_v34 = vadd.f32 %v9585_v54, %v9584_v49  ;;  %v10000_v41 = vpop.f32.mrb[75].mxu0  ;;  %12160 = vxpose.xlu1.b32.start [1/2] (short) (narrow) %v10259_v63, 8  ;;  %v10274_v50 = vsel %vm7354_vm1, %v16835_v61, 0.0 }
 0x4f5   :  { %v16801_v36 = vpop.f32.mrb[66].mxu1  ;;  %v10267_v29 = vsel %vm7354_vm1, %v10000_v41, 0.0 }
 0x4f6   :  { %v9594_v20 = vsel %vm7354_vm1, %v16801_v36, 0.0  ;;  %v9467_v57 = vpop.f32.mrb[67].mxu1 }
 0x4f7   :  { %v9595_v0 = vadd.f32 %v9594_v20, %v9593_v60  ;;  %v9587_v13 = vsel %vm7354_vm1, %v9467_v57, 0.0  ;;  %v16838_v55 = vpop.f32.mrb[76].mxu0 }
 0x4f8   :  { %v9588_v62 = vadd.f32 %v9587_v13, %v9586_v34  ;;  %v10275_v35 = vsel %vm7354_vm1, %v16838_v55, 0.0  ;;  %v10010_v18 = vpop.f32.mrb[77].mxu0  ;;  %12161 = vxpose.xlu1.b32.end [2/2] (short) (narrow) %v10266_v38, 8 }
 0x4f9   :  { %v10276_v21 = vadd.f32 %v10275_v35, %v10274_v50  ;;  %v10268_v23 = vsel %vm7354_vm1, %v10010_v18, 0.0  ;;  %v16804_v17 = vpop.f32.mrb[68].mxu1 }
 0x4fa   :  { %v10269_v58 = vadd.f32 %v10268_v23, %v10267_v29  ;;  %v9596_v9 = vsel %vm7354_vm1, %v16804_v17, 0.0  ;;  %v9477_v51 = vpop.f32.mrb[69].mxu1 }
 0x4fb   :  { %v20704_v11 = vadd.f32 %v9596_v9, %v9595_v0  ;;  %v9589_v40 = vsel %vm7354_vm1, %v9477_v51, 0.0  ;;  %v16841_v22 = vpop.f32.mrb[78].mxu0 }
 0x4fc   :  { %v20708_v10 = vadd.f32 %v9589_v40, %v9588_v62  ;;  %v10277_v31 = vsel %vm7354_vm1, %v16841_v22, 0.0  ;;  %v10020_v3 = vpop.f32.mrb[79].mxu0  ;;  %12032 = vxpose.xlu1.b32.start [1/2] (short) (narrow) %v20624_v43, 8 }
 0x4fd   :  { %v10278_v5 = vadd.f32 %v10277_v31, %v10276_v21  ;;  %v10270_v14 = vsel %vm7354_vm1, %v10020_v3, 0.0  ;;  %v16911_v52 = vpop.f32.mrb[70].mxu1 }
 0x4fe   :  { %v10271_v59 = vadd.f32 %v10270_v14, %v10269_v58  ;;  %v10673_v33 = vpop.f32.mrb[71].mxu1  ;;  %v10999_v1 = vsel %vm7354_vm1, %v16911_v52, 0.0 }
 0x4ff   :  { %v16844_v37 = vpop.f32.mrb[80].mxu0  ;;  %v10992_v38 = vsel %vm7354_vm1, %v10673_v33, 0.0 }
 0x500   :  { %v10279_v16 = vsel %vm7354_vm1, %v16844_v37, 0.0  ;;  %v10030_v30 = vpop.f32.mrb[81].mxu0  ;;  %12033 = vxpose.xlu1.b32.end [2/2] (short) (narrow) %v20621_v26, 8 }
 0x501   :  { %v10280_v32 = vadd.f32 %v10279_v16, %v10278_v5  ;;  %v10272_v56 = vsel %vm7354_vm1, %v10030_v30, 0.0  ;;  %v16914_v43 = vpop.f32.mrb[72].mxu1 }
 0x502   :  { %v10273_v44 = vadd.f32 %v10272_v56, %v10271_v59  ;;  %v11000_v15 = vsel %vm7354_vm1, %v16914_v43, 0.0  ;;  %v10683_v48 = vpop.f32.mrb[73].mxu1 }
 0x503   :  { %v11001_v28 = vadd.f32 %v11000_v15, %v10999_v1  ;;  %v10993_v27 = vsel %vm7354_vm1, %v10683_v48, 0.0  ;;  %v16847_v39 = vpop.f32.mrb[82].mxu0 }
 0x504   :  { %v10994_v63 = vadd.f32 %v10993_v27, %v10992_v38  ;;  %v10040_v24 = vpop.f32.mrb[83].mxu0  ;;  %12192 = vxpose.xlu0.b32.start [1/2] (short) (narrow) %v10273_v44, 8  ;;  %v10288_v61 = vsel %vm7354_vm1, %v16847_v39, 0.0  ;;  %v11696_v16 = vpop.trf.xlu0 }
 0x505   :  { %v16917_v26 = vpop.f32.mrb[74].mxu1  ;;  %v10281_v36 = vsel %vm7354_vm1, %v10040_v24, 0.0 }
 0x506   :  { %v11002_v2 = vsel %vm7354_vm1, %v16917_v26, 0.0  ;;  %v10693_v47 = vpop.f32.mrb[75].mxu1 }
 0x507   :  { %v11003_v49 = vadd.f32 %v11002_v2, %v11001_v28  ;;  %v10995_v60 = vsel %vm7354_vm1, %v10693_v47, 0.0  ;;  %v16850_v54 = vpop.f32.mrb[84].mxu0 }
 0x508   :  { %v10996_v12 = vadd.f32 %v10995_v60, %v10994_v63  ;;  %v10289_v34 = vsel %vm7354_vm1, %v16850_v54, 0.0  ;;  %v10050_v41 = vpop.f32.mrb[85].mxu0  ;;  %12193 = vxpose.xlu0.b32.end [2/2] (short) (narrow) %v10280_v32, 8 }
 0x509   :  { %v10290_v20 = vadd.f32 %v10289_v34, %v10288_v61  ;;  %v10282_v57 = vsel %vm7354_vm1, %v10050_v41, 0.0  ;;  %v16920_v45 = vpop.f32.mrb[76].mxu1 }
 0x50a   :  { %v10283_v0 = vadd.f32 %v10282_v57, %v10281_v36  ;;  %v11004_v13 = vsel %vm7354_vm1, %v16920_v45, 0.0  ;;  %v10703_v55 = vpop.f32.mrb[77].mxu1  ;;  %v12696_v36 = vcombine.low %v20684_v7, %v20686_v4 }
 0x50b   :  { %v20729_v53 = vadd.f32 %v11004_v13, %v11003_v49  ;;  %v10997_v50 = vsel %vm7354_vm1, %v10703_v55, 0.0  ;;  %v16853_v62 = vpop.f32.mrb[86].mxu0 }
 0x50c   :  { %v20732_v35 = vadd.f32 %v10997_v50, %v10996_v12  ;;  %v10291_v18 = vsel %vm7354_vm1, %v16853_v62, 0.0  ;;  %v10060_v29 = vpop.f32.mrb[87].mxu0  ;;  %12064 = vxpose.xlu0.b32.start [1/2] (short) (narrow) %v20658_v46, 8  ;;  %v11568_v61 = vpop.trf.xlu0 }
 0x50d   :  { %v10292_v21 = vadd.f32 %v10291_v18, %v10290_v20  ;;  %v10284_v23 = vsel %vm7354_vm1, %v10060_v29, 0.0  ;;  %v16923_v17 = vpop.f32.mrb[78].mxu1 }
 0x50e   :  { %v10285_v8 = vadd.f32 %v10284_v23, %v10283_v0  ;;  %v10713_v58 = vpop.f32.mrb[79].mxu1  ;;  %v11013_v42 = vsel %vm7354_vm1, %v16923_v17, 0.0 }
 0x50f   :  { %v16856_v9 = vpop.f32.mrb[88].mxu0  ;;  %v11006_v5 = vsel %vm7354_vm1, %v10713_v58, 0.0 }
 0x510   :  { %v10293_v51 = vsel %vm7354_vm1, %v16856_v9, 0.0  ;;  %v10070_v6 = vpop.f32.mrb[89].mxu0  ;;  %12065 = vxpose.xlu0.b32.end [2/2] (short) (narrow) %v20655_v19, 8 }
 0x511   :  { %v10294_v25 = vadd.f32 %v10293_v51, %v10292_v21  ;;  %v10286_v40 = vsel %vm7354_vm1, %v10070_v6, 0.0  ;;  %v16926_v22 = vpop.f32.mrb[80].mxu1 }
 0x512   :  { %v10287_v31 = vadd.f32 %v10286_v40, %v10285_v8  ;;  %v11014_v46 = vsel %vm7354_vm1, %v16926_v22, 0.0  ;;  %v10723_v3 = vpop.f32.mrb[81].mxu1 }
 0x513   :  { %v11015_v14 = vadd.f32 %v11014_v46, %v11013_v42  ;;  %v11007_v52 = vsel %vm7354_vm1, %v10723_v3, 0.0  ;;  %v16859_v59 = vpop.f32.mrb[90].mxu0 }
 0x514   :  { %v11008_v33 = vadd.f32 %v11007_v52, %v11006_v5  ;;  %v10080_v37 = vpop.f32.mrb[91].mxu0  ;;  %12224 = vxpose.xlu1.b32.start [1/2] (short) (narrow) %v10287_v31, 8  ;;  %v11728_v56 = vpop.trf.xlu1  ;;  %v10302_v15 = vsel %vm7354_vm1, %v16859_v59, 0.0 }
 0x515   :  { %v16929_v19 = vpop.f32.mrb[82].mxu1  ;;  %v10295_v27 = vsel %vm7354_vm1, %v10080_v37, 0.0  ;;  %v12697_v18 = vcombine.low %v11696_v16, %v11728_v56 }
 0x516   :  { %v11016_v30 = vsel %vm7354_vm1, %v16929_v19, 0.0  ;;  %v10733_v32 = vpop.f32.mrb[83].mxu1 }
 0x517   :  { %v11017_v43 = vadd.f32 %v11016_v30, %v11015_v14  ;;  %v11009_v1 = vsel %vm7354_vm1, %v10733_v32, 0.0  ;;  %v16862_v44 = vpop.f32.mrb[92].mxu0 }
 0x518   :  { %v11010_v48 = vadd.f32 %v11009_v1, %v11008_v33  ;;  %v10303_v38 = vsel %vm7354_vm1, %v16862_v44, 0.0  ;;  %v10090_v28 = vpop.f32.mrb[93].mxu0  ;;  %12225 = vxpose.xlu1.b32.end [2/2] (short) (narrow) %v10294_v25, 8 }
 0x519   :  { %v10304_v39 = vadd.f32 %v10303_v38, %v10302_v15  ;;  %v10296_v63 = vsel %vm7354_vm1, %v10090_v28, 0.0  ;;  %v16932_v24 = vpop.f32.mrb[84].mxu1 }
 0x51a   :  { %v10297_v26 = vadd.f32 %v10296_v63, %v10295_v27  ;;  %v11018_v2 = vsel %vm7354_vm1, %v16932_v24, 0.0  ;;  %v10743_v47 = vpop.f32.mrb[85].mxu1 }
 0x51b   :  { %v20751_v49 = vadd.f32 %v11018_v2, %v11017_v43  ;;  %v11011_v60 = vsel %vm7354_vm1, %v10743_v47, 0.0  ;;  %v16865_v54 = vpop.f32.mrb[94].mxu0 }
 0x51c   :  { %v20754_v12 = vadd.f32 %v11011_v60, %v11010_v48  ;;  %v10305_v34 = vsel %vm7354_vm1, %v16865_v54, 0.0  ;;  %v10100_v41 = vpop.f32.mrb[95].mxu0  ;;  %12096 = vxpose.xlu1.b32.start [1/2] (short) (narrow) %v20708_v10, 8  ;;  %v11600_v20 = vpop.trf.xlu1 }
 0x51d   :  { %v10306_v57 = vadd.f32 %v10305_v34, %v10304_v39  ;;  %v10298_v45 = vsel %vm7354_vm1, %v10100_v41, 0.0  ;;  %v16935_v0 = vpop.f32.mrb[86].mxu1  ;;  %v12695_v13 = vcombine.low %v11568_v61, %v11600_v20 }
 0x51e   :  { %v10299_v55 = vadd.f32 %v10298_v45, %v10297_v26  ;;  %v10753_v50 = vpop.f32.mrb[87].mxu1  ;;  %v11027_v23 = vsel %vm7354_vm1, %v16935_v0, 0.0 }
 0x51f   :  { %v16868_v62 = vpop.f32.mrb[96].mxu0  ;;  %17019 = vmatmul.mubr.msk.f32.gmra.mrb[128].mxu0 %vm374_vm0, %v12695_v13  ;;  %v11020_v9 = vsel %vm7354_vm1, %v10753_v50, 0.0 }
 0x520   :  { %v10307_v29 = vsel %vm7354_vm1, %v16868_v62, 0.0  ;;  %v10110_v21 = vpop.f32.mrb[97].mxu0  ;;  %12097 = vxpose.xlu1.b32.end [2/2] (short) (narrow) %v20704_v11, 8  ;;  %17021 = vmatprep.mubr.msk.f32.mxu0 %vm374_vm0, %v12696_v36 }
 0x521   :  { %v10308_v7 = vadd.f32 %v10307_v29, %v10306_v57  ;;  %v10300_v4 = vsel %vm7354_vm1, %v10110_v21, 0.0  ;;  %v16938_v10 = vpop.f32.mrb[88].mxu1 }
 0x522   :  { %v10301_v17 = vadd.f32 %v10300_v4, %v10299_v55  ;;  %v11028_v8 = vsel %vm7354_vm1, %v16938_v10, 0.0  ;;  %v10763_v58 = vpop.f32.mrb[89].mxu1 }
 0x523   :  { %v11029_v51 = vadd.f32 %v11028_v8, %v11027_v23  ;;  %v11021_v6 = vsel %vm7354_vm1, %v10763_v58, 0.0  ;;  %v16871_v25 = vpop.f32.mrb[98].mxu0  ;;  %17022 = vmatmul.mubr.msk.f32.gmra.mrb[130].mxu0 %vm374_vm0, %v12697_v18 }
 0x524   :  { %v11022_v11 = vadd.f32 %v11021_v6, %v11020_v9  ;;  %v10120_v40 = vpop.f32.mrb[99].mxu0  ;;  %12256 = vxpose.xlu0.b32.start [1/2] (short) (narrow) %v10301_v17, 8  ;;  %v10316_v14 = vsel %vm7354_vm1, %v16871_v25, 0.0  ;;  %v11760_v55 = vpop.trf.xlu0 }
 0x525   :  { %v16941_v22 = vpop.f32.mrb[90].mxu1  ;;  %v10309_v37 = vsel %vm7354_vm1, %v10120_v40, 0.0 }
 0x526   :  { %v11030_v42 = vsel %vm7354_vm1, %v16941_v22, 0.0  ;;  %v10773_v31 = vpop.f32.mrb[91].mxu1 }
 0x527   :  { %v11031_v46 = vadd.f32 %v11030_v42, %v11029_v51  ;;  %v11023_v3 = vsel %vm7354_vm1, %v10773_v31, 0.0  ;;  %v16874_v5 = vpop.f32.mrb[100].mxu0 }
 0x528   :  { %v11024_v52 = vadd.f32 %v11023_v3, %v11022_v11  ;;  %v10317_v59 = vsel %vm7354_vm1, %v16874_v5, 0.0  ;;  %v10130_v33 = vpop.f32.mrb[101].mxu0  ;;  %12257 = vxpose.xlu0.b32.end [2/2] (short) (narrow) %v10308_v7, 8 }
 0x529   :  { %v10318_v19 = vadd.f32 %v10317_v59, %v10316_v14  ;;  %v10310_v16 = vsel %vm7354_vm1, %v10130_v33, 0.0  ;;  %v16944_v30 = vpop.f32.mrb[92].mxu1 }
 0x52a   :  { %v10311_v32 = vadd.f32 %v10310_v16, %v10309_v37  ;;  %v11032_v56 = vsel %vm7354_vm1, %v16944_v30, 0.0  ;;  %v10783_v43 = vpop.f32.mrb[93].mxu1 }
 0x52b   :  { %v20778_v1 = vadd.f32 %v11032_v56, %v11031_v46  ;;  %v11025_v44 = vsel %vm7354_vm1, %v10783_v43, 0.0  ;;  %v16877_v15 = vpop.f32.mrb[102].mxu0 }
 0x52c   :  { %v20781_v48 = vadd.f32 %v11025_v44, %v11024_v52  ;;  %v10319_v38 = vsel %vm7354_vm1, %v16877_v15, 0.0  ;;  %v10140_v28 = vpop.f32.mrb[103].mxu0  ;;  %12384 = vxpose.xlu0.b32.start [1/2] (short) (narrow) %v20732_v35, 8 }
 0x52d   :  { %v10320_v27 = vadd.f32 %v10319_v38, %v10318_v19  ;;  %v10312_v39 = vsel %vm7354_vm1, %v10140_v28, 0.0  ;;  %v16947_v63 = vpop.f32.mrb[94].mxu1 }
 0x52e   :  { %v10313_v24 = vadd.f32 %v10312_v39, %v10311_v32  ;;  %v10793_v26 = vpop.f32.mrb[95].mxu1  ;;  %v11041_v41 = vsel %vm7354_vm1, %v16947_v63, 0.0 }
 0x52f   :  { %v16880_v2 = vpop.f32.mrb[104].mxu0  ;;  %v11034_v57 = vsel %vm7354_vm1, %v10793_v26, 0.0 }
 0x530   :  { %v10321_v47 = vsel %vm7354_vm1, %v16880_v2, 0.0  ;;  %v10150_v60 = vpop.f32.mrb[105].mxu0  ;;  %12385 = vxpose.xlu0.b32.end [2/2] (short) (narrow) %v20729_v53, 8 }
 0x531   :  { %v10322_v54 = vadd.f32 %v10321_v47, %v10320_v27  ;;  %v10314_v61 = vsel %vm7354_vm1, %v10150_v60, 0.0  ;;  %v16950_v34 = vpop.f32.mrb[96].mxu1 }
 0x532   :  { %v10315_v36 = vadd.f32 %v10314_v61, %v10313_v24  ;;  %v11042_v35 = vsel %vm7354_vm1, %v16950_v34, 0.0  ;;  %v10803_v20 = vpop.f32.mrb[97].mxu1 }
 0x533   :  { %v11043_v45 = vadd.f32 %v11042_v35, %v11041_v41  ;;  %v11035_v0 = vsel %vm7354_vm1, %v10803_v20, 0.0  ;;  %v16883_v13 = vpop.f32.mrb[106].mxu0 }
 0x534   :  { %v11036_v50 = vadd.f32 %v11035_v0, %v11034_v57  ;;  %v10160_v62 = vpop.f32.mrb[107].mxu0  ;;  %12288 = vxpose.xlu1.b32.start [1/2] (short) (narrow) %v10315_v36, 8  ;;  %v11792_v53 = vpop.trf.xlu1  ;;  %v10330_v17 = vsel %vm7354_vm1, %v16883_v13, 0.0 }
 0x535   :  { %v16953_v18 = vpop.f32.mrb[98].mxu1  ;;  %v12698_v29 = vcombine.low %v11760_v55, %v11792_v53  ;;  %v10323_v51 = vsel %vm7354_vm1, %v10160_v62, 0.0 }
 0x536   :  { %v11044_v21 = vsel %vm7354_vm1, %v16953_v18, 0.0  ;;  %v10813_v7 = vpop.f32.mrb[99].mxu1 }
 0x537   :  { %v11045_v4 = vadd.f32 %v11044_v21, %v11043_v45  ;;  %v11037_v10 = vsel %vm7354_vm1, %v10813_v7, 0.0  ;;  %v16886_v23 = vpop.f32.mrb[108].mxu0  ;;  %17024 = vmatprep.mubr.msk.f32.mxu0 %vm374_vm0, %v12698_v29 }
 0x538   :  { %v11038_v8 = vadd.f32 %v11037_v10, %v11036_v50  ;;  %v10331_v58 = vsel %vm7354_vm1, %v16886_v23, 0.0  ;;  %v10170_v9 = vpop.f32.mrb[109].mxu0  ;;  %12289 = vxpose.xlu1.b32.end [2/2] (short) (narrow) %v10322_v54, 8 }
 0x539   :  { %v10332_v6 = vadd.f32 %v10331_v58, %v10330_v17  ;;  %v10324_v25 = vsel %vm7354_vm1, %v10170_v9, 0.0  ;;  %v16956_v11 = vpop.f32.mrb[100].mxu1  ;;  %v11888_v58 = vpop.trf.xlu0 }
 0x53a   :  { %v10325_v40 = vadd.f32 %v10324_v25, %v10323_v51  ;;  %v11046_v22 = vsel %vm7354_vm1, %v16956_v11, 0.0  ;;  %v10823_v42 = vpop.f32.mrb[101].mxu1 }
 0x53b   :  { %v20801_v31 = vadd.f32 %v11046_v22, %v11045_v4  ;;  %v11039_v46 = vsel %vm7354_vm1, %v10823_v42, 0.0  ;;  %v16889_v3 = vpop.f32.mrb[110].mxu0 }
 0x53c   :  { %v20804_v5 = vadd.f32 %v11039_v46, %v11038_v8  ;;  %v10333_v14 = vsel %vm7354_vm1, %v16889_v3, 0.0  ;;  %v10180_v52 = vpop.f32.mrb[111].mxu0  ;;  %12416 = vxpose.xlu1.b32.start [1/2] (short) (narrow) %v20754_v12, 8 }
 0x53d   :  { %v10334_v59 = vadd.f32 %v10333_v14, %v10332_v6  ;;  %v10326_v33 = vsel %vm7354_vm1, %v10180_v52, 0.0  ;;  %v16959_v37 = vpop.f32.mrb[102].mxu1  ;;  %v11920_v6 = vpop.trf.xlu1 }
 0x53e   :  { %v10327_v19 = vadd.f32 %v10326_v33, %v10325_v40  ;;  %v10833_v16 = vpop.f32.mrb[103].mxu1  ;;  %v11055_v38 = vsel %vm7354_vm1, %v16959_v37, 0.0 }
 0x53f   :  { %v16892_v30 = vpop.f32.mrb[112].mxu0  ;;  %v11048_v39 = vsel %vm7354_vm1, %v10833_v16, 0.0 }
 0x540   :  { %v10335_v32 = vsel %vm7354_vm1, %v16892_v30, 0.0  ;;  %v10190_v56 = vpop.f32.mrb[113].mxu0  ;;  %12417 = vxpose.xlu1.b32.end [2/2] (short) (narrow) %v20751_v49, 8 }
 0x541   :  { %v10336_v43 = vadd.f32 %v10335_v32, %v10334_v59  ;;  %v10328_v44 = vsel %vm7354_vm1, %v10190_v56, 0.0  ;;  %v16962_v15 = vpop.f32.mrb[104].mxu1  ;;  %v12700_v32 = vcombine.low %v11888_v58, %v11920_v6 }
 0x542   :  { %v10329_v28 = vadd.f32 %v10328_v44, %v10327_v19  ;;  %v11056_v12 = vsel %vm7354_vm1, %v16962_v15, 0.0  ;;  %v10843_v27 = vpop.f32.mrb[105].mxu1 }
 0x543   :  { %v11057_v63 = vadd.f32 %v11056_v12, %v11055_v38  ;;  %v11049_v24 = vsel %vm7354_vm1, %v10843_v27, 0.0  ;;  %v16895_v26 = vpop.f32.mrb[114].mxu0 }
 0x544   :  { %v11050_v2 = vadd.f32 %v11049_v24, %v11048_v39  ;;  %v10200_v47 = vpop.f32.mrb[115].mxu0  ;;  %12320 = vxpose.xlu0.b32.start [1/2] (short) (narrow) %v10329_v28, 8  ;;  %v10344_v36 = vsel %vm7354_vm1, %v16895_v26, 0.0  ;;  %v11824_v16 = vpop.trf.xlu0 }
 0x545   :  { %v16965_v49 = vpop.f32.mrb[106].mxu1  ;;  %v10337_v45 = vsel %vm7354_vm1, %v10200_v47, 0.0 }
 0x546   :  { %v11058_v60 = vsel %vm7354_vm1, %v16965_v49, 0.0  ;;  %v10853_v54 = vpop.f32.mrb[107].mxu1 }
 0x547   :  { %v11059_v61 = vadd.f32 %v11058_v60, %v11057_v63  ;;  %v11051_v34 = vsel %vm7354_vm1, %v10853_v54, 0.0  ;;  %v16898_v41 = vpop.f32.mrb[116].mxu0 }
 0x548   :  { %v11052_v35 = vadd.f32 %v11051_v34, %v11050_v2  ;;  %v10345_v20 = vsel %vm7354_vm1, %v16898_v41, 0.0  ;;  %v10210_v57 = vpop.f32.mrb[117].mxu0  ;;  %12321 = vxpose.xlu0.b32.end [2/2] (short) (narrow) %v10336_v43, 8 }
 0x549   :  { %v10346_v0 = vadd.f32 %v10345_v20, %v10344_v36  ;;  %v10338_v13 = vsel %vm7354_vm1, %v10210_v57, 0.0  ;;  %v16968_v55 = vpop.f32.mrb[108].mxu1 }
 0x54a   :  { %v10339_v50 = vadd.f32 %v10338_v13, %v10337_v45  ;;  %v11060_v62 = vsel %vm7354_vm1, %v16968_v55, 0.0  ;;  %v10863_v53 = vpop.f32.mrb[109].mxu1 }
 0x54b   :  { %v11061_v18 = vadd.f32 %v11060_v62, %v11059_v61  ;;  %v11053_v29 = vsel %vm7354_vm1, %v10863_v53, 0.0  ;;  %v16901_v21 = vpop.f32.mrb[118].mxu0 }
 0x54c   :  { %v11054_v7 = vadd.f32 %v11053_v29, %v11052_v35  ;;  %v10347_v4 = vsel %vm7354_vm1, %v16901_v21, 0.0  ;;  %v10220_v10 = vpop.f32.mrb[119].mxu0  ;;  %12448 = vxpose.xlu0.b32.start [1/2] (short) (narrow) %v20781_v48, 8  ;;  %v11952_v2 = vpop.trf.xlu0 }
 0x54d   :  { %v10348_v23 = vadd.f32 %v10347_v4, %v10346_v0  ;;  %v10340_v17 = vsel %vm7354_vm1, %v10220_v10, 0.0  ;;  %v16971_v8 = vpop.f32.mrb[110].mxu1 }
 0x54e   :  { %v10341_v9 = vadd.f32 %v10340_v17, %v10339_v50  ;;  %v10873_v51 = vpop.f32.mrb[111].mxu1  ;;  %v11069_v48 = vsel %vm7354_vm1, %v16971_v8, 0.0 }
 0x54f   :  { %v16904_v25 = vpop.f32.mrb[120].mxu0  ;;  %v11062_v59 = vsel %vm7354_vm1, %v10873_v51, 0.0 }
 0x550   :  { %v10349_v11 = vsel %vm7354_vm1, %v16904_v25, 0.0  ;;  %v10230_v40 = vpop.f32.mrb[121].mxu0  ;;  %12449 = vxpose.xlu0.b32.end [2/2] (short) (narrow) %v20778_v1, 8 }
 0x551   :  { %v10350_v22 = vadd.f32 %v10349_v11, %v10348_v23  ;;  %v10342_v42 = vsel %vm7354_vm1, %v10230_v40, 0.0  ;;  %v16974_v46 = vpop.f32.mrb[112].mxu1 }
 0x552   :  { %v10343_v3 = vadd.f32 %v10342_v42, %v10341_v9  ;;  %v11070_v14 = vsel %vm7354_vm1, %v16974_v46, 0.0  ;;  %v10883_v52 = vpop.f32.mrb[113].mxu1 }
 0x553   :  { %v11071_v33 = vadd.f32 %v11070_v14, %v11069_v48  ;;  %v11063_v37 = vsel %vm7354_vm1, %v10883_v52, 0.0 }
 0x554   :  { %v11064_v19 = vadd.f32 %v11063_v37, %v11062_v59  ;;  %12512 = vxpose.xlu0.b32.start [1/2] (short) (narrow) %v11054_v7, 8  ;;  %12352 = vxpose.xlu1.b32.start [1/2] (short) (narrow) %v10343_v3, 8  ;;  %v11856_v1 = vpop.trf.xlu1 }
 0x555   :  { %v16977_v30 = vpop.f32.mrb[114].mxu1  ;;  %v12699_v56 = vcombine.low %v11824_v16, %v11856_v1 }
 0x556   :  { %v11072_v43 = vsel %vm7354_vm1, %v16977_v30, 0.0  ;;  %v10893_v44 = vpop.f32.mrb[115].mxu1 }
 0x557   :  { %v11073_v15 = vadd.f32 %v11072_v43, %v11071_v33  ;;  %v11065_v38 = vsel %vm7354_vm1, %v10893_v44, 0.0  ;;  %17025 = vmatmul.mubr.msk.f32.gmra.mrb[132].mxu0 %vm374_vm0, %v12699_v56 }
 0x558   :  { %v11066_v28 = vadd.f32 %v11065_v38, %v11064_v19  ;;  %12513 = vxpose.xlu0.b32.end [2/2] (short) (narrow) %v11061_v18, 8  ;;  %12353 = vxpose.xlu1.b32.end [2/2] (short) (narrow) %v10350_v22, 8 }
 0x559   :  { %v16980_v12 = vpop.f32.mrb[116].mxu1  ;;  %17027 = vmatprep.mubr.msk.f32.mxu0 %vm374_vm0, %v12700_v32 }
 0x55a   :  { %v11074_v27 = vsel %vm7354_vm1, %v16980_v12, 0.0  ;;  %v10903_v39 = vpop.f32.mrb[117].mxu1 }
 0x55b   :  { %v11075_v63 = vadd.f32 %v11074_v27, %v11073_v15  ;;  %v11067_v24 = vsel %vm7354_vm1, %v10903_v39, 0.0 }
 0x55c   :  { %v11068_v26 = vadd.f32 %v11067_v24, %v11066_v28  ;;  %12480 = vxpose.xlu1.b32.start [1/2] (short) (narrow) %v20804_v5, 8  ;;  %v11984_v47 = vpop.trf.xlu1 }
 0x55d   :  { %v16983_v49 = vpop.f32.mrb[118].mxu1  ;;  %v12701_v60 = vcombine.low %v11952_v2, %v11984_v47 }
 0x55e   :  { %v10913_v54 = vpop.f32.mrb[119].mxu1  ;;  %v11083_v34 = vsel %vm7354_vm1, %v16983_v49, 0.0 }
 0x55f   :  { %17028 = vmatmul.mubr.msk.f32.gmra.mrb[134].mxu0 %vm374_vm0, %v12701_v60  ;;  %v11076_v35 = vsel %vm7354_vm1, %v10913_v54, 0.0 }
 0x560   :  { %12481 = vxpose.xlu1.b32.end [2/2] (short) (narrow) %v20801_v31, 8 }
 0x561   :  { %v16986_v61 = vpop.f32.mrb[120].mxu1 }
 0x562   :  { %v11084_v41 = vsel %vm7354_vm1, %v16986_v61, 0.0  ;;  %v10923_v36 = vpop.f32.mrb[121].mxu1 }
 0x563   :  { %v11085_v20 = vadd.f32 %v11084_v41, %v11083_v34  ;;  %v11077_v5 = vsel %vm7354_vm1, %v10923_v36, 0.0 }
 0x564   :  { %v11078_v57 = vadd.f32 %v11077_v5, %v11076_v35  ;;  %12544 = vxpose.xlu1.b32.start [1/2] (short) (narrow) %v11068_v26, 8  ;;  %v12144_v40 = vpop.trf.xlu0 }
 0x565   :  { %v16989_v45 = vpop.f32.mrb[122].mxu1 }
 0x566   :  { %v11086_v0 = vsel %vm7354_vm1, %v16989_v45, 0.0  ;;  %v10933_v13 = vpop.f32.mrb[123].mxu1 }
 0x567   :  { %v11087_v55 = vadd.f32 %v11086_v0, %v11085_v20  ;;  %v11079_v31 = vsel %vm7354_vm1, %v10933_v13, 0.0 }
 0x568   :  { %v11080_v50 = vadd.f32 %v11079_v31, %v11078_v57  ;;  %12545 = vxpose.xlu1.b32.end [2/2] (short) (narrow) %v11075_v63, 8 }
 0x569   :  { %v16992_v62 = vpop.f32.mrb[124].mxu1 }
 0x56a   :  { %v11088_v53 = vsel %vm7354_vm1, %v16992_v62, 0.0  ;;  %v10943_v18 = vpop.f32.mrb[125].mxu1 }
 0x56b   :  { %v11089_v29 = vadd.f32 %v11088_v53, %v11087_v55  ;;  %v11081_v21 = vsel %vm7354_vm1, %v10943_v18, 0.0 }
 0x56c   :  { %v11082_v7 = vadd.f32 %v11081_v21, %v11080_v50  ;;  %v12016_v1 = vpop.trf.xlu0 }
 0x56d   :  { %v16995_v4 = vpop.f32.mrb[126].mxu1 }
 0x56e   :  { %12576 = vxpose.xlu0.b32.start [1/2] (short) (narrow) %v11082_v7, 8  ;;  %v10953_v10 = vpop.f32.mrb[127].mxu1  ;;  %v11097_v17 = vsel %vm7354_vm1, %v16995_v4, 0.0 }
 0x56f   :  { %v11090_v9 = vsel %vm7354_vm1, %v10953_v10, 0.0  ;;  %v13017_v10 = vlaneseq }
 0x571   :  { %v16998_v23 = vpop.f32.mrb[128].mxu1 }
 0x572   :  { %v11098_v8 = vsel %vm7354_vm1, %v16998_v23, 0.0  ;;  %12577 = vxpose.xlu0.b32.end [2/2] (short) (narrow) %v11089_v29, 8  ;;  %v10963_v58 = vpop.f32.mrb[129].mxu1 }
 0x573   :  { %v11099_v51 = vadd.f32 %v11098_v8, %v11097_v17  ;;  %v11091_v6 = vsel %vm7354_vm1, %v10963_v58, 0.0  ;;  %v13018_v8 = vshrl.u32 %v13017_v10, 7 }
 0x574   :  { %v11092_v25 = vadd.f32 %v11091_v6, %v11090_v9  ;;  %v12176_v46 = vpop.trf.xlu1 }
 0x575   :  { %v17001_v11 = vpop.f32.mrb[130].mxu1  ;;  %v12704_v15 = vcombine.low %v12144_v40, %v12176_v46  ;;  %v20889_v6 = vsub.s32 0, %v13018_v8  ;;  %v20893_v40 = vsub.s32 2, %v13018_v8  ;;  %v20895_v46 = vsub.s32 3, %v13018_v8 }
 0x576   :  { %v11100_v22 = vsel %vm7354_vm1, %v17001_v11, 0.0  ;;  %v10973_v42 = vpop.f32.mrb[131].mxu1 }
 0x577   :  { %v11101_v48 = vadd.f32 %v11100_v22, %v11099_v51  ;;  %v11093_v3 = vsel %vm7354_vm1, %v10973_v42, 0.0 }
 0x578   :  { %v11094_v14 = vadd.f32 %v11093_v3, %v11092_v25  ;;  %v20891_v25 = vsub.s32 1, %v13018_v8 }
 0x579   :  { %v17004_v52 = vpop.f32.mrb[132].mxu1 }
 0x57a   :  { %v11102_v59 = vsel %vm7354_vm1, %v17004_v52, 0.0  ;;  %v10983_v33 = vpop.f32.mrb[133].mxu1 }
 0x57b   :  { %v11103_v37 = vadd.f32 %v11102_v59, %v11101_v48  ;;  %v11095_v19 = vsel %vm7354_vm1, %v10983_v33, 0.0 }
 0x57c   :  { %v11096_v16 = vadd.f32 %v11095_v19, %v11094_v14  ;;  %v12048_v30 = vpop.trf.xlu1 }
 0x57d   :  { %v12702_v32 = vcombine.low %v12016_v1, %v12048_v30 }
 0x57e   :  { %12608 = vxpose.xlu1.b32.start [1/2] (short) (narrow) %v11096_v16, 8 }
 0x57f   :  { %17030 = vmatprep.mubr.msk.f32.mxu0 %vm374_vm0, %v12702_v32 }
 0x582   :  { %12609 = vxpose.xlu1.b32.end [2/2] (short) (narrow) %v11103_v37, 8 }
 0x584   :  { %v12208_v56 = vpop.trf.xlu0 }
 0x58c   :  { %v12080_v44 = vpop.trf.xlu0 }
 0x594   :  { %v12240_v43 = vpop.trf.xlu1 }
 0x595   :  { %v12705_v12 = vcombine.low %v12208_v56, %v12240_v43 }
 0x59c   :  { %v12112_v38 = vpop.trf.xlu1 }
 0x59d   :  { %v12703_v28 = vcombine.low %v12080_v44, %v12112_v38 }
 0x59f   :  { %17031 = vmatmul.mubr.msk.f32.gmra.mrb[136].mxu0 %vm374_vm0, %v12703_v28 }
 0x5a0   :  { %17033 = vmatprep.mubr.msk.f32.mxu0 %vm374_vm0, %v12704_v15 }
 0x5a3   :  { %17034 = vmatmul.mubr.msk.f32.gmra.mrb[138].mxu0 %vm374_vm0, %v12705_v12 }
 0x5a4   :  { %v12272_v27 = vpop.trf.xlu0 }
 0x5ac   :  { %v12400_v2 = vpop.trf.xlu0 }
 0x5b4   :  { %v12304_v39 = vpop.trf.xlu1 }
 0x5b5   :  { %v12706_v63 = vcombine.low %v12272_v27, %v12304_v39 }
 0x5b7   :  { %17036 = vmatprep.mubr.msk.f32.mxu0 %vm374_vm0, %v12706_v63 }
 0x5bb   :  { %v17011_v24 = vpop.f32.mrb[122].mxu0 }
 0x5bc   :  { %v12826_v26 = vpop.f32.mrb[123].mxu0  ;;  %v12432_v49 = vpop.trf.xlu1  ;;  %v12946_v7 = vmul.f32 %v17011_v24, %v17011_v24 }
 0x5bd   :  { %v12708_v41 = vcombine.low %v12400_v2, %v12432_v49  ;;  %v12945_v23 = vmul.f32 %v12826_v26, %v12826_v26 }
 0x5be   :  { %v12958_v17 = vmul.f32 0.015625, %v12946_v7 }
 0x5bf   :  { %v20864_v47 = vpop.f32.mrb[124].mxu0  ;;  %v12957_v58 = vmul.f32 0.015625, %v12945_v23 }
 0x5c0   :  { %v20866_v60 = vpop.f32.mrb[125].mxu0 }
 0x5c3   :  { %v20868_v54 = vpop.f32.mrb[126].mxu0 }
 0x5c4   :  { %v12336_v61 = vpop.trf.xlu0  ;;  %v20870_v34 = vpop.f32.mrb[127].mxu0 }
 0x5cc   :  { %v12464_v20 = vpop.trf.xlu0 }
 0x5d4   :  { %v12368_v36 = vpop.trf.xlu1  ;;  %v12528_v45 = vpop.trf.xlu0 }
 0x5d5   :  { %v12707_v35 = vcombine.low %v12336_v61, %v12368_v36 }
 0x5d7   :  { %17037 = vmatmul.mubr.msk.f32.gmra.mrb[140].mxu0 %vm374_vm0, %v12707_v35 }
 0x5d8   :  { %17039 = vmatprep.mubr.msk.f32.mxu0 %vm374_vm0, %v12708_v41 }
 0x5dc   :  { %v12496_v5 = vpop.trf.xlu1 }
 0x5dd   :  { %v12709_v57 = vcombine.low %v12464_v20, %v12496_v5  ;;  %v12948_v5 = vmul.f32 %v20864_v47, %v20864_v47 }
 0x5df   :  { %17040 = vmatmul.mubr.msk.f32.gmra.mrb[142].mxu0 %vm374_vm0, %v12709_v57  ;;  %v12947_v57 = vmul.f32 %v20866_v60, %v20866_v60 }
 0x5e4   :  { %v12560_v0 = vpop.trf.xlu1 }
 0x5e5   :  { %v12710_v13 = vcombine.low %v12528_v45, %v12560_v0  ;;  %v12960_v45 = vmul.f32 0.015625, %v12948_v5  ;;  %v12959_v0 = vmul.f32 0.015625, %v12947_v57 }
 0x5e7   :  { %17042 = vmatprep.mubr.msk.f32.mxu0 %vm374_vm0, %v12710_v13  ;;  %v12950_v13 = vmul.f32 %v20868_v54, %v20868_v54 }
 0x5e9   :  { %v12962_v23 = vmul.f32 0.015625, %v12950_v13 }
 0x5ee   :  { %v12592_v53 = vpop.trf.xlu0 }
 0x5f2   :  { %v20876_v55 = vpop.f32.mrb[128].mxu0 }
 0x5f3   :  { %v20878_v31 = vpop.f32.mrb[129].mxu0 }
 0x5f6   :  { %v20880_v50 = vpop.f32.mrb[130].mxu0 }
 0x5f7   :  { %v20882_v62 = vpop.f32.mrb[131].mxu0 }
 0x5fe   :  { %v12624_v18 = vpop.trf.xlu1 }
 0x5ff   :  { %v12711_v29 = vcombine.low %v12592_v53, %v12624_v18  ;;  %v12949_v53 = vmul.f32 %v20870_v34, %v20870_v34 }
 0x601   :  { %17043 = vmatmul.mubr.msk.f32.gmra.mrb[144].mxu0 %vm374_vm0, %v12711_v29 }
 0x62a   :  { %v20885_v21 = vpop.f32.mrb[132].mxu0 }
 0x62b   :  { %v20887_v4 = vpop.f32.mrb[133].mxu0 }
 0x632   :  { %v17029_v9 = vpop.f32.mrb[134].mxu0 }
 0x633   :  { %v12970_v51 = vsub.f32 %v17029_v9, %v12958_v17  ;;  %v12886_v11 = vpop.f32.mrb[135].mxu0  ;;  %v12961_v17 = vmul.f32 0.015625, %v12949_v53 }
 0x634   :  { %v12969_v22 = vsub.f32 %v12886_v11, %v12957_v58 }
 0x635   :  { %v12982_v42 = vmul.f32 0.015873017, %v12970_v51 }
 0x636   :  { %v12981_v48 = vmul.f32 0.015873017, %v12969_v22 }
 0x637   :  { %v13006_v3 = vcombine.high %v12982_v42, %v12982_v42  ;;  %v13028_v14 = vrot.slane %v12982_v42, %v20889_v6  ;;  %v13155_v52 = vrot.slane %v12982_v42, %v20891_v25  ;;  %v13281_v59 = vrot.slane %v12982_v42, %v20893_v40 }
 0x638   :  { %v13005_v33 = vcombine.high %v12981_v48, %v12981_v48  ;;  %v13020_v37 = vrot.slane %v12981_v48, %v20889_v6  ;;  %v13147_v19 = vrot.slane %v12981_v48, %v20891_v25  ;;  %v13407_v32 = vrot.slane %v12982_v42, %v20895_v46 }
 0x639   :  { %v13032_v16 = vrot.slane %v13006_v3, %v20889_v6  ;;  %v13159_v1 = vrot.slane %v13006_v3, %v20891_v25  ;;  %v13285_v30 = vrot.slane %v13006_v3, %v20893_v40  ;;  %v13273_v44 = vrot.slane %v12981_v48, %v20893_v40 }
 0x63a   :  { %v13024_v56 = vrot.slane %v13005_v33, %v20889_v6  ;;  %v13151_v43 = vrot.slane %v13005_v33, %v20891_v25  ;;  %v13277_v15 = vrot.slane %v13005_v33, %v20893_v40  ;;  %v13411_v38 = vrot.slane %v13006_v3, %v20895_v46 }
 0x63b   :  { %v13399_v28 = vrot.slane %v12981_v48, %v20895_v46  ;;  %v13403_v12 = vrot.slane %v13005_v33, %v20895_v46 }
 0x63c   :  { %v13114_v27 = vsel %vm13113_vm2, %v13024_v56, %v13020_v37  ;;  %v13240_v39 = vsel %vm13113_vm2, %v13151_v43, %v13147_v19  ;;  %v13366_v63 = vsel %vm13113_vm2, %v13277_v15, %v13273_v44 }
 0x63d   :  { %v13492_v24 = vsel %vm13113_vm2, %v13403_v12, %v13399_v28  ;;  %v13367_v26 = vsel %vm13115_vm3, %v13281_v59, %v13366_v63  ;;  %v13241_v2 = vsel %vm13115_vm3, %v13155_v52, %v13240_v39  ;;  %v13116_v49 = vsel %vm13115_vm3, %v13028_v14, %v13114_v27 }
 0x63e   :  { %v13368_v61 = vsel %vm13117_vm4, %v13285_v30, %v13367_v26  ;;  %v13242_v41 = vsel %vm13117_vm4, %v13159_v1, %v13241_v2  ;;  %v13493_v36 = vsel %vm13115_vm3, %v13407_v32, %v13492_v24  ;;  %v20924_v35 = vsel %vm13117_vm4, %v13032_v16, %v13116_v49 }
 0x63f   :  { %v20927_v20 = vsel %vm13117_vm4, %v13411_v38, %v13493_v36 }
 0x672   :  { %v17032_v18 = vpop.f32.mrb[136].mxu0 }
 0x673   :  { %v12972_v29 = vsub.f32 %v17032_v18, %v12960_v45  ;;  %v12896_v7 = vpop.f32.mrb[137].mxu0 }
 0x674   :  { %v12971_v10 = vsub.f32 %v12896_v7, %v12959_v0 }
 0x675   :  { %v20937_v8 = vmul.f32 0.015873017, %v12972_v29 }
 0x676   :  { %v20939_v47 = vmul.f32 0.015873017, %v12971_v10  ;;  %v17035_v58 = vpop.f32.mrb[138].mxu0 }
 0x677   :  { %v20943_v60 = vcombine.high %v20937_v8, %v20937_v8  ;;  %v13044_v54 = vrot.slane %v20937_v8, %v20889_v6  ;;  %v13171_v34 = vrot.slane %v20937_v8, %v20891_v25  ;;  %v13297_v9 = vrot.slane %v20937_v8, %v20893_v40  ;;  %v12906_v51 = vpop.f32.mrb[139].mxu0 }
 0x678   :  { %v13423_v11 = vrot.slane %v20937_v8, %v20895_v46  ;;  %v13007_v22 = vcombine.high %v20939_v47, %v20939_v47  ;;  %v13036_v42 = vrot.slane %v20939_v47, %v20889_v6  ;;  %v13163_v48 = vrot.slane %v20939_v47, %v20891_v25 }
 0x679   :  { %v13289_v3 = vrot.slane %v20939_v47, %v20893_v40  ;;  %v13415_v14 = vrot.slane %v20939_v47, %v20895_v46  ;;  %v12974_v52 = vsub.f32 %v17035_v58, %v12962_v23  ;;  %v12973_v59 = vsub.f32 %v12906_v51, %v12961_v17 }
 0x67a   :  { %v13293_v33 = vrot.slane %v13007_v22, %v20893_v40  ;;  %v13301_v37 = vrot.slane %v20943_v60, %v20893_v40  ;;  %v13167_v19 = vrot.slane %v13007_v22, %v20891_v25  ;;  %v13175_v16 = vrot.slane %v20943_v60, %v20891_v25 }
 0x67b   :  { %v12986_v1 = vmul.f32 0.015873017, %v12974_v52  ;;  %v12985_v30 = vmul.f32 0.015873017, %v12973_v59  ;;  %v13369_v32 = vsel %vm13119_vm5, %v13289_v3, %v13368_v61  ;;  %v13243_v56 = vsel %vm13119_vm5, %v13163_v48, %v13242_v41 }
 0x67c   :  { %v13370_v43 = vsel %vm13121_vm6, %v13293_v33, %v13369_v32  ;;  %v13244_v44 = vsel %vm13121_vm6, %v13167_v19, %v13243_v56  ;;  %v13419_v15 = vrot.slane %v13007_v22, %v20895_v46  ;;  %v13427_v38 = vrot.slane %v20943_v60, %v20895_v46 }
 0x67d   :  { %v13010_v28 = vcombine.high %v12986_v1, %v12986_v1  ;;  %v13060_v12 = vrot.slane %v12986_v1, %v20889_v6  ;;  %v13187_v27 = vrot.slane %v12986_v1, %v20891_v25  ;;  %v13313_v39 = vrot.slane %v12986_v1, %v20893_v40 }
 0x67e   :  { %v13439_v63 = vrot.slane %v12986_v1, %v20895_v46  ;;  %v13009_v24 = vcombine.high %v12985_v30, %v12985_v30  ;;  %v13052_v26 = vrot.slane %v12985_v30, %v20889_v6  ;;  %v13179_v2 = vrot.slane %v12985_v30, %v20891_v25 }
 0x67f   :  { %v13064_v49 = vrot.slane %v13010_v28, %v20889_v6  ;;  %v13191_v61 = vrot.slane %v13010_v28, %v20891_v25  ;;  %v13317_v41 = vrot.slane %v13010_v28, %v20893_v40  ;;  %v13443_v36 = vrot.slane %v13010_v28, %v20895_v46 }
 0x680   :  { %v13056_v5 = vrot.slane %v13009_v24, %v20889_v6  ;;  %v13183_v57 = vrot.slane %v13009_v24, %v20891_v25  ;;  %v13305_v45 = vrot.slane %v12985_v30, %v20893_v40  ;;  %v13309_v0 = vrot.slane %v13009_v24, %v20893_v40 }
 0x681   :  { %v13431_v13 = vrot.slane %v12985_v30, %v20895_v46  ;;  %v13435_v53 = vrot.slane %v13009_v24, %v20895_v46  ;;  %v13371_v18 = vsel %vm13123_vm7, %v13297_v9, %v13370_v43  ;;  %v13245_v29 = vsel %vm13123_vm7, %v13171_v34, %v13244_v44 }
 0x682   :  { %v13127_v7 = vsel %vm13113_vm2, %v13056_v5, %v13052_v26  ;;  %v13247_v10 = vsel %vm13113_vm2, %v13183_v57, %v13179_v2  ;;  %v13373_v23 = vsel %vm13113_vm2, %v13309_v0, %v13305_v45  ;;  %v20998_v17 = vsel %vm13125_vm8, %v13301_v37, %v13371_v18 }
 0x683   :  { %v13499_v47 = vsel %vm13113_vm2, %v13435_v53, %v13431_v13  ;;  %v13374_v58 = vsel %vm13115_vm3, %v13313_v39, %v13373_v23  ;;  %v21003_v51 = vsel %vm13125_vm8, %v13175_v16, %v13245_v29  ;;  %v13248_v9 = vsel %vm13115_vm3, %v13187_v27, %v13247_v10 }
 0x684   :  { %v13375_v34 = vsel %vm13117_vm4, %v13317_v41, %v13374_v58  ;;  %v13249_v48 = vsel %vm13117_vm4, %v13191_v61, %v13248_v9  ;;  %v13495_v3 = vsel %vm13119_vm5, %v13415_v14, %v20927_v20  ;;  %v13500_v52 = vsel %vm13115_vm3, %v13439_v63, %v13499_v47 }
 0x685   :  { %v13496_v59 = vsel %vm13121_vm6, %v13419_v15, %v13495_v3  ;;  %v13501_v33 = vsel %vm13117_vm4, %v13443_v36, %v13500_v52  ;;  %v13040_v37 = vrot.slane %v13007_v22, %v20889_v6  ;;  %v13048_v19 = vrot.slane %v20943_v60, %v20889_v6 }
 0x686   :  { %v13497_v16 = vsel %vm13123_vm7, %v13423_v11, %v13496_v59  ;;  %v13120_v1 = vsel %vm13119_vm5, %v13036_v42, %v20924_v35  ;;  %v13128_v30 = vsel %vm13115_vm3, %v13060_v12, %v13127_v7  ;;  %v12952_v35 = vmul.f32 %v20876_v55, %v20876_v55 }
 0x687   :  { %v21021_v20 = vsel %vm13125_vm8, %v13427_v38, %v13497_v16  ;;  %v13122_v14 = vsel %vm13121_vm6, %v13040_v37, %v13120_v1  ;;  %v21025_v32 = vsel %vm13117_vm4, %v13064_v49, %v13128_v30  ;;  %v12951_v22 = vmul.f32 %v20878_v31, %v20878_v31 }
 0x688   :  { %v13124_v60 = vsel %vm13123_vm7, %v13044_v54, %v13122_v14  ;;  %v12964_v42 = vmul.f32 0.015625, %v12952_v35  ;;  %v12954_v43 = vmul.f32 %v20880_v50, %v20880_v50  ;;  %v12953_v44 = vmul.f32 %v20882_v62, %v20882_v62 }
 0x689   :  { %v21032_v11 = vsel %vm13125_vm8, %v13048_v19, %v13124_v60  ;;  %v12963_v56 = vmul.f32 0.015625, %v12951_v22 }
 0x68a   :  { %v12966_v12 = vmul.f32 0.015625, %v12954_v43  ;;  %v12965_v27 = vmul.f32 0.015625, %v12953_v44 }
 0x6aa   :  { %v17038_v8 = vpop.f32.mrb[140].mxu0 }
 0x6ab   :  { %v12976_v15 = vsub.f32 %v17038_v8, %v12964_v42  ;;  %v12916_v54 = vpop.f32.mrb[141].mxu0 }
 0x6ac   :  { %v12975_v38 = vsub.f32 %v12916_v54, %v12963_v56 }
 0x6ad   :  { %v21042_v28 = vmul.f32 0.015873017, %v12976_v15 }
 0x6ae   :  { %v21044_v55 = vmul.f32 0.015873017, %v12975_v38 }
 0x6af   :  { %v21048_v31 = vcombine.high %v21042_v28, %v21042_v28  ;;  %v13076_v50 = vrot.slane %v21042_v28, %v20889_v6  ;;  %v13203_v62 = vrot.slane %v21042_v28, %v20891_v25  ;;  %v13329_v39 = vrot.slane %v21042_v28, %v20893_v40 }
 0x6b0   :  { %v13455_v63 = vrot.slane %v21042_v28, %v20895_v46  ;;  %v21060_v24 = vcombine.high %v21044_v55, %v21044_v55  ;;  %v13068_v26 = vrot.slane %v21044_v55, %v20889_v6  ;;  %v13195_v2 = vrot.slane %v21044_v55, %v20891_v25 }
 0x6b1   :  { %v13321_v49 = vrot.slane %v21044_v55, %v20893_v40  ;;  %v13447_v61 = vrot.slane %v21044_v55, %v20895_v46  ;;  %v13333_v41 = vrot.slane %v21048_v31, %v20893_v40  ;;  %v13207_v36 = vrot.slane %v21048_v31, %v20891_v25 }
 0x6b2   :  { %v17041_v5 = vpop.f32.mrb[142].mxu0  ;;  %v13325_v57 = vrot.slane %v21060_v24, %v20893_v40  ;;  %v13199_v45 = vrot.slane %v21060_v24, %v20891_v25  ;;  %v13250_v0 = vsel %vm13119_vm5, %v13195_v2, %v13249_v48  ;;  %v13451_v13 = vrot.slane %v21060_v24, %v20895_v46 }
 0x6b3   :  { %v12978_v53 = vsub.f32 %v17041_v5, %v12966_v12  ;;  %v12926_v18 = vpop.f32.mrb[143].mxu0  ;;  %v13376_v29 = vsel %vm13119_vm5, %v13321_v49, %v13375_v34  ;;  %v13459_v7 = vrot.slane %v21048_v31, %v20895_v46  ;;  %v13502_v10 = vsel %vm13119_vm5, %v13447_v61, %v13501_v33 }
 0x6b4   :  { %v12977_v23 = vsub.f32 %v12926_v18, %v12965_v27  ;;  %v13377_v47 = vsel %vm13121_vm6, %v13325_v57, %v13376_v29  ;;  %v13251_v58 = vsel %vm13121_vm6, %v13199_v45, %v13250_v0  ;;  %v13503_v9 = vsel %vm13121_vm6, %v13451_v13, %v13502_v10 }
 0x6b5   :  { %v12990_v48 = vmul.f32 0.015873017, %v12978_v53  ;;  %v13378_v3 = vsel %vm13123_vm7, %v13329_v39, %v13377_v47  ;;  %v13252_v52 = vsel %vm13123_vm7, %v13203_v62, %v13251_v58  ;;  %v13504_v59 = vsel %vm13123_vm7, %v13455_v63, %v13503_v9 }
 0x6b6   :  { %v12989_v34 = vmul.f32 0.015873017, %v12977_v23  ;;  %v13379_v37 = vsel %vm13125_vm8, %v13333_v41, %v13378_v3  ;;  %v13253_v19 = vsel %vm13125_vm8, %v13207_v36, %v13252_v52  ;;  %v13505_v33 = vsel %vm13125_vm8, %v13459_v7, %v13504_v59 }
 0x6b7   :  { %v13014_v16 = vcombine.high %v12990_v48, %v12990_v48  ;;  %v13092_v1 = vrot.slane %v12990_v48, %v20889_v6  ;;  %v13219_v30 = vrot.slane %v12990_v48, %v20891_v25  ;;  %v13345_v14 = vrot.slane %v12990_v48, %v20893_v40 }
 0x6b8   :  { %v13471_v60 = vrot.slane %v12990_v48, %v20895_v46  ;;  %v13013_v35 = vcombine.high %v12989_v34, %v12989_v34  ;;  %v13084_v22 = vrot.slane %v12989_v34, %v20889_v6  ;;  %v13211_v42 = vrot.slane %v12989_v34, %v20891_v25 }
 0x6b9   :  { %v13337_v56 = vrot.slane %v12989_v34, %v20893_v40  ;;  %v13463_v43 = vrot.slane %v12989_v34, %v20895_v46  ;;  %v17219_v44 = vpack.i.bf16 %v13379_v37, %v20998_v17  ;;  %v17214_v8 = vpack.i.bf16 %v13253_v19, %v21003_v51 }
 0x6ba   :  { %v13088_v15 = vrot.slane %v13013_v35, %v20889_v6  ;;  %v17224_v54 = vpack.i.bf16 %v13505_v33, %v21021_v20  ;;  %v13467_v38 = vrot.slane %v13013_v35, %v20895_v46  ;;  %v13475_v12 = vrot.slane %v13014_v16, %v20895_v46 }
 0x6bb   :  { %17220 = vrot.lane.b32.xlu1 %v17219_v44, %s17247_s6  ;;  %17215 = vrot.lane.b32.xlu0 %v17214_v8, %s17248_s30  ;;  %v13215_v27 = vrot.slane %v13013_v35, %v20891_v25  ;;  %v13223_v17 = vrot.slane %v13014_v16, %v20891_v25  ;;  %v13341_v51 = vrot.slane %v13013_v35, %v20893_v40  ;;  %v17250_v57 = vmov 0.0|0.0  }
 0x6bc   :  { %v13506_v55 = vsel %vm13113_vm2, %v13467_v38, %v13463_v43  ;;  %v13349_v20 = vrot.slane %v13014_v16, %v20893_v40  ;;  %v13080_v62 = vrot.slane %v21048_v31, %v20889_v6  ;;  %v13130_v39 = vsel %vm13119_vm5, %v13068_v26, %v21025_v32  ;;  %17179 = vmatprep.subr.bf16.mxu1 %v17250_v57 }
 0x6bd   :  { %v13507_v63 = vsel %vm13115_vm3, %v13471_v60, %v13506_v55  ;;  %v13254_v2 = vsel %vm13113_vm2, %v13215_v27, %v13211_v42  ;;  %v13380_v49 = vsel %vm13113_vm2, %v13341_v51, %v13337_v56  ;;  %v13072_v61 = vrot.slane %v21060_v24, %v20889_v6  ;;  %17191 = vmatprep.subr.bf16.mxu0 %v17250_v57 }
 0x6be   :  { %v13508_v41 = vsel %vm13117_vm4, %v13475_v12, %v13507_v63  ;;  %v13255_v36 = vsel %vm13115_vm3, %v13219_v30, %v13254_v2  ;;  %v13381_v5 = vsel %vm13115_vm3, %v13345_v14, %v13380_v49  ;;  %v13096_v45 = vrot.slane %v13014_v16, %v20889_v6 }
 0x6bf   :  { %17225 = vrot.lane.b32.xlu1 %v17224_v54, %s17249_s1  ;;  %v13256_v32 = vsel %vm13117_vm4, %v13223_v17, %v13255_v36  ;;  %v13382_v31 = vsel %vm13117_vm4, %v13349_v20, %v13381_v5  ;;  %v13131_v26 = vsel %vm13121_vm6, %v13072_v61, %v13130_v39  ;;  %v13134_v0 = vsel %vm13113_vm2, %v13088_v15, %v13084_v22 }
 0x6c0   :  { %v13132_v24 = vsel %vm13123_vm7, %v13076_v50, %v13131_v26  ;;  %v13135_v53 = vsel %vm13115_vm3, %v13092_v1, %v13134_v0  ;;  %v12956_v28 = vmul.f32 %v20885_v21, %v20885_v21  ;;  %v12955_v50 = vmul.f32 %v20887_v4, %v20887_v4 }
 0x6c1   :  { %v13133_v13 = vsel %vm13125_vm8, %v13080_v62, %v13132_v24  ;;  %v13136_v18 = vsel %vm13117_vm4, %v13096_v45, %v13135_v53  ;;  %v17252_v62 = vmov 0.0   ;;  %vm14117_vm4 = vcmask 125952  }
 0x6c2   :  { %v12968_v29 = vmul.f32 0.015625, %v12956_v28  ;;  %v12967_v7 = vmul.f32 0.015625, %v12955_v50  ;;  %17051 = vmatprep.mubr.msk.f32.mxu1 %vm17251_vm9, %v17252_v62  ;;  %17105 = vmatprep.mubr.msk.f32.mxu0 %vm17251_vm9, %v17252_v62 }
 0x6d4   :  { %v17044_v10 = vpop.f32.mrb[144].mxu0 }
 0x6d5   :  { %v12980_v23 = vsub.f32 %v17044_v10, %v12968_v29  ;;  %v12936_v47 = vpop.f32.mrb[145].mxu0 }
 0x6d6   :  { %v12979_v58 = vsub.f32 %v12936_v47, %v12967_v7  ;;  %v13533_v7 = vld [vmem:[%s21307_s7] sm:$0xff]  ;;  %v13535_v47 = vld [vmem:[%s21307_s7 + $0x10] sm:$0xff] }
 0x6d7   :  { %v12992_v9 = vmul.f32 0.015873017, %v12980_v23  ;;  %v13534_v23 = vld [vmem:[%s21307_s7 + $0x8] sm:$0xff] }
 0x6d8   :  { %v12991_v48 = vmul.f32 0.015873017, %v12979_v58  ;;  %v13626_v58 = vld [vmem:[%s21308_s8] sm:$0xff] }
 0x6d9   :  { %v13016_v3 = vcombine.high %v12992_v9, %v12992_v9  ;;  %v13487_v52 = vrot.slane %v12992_v9, %v20895_v46  ;;  %v13235_v59 = vrot.slane %v12992_v9, %v20891_v25  ;;  %v13361_v34 = vrot.slane %v12992_v9, %v20893_v40 }
 0x6da   :  { %v13015_v37 = vcombine.high %v12991_v48, %v12991_v48  ;;  %v13100_v21 = vrot.slane %v12991_v48, %v20889_v6  ;;  %v13227_v4 = vrot.slane %v12991_v48, %v20891_v25  ;;  %v13353_v19 = vrot.slane %v12991_v48, %v20893_v40 }
 0x6db   :  { %v13479_v33 = vrot.slane %v12991_v48, %v20895_v46  ;;  %v13491_v16 = vrot.slane %v13016_v3, %v20895_v46  ;;  %v13239_v1 = vrot.slane %v13016_v3, %v20891_v25  ;;  %v13365_v30 = vrot.slane %v13016_v3, %v20893_v40  ;;  %v13628_v48 = vld [vmem:[%s21308_s8 + $0x10] sm:$0xff] }
 0x6dc   :  { %v13483_v14 = vrot.slane %v13015_v37, %v20895_v46  ;;  %v13231_v60 = vrot.slane %v13015_v37, %v20891_v25  ;;  %v13257_v35 = vsel %vm13119_vm5, %v13227_v4, %v13256_v32  ;;  %v13357_v22 = vrot.slane %v13015_v37, %v20893_v40 }
 0x6dd   :  { %v13509_v42 = vsel %vm13119_vm5, %v13479_v33, %v13508_v41  ;;  %v13383_v56 = vsel %vm13119_vm5, %v13353_v19, %v13382_v31  ;;  %v13104_v43 = vrot.slane %v13015_v37, %v20889_v6  ;;  %v13108_v44 = vrot.slane %v12992_v9, %v20889_v6  ;;  %v13627_v9 = vld [vmem:[%s21308_s8 + $0x8] sm:$0xff] }
 0x6de   :  { %v13510_v8 = vsel %vm13121_vm6, %v13483_v14, %v13509_v42  ;;  %v13258_v15 = vsel %vm13121_vm6, %v13231_v60, %v13257_v35  ;;  %v13384_v46 = vsel %vm13121_vm6, %v13357_v22, %v13383_v56  ;;  %v13112_v25 = vrot.slane %v13016_v3, %v20889_v6  ;;  %v13718_v3 = vld [vmem:[%s21309_s9] sm:$0xff]  ;;  %v13721_v37 = vld [vmem:[%s21310_s10 + $0x8] sm:$0xff] }
 0x6df   :  { %v13511_v54 = vsel %vm13123_vm7, %v13487_v52, %v13510_v8  ;;  %v13259_v40 = vsel %vm13123_vm7, %v13235_v59, %v13258_v15  ;;  %v13385_v38 = vsel %vm13123_vm7, %v13361_v34, %v13384_v46  ;;  %v13137_v12 = vsel %vm13119_vm5, %v13100_v21, %v13136_v18  ;;  %v13719_v52 = vld [vmem:[%s21309_s9 + $0x8] sm:$0xff]  ;;  %v13720_v34 = vld [vmem:[%s21310_s10] sm:$0xff] }
 0x6e0   :  { %v13512_v27 = vsel %vm13125_vm8, %v13491_v16, %v13511_v54  ;;  %v13260_v17 = vsel %vm13125_vm8, %v13239_v1, %v13259_v40  ;;  %v13386_v51 = vsel %vm13125_vm8, %v13365_v30, %v13385_v38  ;;  %v13138_v55 = vsel %vm13121_vm6, %v13104_v43, %v13137_v12 }
 0x6e1   :  { %13517 = vrot.lane.b32.xlu0 %v13512_v27, %s17249_s1  ;;  %13265 = vrot.lane.b32.xlu1 %v13260_v17, %s17248_s30  ;;  %v13139_v6 = vsel %vm13123_vm7, %v13108_v44, %v13138_v55  ;;  %v17186_v59 = vpack.c.bf16 %v13719_v52, %v13718_v3  ;;  %v17189_v21 = vpack.c.bf16 %v13721_v37, %v13720_v34  ;;  %s17235_s30 = scalar_lea.hbm %s21312_s12, 16 }
 0x6e2   :  { %v13140_v20 = vsel %vm13125_vm8, %v13112_v25, %v13139_v6  ;;  %p17236_p0 = scmp.ne.s32.totalorder %s21312_s12, %s17235_s30  ;;  %p17239_p1 = scmp.lt.u32.totalorder %s17235_s30, %s21312_s12 }
 0x6e3   :  { %17193 = vmatpush3.bf16.msra.mxu0 %v17186_v59 }
 0x6e4   :  { %17194 = vmatprep.subr.bf16.mxu0 %v17250_v57  ;;  %p17241_p2 = pnand %p17239_p1, %p17236_p0 }
 0x6e5   :  { %13391 = vrot.lane.b32.xlu1 %v13386_v51, %s17247_s6 }
 0x72d   :  { %v17216_v39 = vpop.permute.xlu0 %17215  ;;  %v17221_v63 = vpop.permute.xlu1 %17220 }
 0x72e   :  { %v17218_v2 = vunpack.i.h.bf16 %v17216_v39  ;;  %v17217_v49 = vunpack.i.l.bf16 %v17216_v39  ;;  %v17223_v61 = vunpack.i.h.bf16 %v17221_v63  ;;  %v17222_v41 = vunpack.i.l.bf16 %v17221_v63 }
 0x730   :  { %v13522_v36 = vsel %vm7354_vm1, %v21032_v11, %v17217_v49  ;;  %v13523_v5 = vsel %vm7354_vm1, %v13133_v13, %v17218_v2 }
 0x731   :  { %v17226_v32 = vpop.permute.xlu1 %17225  ;;  %v13527_v24 = vsel %vm13525_vm10, %v13523_v5, %v17223_v61  ;;  %v13526_v45 = vsel %vm13525_vm10, %v13522_v36, %v17222_v41 }
 0x732   :  { %v17228_v31 = vunpack.i.h.bf16 %v17226_v32  ;;  %v17227_v26 = vunpack.i.l.bf16 %v17226_v32 }
 0x734   :  { %v13530_v0 = vsel %vm13529_vm11, %v13526_v45, %v17227_v26  ;;  %v13531_v53 = vsel %vm13529_vm11, %v13527_v24, %v17228_v31 }
 0x735   :  { %v17180_v18 = vpack.c.bf16 %v13531_v53, %v13530_v0 }
 0x737   :  { %17181 = vmatpush3.bf16.msra.mxu1 %v17180_v18 }
 0x738   :  { %17049 = vmatprep.subr.mxu1 %v17252_v62 }
 0x753   :  { %v13266_v11 = vpop.permute.xlu1 %13265  ;;  %v13518_v50 = vpop.permute.xlu0 %13517 }
 0x754   :  { %v13524_v13 = vsel %vm7354_vm1, %v13140_v20, %v13266_v11 }
 0x757   :  { %v13392_v28 = vpop.permute.xlu1 %13391 }
 0x758   :  { %v13528_v29 = vsel %vm13525_vm10, %v13524_v13, %v13392_v28 }
 0x759   :  { %v13532_v10 = vsel %vm13529_vm11, %v13528_v29, %v13518_v50 }
 0x75a   :  { %17050 = vmatpush3.msra.mxu1 %v13532_v10 }
 0x75b   :  { %17182 = vmatprep.subr.bf16.mxu1 %v17250_v57  ;;  %17052 = vmatmul.mubr.msk.f32.vlgmr.msra.gmra.mrb[134].mxu1 %vm13536_vm12, %v13533_v7 }
 0x75c   :  { %17184 = vmatpush3.bf16.msra.mxu1 %v17180_v18  ;;  %17054 = vmatprep.mubr.msk.f32.mxu1 %vm17251_vm9, %v17252_v62 }
 0x75d   :  { %17064 = vmatprep.subr.mxu1 %v17252_v62 }
 0x75f   :  { %17055 = vmatmul.mubr.msk.f32.gmra.mrb[136].mxu1 %vm13536_vm12, %v13534_v23 }
 0x760   :  { %17065 = vmatpush3.msra.mxu1 %v13532_v10  ;;  %17057 = vmatprep.mubr.msk.f32.mxu1 %vm17251_vm9, %v17252_v62 }
 0x761   :  { %17185 = vmatprep.subr.bf16.mxu1 %v17250_v57 }
 0x763   :  { %17058 = vmatmul.mubr.msk.f32.gmra.mrb[138].mxu1 %vm13536_vm12, %v13535_v47 }
 0x764   :  { %17066 = vmatprep.mubr.msk.f32.mxu1 %vm17251_vm9, %v17252_v62 }
 0x767   :  { %17067 = vmatmul.mubr.msk.f32.vlgmr.msra.gmra.mrb[140].mxu1 %vm13536_vm12, %v13626_v58 }
 0x768   :  { %17069 = vmatprep.mubr.msk.f32.mxu1 %vm17251_vm9, %v17252_v62  ;;  %17187 = vmatpush3.bf16.msra.mxu1 %v17186_v59 }
 0x769   :  { %17188 = vmatprep.subr.bf16.mxu1 %v17250_v57 }
 0x76b   :  { %17070 = vmatmul.mubr.msk.f32.gmra.mrb[142].mxu1 %vm13536_vm12, %v13627_v9 }
 0x76c   :  { %17072 = vmatprep.mubr.msk.f32.mxu1 %vm17251_vm9, %v17252_v62 }
 0x76f   :  { %17073 = vmatmul.mubr.msk.f32.gmra.mrb[144].mxu1 %vm13536_vm12, %v13628_v48 }
 0x770   :  { %17079 = vmatprep.mubr.msk.f32.mxu1 %vm17251_vm9, %v17252_v62 }
 0x82e   :  { %v13612_v4 = vpop.f32.mrb[134].mxu1 }
 0x82f   :  { %v17053_v19 = vpop.f32.mrb[135].mxu1  ;;  %17080 = vmatmul.mubr.msk.f32.vlgmr.msra.gmra.mrb[146].mxu1 %vm374_vm0, %v13612_v4 }
 0x830   :  { %17082 = vmatprep.mubr.msk.f32.mxu1 %vm17251_vm9, %v17252_v62  ;;  %17190 = vmatpush3.bf16.msra.mxu1 %v17189_v21 }
 0x832   :  { %v13617_v33 = vpop.f32.mrb[136].mxu1 }
 0x833   :  { %v17056_v16 = vpop.f32.mrb[137].mxu1  ;;  %17083 = vmatmul.mubr.msk.f32.gmra.mrb[148].mxu1 %vm374_vm0, %v13617_v33 }
 0x834   :  { %17085 = vmatprep.mubr.msk.f32.mxu1 %vm17251_vm9, %v17252_v62  ;;  %v14109_v16 = vld [vmem:[%s21311_s11 + $0x8] sm:$0xf] }
 0x836   :  { %v13622_v57 = vpop.f32.mrb[138].mxu1 }
 0x837   :  { %v17059_v1 = vpop.f32.mrb[139].mxu1  ;;  %17086 = vmatmul.mubr.msk.f32.gmra.mrb[150].mxu1 %vm374_vm0, %v13622_v57 }
 0x838   :  { %17092 = vmatprep.mubr.msk.f32.mxu1 %vm17251_vm9, %v17252_v62 }
 0x83a   :  { %v13704_v30 = vpop.f32.mrb[140].mxu1 }
 0x83b   :  { %17106 = vmatmul.mubr.msk.f32.vlgmr.msra.gmra.mrb[146].mxu0 %vm374_vm0, %v13704_v30  ;;  %v17068_v14 = vpop.f32.mrb[141].mxu1  ;;  %17093 = vmatmul.mubr.msk.f32.vlgmr.msra.gmra.mrb[152].mxu1 %vm374_vm0, %v13704_v30 }
 0x83c   :  { %17108 = vmatprep.mubr.msk.f32.mxu0 %vm17251_vm9, %v17252_v62  ;;  %17196 = vmatpush3.bf16.msra.mxu0 %v17189_v21 }
 0x83d   :  { %17095 = vmatprep.mubr.msk.f32.mxu1 %vm17251_vm9, %v17252_v62 }
 0x83e   :  { %v13709_v60 = vpop.f32.mrb[142].mxu1 }
 0x83f   :  { %17109 = vmatmul.mubr.msk.f32.gmra.mrb[148].mxu0 %vm374_vm0, %v13709_v60  ;;  %v17071_v35 = vpop.f32.mrb[143].mxu1  ;;  %17096 = vmatmul.mubr.msk.f32.gmra.mrb[154].mxu1 %vm374_vm0, %v13709_v60 }
 0x840   :  { %17111 = vmatprep.mubr.msk.f32.mxu0 %vm17251_vm9, %v17252_v62  ;;  %17098 = vmatprep.mubr.msk.f32.mxu1 %vm17251_vm9, %v17252_v62 }
 0x842   :  { %v13714_v22 = vpop.f32.mrb[144].mxu1 }
 0x843   :  { %17112 = vmatmul.mubr.msk.f32.gmra.mrb[150].mxu0 %vm374_vm0, %v13714_v22  ;;  %17099 = vmatmul.mubr.msk.f32.gmra.mrb[156].mxu1 %vm374_vm0, %v13714_v22  ;;  %v17074_v42 = vpop.f32.mrb[145].mxu1 }
 0x844   :  { %17118 = vmatprep.mubr.msk.f32.mxu0 %vm17251_vm9, %v17252_v62 }
 0x847   :  { %17119 = vmatmul.mubr.msk.f32.vlgmr.msra.gmra.mrb[146].mxu0 %vm374_vm0, %v13612_v4  ;;  %v14108_v4 = vld [vmem:[%s21311_s11] sm:$0xff] }
 0x848   :  { %17121 = vmatprep.mubr.msk.f32.mxu0 %vm17251_vm9, %v17252_v62 }
 0x84b   :  { %17122 = vmatmul.mubr.msk.f32.gmra.mrb[148].mxu0 %vm374_vm0, %v13617_v33 }
 0x84c   :  { %17124 = vmatprep.mubr.msk.f32.mxu0 %vm17251_vm9, %v17252_v62 }
 0x84f   :  { %17125 = vmatmul.mubr.msk.f32.gmra.mrb[150].mxu0 %vm374_vm0, %v13622_v57 }
 0x902   :  { %v13797_v56 = vpop.f32.mrb[146].mxu1 }
 0x903   :  { %v17081_v43 = vpop.f32.mrb[147].mxu1 }
 0x906   :  { %v13802_v44 = vpop.f32.mrb[148].mxu1 }
 0x907   :  { %v17084_v8 = vpop.f32.mrb[149].mxu1 }
 0x90a   :  { %v13807_v15 = vpop.f32.mrb[150].mxu1 }
 0x90b   :  { %v17087_v46 = vpop.f32.mrb[151].mxu1 }
 0x90e   :  { %v13886_v25 = vpop.f32.mrb[152].mxu1 }
 0x90f   :  { %v13900_v54 = vsub.f32 %v13797_v56, %v13886_v25  ;;  %v17094_v40 = vpop.f32.mrb[153].mxu1 }
 0x911   :  { %v14063_v20 = vmul.f32 %v13900_v54, %v13900_v54 }
 0x912   :  { %v13891_v38 = vpop.f32.mrb[154].mxu1 }
 0x913   :  { %v13901_v12 = vsub.f32 %v13802_v44, %v13891_v38  ;;  %v17097_v27 = vpop.f32.mrb[155].mxu1 }
 0x915   :  { %v14064_v49 = vmul.f32 %v13901_v12, %v13901_v12 }
 0x916   :  { %v13896_v17 = vpop.f32.mrb[156].mxu1 }
 0x917   :  { %v13902_v51 = vsub.f32 %v13807_v15, %v13896_v17  ;;  %v17100_v55 = vpop.f32.mrb[157].mxu1 }
 0x919   :  { %v14065_v32 = vmul.f32 %v13902_v51, %v13902_v51 }
 0x91a   :  { %v14049_v6 = vpop.f32.mrb[146].mxu0 }
 0x91b   :  { %v14066_v62 = vmul.f32 %v14049_v6, %v14049_v6  ;;  %v17120_v39 = vpop.f32.mrb[147].mxu0 }
 0x91d   :  { %v14069_v63 = vadd.f32 %v14066_v62, %v14063_v20 }
 0x91e   :  { %v14054_v2 = vpop.f32.mrb[148].mxu0 }
 0x91f   :  { %17229 = vrsqrt.f32 %v14069_v63  ;;  %v14067_v61 = vmul.f32 %v14054_v2, %v14054_v2  ;;  %v17123_v41 = vpop.f32.mrb[149].mxu0  ;;  %vm14074_vm13 = vcmp.eq.f32.partialorder %v14069_v63, inf  ;;  %v14077_v53 = vand.u32 2147483648, %v14069_v63 }
 0x920   :  { %vm14076_vm14 = vcmp.eq.f32.partialorder %v14069_v63, 0.0 }
 0x921   :  { %v14070_v36 = vadd.f32 %v14067_v61, %v14064_v49 }
 0x922   :  { %v14059_v5 = vpop.f32.mrb[150].mxu0 }
 0x923   :  { %17231 = vrsqrt.f32 %v14070_v36  ;;  %v14068_v31 = vmul.f32 %v14059_v5, %v14059_v5  ;;  %v17126_v26 = vpop.f32.mrb[151].mxu0  ;;  %vm14081_vm15 = vcmp.eq.f32.partialorder %v14070_v36, inf  ;;  %v14084_v29 = vand.u32 2147483648, %v14070_v36 }
 0x924   :  { %vm14083_vm1 = vcmp.eq.f32.partialorder %v14070_v36, 0.0 }
 0x925   :  { %v14071_v24 = vadd.f32 %v14068_v31, %v14065_v32 }
 0x927   :  { %17233 = vrsqrt.f32 %v14071_v24  ;;  %vm14088_vm2 = vcmp.eq.f32.partialorder %v14071_v24, inf  ;;  %v14091_v48 = vand.u32 2147483648, %v14071_v24  ;;  %vm14090_vm3 = vcmp.eq.f32.partialorder %v14071_v24, 0.0 }
 0x929   :  { %v17230_v45 = vpop.eup %17229 }
 0x92a   :  { %v14073_v0 = vmul.f32 %v17230_v45, %v14069_v63 }
 0x92c   :  { %v14075_v18 = vsel %vm14074_vm13, %v14069_v63, %v14073_v0 }
 0x92d   :  { %v17232_v11 = vpop.eup %17231  ;;  %v14078_v13 = vsel %vm14076_vm14, %v14077_v53, %v14075_v18 }
 0x92e   :  { %v14080_v28 = vmul.f32 %v17232_v11, %v14070_v36  ;;  %v14096_v50 = vcombine.high %v14078_v13, %v14078_v13 }
 0x930   :  { %v14082_v7 = vsel %vm14081_vm15, %v14070_v36, %v14080_v28  ;;  %v14102_v9 = vsub.f32 %v14078_v13, %v14096_v50 }
 0x931   :  { %v17234_v10 = vpop.eup %17233  ;;  %v14085_v23 = vsel %vm14083_vm1, %v14084_v29, %v14082_v7 }
 0x932   :  { %v14087_v47 = vmul.f32 %v17234_v10, %v14071_v24  ;;  %v14097_v58 = vcombine.high %v14085_v23, %v14085_v23  ;;  %v14105_v37 = vand.u32 2147483647, %v14102_v9 }
 0x934   :  { %v14089_v3 = vsel %vm14088_vm2, %v14071_v24, %v14087_v47  ;;  %v14103_v52 = vsub.f32 %v14085_v23, %v14097_v58 }
 0x935   :  { %v14092_v59 = vsel %vm14090_vm3, %v14091_v48, %v14089_v3 }
 0x936   :  { %v14098_v34 = vcombine.high %v14092_v59, %v14092_v59  ;;  %v14106_v21 = vand.u32 2147483647, %v14103_v52 }
 0x938   :  { %v14104_v19 = vsub.f32 %v14092_v59, %v14098_v34  ;;  %v14112_v33 = vcombine.low %v14105_v37, %v14106_v21 }
 0x93a   :  { %v14107_v57 = vand.u32 2147483647, %v14104_v19  ;;  %v14114_v1 = vmul.f32 %v14112_v33, %v14108_v4 }
 0x93c   :  { %v14115_v30 = vmul.f32 %v14109_v16, %v14107_v57  ;;  %v14116_v14 = vsel %vm374_vm0, %v14114_v1, 0.0 }
 0x93e   :  { %v14118_v60 = vsel %vm14117_vm4, %v14115_v30, 0.0 }
 0x93f   :  { %v14119_v35 = vadd.f32 %v14118_v60, %v14116_v14 }
 0x941   :  { %14120 = vadd.xlane.f32.xlu1 %v14119_v35 }
 0x9ce   :  { %v14121_v22 = vpop.xlane.xlu1 %14120 }
 0x9cf   :  { %v14122_v42 = vrot.slane %v14121_v22, 4 }
 0x9d1   :  { %v14123_v56 = vadd.f32 %v14122_v42, %v14121_v22 }
 0x9d3   :  { %v14124_v43 = vrot.slane %v14123_v56, 2 }
 0x9d5   :  { %v14125_v44 = vadd.f32 %v14124_v43, %v14123_v56 }
 0x9d7   :  { %v14126_v8 = vrot.slane %v14125_v44, 1 }
 0x9d9   :  { %v14127_v15 = vadd.f32 %v14126_v8, %v14125_v44 }
 0x9db   :  { %17205 = vpush %v14127_v15 }
 0xa0c   :  { %s17206_s28 = spop %17205 }
 0xa0d   :  { %s14129_s29 = smul.f32 0.015625, %s17206_s28 }
 0xa0f   :  { %14131 = sst [smem:[#allocation2]] %s14129_s29 }
 0xa10   :  { %17244 = shalt.err (!%p17241_p2)
}
 0xa11   :  { %s17253_s15 = smov [#allocation2]  }
 0xa12   :  { %14139 = dma.smem_to_hbm %s17253_s15, 16, %s21312_s12, [#allocation3]  }
 0xa13   :  { %17245 = dma.done.wait [#allocation3], 16  }
 0xa14   :  { %17246 = vsyncadd [#allocation3], 4294967280 }
 0xa15   :  { %14143 = sfence }
 0xa16   :  { %14144 = vsyncpa [#allocation3], 1 }

</bundles_post_ra>
